<compile_context>
chip_gen: v5e
topology: v5e:2x2
jax: 0.10.0
libtpu: 0.0.40
codegen_flags: <defaults>
</compile_context>

<pallas_src>
import functools

import jax
import jax.numpy as jnp
import numpy as np
from jax.experimental import pallas as pl
from jax.experimental.pallas import tpu as pltpu

EPS = 1e-5  # PyTorch GroupNorm default eps

_PARALLEL = pltpu.CompilerParams(dimension_semantics=("parallel",))


# ----------------------------------------------------------------------------
# Constant matrices for spatial ops (built once per (H, W) in numpy)
# ----------------------------------------------------------------------------
@functools.lru_cache(maxsize=None)
def _shift_mats(H, W):
    """S[t]: (HW, HW) zero-padded spatial shift for 3x3 tap t (t = ky*3 + kx)."""
    HW = H * W
    ys, xs = np.meshgrid(np.arange(H), np.arange(W), indexing="ij")
    out_idx = (ys * W + xs).ravel()
    S = np.zeros((9, HW, HW), np.float32)
    for ky in range(3):
        for kx in range(3):
            dy, dx = ky - 1, kx - 1
            sy, sx = ys + dy, xs + dx
            valid = ((sy >= 0) & (sy < H) & (sx >= 0) & (sx < W)).ravel()
            src = (np.clip(sy, 0, H - 1) * W + np.clip(sx, 0, W - 1)).ravel()
            S[ky * 3 + kx, src[valid], out_idx[valid]] = 1.0
    return S


@functools.lru_cache(maxsize=None)
def _pool_mat(H, W):
    """(HW, HW/4) matrix implementing AvgPool2d(2) on flattened spatial dims."""
    Wo = W // 2
    ys, xs = np.meshgrid(np.arange(H), np.arange(W), indexing="ij")
    src = (ys * W + xs).ravel()
    dst = ((ys // 2) * Wo + (xs // 2)).ravel()
    P = np.zeros((H * W, (H // 2) * Wo), np.float32)
    P[src, dst] = 0.25
    return P


@functools.lru_cache(maxsize=None)
def _up_mat(H, W):
    """(HW, 4*HW) matrix implementing nearest-neighbor 2x upsampling."""
    Ho, Wo = 2 * H, 2 * W
    ys, xs = np.meshgrid(np.arange(Ho), np.arange(Wo), indexing="ij")
    dst = (ys * Wo + xs).ravel()
    src = ((ys // 2) * W + (xs // 2)).ravel()
    U = np.zeros((H * W, Ho * Wo), np.float32)
    U[src, dst] = 1.0
    return U


# ----------------------------------------------------------------------------
# In-kernel helpers (operate on (C, HW) f32 tiles resident in VMEM)
# ----------------------------------------------------------------------------
def _gn_relu(x, gamma, beta, groups):
    """GroupNorm (biased var, eps=1e-5, affine) + ReLU on a (C, HW) f32 tile."""
    c, hw = x.shape
    cg = c // groups
    parts = []
    for g in range(groups):
        xg = x[g * cg:(g + 1) * cg, :]
        cnt = float(cg * hw)
        mu = jnp.sum(jnp.sum(xg, axis=1, keepdims=True), axis=0, keepdims=True) / cnt
        d = xg - mu
        var = jnp.sum(jnp.sum(d * d, axis=1, keepdims=True), axis=0, keepdims=True) / cnt
        parts.append(d * jax.lax.rsqrt(var + EPS))
    xn = parts[0] if groups == 1 else jnp.concatenate(parts, axis=0)
    return jnp.maximum(xn * gamma + beta, 0.0)


def _conv1x1(x, w, b):
    # x: (Cin, HW), w: (Cout, Cin), b: (Cout, 1)
    return jnp.dot(w, x, preferred_element_type=jnp.float32) + b


def _conv3x3(x, w9_ref, b, s9_ref):
    """3x3 / pad=1 conv on (Cin, HW) via 9 constant shift-matrix taps."""
    cout = w9_ref.shape[1]
    hw = x.shape[1]
    acc = jnp.zeros((cout, hw), jnp.float32)
    for t in range(9):
        shifted = jnp.dot(x, s9_ref[t], preferred_element_type=jnp.float32)
        acc = acc + jnp.dot(w9_ref[t], shifted, preferred_element_type=jnp.float32)
    return acc + b


# ----------------------------------------------------------------------------
# Fused kernels
# ----------------------------------------------------------------------------
def _make_block_kernel(groups, has_res, has_resize):
    """Whole Encoder/Decoder block for one sample, fully fused in VMEM."""

    def kernel(*refs):
        o_ref = refs[-1]
        it = iter(refs[:-1])
        x_ref = next(it)
        s9 = next(it)
        rz = next(it) if has_resize else None
        g1, be1 = next(it), next(it)
        w1, c1 = next(it), next(it)
        g2, be2 = next(it), next(it)
        w2, c2 = next(it), next(it)
        g3, be3 = next(it), next(it)
        w3, c3 = next(it), next(it)
        g4, be4 = next(it), next(it)
        w4, c4 = next(it), next(it)
        wr = cr = None
        if has_res:
            wr, cr = next(it), next(it)

        x = _gn_relu(x_ref[...].astype(jnp.float32), g1[...], be1[...], groups)
        h = _conv1x1(x, w1[...], c1[...])
        h = _gn_relu(h, g2[...], be2[...], groups)
        h = _conv3x3(h, w2, c2[...], s9)
        h = _gn_relu(h, g3[...], be3[...], groups)
        h = _conv3x3(h, w3, c3[...], s9)
        h = _gn_relu(h, g4[...], be4[...], groups)
        h = _conv1x1(h, w4[...], c4[...])                # (Cout, HW)

        cout = h.shape[0]
        if has_res:                                      # encoder with in != out
            r = _conv1x1(x, wr[...], cr[...])
            xres = jnp.concatenate([x, r], axis=0)
        elif cout < x.shape[0]:                          # decoder residual slice
            xres = x[:cout, :]
        else:
            xres = x
        y = h + xres
        if has_resize:                                   # AvgPool2d(2) / Upsample(2x)
            y = jnp.dot(y, rz[...], preferred_element_type=jnp.float32)
        o_ref[...] = y.astype(o_ref.dtype)

    return kernel


def _conv1x1_head_kernel(x_ref, w_ref, b_ref, o_ref):
    y = _conv1x1(x_ref[...].astype(jnp.float32), w_ref[...], b_ref[...])
    o_ref[...] = y.astype(o_ref.dtype)


def _make_gn_conv1x1_kernel(groups):
    def kernel(x_ref, g_ref, be_ref, w_ref, b_ref, o_ref):
        x = _gn_relu(x_ref[...].astype(jnp.float32), g_ref[...], be_ref[...], groups)
        y = _conv1x1(x, w_ref[...], b_ref[...])
        o_ref[...] = y.astype(o_ref.dtype)

    return kernel


# ----------------------------------------------------------------------------
# pallas_call wrappers
# ----------------------------------------------------------------------------
def _full_spec(a):
    nd = a.ndim
    return pl.BlockSpec(tuple(a.shape), lambda n, _z=(0,) * nd: _z)


def conv1x1_head(x, w, b):
    """1x1 conv on (N, C, HW) activations (inConv)."""
    N, cin, hw = x.shape
    cout = w.shape[0]
    wm = w.reshape(cout, cin)
    bm = b.reshape(cout, 1)
    return pl.pallas_call(
        _conv1x1_head_kernel,
        out_shape=jax.ShapeDtypeStruct((N, cout, hw), x.dtype),
        grid=(N,),
        in_specs=[pl.BlockSpec((None, cin, hw), lambda n: (n, 0, 0)),
                  _full_spec(wm), _full_spec(bm)],
        out_specs=pl.BlockSpec((None, cout, hw), lambda n: (n, 0, 0)),
        compiler_params=_PARALLEL,
    )(x, wm, bm)


def gn_relu_conv1x1_head(x, gamma, beta, w, b, groups):
    """Fused GroupNorm + ReLU + 1x1 conv (final norm + outConv)."""
    N, cin, hw = x.shape
    cout = w.shape[0]
    wm = w.reshape(cout, cin)
    bm = b.reshape(cout, 1)
    gm = gamma.reshape(cin, 1)
    bem = beta.reshape(cin, 1)
    return pl.pallas_call(
        _make_gn_conv1x1_kernel(groups),
        out_shape=jax.ShapeDtypeStruct((N, cout, hw), x.dtype),
        grid=(N,),
        in_specs=[pl.BlockSpec((None, cin, hw), lambda n: (n, 0, 0)),
                  _full_spec(gm), _full_spec(bem), _full_spec(wm), _full_spec(bm)],
        out_specs=pl.BlockSpec((None, cout, hw), lambda n: (n, 0, 0)),
        compiler_params=_PARALLEL,
    )(x, gm, bem, wm, bm)


def _w3x3_taps(w):
    # PyTorch (Cout, Cin, 3, 3) -> (9, Cout, Cin) with tap index t = ky*3 + kx
    cout, cin = w.shape[0], w.shape[1]
    return jnp.transpose(w, (2, 3, 0, 1)).reshape(9, cout, cin)


def block_forward(p, x, H, W, groups, resize):
    """One EncoderBlock / DecoderBlock as a single fused pallas_call."""
    N, cin, hw = x.shape
    hidden = p['conv1']['w'].shape[0]
    cout = p['conv4']['w'].shape[0]
    has_res = 'resConv' in p

    s9 = jnp.asarray(_shift_mats(H, W))
    if resize == 'pool':
        rz, Ho, Wo = jnp.asarray(_pool_mat(H, W)), H // 2, W // 2
    elif resize == 'up':
        rz, Ho, Wo = jnp.asarray(_up_mat(H, W)), 2 * H, 2 * W
    else:
        rz, Ho, Wo = None, H, W
    hwo = Ho * Wo

    inputs = [x, s9]
    in_specs = [pl.BlockSpec((None, cin, hw), lambda n: (n, 0, 0)), _full_spec(s9)]
    if rz is not None:
        inputs.append(rz)
        in_specs.append(_full_spec(rz))

    def add(a):
        inputs.append(a)
        in_specs.append(_full_spec(a))

    add(p['norm1']['gamma'].reshape(cin, 1)); add(p['norm1']['beta'].reshape(cin, 1))
    add(p['conv1']['w'].reshape(hidden, cin)); add(p['conv1']['b'].reshape(hidden, 1))
    add(p['norm2']['gamma'].reshape(hidden, 1)); add(p['norm2']['beta'].reshape(hidden, 1))
    add(_w3x3_taps(p['conv2']['w'])); add(p['conv2']['b'].reshape(hidden, 1))
    add(p['norm3']['gamma'].reshape(hidden, 1)); add(p['norm3']['beta'].reshape(hidden, 1))
    add(_w3x3_taps(p['conv3']['w'])); add(p['conv3']['b'].reshape(hidden, 1))
    add(p['norm4']['gamma'].reshape(hidden, 1)); add(p['norm4']['beta'].reshape(hidden, 1))
    add(p['conv4']['w'].reshape(cout, hidden)); add(p['conv4']['b'].reshape(cout, 1))
    if has_res:
        cres = p['resConv']['w'].shape[0]
        add(p['resConv']['w'].reshape(cres, cin)); add(p['resConv']['b'].reshape(cres, 1))

    out = pl.pallas_call(
        _make_block_kernel(groups, has_res, rz is not None),
        out_shape=jax.ShapeDtypeStruct((N, cout, hwo), x.dtype),
        grid=(N,),
        in_specs=in_specs,
        out_specs=pl.BlockSpec((None, cout, hwo), lambda n: (n, 0, 0)),
        compiler_params=_PARALLEL,
    )(*inputs)
    return out, Ho, Wo


# ----------------------------------------------------------------------------
# Model forward (NCHW in / NCHW out, like the PyTorch module)
# ----------------------------------------------------------------------------
def autoencoder_fwd(params, arch, x_nchw):
    N, cin, H, W = x_nchw.shape
    groups = arch['groups']
    x = x_nchw.reshape(N, cin, H * W)                      # free reshape, no transpose
    x = conv1x1_head(x, params['inConv']['w'], params['inConv']['b'])
    for p, blk in zip(params['enc'], arch['encoder']):
        x, H, W = block_forward(p, x, H, W, groups, 'pool' if blk[2] else None)
    for p, blk in zip(params['dec'], arch['decoder']):
        x, H, W = block_forward(p, x, H, W, groups, 'up' if blk[2] else None)
    x = gn_relu_conv1x1_head(x, params['norm']['gamma'], params['norm']['beta'],
                             params['outConv']['w'], params['outConv']['b'], groups)
    return x.reshape(N, x.shape[1], H, W)


# ----------------------------------------------------------------------------
# Deterministic parameter init (shapes from the PyTorch module __init__)
# ----------------------------------------------------------------------------
def init_conv(key, cin, cout, k):
    kw, kb = jax.random.split(key)
    fan_in = cin * k * k
    w = jax.random.normal(kw, (cout, cin, k, k), jnp.float32) / jnp.sqrt(fan_in)
    b = 0.01 * jax.random.normal(kb, (cout,), jnp.float32)
    return {'w': w, 'b': b}


def init_gn(key, c):
    kg, kb = jax.random.split(key)
    gamma = 1.0 + 0.1 * jax.random.normal(kg, (c,), jnp.float32)
    beta = 0.1 * jax.random.normal(kb, (c,), jnp.float32)
    return {'gamma': gamma, 'beta': beta}


def init_block(key, cin, cout, ratio, is_encoder):
    hidden = cin // ratio
    keys = jax.random.split(key, 9)
    p = {
        'conv1': init_conv(keys[0], cin, hidden, 1),
        'conv2': init_conv(keys[1], hidden, hidden, 3),
        'conv3': init_conv(keys[2], hidden, hidden, 3),
        'conv4': init_conv(keys[3], hidden, cout, 1),
        'norm1': init_gn(keys[4], cin),
        'norm2': init_gn(keys[5], hidden),
        'norm3': init_gn(keys[6], hidden),
        'norm4': init_gn(keys[7], hidden),
    }
    if is_encoder and cin != cout:
        p['resConv'] = init_conv(keys[8], cin, cout - cin, 1)
    return p


def init_autoencoder(key, arch):
    enc_arch, dec_arch = arch['encoder'], arch['decoder']
    keys = jax.random.split(key, 3 + len(enc_arch) + len(dec_arch))
    return {
        'inConv': init_conv(keys[0], arch['in'], enc_arch[0][0], 1),
        'outConv': init_conv(keys[1], dec_arch[-1][1], arch['out'], 1),
        'norm': init_gn(keys[2], dec_arch[-1][1]),
        'enc': [init_block(keys[3 + i], b[0], b[1], arch['channel_ratio'], True)
                for i, b in enumerate(enc_arch)],
        'dec': [init_block(keys[3 + len(enc_arch) + i], b[0], b[1],
                           arch['channel_ratio'], False)
                for i, b in enumerate(dec_arch)],
    }


# ----------------------------------------------------------------------------
if __name__ == "__main__":
    arch = {
        'in': 4, 'out': 4, 'groups': 1, 'channel_ratio': 4,
        'encoder': [(8, 16, True)],    # (in_ch, out_ch, pool)
        'decoder': [(16, 8, True)],    # (in_ch, out_ch, upsample)
    }
    key = jax.random.PRNGKey(0)
    kp, kx = jax.random.split(key)
    params = init_autoencoder(kp, arch)
    x = jax.random.normal(kx, (2, 4, 16, 16), jnp.float32)  # NCHW, like PyTorch

    fwd = jax.jit(functools.partial(autoencoder_fwd, params, arch))
    y = fwd(x)
    jax.block_until_ready(y)
    assert y.shape == (2, 4, 16, 16) and y.dtype == jnp.float32
    print("KERNEL_OK")
</pallas_src>

<mosaic_0001>
module attributes {stable_mosaic.version = 11 : i64} {
  func.func @_conv1x1_head_kernel(%arg0: i32, %arg1: memref<1x4x256xf32, #tpu.memory_space<vmem>>, %arg2: memref<8x4xf32, #tpu.memory_space<vmem>>, %arg3: memref<8x1xf32, #tpu.memory_space<vmem>>, %arg4: memref<1x8x256xf32, #tpu.memory_space<vmem>>) attributes {dimension_semantics = [#tpu.dimension_semantics<parallel>], iteration_bounds = array<i64: 2>, scalar_prefetch = 0 : i64, scratch_operands = 0 : i64, tpu.core_type = #tpu.core_type<tc>, window_params = [{transform_indices = @transform_0, window_bounds = array<i64: 1, 4, 256>}, {pipeline_mode = #tpu.pipeline_mode<synchronous>, transform_indices = @transform_1, window_bounds = array<i64: 8, 4>}, {pipeline_mode = #tpu.pipeline_mode<synchronous>, transform_indices = @transform_2, window_bounds = array<i64: 8, 1>}, {transform_indices = @transform_3, window_bounds = array<i64: 1, 8, 256>}]} {
    %c0 = arith.constant 0 : index
    %c0_0 = arith.constant 0 : index
    %c0_1 = arith.constant 0 : index
    %0 = vector.load %arg1[%c0, %c0_0, %c0_1] : memref<1x4x256xf32, #tpu.memory_space<vmem>>, vector<1x4x256xf32>
    %1 = vector.shape_cast %0 : vector<1x4x256xf32> to vector<4x256xf32>
    %c0_2 = arith.constant 0 : index
    %c0_3 = arith.constant 0 : index
    %2 = vector.load %arg2[%c0_2, %c0_3] : memref<8x4xf32, #tpu.memory_space<vmem>>, vector<8x4xf32>
    %c0_4 = arith.constant 0 : index
    %c0_5 = arith.constant 0 : index
    %3 = vector.load %arg3[%c0_4, %c0_5] : memref<8x1xf32, #tpu.memory_space<vmem>>, vector<8x1xf32>
    %cst = arith.constant dense<0.000000e+00> : vector<8x256xf32>
    %4 = tpu.matmul %2, %1, %cst {dimension_numbers = #tpu.dot_dimension_numbers<[1], [0], [0], [1], [0, 0, 1, 1], [], []>} : vector<8x4xf32>, vector<4x256xf32>, vector<8x256xf32> -> vector<8x256xf32>
    %5 = vector.broadcast %3 : vector<8x1xf32> to vector<8x256xf32>
    %6 = arith.addf %4, %5 : vector<8x256xf32>
    %c0_6 = arith.constant 0 : index
    %c0_7 = arith.constant 0 : index
    %c0_8 = arith.constant 0 : index
    %7 = vector.load %arg4[%c0_6, %c0_7, %c0_8] : memref<1x8x256xf32, #tpu.memory_space<vmem>>, vector<1x8x256xf32>
    %8 = vector.shape_cast %7 : vector<1x8x256xf32> to vector<8x256xf32>
    %9 = vector.shape_cast %6 : vector<8x256xf32> to vector<1x8x256xf32>
    tpu.vector_store %arg4[%c0_6, %c0_7, %c0_8], %9 {strides = array<i32>} : memref<1x8x256xf32, #tpu.memory_space<vmem>>, vector<1x8x256xf32>,
    return
  }
  func.func @transform_0(%arg0: i32) -> (i32, i32, i32) {
    %c0_i32 = arith.constant 0 : i32
    %c0_i32_0 = arith.constant 0 : i32
    %c0_i32_1 = arith.constant 0 : i32
    return %arg0, %c0_i32, %c0_i32_0 : i32, i32, i32
  }
  func.func @transform_1(%arg0: i32) -> (i32, i32) {
    %c0_i32 = arith.constant 0 : i32
    %c0_i32_0 = arith.constant 0 : i32
    %c0_i32_1 = arith.constant 0 : i32
    return %c0_i32, %c0_i32_0 : i32, i32
  }
  func.func @transform_2(%arg0: i32) -> (i32, i32) {
    %c0_i32 = arith.constant 0 : i32
    %c0_i32_0 = arith.constant 0 : i32
    %c0_i32_1 = arith.constant 0 : i32
    return %c0_i32, %c0_i32_0 : i32, i32
  }
  func.func @transform_3(%arg0: i32) -> (i32, i32, i32) {
    %c0_i32 = arith.constant 0 : i32
    %c0_i32_0 = arith.constant 0 : i32
    %c0_i32_1 = arith.constant 0 : i32
    return %arg0, %c0_i32, %c0_i32_0 : i32, i32, i32
  }
}

module attributes {stable_mosaic.version = 11 : i64} {
  func.func @kernel(%arg0: i32, %arg1: memref<1x16x64xf32, #tpu.memory_space<vmem>>, %arg2: memref<9x64x64xf32, #tpu.memory_space<vmem>>, %arg3: memref<64x256xf32, #tpu.memory_space<vmem>>, %arg4: memref<16x1xf32, #tpu.memory_space<vmem>>, %arg5: memref<16x1xf32, #tpu.memory_space<vmem>>, %arg6: memref<4x16xf32, #tpu.memory_space<vmem>>, %arg7: memref<4x1xf32, #tpu.memory_space<vmem>>, %arg8: memref<4x1xf32, #tpu.memory_space<vmem>>, %arg9: memref<4x1xf32, #tpu.memory_space<vmem>>, %arg10: memref<9x4x4xf32, #tpu.memory_space<vmem>>, %arg11: memref<4x1xf32, #tpu.memory_space<vmem>>, %arg12: memref<4x1xf32, #tpu.memory_space<vmem>>, %arg13: memref<4x1xf32, #tpu.memory_space<vmem>>, %arg14: memref<9x4x4xf32, #tpu.memory_space<vmem>>, %arg15: memref<4x1xf32, #tpu.memory_space<vmem>>, %arg16: memref<4x1xf32, #tpu.memory_space<vmem>>, %arg17: memref<4x1xf32, #tpu.memory_space<vmem>>, %arg18: memref<8x4xf32, #tpu.memory_space<vmem>>, %arg19: memref<8x1xf32, #tpu.memory_space<vmem>>, %arg20: memref<1x8x256xf32, #tpu.memory_space<vmem>>) attributes {dimension_semantics = [#tpu.dimension_semantics<parallel>], iteration_bounds = array<i64: 2>, scalar_prefetch = 0 : i64, scratch_operands = 0 : i64, tpu.core_type = #tpu.core_type<tc>, window_params = [{transform_indices = @transform_0, window_bounds = array<i64: 1, 16, 64>}, {pipeline_mode = #tpu.pipeline_mode<synchronous>, transform_indices = @transform_1, window_bounds = array<i64: 9, 64, 64>}, {pipeline_mode = #tpu.pipeline_mode<synchronous>, transform_indices = @transform_2, window_bounds = array<i64: 64, 256>}, {pipeline_mode = #tpu.pipeline_mode<synchronous>, transform_indices = @transform_3, window_bounds = array<i64: 16, 1>}, {pipeline_mode = #tpu.pipeline_mode<synchronous>, transform_indices = @transform_4, window_bounds = array<i64: 16, 1>}, {pipeline_mode = #tpu.pipeline_mode<synchronous>, transform_indices = @transform_5, window_bounds = array<i64: 4, 16>}, {pipeline_mode = #tpu.pipeline_mode<synchronous>, transform_indices = @transform_6, window_bounds = array<i64: 4, 1>}, {pipeline_mode = #tpu.pipeline_mode<synchronous>, transform_indices = @transform_7, window_bounds = array<i64: 4, 1>}, {pipeline_mode = #tpu.pipeline_mode<synchronous>, transform_indices = @transform_8, window_bounds = array<i64: 4, 1>}, {pipeline_mode = #tpu.pipeline_mode<synchronous>, transform_indices = @transform_9, window_bounds = array<i64: 9, 4, 4>}, {pipeline_mode = #tpu.pipeline_mode<synchronous>, transform_indices = @transform_10, window_bounds = array<i64: 4, 1>}, {pipeline_mode = #tpu.pipeline_mode<synchronous>, transform_indices = @transform_11, window_bounds = array<i64: 4, 1>}, {pipeline_mode = #tpu.pipeline_mode<synchronous>, transform_indices = @transform_12, window_bounds = array<i64: 4, 1>}, {pipeline_mode = #tpu.pipeline_mode<synchronous>, transform_indices = @transform_13, window_bounds = array<i64: 9, 4, 4>}, {pipeline_mode = #tpu.pipeline_mode<synchronous>, transform_indices = @transform_14, window_bounds = array<i64: 4, 1>}, {pipeline_mode = #tpu.pipeline_mode<synchronous>, transform_indices = @transform_15, window_bounds = array<i64: 4, 1>}, {pipeline_mode = #tpu.pipeline_mode<synchronous>, transform_indices = @transform_16, window_bounds = array<i64: 4, 1>}, {pipeline_mode = #tpu.pipeline_mode<synchronous>, transform_indices = @transform_17, window_bounds = array<i64: 8, 4>}, {pipeline_mode = #tpu.pipeline_mode<synchronous>, transform_indices = @transform_18, window_bounds = array<i64: 8, 1>}, {transform_indices = @transform_19, window_bounds = array<i64: 1, 8, 256>}]} {
    %c0 = arith.constant 0 : index
    %c0_0 = arith.constant 0 : index
    %c0_1 = arith.constant 0 : index
    %0 = vector.load %arg1[%c0, %c0_0, %c0_1] : memref<1x16x64xf32, #tpu.memory_space<vmem>>, vector<1x16x64xf32>
    %1 = vector.shape_cast %0 : vector<1x16x64xf32> to vector<16x64xf32>
    %c0_2 = arith.constant 0 : index
    %c0_3 = arith.constant 0 : index
    %2 = vector.load %arg4[%c0_2, %c0_3] : memref<16x1xf32, #tpu.memory_space<vmem>>, vector<16x1xf32>
    %c0_4 = arith.constant 0 : index
    %c0_5 = arith.constant 0 : index
    %3 = vector.load %arg5[%c0_4, %c0_5] : memref<16x1xf32, #tpu.memory_space<vmem>>, vector<16x1xf32>
    %cst = arith.constant dense<0.000000e+00> : vector<16xf32>
    %4 = vector.multi_reduction <add>, %1, %cst [1] : vector<16x64xf32> to vector<16xf32>
    %5 = vector.shape_cast %4 : vector<16xf32> to vector<16x1xf32>
    %cst_6 = arith.constant dense<0.000000e+00> : vector<1xf32>
    %6 = vector.multi_reduction <add>, %5, %cst_6 [0] : vector<16x1xf32> to vector<1xf32>
    %7 = vector.shape_cast %6 : vector<1xf32> to vector<1x1xf32>
    %cst_7 = arith.constant 1.024000e+03 : f32
    %8 = vector.broadcast %cst_7 : f32 to vector<1x1xf32>
    %9 = arith.divf %7, %8 : vector<1x1xf32>
    %10 = vector.broadcast %9 : vector<1x1xf32> to vector<16x64xf32>
    %11 = arith.subf %1, %10 : vector<16x64xf32>
    %12 = arith.mulf %11, %11 : vector<16x64xf32>
    %cst_8 = arith.constant dense<0.000000e+00> : vector<16xf32>
    %13 = vector.multi_reduction <add>, %12, %cst_8 [1] : vector<16x64xf32> to vector<16xf32>
    %14 = vector.shape_cast %13 : vector<16xf32> to vector<16x1xf32>
    %cst_9 = arith.constant dense<0.000000e+00> : vector<1xf32>
    %15 = vector.multi_reduction <add>, %14, %cst_9 [0] : vector<16x1xf32> to vector<1xf32>
    %16 = vector.shape_cast %15 : vector<1xf32> to vector<1x1xf32>
    %cst_10 = arith.constant 1.024000e+03 : f32
    %17 = vector.broadcast %cst_10 : f32 to vector<1x1xf32>
    %18 = arith.divf %16, %17 : vector<1x1xf32>
    %cst_11 = arith.constant 9.99999974E-6 : f32
    %19 = vector.broadcast %cst_11 : f32 to vector<1x1xf32>
    %20 = arith.addf %18, %19 : vector<1x1xf32>
    %21 = math.rsqrt %20 : vector<1x1xf32>
    %22 = vector.broadcast %21 : vector<1x1xf32> to vector<16x64xf32>
    %23 = arith.mulf %11, %22 : vector<16x64xf32>
    %24 = vector.broadcast %2 : vector<16x1xf32> to vector<16x64xf32>
    %25 = arith.mulf %23, %24 : vector<16x64xf32>
    %26 = vector.broadcast %3 : vector<16x1xf32> to vector<16x64xf32>
    %27 = arith.addf %25, %26 : vector<16x64xf32>
    %cst_12 = arith.constant 0.000000e+00 : f32
    %28 = vector.broadcast %cst_12 : f32 to vector<16x64xf32>
    %29 = arith.maximumf %27, %28 : vector<16x64xf32>
    %c0_13 = arith.constant 0 : index
    %c0_14 = arith.constant 0 : index
    %30 = vector.load %arg6[%c0_13, %c0_14] : memref<4x16xf32, #tpu.memory_space<vmem>>, vector<4x16xf32>
    %c0_15 = arith.constant 0 : index
    %c0_16 = arith.constant 0 : index
    %31 = vector.load %arg7[%c0_15, %c0_16] : memref<4x1xf32, #tpu.memory_space<vmem>>, vector<4x1xf32>
    %cst_17 = arith.constant dense<0.000000e+00> : vector<4x64xf32>
    %32 = tpu.matmul %30, %29, %cst_17 {dimension_numbers = #tpu.dot_dimension_numbers<[1], [0], [0], [1], [0, 0, 1, 1], [], []>} : vector<4x16xf32>, vector<16x64xf32>, vector<4x64xf32> -> vector<4x64xf32>
    %33 = vector.broadcast %31 : vector<4x1xf32> to vector<4x64xf32>
    %34 = arith.addf %32, %33 : vector<4x64xf32>
    %c0_18 = arith.constant 0 : index
    %c0_19 = arith.constant 0 : index
    %35 = vector.load %arg8[%c0_18, %c0_19] : memref<4x1xf32, #tpu.memory_space<vmem>>, vector<4x1xf32>
    %c0_20 = arith.constant 0 : index
    %c0_21 = arith.constant 0 : index
    %36 = vector.load %arg9[%c0_20, %c0_21] : memref<4x1xf32, #tpu.memory_space<vmem>>, vector<4x1xf32>
    %cst_22 = arith.constant dense<0.000000e+00> : vector<4xf32>
    %37 = vector.multi_reduction <add>, %34, %cst_22 [1] : vector<4x64xf32> to vector<4xf32>
    %38 = vector.shape_cast %37 : vector<4xf32> to vector<4x1xf32>
    %cst_23 = arith.constant dense<0.000000e+00> : vector<1xf32>
    %39 = vector.multi_reduction <add>, %38, %cst_23 [0] : vector<4x1xf32> to vector<1xf32>
    %40 = vector.shape_cast %39 : vector<1xf32> to vector<1x1xf32>
    %cst_24 = arith.constant 2.560000e+02 : f32
    %41 = vector.broadcast %cst_24 : f32 to vector<1x1xf32>
    %42 = arith.divf %40, %41 : vector<1x1xf32>
    %43 = vector.broadcast %42 : vector<1x1xf32> to vector<4x64xf32>
    %44 = arith.subf %34, %43 : vector<4x64xf32>
    %45 = arith.mulf %44, %44 : vector<4x64xf32>
    %cst_25 = arith.constant dense<0.000000e+00> : vector<4xf32>
    %46 = vector.multi_reduction <add>, %45, %cst_25 [1] : vector<4x64xf32> to vector<4xf32>
    %47 = vector.shape_cast %46 : vector<4xf32> to vector<4x1xf32>
    %cst_26 = arith.constant dense<0.000000e+00> : vector<1xf32>
    %48 = vector.multi_reduction <add>, %47, %cst_26 [0] : vector<4x1xf32> to vector<1xf32>
    %49 = vector.shape_cast %48 : vector<1xf32> to vector<1x1xf32>
    %cst_27 = arith.constant 2.560000e+02 : f32
    %50 = vector.broadcast %cst_27 : f32 to vector<1x1xf32>
    %51 = arith.divf %49, %50 : vector<1x1xf32>
    %cst_28 = arith.constant 9.99999974E-6 : f32
    %52 = vector.broadcast %cst_28 : f32 to vector<1x1xf32>
    %53 = arith.addf %51, %52 : vector<1x1xf32>
    %54 = math.rsqrt %53 : vector<1x1xf32>
    %55 = vector.broadcast %54 : vector<1x1xf32> to vector<4x64xf32>
    %56 = arith.mulf %44, %55 : vector<4x64xf32>
    %57 = vector.broadcast %35 : vector<4x1xf32> to vector<4x64xf32>
    %58 = arith.mulf %56, %57 : vector<4x64xf32>
    %59 = vector.broadcast %36 : vector<4x1xf32> to vector<4x64xf32>
    %60 = arith.addf %58, %59 : vector<4x64xf32>
    %cst_29 = arith.constant 0.000000e+00 : f32
    %61 = vector.broadcast %cst_29 : f32 to vector<4x64xf32>
    %62 = arith.maximumf %60, %61 : vector<4x64xf32>
    %c0_30 = arith.constant 0 : index
    %c0_31 = arith.constant 0 : index
    %63 = vector.load %arg11[%c0_30, %c0_31] : memref<4x1xf32, #tpu.memory_space<vmem>>, vector<4x1xf32>
    %cst_32 = arith.constant 0.000000e+00 : f32
    %64 = vector.broadcast %cst_32 : f32 to vector<4x64xf32>
    %c0_33 = arith.constant 0 : index
    %c0_34 = arith.constant 0 : index
    %c0_35 = arith.constant 0 : index
    %65 = vector.load %arg2[%c0_33, %c0_34, %c0_35] : memref<9x64x64xf32, #tpu.memory_space<vmem>>, vector<1x64x64xf32>
    %66 = vector.shape_cast %65 : vector<1x64x64xf32> to vector<64x64xf32>
    %cst_36 = arith.constant dense<0.000000e+00> : vector<4x64xf32>
    %67 = tpu.matmul %62, %66, %cst_36 {dimension_numbers = #tpu.dot_dimension_numbers<[1], [0], [0], [1], [0, 0, 1, 1], [], []>} : vector<4x64xf32>, vector<64x64xf32>, vector<4x64xf32> -> vector<4x64xf32>
    %c0_37 = arith.constant 0 : index
    %c0_38 = arith.constant 0 : index
    %c0_39 = arith.constant 0 : index
    %68 = vector.load %arg10[%c0_37, %c0_38, %c0_39] : memref<9x4x4xf32, #tpu.memory_space<vmem>>, vector<1x4x4xf32>
    %69 = vector.shape_cast %68 : vector<1x4x4xf32> to vector<4x4xf32>
    %cst_40 = arith.constant dense<0.000000e+00> : vector<4x64xf32>
    %70 = tpu.matmul %69, %67, %cst_40 {dimension_numbers = #tpu.dot_dimension_numbers<[1], [0], [0], [1], [0, 0, 1, 1], [], []>} : vector<4x4xf32>, vector<4x64xf32>, vector<4x64xf32> -> vector<4x64xf32>
    %71 = arith.addf %64, %70 : vector<4x64xf32>
    %c1 = arith.constant 1 : index
    %c0_41 = arith.constant 0 : index
    %c0_42 = arith.constant 0 : index
    %72 = vector.load %arg2[%c1, %c0_41, %c0_42] : memref<9x64x64xf32, #tpu.memory_space<vmem>>, vector<1x64x64xf32>
    %73 = vector.shape_cast %72 : vector<1x64x64xf32> to vector<64x64xf32>
    %cst_43 = arith.constant dense<0.000000e+00> : vector<4x64xf32>
    %74 = tpu.matmul %62, %73, %cst_43 {dimension_numbers = #tpu.dot_dimension_numbers<[1], [0], [0], [1], [0, 0, 1, 1], [], []>} : vector<4x64xf32>, vector<64x64xf32>, vector<4x64xf32> -> vector<4x64xf32>
    %c1_44 = arith.constant 1 : index
    %c0_45 = arith.constant 0 : index
    %c0_46 = arith.constant 0 : index
    %75 = vector.load %arg10[%c1_44, %c0_45, %c0_46] : memref<9x4x4xf32, #tpu.memory_space<vmem>>, vector<1x4x4xf32>
    %76 = vector.shape_cast %75 : vector<1x4x4xf32> to vector<4x4xf32>
    %cst_47 = arith.constant dense<0.000000e+00> : vector<4x64xf32>
    %77 = tpu.matmul %76, %74, %cst_47 {dimension_numbers = #tpu.dot_dimension_numbers<[1], [0], [0], [1], [0, 0, 1, 1], [], []>} : vector<4x4xf32>, vector<4x64xf32>, vector<4x64xf32> -> vector<4x64xf32>
    %78 = arith.addf %71, %77 : vector<4x64xf32>
    %c2 = arith.constant 2 : index
    %c0_48 = arith.constant 0 : index
    %c0_49 = arith.constant 0 : index
    %79 = vector.load %arg2[%c2, %c0_48, %c0_49] : memref<9x64x64xf32, #tpu.memory_space<vmem>>, vector<1x64x64xf32>
    %80 = vector.shape_cast %79 : vector<1x64x64xf32> to vector<64x64xf32>
    %cst_50 = arith.constant dense<0.000000e+00> : vector<4x64xf32>
    %81 = tpu.matmul %62, %80, %cst_50 {dimension_numbers = #tpu.dot_dimension_numbers<[1], [0], [0], [1], [0, 0, 1, 1], [], []>} : vector<4x64xf32>, vector<64x64xf32>, vector<4x64xf32> -> vector<4x64xf32>
    %c2_51 = arith.constant 2 : index
    %c0_52 = arith.constant 0 : index
    %c0_53 = arith.constant 0 : index
    %82 = vector.load %arg10[%c2_51, %c0_52, %c0_53] : memref<9x4x4xf32, #tpu.memory_space<vmem>>, vector<1x4x4xf32>
    %83 = vector.shape_cast %82 : vector<1x4x4xf32> to vector<4x4xf32>
    %cst_54 = arith.constant dense<0.000000e+00> : vector<4x64xf32>
    %84 = tpu.matmul %83, %81, %cst_54 {dimension_numbers = #tpu.dot_dimension_numbers<[1], [0], [0], [1], [0, 0, 1, 1], [], []>} : vector<4x4xf32>, vector<4x64xf32>, vector<4x64xf32> -> vector<4x64xf32>
    %85 = arith.addf %78, %84 : vector<4x64xf32>
    %c3 = arith.constant 3 : index
    %c0_55 = arith.constant 0 : index
    %c0_56 = arith.constant 0 : index
    %86 = vector.load %arg2[%c3, %c0_55, %c0_56] : memref<9x64x64xf32, #tpu.memory_space<vmem>>, vector<1x64x64xf32>
    %87 = vector.shape_cast %86 : vector<1x64x64xf32> to vector<64x64xf32>
    %cst_57 = arith.constant dense<0.000000e+00> : vector<4x64xf32>
    %88 = tpu.matmul %62, %87, %cst_57 {dimension_numbers = #tpu.dot_dimension_numbers<[1], [0], [0], [1], [0, 0, 1, 1], [], []>} : vector<4x64xf32>, vector<64x64xf32>, vector<4x64xf32> -> vector<4x64xf32>
    %c3_58 = arith.constant 3 : index
    %c0_59 = arith.constant 0 : index
    %c0_60 = arith.constant 0 : index
    %89 = vector.load %arg10[%c3_58, %c0_59, %c0_60] : memref<9x4x4xf32, #tpu.memory_space<vmem>>, vector<1x4x4xf32>
    %90 = vector.shape_cast %89 : vector<1x4x4xf32> to vector<4x4xf32>
    %cst_61 = arith.constant dense<0.000000e+00> : vector<4x64xf32>
    %91 = tpu.matmul %90, %88, %cst_61 {dimension_numbers = #tpu.dot_dimension_numbers<[1], [0], [0], [1], [0, 0, 1, 1], [], []>} : vector<4x4xf32>, vector<4x64xf32>, vector<4x64xf32> -> vector<4x64xf32>
    %92 = arith.addf %85, %91 : vector<4x64xf32>
    %c4 = arith.constant 4 : index
    %c0_62 = arith.constant 0 : index
    %c0_63 = arith.constant 0 : index
    %93 = vector.load %arg2[%c4, %c0_62, %c0_63] : memref<9x64x64xf32, #tpu.memory_space<vmem>>, vector<1x64x64xf32>
    %94 = vector.shape_cast %93 : vector<1x64x64xf32> to vector<64x64xf32>
    %cst_64 = arith.constant dense<0.000000e+00> : vector<4x64xf32>
    %95 = tpu.matmul %62, %94, %cst_64 {dimension_numbers = #tpu.dot_dimension_numbers<[1], [0], [0], [1], [0, 0, 1, 1], [], []>} : vector<4x64xf32>, vector<64x64xf32>, vector<4x64xf32> -> vector<4x64xf32>
    %c4_65 = arith.constant 4 : index
    %c0_66 = arith.constant 0 : index
    %c0_67 = arith.constant 0 : index
    %96 = vector.load %arg10[%c4_65, %c0_66, %c0_67] : memref<9x4x4xf32, #tpu.memory_space<vmem>>, vector<1x4x4xf32>
    %97 = vector.shape_cast %96 : vector<1x4x4xf32> to vector<4x4xf32>
    %cst_68 = arith.constant dense<0.000000e+00> : vector<4x64xf32>
    %98 = tpu.matmul %97, %95, %cst_68 {dimension_numbers = #tpu.dot_dimension_numbers<[1], [0], [0], [1], [0, 0, 1, 1], [], []>} : vector<4x4xf32>, vector<4x64xf32>, vector<4x64xf32> -> vector<4x64xf32>
    %99 = arith.addf %92, %98 : vector<4x64xf32>
    %c5 = arith.constant 5 : index
    %c0_69 = arith.constant 0 : index
    %c0_70 = arith.constant 0 : index
    %100 = vector.load %arg2[%c5, %c0_69, %c0_70] : memref<9x64x64xf32, #tpu.memory_space<vmem>>, vector<1x64x64xf32>
    %101 = vector.shape_cast %100 : vector<1x64x64xf32> to vector<64x64xf32>
    %cst_71 = arith.constant dense<0.000000e+00> : vector<4x64xf32>
    %102 = tpu.matmul %62, %101, %cst_71 {dimension_numbers = #tpu.dot_dimension_numbers<[1], [0], [0], [1], [0, 0, 1, 1], [], []>} : vector<4x64xf32>, vector<64x64xf32>, vector<4x64xf32> -> vector<4x64xf32>
    %c5_72 = arith.constant 5 : index
    %c0_73 = arith.constant 0 : index
    %c0_74 = arith.constant 0 : index
    %103 = vector.load %arg10[%c5_72, %c0_73, %c0_74] : memref<9x4x4xf32, #tpu.memory_space<vmem>>, vector<1x4x4xf32>
    %104 = vector.shape_cast %103 : vector<1x4x4xf32> to vector<4x4xf32>
    %cst_75 = arith.constant dense<0.000000e+00> : vector<4x64xf32>
    %105 = tpu.matmul %104, %102, %cst_75 {dimension_numbers = #tpu.dot_dimension_numbers<[1], [0], [0], [1], [0, 0, 1, 1], [], []>} : vector<4x4xf32>, vector<4x64xf32>, vector<4x64xf32> -> vector<4x64xf32>
    %106 = arith.addf %99, %105 : vector<4x64xf32>
    %c6 = arith.constant 6 : index
    %c0_76 = arith.constant 0 : index
    %c0_77 = arith.constant 0 : index
    %107 = vector.load %arg2[%c6, %c0_76, %c0_77] : memref<9x64x64xf32, #tpu.memory_space<vmem>>, vector<1x64x64xf32>
    %108 = vector.shape_cast %107 : vector<1x64x64xf32> to vector<64x64xf32>
    %cst_78 = arith.constant dense<0.000000e+00> : vector<4x64xf32>
    %109 = tpu.matmul %62, %108, %cst_78 {dimension_numbers = #tpu.dot_dimension_numbers<[1], [0], [0], [1], [0, 0, 1, 1], [], []>} : vector<4x64xf32>, vector<64x64xf32>, vector<4x64xf32> -> vector<4x64xf32>
    %c6_79 = arith.constant 6 : index
    %c0_80 = arith.constant 0 : index
    %c0_81 = arith.constant 0 : index
    %110 = vector.load %arg10[%c6_79, %c0_80, %c0_81] : memref<9x4x4xf32, #tpu.memory_space<vmem>>, vector<1x4x4xf32>
    %111 = vector.shape_cast %110 : vector<1x4x4xf32> to vector<4x4xf32>
    %cst_82 = arith.constant dense<0.000000e+00> : vector<4x64xf32>
    %112 = tpu.matmul %111, %109, %cst_82 {dimension_numbers = #tpu.dot_dimension_numbers<[1], [0], [0], [1], [0, 0, 1, 1], [], []>} : vector<4x4xf32>, vector<4x64xf32>, vector<4x64xf32> -> vector<4x64xf32>
    %113 = arith.addf %106, %112 : vector<4x64xf32>
    %c7 = arith.constant 7 : index
    %c0_83 = arith.constant 0 : index
    %c0_84 = arith.constant 0 : index
    %114 = vector.load %arg2[%c7, %c0_83, %c0_84] : memref<9x64x64xf32, #tpu.memory_space<vmem>>, vector<1x64x64xf32>
    %115 = vector.shape_cast %114 : vector<1x64x64xf32> to vector<64x64xf32>
    %cst_85 = arith.constant dense<0.000000e+00> : vector<4x64xf32>
    %116 = tpu.matmul %62, %115, %cst_85 {dimension_numbers = #tpu.dot_dimension_numbers<[1], [0], [0], [1], [0, 0, 1, 1], [], []>} : vector<4x64xf32>, vector<64x64xf32>, vector<4x64xf32> -> vector<4x64xf32>
    %c7_86 = arith.constant 7 : index
    %c0_87 = arith.constant 0 : index
    %c0_88 = arith.constant 0 : index
    %117 = vector.load %arg10[%c7_86, %c0_87, %c0_88] : memref<9x4x4xf32, #tpu.memory_space<vmem>>, vector<1x4x4xf32>
    %118 = vector.shape_cast %117 : vector<1x4x4xf32> to vector<4x4xf32>
    %cst_89 = arith.constant dense<0.000000e+00> : vector<4x64xf32>
    %119 = tpu.matmul %118, %116, %cst_89 {dimension_numbers = #tpu.dot_dimension_numbers<[1], [0], [0], [1], [0, 0, 1, 1], [], []>} : vector<4x4xf32>, vector<4x64xf32>, vector<4x64xf32> -> vector<4x64xf32>
    %120 = arith.addf %113, %119 : vector<4x64xf32>
    %c8 = arith.constant 8 : index
    %c0_90 = arith.constant 0 : index
    %c0_91 = arith.constant 0 : index
    %121 = vector.load %arg2[%c8, %c0_90, %c0_91] : memref<9x64x64xf32, #tpu.memory_space<vmem>>, vector<1x64x64xf32>
    %122 = vector.shape_cast %121 : vector<1x64x64xf32> to vector<64x64xf32>
    %cst_92 = arith.constant dense<0.000000e+00> : vector<4x64xf32>
    %123 = tpu.matmul %62, %122, %cst_92 {dimension_numbers = #tpu.dot_dimension_numbers<[1], [0], [0], [1], [0, 0, 1, 1], [], []>} : vector<4x64xf32>, vector<64x64xf32>, vector<4x64xf32> -> vector<4x64xf32>
    %c8_93 = arith.constant 8 : index
    %c0_94 = arith.constant 0 : index
    %c0_95 = arith.constant 0 : index
    %124 = vector.load %arg10[%c8_93, %c0_94, %c0_95] : memref<9x4x4xf32, #tpu.memory_space<vmem>>, vector<1x4x4xf32>
    %125 = vector.shape_cast %124 : vector<1x4x4xf32> to vector<4x4xf32>
    %cst_96 = arith.constant dense<0.000000e+00> : vector<4x64xf32>
    %126 = tpu.matmul %125, %123, %cst_96 {dimension_numbers = #tpu.dot_dimension_numbers<[1], [0], [0], [1], [0, 0, 1, 1], [], []>} : vector<4x4xf32>, vector<4x64xf32>, vector<4x64xf32> -> vector<4x64xf32>
    %127 = arith.addf %120, %126 : vector<4x64xf32>
    %128 = vector.broadcast %63 : vector<4x1xf32> to vector<4x64xf32>
    %129 = arith.addf %127, %128 : vector<4x64xf32>
    %c0_97 = arith.constant 0 : index
    %c0_98 = arith.constant 0 : index
    %130 = vector.load %arg12[%c0_97, %c0_98] : memref<4x1xf32, #tpu.memory_space<vmem>>, vector<4x1xf32>
    %c0_99 = arith.constant 0 : index
    %c0_100 = arith.constant 0 : index
    %131 = vector.load %arg13[%c0_99, %c0_100] : memref<4x1xf32, #tpu.memory_space<vmem>>, vector<4x1xf32>
    %cst_101 = arith.constant dense<0.000000e+00> : vector<4xf32>
    %132 = vector.multi_reduction <add>, %129, %cst_101 [1] : vector<4x64xf32> to vector<4xf32>
    %133 = vector.shape_cast %132 : vector<4xf32> to vector<4x1xf32>
    %cst_102 = arith.constant dense<0.000000e+00> : vector<1xf32>
    %134 = vector.multi_reduction <add>, %133, %cst_102 [0] : vector<4x1xf32> to vector<1xf32>
    %135 = vector.shape_cast %134 : vector<1xf32> to vector<1x1xf32>
    %cst_103 = arith.constant 2.560000e+02 : f32
    %136 = vector.broadcast %cst_103 : f32 to vector<1x1xf32>
    %137 = arith.divf %135, %136 : vector<1x1xf32>
    %138 = vector.broadcast %137 : vector<1x1xf32> to vector<4x64xf32>
    %139 = arith.subf %129, %138 : vector<4x64xf32>
    %140 = arith.mulf %139, %139 : vector<4x64xf32>
    %cst_104 = arith.constant dense<0.000000e+00> : vector<4xf32>
    %141 = vector.multi_reduction <add>, %140, %cst_104 [1] : vector<4x64xf32> to vector<4xf32>
    %142 = vector.shape_cast %141 : vector<4xf32> to vector<4x1xf32>
    %cst_105 = arith.constant dense<0.000000e+00> : vector<1xf32>
    %143 = vector.multi_reduction <add>, %142, %cst_105 [0] : vector<4x1xf32> to vector<1xf32>
    %144 = vector.shape_cast %143 : vector<1xf32> to vector<1x1xf32>
    %cst_106 = arith.constant 2.560000e+02 : f32
    %145 = vector.broadcast %cst_106 : f32 to vector<1x1xf32>
    %146 = arith.divf %144, %145 : vector<1x1xf32>
    %cst_107 = arith.constant 9.99999974E-6 : f32
    %147 = vector.broadcast %cst_107 : f32 to vector<1x1xf32>
    %148 = arith.addf %146, %147 : vector<1x1xf32>
    %149 = math.rsqrt %148 : vector<1x1xf32>
    %150 = vector.broadcast %149 : vector<1x1xf32> to vector<4x64xf32>
    %151 = arith.mulf %139, %150 : vector<4x64xf32>
    %152 = vector.broadcast %130 : vector<4x1xf32> to vector<4x64xf32>
    %153 = arith.mulf %151, %152 : vector<4x64xf32>
    %154 = vector.broadcast %131 : vector<4x1xf32> to vector<4x64xf32>
    %155 = arith.addf %153, %154 : vector<4x64xf32>
    %cst_108 = arith.constant 0.000000e+00 : f32
    %156 = vector.broadcast %cst_108 : f32 to vector<4x64xf32>
    %157 = arith.maximumf %155, %156 : vector<4x64xf32>
    %c0_109 = arith.constant 0 : index
    %c0_110 = arith.constant 0 : index
    %158 = vector.load %arg15[%c0_109, %c0_110] : memref<4x1xf32, #tpu.memory_space<vmem>>, vector<4x1xf32>
    %cst_111 = arith.constant 0.000000e+00 : f32
    %159 = vector.broadcast %cst_111 : f32 to vector<4x64xf32>
    %c0_112 = arith.constant 0 : index
    %c0_113 = arith.constant 0 : index
    %c0_114 = arith.constant 0 : index
    %160 = vector.load %arg2[%c0_112, %c0_113, %c0_114] : memref<9x64x64xf32, #tpu.memory_space<vmem>>, vector<1x64x64xf32>
    %161 = vector.shape_cast %160 : vector<1x64x64xf32> to vector<64x64xf32>
    %cst_115 = arith.constant dense<0.000000e+00> : vector<4x64xf32>
    %162 = tpu.matmul %157, %161, %cst_115 {dimension_numbers = #tpu.dot_dimension_numbers<[1], [0], [0], [1], [0, 0, 1, 1], [], []>} : vector<4x64xf32>, vector<64x64xf32>, vector<4x64xf32> -> vector<4x64xf32>
    %c0_116 = arith.constant 0 : index
    %c0_117 = arith.constant 0 : index
    %c0_118 = arith.constant 0 : index
    %163 = vector.load %arg14[%c0_116, %c0_117, %c0_118] : memref<9x4x4xf32, #tpu.memory_space<vmem>>, vector<1x4x4xf32>
    %164 = vector.shape_cast %163 : vector<1x4x4xf32> to vector<4x4xf32>
    %cst_119 = arith.constant dense<0.000000e+00> : vector<4x64xf32>
    %165 = tpu.matmul %164, %162, %cst_119 {dimension_numbers = #tpu.dot_dimension_numbers<[1], [0], [0], [1], [0, 0, 1, 1], [], []>} : vector<4x4xf32>, vector<4x64xf32>, vector<4x64xf32> -> vector<4x64xf32>
    %166 = arith.addf %159, %165 : vector<4x64xf32>
    %c1_120 = arith.constant 1 : index
    %c0_121 = arith.constant 0 : index
    %c0_122 = arith.constant 0 : index
    %167 = vector.load %arg2[%c1_120, %c0_121, %c0_122] : memref<9x64x64xf32, #tpu.memory_space<vmem>>, vector<1x64x64xf32>
    %168 = vector.shape_cast %167 : vector<1x64x64xf32> to vector<64x64xf32>
    %cst_123 = arith.constant dense<0.000000e+00> : vector<4x64xf32>
    %169 = tpu.matmul %157, %168, %cst_123 {dimension_numbers = #tpu.dot_dimension_numbers<[1], [0], [0], [1], [0, 0, 1, 1], [], []>} : vector<4x64xf32>, vector<64x64xf32>, vector<4x64xf32> -> vector<4x64xf32>
    %c1_124 = arith.constant 1 : index
    %c0_125 = arith.constant 0 : index
    %c0_126 = arith.constant 0 : index
    %170 = vector.load %arg14[%c1_124, %c0_125, %c0_126] : memref<9x4x4xf32, #tpu.memory_space<vmem>>, vector<1x4x4xf32>
    %171 = vector.shape_cast %170 : vector<1x4x4xf32> to vector<4x4xf32>
    %cst_127 = arith.constant dense<0.000000e+00> : vector<4x64xf32>
    %172 = tpu.matmul %171, %169, %cst_127 {dimension_numbers = #tpu.dot_dimension_numbers<[1], [0], [0], [1], [0, 0, 1, 1], [], []>} : vector<4x4xf32>, vector<4x64xf32>, vector<4x64xf32> -> vector<4x64xf32>
    %173 = arith.addf %166, %172 : vector<4x64xf32>
    %c2_128 = arith.constant 2 : index
    %c0_129 = arith.constant 0 : index
    %c0_130 = arith.constant 0 : index
    %174 = vector.load %arg2[%c2_128, %c0_129, %c0_130] : memref<9x64x64xf32, #tpu.memory_space<vmem>>, vector<1x64x64xf32>
    %175 = vector.shape_cast %174 : vector<1x64x64xf32> to vector<64x64xf32>
    %cst_131 = arith.constant dense<0.000000e+00> : vector<4x64xf32>
    %176 = tpu.matmul %157, %175, %cst_131 {dimension_numbers = #tpu.dot_dimension_numbers<[1], [0], [0], [1], [0, 0, 1, 1], [], []>} : vector<4x64xf32>, vector<64x64xf32>, vector<4x64xf32> -> vector<4x64xf32>
    %c2_132 = arith.constant 2 : index
    %c0_133 = arith.constant 0 : index
    %c0_134 = arith.constant 0 : index
    %177 = vector.load %arg14[%c2_132, %c0_133, %c0_134] : memref<9x4x4xf32, #tpu.memory_space<vmem>>, vector<1x4x4xf32>
    %178 = vector.shape_cast %177 : vector<1x4x4xf32> to vector<4x4xf32>
    %cst_135 = arith.constant dense<0.000000e+00> : vector<4x64xf32>
    %179 = tpu.matmul %178, %176, %cst_135 {dimension_numbers = #tpu.dot_dimension_numbers<[1], [0], [0], [1], [0, 0, 1, 1], [], []>} : vector<4x4xf32>, vector<4x64xf32>, vector<4x64xf32> -> vector<4x64xf32>
    %180 = arith.addf %173, %179 : vector<4x64xf32>
    %c3_136 = arith.constant 3 : index
    %c0_137 = arith.constant 0 : index
    %c0_138 = arith.constant 0 : index
    %181 = vector.load %arg2[%c3_136, %c0_137, %c0_138] : memref<9x64x64xf32, #tpu.memory_space<vmem>>, vector<1x64x64xf32>
    %182 = vector.shape_cast %181 : vector<1x64x64xf32> to vector<64x64xf32>
    %cst_139 = arith.constant dense<0.000000e+00> : vector<4x64xf32>
    %183 = tpu.matmul %157, %182, %cst_139 {dimension_numbers = #tpu.dot_dimension_numbers<[1], [0], [0], [1], [0, 0, 1, 1], [], []>} : vector<4x64xf32>, vector<64x64xf32>, vector<4x64xf32> -> vector<4x64xf32>
    %c3_140 = arith.constant 3 : index
    %c0_141 = arith.constant 0 : index
    %c0_142 = arith.constant 0 : index
    %184 = vector.load %arg14[%c3_140, %c0_141, %c0_142] : memref<9x4x4xf32, #tpu.memory_space<vmem>>, vector<1x4x4xf32>
    %185 = vector.shape_cast %184 : vector<1x4x4xf32> to vector<4x4xf32>
    %cst_143 = arith.constant dense<0.000000e+00> : vector<4x64xf32>
    %186 = tpu.matmul %185, %183, %cst_143 {dimension_numbers = #tpu.dot_dimension_numbers<[1], [0], [0], [1], [0, 0, 1, 1], [], []>} : vector<4x4xf32>, vector<4x64xf32>, vector<4x64xf32> -> vector<4x64xf32>
    %187 = arith.addf %180, %186 : vector<4x64xf32>
    %c4_144 = arith.constant 4 : index
    %c0_145 = arith.constant 0 : index
    %c0_146 = arith.constant 0 : index
    %188 = vector.load %arg2[%c4_144, %c0_145, %c0_146] : memref<9x64x64xf32, #tpu.memory_space<vmem>>, vector<1x64x64xf32>
    %189 = vector.shape_cast %188 : vector<1x64x64xf32> to vector<64x64xf32>
    %cst_147 = arith.constant dense<0.000000e+00> : vector<4x64xf32>
    %190 = tpu.matmul %157, %189, %cst_147 {dimension_numbers = #tpu.dot_dimension_numbers<[1], [0], [0], [1], [0, 0, 1, 1], [], []>} : vector<4x64xf32>, vector<64x64xf32>, vector<4x64xf32> -> vector<4x64xf32>
    %c4_148 = arith.constant 4 : index
    %c0_149 = arith.constant 0 : index
    %c0_150 = arith.constant 0 : index
    %191 = vector.load %arg14[%c4_148, %c0_149, %c0_150] : memref<9x4x4xf32, #tpu.memory_space<vmem>>, vector<1x4x4xf32>
    %192 = vector.shape_cast %191 : vector<1x4x4xf32> to vector<4x4xf32>
    %cst_151 = arith.constant dense<0.000000e+00> : vector<4x64xf32>
    %193 = tpu.matmul %192, %190, %cst_151 {dimension_numbers = #tpu.dot_dimension_numbers<[1], [0], [0], [1], [0, 0, 1, 1], [], []>} : vector<4x4xf32>, vector<4x64xf32>, vector<4x64xf32> -> vector<4x64xf32>
    %194 = arith.addf %187, %193 : vector<4x64xf32>
    %c5_152 = arith.constant 5 : index
    %c0_153 = arith.constant 0 : index
    %c0_154 = arith.constant 0 : index
    %195 = vector.load %arg2[%c5_152, %c0_153, %c0_154] : memref<9x64x64xf32, #tpu.memory_space<vmem>>, vector<1x64x64xf32>
    %196 = vector.shape_cast %195 : vector<1x64x64xf32> to vector<64x64xf32>
    %cst_155 = arith.constant dense<0.000000e+00> : vector<4x64xf32>
    %197 = tpu.matmul %157, %196, %cst_155 {dimension_numbers = #tpu.dot_dimension_numbers<[1], [0], [0], [1], [0, 0, 1, 1], [], []>} : vector<4x64xf32>, vector<64x64xf32>, vector<4x64xf32> -> vector<4x64xf32>
    %c5_156 = arith.constant 5 : index
    %c0_157 = arith.constant 0 : index
    %c0_158 = arith.constant 0 : index
    %198 = vector.load %arg14[%c5_156, %c0_157, %c0_158] : memref<9x4x4xf32, #tpu.memory_space<vmem>>, vector<1x4x4xf32>
    %199 = vector.shape_cast %198 : vector<1x4x4xf32> to vector<4x4xf32>
    %cst_159 = arith.constant dense<0.000000e+00> : vector<4x64xf32>
    %200 = tpu.matmul %199, %197, %cst_159 {dimension_numbers = #tpu.dot_dimension_numbers<[1], [0], [0], [1], [0, 0, 1, 1], [], []>} : vector<4x4xf32>, vector<4x64xf32>, vector<4x64xf32> -> vector<4x64xf32>
    %201 = arith.addf %194, %200 : vector<4x64xf32>
    %c6_160 = arith.constant 6 : index
    %c0_161 = arith.constant 0 : index
    %c0_162 = arith.constant 0 : index
    %202 = vector.load %arg2[%c6_160, %c0_161, %c0_162] : memref<9x64x64xf32, #tpu.memory_space<vmem>>, vector<1x64x64xf32>
    %203 = vector.shape_cast %202 : vector<1x64x64xf32> to vector<64x64xf32>
    %cst_163 = arith.constant dense<0.000000e+00> : vector<4x64xf32>
    %204 = tpu.matmul %157, %203, %cst_163 {dimension_numbers = #tpu.dot_dimension_numbers<[1], [0], [0], [1], [0, 0, 1, 1], [], []>} : vector<4x64xf32>, vector<64x64xf32>, vector<4x64xf32> -> vector<4x64xf32>
    %c6_164 = arith.constant 6 : index
    %c0_165 = arith.constant 0 : index
    %c0_166 = arith.constant 0 : index
    %205 = vector.load %arg14[%c6_164, %c0_165, %c0_166] : memref<9x4x4xf32, #tpu.memory_space<vmem>>, vector<1x4x4xf32>
    %206 = vector.shape_cast %205 : vector<1x4x4xf32> to vector<4x4xf32>
    %cst_167 = arith.constant dense<0.000000e+00> : vector<4x64xf32>
    %207 = tpu.matmul %206, %204, %cst_167 {dimension_numbers = #tpu.dot_dimension_numbers<[1], [0], [0], [1], [0, 0, 1, 1], [], []>} : vector<4x4xf32>, vector<4x64xf32>, vector<4x64xf32> -> vector<4x64xf32>
    %208 = arith.addf %201, %207 : vector<4x64xf32>
    %c7_168 = arith.constant 7 : index
    %c0_169 = arith.constant 0 : index
    %c0_170 = arith.constant 0 : index
    %209 = vector.load %arg2[%c7_168, %c0_169, %c0_170] : memref<9x64x64xf32, #tpu.memory_space<vmem>>, vector<1x64x64xf32>
    %210 = vector.shape_cast %209 : vector<1x64x64xf32> to vector<64x64xf32>
    %cst_171 = arith.constant dense<0.000000e+00> : vector<4x64xf32>
    %211 = tpu.matmul %157, %210, %cst_171 {dimension_numbers = #tpu.dot_dimension_numbers<[1], [0], [0], [1], [0, 0, 1, 1], [], []>} : vector<4x64xf32>, vector<64x64xf32>, vector<4x64xf32> -> vector<4x64xf32>
    %c7_172 = arith.constant 7 : index
    %c0_173 = arith.constant 0 : index
    %c0_174 = arith.constant 0 : index
    %212 = vector.load %arg14[%c7_172, %c0_173, %c0_174] : memref<9x4x4xf32, #tpu.memory_space<vmem>>, vector<1x4x4xf32>
    %213 = vector.shape_cast %212 : vector<1x4x4xf32> to vector<4x4xf32>
    %cst_175 = arith.constant dense<0.000000e+00> : vector<4x64xf32>
    %214 = tpu.matmul %213, %211, %cst_175 {dimension_numbers = #tpu.dot_dimension_numbers<[1], [0], [0], [1], [0, 0, 1, 1], [], []>} : vector<4x4xf32>, vector<4x64xf32>, vector<4x64xf32> -> vector<4x64xf32>
    %215 = arith.addf %208, %214 : vector<4x64xf32>
    %c8_176 = arith.constant 8 : index
    %c0_177 = arith.constant 0 : index
    %c0_178 = arith.constant 0 : index
    %216 = vector.load %arg2[%c8_176, %c0_177, %c0_178] : memref<9x64x64xf32, #tpu.memory_space<vmem>>, vector<1x64x64xf32>
    %217 = vector.shape_cast %216 : vector<1x64x64xf32> to vector<64x64xf32>
    %cst_179 = arith.constant dense<0.000000e+00> : vector<4x64xf32>
    %218 = tpu.matmul %157, %217, %cst_179 {dimension_numbers = #tpu.dot_dimension_numbers<[1], [0], [0], [1], [0, 0, 1, 1], [], []>} : vector<4x64xf32>, vector<64x64xf32>, vector<4x64xf32> -> vector<4x64xf32>
    %c8_180 = arith.constant 8 : index
    %c0_181 = arith.constant 0 : index
    %c0_182 = arith.constant 0 : index
    %219 = vector.load %arg14[%c8_180, %c0_181, %c0_182] : memref<9x4x4xf32, #tpu.memory_space<vmem>>, vector<1x4x4xf32>
    %220 = vector.shape_cast %219 : vector<1x4x4xf32> to vector<4x4xf32>
    %cst_183 = arith.constant dense<0.000000e+00> : vector<4x64xf32>
    %221 = tpu.matmul %220, %218, %cst_183 {dimension_numbers = #tpu.dot_dimension_numbers<[1], [0], [0], [1], [0, 0, 1, 1], [], []>} : vector<4x4xf32>, vector<4x64xf32>, vector<4x64xf32> -> vector<4x64xf32>
    %222 = arith.addf %215, %221 : vector<4x64xf32>
    %223 = vector.broadcast %158 : vector<4x1xf32> to vector<4x64xf32>
    %224 = arith.addf %222, %223 : vector<4x64xf32>
    %c0_184 = arith.constant 0 : index
    %c0_185 = arith.constant 0 : index
    %225 = vector.load %arg16[%c0_184, %c0_185] : memref<4x1xf32, #tpu.memory_space<vmem>>, vector<4x1xf32>
    %c0_186 = arith.constant 0 : index
    %c0_187 = arith.constant 0 : index
    %226 = vector.load %arg17[%c0_186, %c0_187] : memref<4x1xf32, #tpu.memory_space<vmem>>, vector<4x1xf32>
    %cst_188 = arith.constant dense<0.000000e+00> : vector<4xf32>
    %227 = vector.multi_reduction <add>, %224, %cst_188 [1] : vector<4x64xf32> to vector<4xf32>
    %228 = vector.shape_cast %227 : vector<4xf32> to vector<4x1xf32>
    %cst_189 = arith.constant dense<0.000000e+00> : vector<1xf32>
    %229 = vector.multi_reduction <add>, %228, %cst_189 [0] : vector<4x1xf32> to vector<1xf32>
    %230 = vector.shape_cast %229 : vector<1xf32> to vector<1x1xf32>
    %cst_190 = arith.constant 2.560000e+02 : f32
    %231 = vector.broadcast %cst_190 : f32 to vector<1x1xf32>
    %232 = arith.divf %230, %231 : vector<1x1xf32>
    %233 = vector.broadcast %232 : vector<1x1xf32> to vector<4x64xf32>
    %234 = arith.subf %224, %233 : vector<4x64xf32>
    %235 = arith.mulf %234, %234 : vector<4x64xf32>
    %cst_191 = arith.constant dense<0.000000e+00> : vector<4xf32>
    %236 = vector.multi_reduction <add>, %235, %cst_191 [1] : vector<4x64xf32> to vector<4xf32>
    %237 = vector.shape_cast %236 : vector<4xf32> to vector<4x1xf32>
    %cst_192 = arith.constant dense<0.000000e+00> : vector<1xf32>
    %238 = vector.multi_reduction <add>, %237, %cst_192 [0] : vector<4x1xf32> to vector<1xf32>
    %239 = vector.shape_cast %238 : vector<1xf32> to vector<1x1xf32>
    %cst_193 = arith.constant 2.560000e+02 : f32
    %240 = vector.broadcast %cst_193 : f32 to vector<1x1xf32>
    %241 = arith.divf %239, %240 : vector<1x1xf32>
    %cst_194 = arith.constant 9.99999974E-6 : f32
    %242 = vector.broadcast %cst_194 : f32 to vector<1x1xf32>
    %243 = arith.addf %241, %242 : vector<1x1xf32>
    %244 = math.rsqrt %243 : vector<1x1xf32>
    %245 = vector.broadcast %244 : vector<1x1xf32> to vector<4x64xf32>
    %246 = arith.mulf %234, %245 : vector<4x64xf32>
    %247 = vector.broadcast %225 : vector<4x1xf32> to vector<4x64xf32>
    %248 = arith.mulf %246, %247 : vector<4x64xf32>
    %249 = vector.broadcast %226 : vector<4x1xf32> to vector<4x64xf32>
    %250 = arith.addf %248, %249 : vector<4x64xf32>
    %cst_195 = arith.constant 0.000000e+00 : f32
    %251 = vector.broadcast %cst_195 : f32 to vector<4x64xf32>
    %252 = arith.maximumf %250, %251 : vector<4x64xf32>
    %c0_196 = arith.constant 0 : index
    %c0_197 = arith.constant 0 : index
    %253 = vector.load %arg18[%c0_196, %c0_197] : memref<8x4xf32, #tpu.memory_space<vmem>>, vector<8x4xf32>
    %c0_198 = arith.constant 0 : index
    %c0_199 = arith.constant 0 : index
    %254 = vector.load %arg19[%c0_198, %c0_199] : memref<8x1xf32, #tpu.memory_space<vmem>>, vector<8x1xf32>
    %cst_200 = arith.constant dense<0.000000e+00> : vector<8x64xf32>
    %255 = tpu.matmul %253, %252, %cst_200 {dimension_numbers = #tpu.dot_dimension_numbers<[1], [0], [0], [1], [0, 0, 1, 1], [], []>} : vector<8x4xf32>, vector<4x64xf32>, vector<8x64xf32> -> vector<8x64xf32>
    %256 = vector.broadcast %254 : vector<8x1xf32> to vector<8x64xf32>
    %257 = arith.addf %255, %256 : vector<8x64xf32>
    %258 = vector.extract_strided_slice %29 {offsets = [0, 0], sizes = [8, 64], strides = [1, 1]} : vector<16x64xf32> to vector<8x64xf32>
    %259 = arith.addf %257, %258 : vector<8x64xf32>
    %c0_201 = arith.constant 0 : index
    %c0_202 = arith.constant 0 : index
    %260 = vector.load %arg3[%c0_201, %c0_202] : memref<64x256xf32, #tpu.memory_space<vmem>>, vector<64x256xf32>
    %cst_203 = arith.constant dense<0.000000e+00> : vector<8x256xf32>
    %261 = tpu.matmul %259, %260, %cst_203 {dimension_numbers = #tpu.dot_dimension_numbers<[1], [0], [0], [1], [0, 0, 1, 1], [], []>} : vector<8x64xf32>, vector<64x256xf32>, vector<8x256xf32> -> vector<8x256xf32>
    %c0_204 = arith.constant 0 : index
    %c0_205 = arith.constant 0 : index
    %c0_206 = arith.constant 0 : index
    %262 = vector.load %arg20[%c0_204, %c0_205, %c0_206] : memref<1x8x256xf32, #tpu.memory_space<vmem>>, vector<1x8x256xf32>
    %263 = vector.shape_cast %262 : vector<1x8x256xf32> to vector<8x256xf32>
    %264 = vector.shape_cast %261 : vector<8x256xf32> to vector<1x8x256xf32>
    tpu.vector_store %arg20[%c0_204, %c0_205, %c0_206], %264 {strides = array<i32>} : memref<1x8x256xf32, #tpu.memory_space<vmem>>, vector<1x8x256xf32>,
    return
  }
  func.func @transform_0(%arg0: i32) -> (i32, i32, i32) {
    %c0_i32 = arith.constant 0 : i32
    %c0_i32_0 = arith.constant 0 : i32
    %c0_i32_1 = arith.constant 0 : i32
    return %arg0, %c0_i32, %c0_i32_0 : i32, i32, i32
  }
  func.func @transform_1(%arg0: i32) -> (i32, i32, i32) {
    %c0_i32 = arith.constant 0 : i32
    %c0_i32_0 = arith.constant 0 : i32
    %c0_i32_1 = arith.constant 0 : i32
    %c0_i32_2 = arith.constant 0 : i32
    return %c0_i32, %c0_i32_0, %c0_i32_1 : i32, i32, i32
  }
  func.func @transform_2(%arg0: i32) -> (i32, i32) {
    %c0_i32 = arith.constant 0 : i32
    %c0_i32_0 = arith.constant 0 : i32
    %c0_i32_1 = arith.constant 0 : i32
    return %c0_i32, %c0_i32_0 : i32, i32
  }
  func.func @transform_3(%arg0: i32) -> (i32, i32) {
    %c0_i32 = arith.constant 0 : i32
    %c0_i32_0 = arith.constant 0 : i32
    %c0_i32_1 = arith.constant 0 : i32
    return %c0_i32, %c0_i32_0 : i32, i32
  }
  func.func @transform_4(%arg0: i32) -> (i32, i32) {
    %c0_i32 = arith.constant 0 : i32
    %c0_i32_0 = arith.constant 0 : i32
    %c0_i32_1 = arith.constant 0 : i32
    return %c0_i32, %c0_i32_0 : i32, i32
  }
  func.func @transform_5(%arg0: i32) -> (i32, i32) {
    %c0_i32 = arith.constant 0 : i32
    %c0_i32_0 = arith.constant 0 : i32
    %c0_i32_1 = arith.constant 0 : i32
    return %c0_i32, %c0_i32_0 : i32, i32
  }
  func.func @transform_6(%arg0: i32) -> (i32, i32) {
    %c0_i32 = arith.constant 0 : i32
    %c0_i32_0 = arith.constant 0 : i32
    %c0_i32_1 = arith.constant 0 : i32
    return %c0_i32, %c0_i32_0 : i32, i32
  }
  func.func @transform_7(%arg0: i32) -> (i32, i32) {
    %c0_i32 = arith.constant 0 : i32
    %c0_i32_0 = arith.constant 0 : i32
    %c0_i32_1 = arith.constant 0 : i32
    return %c0_i32, %c0_i32_0 : i32, i32
  }
  func.func @transform_8(%arg0: i32) -> (i32, i32) {
    %c0_i32 = arith.constant 0 : i32
    %c0_i32_0 = arith.constant 0 : i32
    %c0_i32_1 = arith.constant 0 : i32
    return %c0_i32, %c0_i32_0 : i32, i32
  }
  func.func @transform_9(%arg0: i32) -> (i32, i32, i32) {
    %c0_i32 = arith.constant 0 : i32
    %c0_i32_0 = arith.constant 0 : i32
    %c0_i32_1 = arith.constant 0 : i32
    %c0_i32_2 = arith.constant 0 : i32
    return %c0_i32, %c0_i32_0, %c0_i32_1 : i32, i32, i32
  }
  func.func @transform_10(%arg0: i32) -> (i32, i32) {
    %c0_i32 = arith.constant 0 : i32
    %c0_i32_0 = arith.constant 0 : i32
    %c0_i32_1 = arith.constant 0 : i32
    return %c0_i32, %c0_i32_0 : i32, i32
  }
  func.func @transform_11(%arg0: i32) -> (i32, i32) {
    %c0_i32 = arith.constant 0 : i32
    %c0_i32_0 = arith.constant 0 : i32
    %c0_i32_1 = arith.constant 0 : i32
    return %c0_i32, %c0_i32_0 : i32, i32
  }
  func.func @transform_12(%arg0: i32) -> (i32, i32) {
    %c0_i32 = arith.constant 0 : i32
    %c0_i32_0 = arith.constant 0 : i32
    %c0_i32_1 = arith.constant 0 : i32
    return %c0_i32, %c0_i32_0 : i32, i32
  }
  func.func @transform_13(%arg0: i32) -> (i32, i32, i32) {
    %c0_i32 = arith.constant 0 : i32
    %c0_i32_0 = arith.constant 0 : i32
    %c0_i32_1 = arith.constant 0 : i32
    %c0_i32_2 = arith.constant 0 : i32
    return %c0_i32, %c0_i32_0, %c0_i32_1 : i32, i32, i32
  }
  func.func @transform_14(%arg0: i32) -> (i32, i32) {
    %c0_i32 = arith.constant 0 : i32
    %c0_i32_0 = arith.constant 0 : i32
    %c0_i32_1 = arith.constant 0 : i32
    return %c0_i32, %c0_i32_0 : i32, i32
  }
  func.func @transform_15(%arg0: i32) -> (i32, i32) {
    %c0_i32 = arith.constant 0 : i32
    %c0_i32_0 = arith.constant 0 : i32
    %c0_i32_1 = arith.constant 0 : i32
    return %c0_i32, %c0_i32_0 : i32, i32
  }
  func.func @transform_16(%arg0: i32) -> (i32, i32) {
    %c0_i32 = arith.constant 0 : i32
    %c0_i32_0 = arith.constant 0 : i32
    %c0_i32_1 = arith.constant 0 : i32
    return %c0_i32, %c0_i32_0 : i32, i32
  }
  func.func @transform_17(%arg0: i32) -> (i32, i32) {
    %c0_i32 = arith.constant 0 : i32
    %c0_i32_0 = arith.constant 0 : i32
    %c0_i32_1 = arith.constant 0 : i32
    return %c0_i32, %c0_i32_0 : i32, i32
  }
  func.func @transform_18(%arg0: i32) -> (i32, i32) {
    %c0_i32 = arith.constant 0 : i32
    %c0_i32_0 = arith.constant 0 : i32
    %c0_i32_1 = arith.constant 0 : i32
    return %c0_i32, %c0_i32_0 : i32, i32
  }
  func.func @transform_19(%arg0: i32) -> (i32, i32, i32) {
    %c0_i32 = arith.constant 0 : i32
    %c0_i32_0 = arith.constant 0 : i32
    %c0_i32_1 = arith.constant 0 : i32
    return %arg0, %c0_i32, %c0_i32_0 : i32, i32, i32
  }
}

module attributes {stable_mosaic.version = 11 : i64} {
  func.func @kernel(%arg0: i32, %arg1: memref<1x8x256xf32, #tpu.memory_space<vmem>>, %arg2: memref<9x256x256xf32, #tpu.memory_space<vmem>>, %arg3: memref<256x64xf32, #tpu.memory_space<vmem>>, %arg4: memref<8x1xf32, #tpu.memory_space<vmem>>, %arg5: memref<8x1xf32, #tpu.memory_space<vmem>>, %arg6: memref<2x8xf32, #tpu.memory_space<vmem>>, %arg7: memref<2x1xf32, #tpu.memory_space<vmem>>, %arg8: memref<2x1xf32, #tpu.memory_space<vmem>>, %arg9: memref<2x1xf32, #tpu.memory_space<vmem>>, %arg10: memref<9x2x2xf32, #tpu.memory_space<vmem>>, %arg11: memref<2x1xf32, #tpu.memory_space<vmem>>, %arg12: memref<2x1xf32, #tpu.memory_space<vmem>>, %arg13: memref<2x1xf32, #tpu.memory_space<vmem>>, %arg14: memref<9x2x2xf32, #tpu.memory_space<vmem>>, %arg15: memref<2x1xf32, #tpu.memory_space<vmem>>, %arg16: memref<2x1xf32, #tpu.memory_space<vmem>>, %arg17: memref<2x1xf32, #tpu.memory_space<vmem>>, %arg18: memref<16x2xf32, #tpu.memory_space<vmem>>, %arg19: memref<16x1xf32, #tpu.memory_space<vmem>>, %arg20: memref<8x8xf32, #tpu.memory_space<vmem>>, %arg21: memref<8x1xf32, #tpu.memory_space<vmem>>, %arg22: memref<1x16x64xf32, #tpu.memory_space<vmem>>) attributes {dimension_semantics = [#tpu.dimension_semantics<parallel>], iteration_bounds = array<i64: 2>, scalar_prefetch = 0 : i64, scratch_operands = 0 : i64, tpu.core_type = #tpu.core_type<tc>, window_params = [{transform_indices = @transform_0, window_bounds = array<i64: 1, 8, 256>}, {pipeline_mode = #tpu.pipeline_mode<synchronous>, transform_indices = @transform_1, window_bounds = array<i64: 9, 256, 256>}, {pipeline_mode = #tpu.pipeline_mode<synchronous>, transform_indices = @transform_2, window_bounds = array<i64: 256, 64>}, {pipeline_mode = #tpu.pipeline_mode<synchronous>, transform_indices = @transform_3, window_bounds = array<i64: 8, 1>}, {pipeline_mode = #tpu.pipeline_mode<synchronous>, transform_indices = @transform_4, window_bounds = array<i64: 8, 1>}, {pipeline_mode = #tpu.pipeline_mode<synchronous>, transform_indices = @transform_5, window_bounds = array<i64: 2, 8>}, {pipeline_mode = #tpu.pipeline_mode<synchronous>, transform_indices = @transform_6, window_bounds = array<i64: 2, 1>}, {pipeline_mode = #tpu.pipeline_mode<synchronous>, transform_indices = @transform_7, window_bounds = array<i64: 2, 1>}, {pipeline_mode = #tpu.pipeline_mode<synchronous>, transform_indices = @transform_8, window_bounds = array<i64: 2, 1>}, {pipeline_mode = #tpu.pipeline_mode<synchronous>, transform_indices = @transform_9, window_bounds = array<i64: 9, 2, 2>}, {pipeline_mode = #tpu.pipeline_mode<synchronous>, transform_indices = @transform_10, window_bounds = array<i64: 2, 1>}, {pipeline_mode = #tpu.pipeline_mode<synchronous>, transform_indices = @transform_11, window_bounds = array<i64: 2, 1>}, {pipeline_mode = #tpu.pipeline_mode<synchronous>, transform_indices = @transform_12, window_bounds = array<i64: 2, 1>}, {pipeline_mode = #tpu.pipeline_mode<synchronous>, transform_indices = @transform_13, window_bounds = array<i64: 9, 2, 2>}, {pipeline_mode = #tpu.pipeline_mode<synchronous>, transform_indices = @transform_14, window_bounds = array<i64: 2, 1>}, {pipeline_mode = #tpu.pipeline_mode<synchronous>, transform_indices = @transform_15, window_bounds = array<i64: 2, 1>}, {pipeline_mode = #tpu.pipeline_mode<synchronous>, transform_indices = @transform_16, window_bounds = array<i64: 2, 1>}, {pipeline_mode = #tpu.pipeline_mode<synchronous>, transform_indices = @transform_17, window_bounds = array<i64: 16, 2>}, {pipeline_mode = #tpu.pipeline_mode<synchronous>, transform_indices = @transform_18, window_bounds = array<i64: 16, 1>}, {pipeline_mode = #tpu.pipeline_mode<synchronous>, transform_indices = @transform_19, window_bounds = array<i64: 8, 8>}, {pipeline_mode = #tpu.pipeline_mode<synchronous>, transform_indices = @transform_20, window_bounds = array<i64: 8, 1>}, {transform_indices = @transform_21, window_bounds = array<i64: 1, 16, 64>}]} {
    %c0 = arith.constant 0 : index
    %c0_0 = arith.constant 0 : index
    %c0_1 = arith.constant 0 : index
    %0 = vector.load %arg1[%c0, %c0_0, %c0_1] : memref<1x8x256xf32, #tpu.memory_space<vmem>>, vector<1x8x256xf32>
    %1 = vector.shape_cast %0 : vector<1x8x256xf32> to vector<8x256xf32>
    %c0_2 = arith.constant 0 : index
    %c0_3 = arith.constant 0 : index
    %2 = vector.load %arg4[%c0_2, %c0_3] : memref<8x1xf32, #tpu.memory_space<vmem>>, vector<8x1xf32>
    %c0_4 = arith.constant 0 : index
    %c0_5 = arith.constant 0 : index
    %3 = vector.load %arg5[%c0_4, %c0_5] : memref<8x1xf32, #tpu.memory_space<vmem>>, vector<8x1xf32>
    %cst = arith.constant dense<0.000000e+00> : vector<8xf32>
    %4 = vector.multi_reduction <add>, %1, %cst [1] : vector<8x256xf32> to vector<8xf32>
    %5 = vector.shape_cast %4 : vector<8xf32> to vector<8x1xf32>
    %cst_6 = arith.constant dense<0.000000e+00> : vector<1xf32>
    %6 = vector.multi_reduction <add>, %5, %cst_6 [0] : vector<8x1xf32> to vector<1xf32>
    %7 = vector.shape_cast %6 : vector<1xf32> to vector<1x1xf32>
    %cst_7 = arith.constant 2.048000e+03 : f32
    %8 = vector.broadcast %cst_7 : f32 to vector<1x1xf32>
    %9 = arith.divf %7, %8 : vector<1x1xf32>
    %10 = vector.broadcast %9 : vector<1x1xf32> to vector<8x256xf32>
    %11 = arith.subf %1, %10 : vector<8x256xf32>
    %12 = arith.mulf %11, %11 : vector<8x256xf32>
    %cst_8 = arith.constant dense<0.000000e+00> : vector<8xf32>
    %13 = vector.multi_reduction <add>, %12, %cst_8 [1] : vector<8x256xf32> to vector<8xf32>
    %14 = vector.shape_cast %13 : vector<8xf32> to vector<8x1xf32>
    %cst_9 = arith.constant dense<0.000000e+00> : vector<1xf32>
    %15 = vector.multi_reduction <add>, %14, %cst_9 [0] : vector<8x1xf32> to vector<1xf32>
    %16 = vector.shape_cast %15 : vector<1xf32> to vector<1x1xf32>
    %cst_10 = arith.constant 2.048000e+03 : f32
    %17 = vector.broadcast %cst_10 : f32 to vector<1x1xf32>
    %18 = arith.divf %16, %17 : vector<1x1xf32>
    %cst_11 = arith.constant 9.99999974E-6 : f32
    %19 = vector.broadcast %cst_11 : f32 to vector<1x1xf32>
    %20 = arith.addf %18, %19 : vector<1x1xf32>
    %21 = math.rsqrt %20 : vector<1x1xf32>
    %22 = vector.broadcast %21 : vector<1x1xf32> to vector<8x256xf32>
    %23 = arith.mulf %11, %22 : vector<8x256xf32>
    %24 = vector.broadcast %2 : vector<8x1xf32> to vector<8x256xf32>
    %25 = arith.mulf %23, %24 : vector<8x256xf32>
    %26 = vector.broadcast %3 : vector<8x1xf32> to vector<8x256xf32>
    %27 = arith.addf %25, %26 : vector<8x256xf32>
    %cst_12 = arith.constant 0.000000e+00 : f32
    %28 = vector.broadcast %cst_12 : f32 to vector<8x256xf32>
    %29 = arith.maximumf %27, %28 : vector<8x256xf32>
    %c0_13 = arith.constant 0 : index
    %c0_14 = arith.constant 0 : index
    %30 = vector.load %arg6[%c0_13, %c0_14] : memref<2x8xf32, #tpu.memory_space<vmem>>, vector<2x8xf32>
    %c0_15 = arith.constant 0 : index
    %c0_16 = arith.constant 0 : index
    %31 = vector.load %arg7[%c0_15, %c0_16] : memref<2x1xf32, #tpu.memory_space<vmem>>, vector<2x1xf32>
    %cst_17 = arith.constant dense<0.000000e+00> : vector<2x256xf32>
    %32 = tpu.matmul %30, %29, %cst_17 {dimension_numbers = #tpu.dot_dimension_numbers<[1], [0], [0], [1], [0, 0, 1, 1], [], []>} : vector<2x8xf32>, vector<8x256xf32>, vector<2x256xf32> -> vector<2x256xf32>
    %33 = vector.broadcast %31 : vector<2x1xf32> to vector<2x256xf32>
    %34 = arith.addf %32, %33 : vector<2x256xf32>
    %c0_18 = arith.constant 0 : index
    %c0_19 = arith.constant 0 : index
    %35 = vector.load %arg8[%c0_18, %c0_19] : memref<2x1xf32, #tpu.memory_space<vmem>>, vector<2x1xf32>
    %c0_20 = arith.constant 0 : index
    %c0_21 = arith.constant 0 : index
    %36 = vector.load %arg9[%c0_20, %c0_21] : memref<2x1xf32, #tpu.memory_space<vmem>>, vector<2x1xf32>
    %cst_22 = arith.constant dense<0.000000e+00> : vector<2xf32>
    %37 = vector.multi_reduction <add>, %34, %cst_22 [1] : vector<2x256xf32> to vector<2xf32>
    %38 = vector.shape_cast %37 : vector<2xf32> to vector<2x1xf32>
    %cst_23 = arith.constant dense<0.000000e+00> : vector<1xf32>
    %39 = vector.multi_reduction <add>, %38, %cst_23 [0] : vector<2x1xf32> to vector<1xf32>
    %40 = vector.shape_cast %39 : vector<1xf32> to vector<1x1xf32>
    %cst_24 = arith.constant 5.120000e+02 : f32
    %41 = vector.broadcast %cst_24 : f32 to vector<1x1xf32>
    %42 = arith.divf %40, %41 : vector<1x1xf32>
    %43 = vector.broadcast %42 : vector<1x1xf32> to vector<2x256xf32>
    %44 = arith.subf %34, %43 : vector<2x256xf32>
    %45 = arith.mulf %44, %44 : vector<2x256xf32>
    %cst_25 = arith.constant dense<0.000000e+00> : vector<2xf32>
    %46 = vector.multi_reduction <add>, %45, %cst_25 [1] : vector<2x256xf32> to vector<2xf32>
    %47 = vector.shape_cast %46 : vector<2xf32> to vector<2x1xf32>
    %cst_26 = arith.constant dense<0.000000e+00> : vector<1xf32>
    %48 = vector.multi_reduction <add>, %47, %cst_26 [0] : vector<2x1xf32> to vector<1xf32>
    %49 = vector.shape_cast %48 : vector<1xf32> to vector<1x1xf32>
    %cst_27 = arith.constant 5.120000e+02 : f32
    %50 = vector.broadcast %cst_27 : f32 to vector<1x1xf32>
    %51 = arith.divf %49, %50 : vector<1x1xf32>
    %cst_28 = arith.constant 9.99999974E-6 : f32
    %52 = vector.broadcast %cst_28 : f32 to vector<1x1xf32>
    %53 = arith.addf %51, %52 : vector<1x1xf32>
    %54 = math.rsqrt %53 : vector<1x1xf32>
    %55 = vector.broadcast %54 : vector<1x1xf32> to vector<2x256xf32>
    %56 = arith.mulf %44, %55 : vector<2x256xf32>
    %57 = vector.broadcast %35 : vector<2x1xf32> to vector<2x256xf32>
    %58 = arith.mulf %56, %57 : vector<2x256xf32>
    %59 = vector.broadcast %36 : vector<2x1xf32> to vector<2x256xf32>
    %60 = arith.addf %58, %59 : vector<2x256xf32>
    %cst_29 = arith.constant 0.000000e+00 : f32
    %61 = vector.broadcast %cst_29 : f32 to vector<2x256xf32>
    %62 = arith.maximumf %60, %61 : vector<2x256xf32>
    %c0_30 = arith.constant 0 : index
    %c0_31 = arith.constant 0 : index
    %63 = vector.load %arg11[%c0_30, %c0_31] : memref<2x1xf32, #tpu.memory_space<vmem>>, vector<2x1xf32>
    %cst_32 = arith.constant 0.000000e+00 : f32
    %64 = vector.broadcast %cst_32 : f32 to vector<2x256xf32>
    %c0_33 = arith.constant 0 : index
    %c0_34 = arith.constant 0 : index
    %c0_35 = arith.constant 0 : index
    %65 = vector.load %arg2[%c0_33, %c0_34, %c0_35] : memref<9x256x256xf32, #tpu.memory_space<vmem>>, vector<1x256x256xf32>
    %66 = vector.shape_cast %65 : vector<1x256x256xf32> to vector<256x256xf32>
    %cst_36 = arith.constant dense<0.000000e+00> : vector<2x256xf32>
    %67 = tpu.matmul %62, %66, %cst_36 {dimension_numbers = #tpu.dot_dimension_numbers<[1], [0], [0], [1], [0, 0, 1, 1], [], []>} : vector<2x256xf32>, vector<256x256xf32>, vector<2x256xf32> -> vector<2x256xf32>
    %c0_37 = arith.constant 0 : index
    %c0_38 = arith.constant 0 : index
    %c0_39 = arith.constant 0 : index
    %68 = vector.load %arg10[%c0_37, %c0_38, %c0_39] : memref<9x2x2xf32, #tpu.memory_space<vmem>>, vector<1x2x2xf32>
    %69 = vector.shape_cast %68 : vector<1x2x2xf32> to vector<2x2xf32>
    %cst_40 = arith.constant dense<0.000000e+00> : vector<2x256xf32>
    %70 = tpu.matmul %69, %67, %cst_40 {dimension_numbers = #tpu.dot_dimension_numbers<[1], [0], [0], [1], [0, 0, 1, 1], [], []>} : vector<2x2xf32>, vector<2x256xf32>, vector<2x256xf32> -> vector<2x256xf32>
    %71 = arith.addf %64, %70 : vector<2x256xf32>
    %c1 = arith.constant 1 : index
    %c0_41 = arith.constant 0 : index
    %c0_42 = arith.constant 0 : index
    %72 = vector.load %arg2[%c1, %c0_41, %c0_42] : memref<9x256x256xf32, #tpu.memory_space<vmem>>, vector<1x256x256xf32>
    %73 = vector.shape_cast %72 : vector<1x256x256xf32> to vector<256x256xf32>
    %cst_43 = arith.constant dense<0.000000e+00> : vector<2x256xf32>
    %74 = tpu.matmul %62, %73, %cst_43 {dimension_numbers = #tpu.dot_dimension_numbers<[1], [0], [0], [1], [0, 0, 1, 1], [], []>} : vector<2x256xf32>, vector<256x256xf32>, vector<2x256xf32> -> vector<2x256xf32>
    %c1_44 = arith.constant 1 : index
    %c0_45 = arith.constant 0 : index
    %c0_46 = arith.constant 0 : index
    %75 = vector.load %arg10[%c1_44, %c0_45, %c0_46] : memref<9x2x2xf32, #tpu.memory_space<vmem>>, vector<1x2x2xf32>
    %76 = vector.shape_cast %75 : vector<1x2x2xf32> to vector<2x2xf32>
    %cst_47 = arith.constant dense<0.000000e+00> : vector<2x256xf32>
    %77 = tpu.matmul %76, %74, %cst_47 {dimension_numbers = #tpu.dot_dimension_numbers<[1], [0], [0], [1], [0, 0, 1, 1], [], []>} : vector<2x2xf32>, vector<2x256xf32>, vector<2x256xf32> -> vector<2x256xf32>
    %78 = arith.addf %71, %77 : vector<2x256xf32>
    %c2 = arith.constant 2 : index
    %c0_48 = arith.constant 0 : index
    %c0_49 = arith.constant 0 : index
    %79 = vector.load %arg2[%c2, %c0_48, %c0_49] : memref<9x256x256xf32, #tpu.memory_space<vmem>>, vector<1x256x256xf32>
    %80 = vector.shape_cast %79 : vector<1x256x256xf32> to vector<256x256xf32>
    %cst_50 = arith.constant dense<0.000000e+00> : vector<2x256xf32>
    %81 = tpu.matmul %62, %80, %cst_50 {dimension_numbers = #tpu.dot_dimension_numbers<[1], [0], [0], [1], [0, 0, 1, 1], [], []>} : vector<2x256xf32>, vector<256x256xf32>, vector<2x256xf32> -> vector<2x256xf32>
    %c2_51 = arith.constant 2 : index
    %c0_52 = arith.constant 0 : index
    %c0_53 = arith.constant 0 : index
    %82 = vector.load %arg10[%c2_51, %c0_52, %c0_53] : memref<9x2x2xf32, #tpu.memory_space<vmem>>, vector<1x2x2xf32>
    %83 = vector.shape_cast %82 : vector<1x2x2xf32> to vector<2x2xf32>
    %cst_54 = arith.constant dense<0.000000e+00> : vector<2x256xf32>
    %84 = tpu.matmul %83, %81, %cst_54 {dimension_numbers = #tpu.dot_dimension_numbers<[1], [0], [0], [1], [0, 0, 1, 1], [], []>} : vector<2x2xf32>, vector<2x256xf32>, vector<2x256xf32> -> vector<2x256xf32>
    %85 = arith.addf %78, %84 : vector<2x256xf32>
    %c3 = arith.constant 3 : index
    %c0_55 = arith.constant 0 : index
    %c0_56 = arith.constant 0 : index
    %86 = vector.load %arg2[%c3, %c0_55, %c0_56] : memref<9x256x256xf32, #tpu.memory_space<vmem>>, vector<1x256x256xf32>
    %87 = vector.shape_cast %86 : vector<1x256x256xf32> to vector<256x256xf32>
    %cst_57 = arith.constant dense<0.000000e+00> : vector<2x256xf32>
    %88 = tpu.matmul %62, %87, %cst_57 {dimension_numbers = #tpu.dot_dimension_numbers<[1], [0], [0], [1], [0, 0, 1, 1], [], []>} : vector<2x256xf32>, vector<256x256xf32>, vector<2x256xf32> -> vector<2x256xf32>
    %c3_58 = arith.constant 3 : index
    %c0_59 = arith.constant 0 : index
    %c0_60 = arith.constant 0 : index
    %89 = vector.load %arg10[%c3_58, %c0_59, %c0_60] : memref<9x2x2xf32, #tpu.memory_space<vmem>>, vector<1x2x2xf32>
    %90 = vector.shape_cast %89 : vector<1x2x2xf32> to vector<2x2xf32>
    %cst_61 = arith.constant dense<0.000000e+00> : vector<2x256xf32>
    %91 = tpu.matmul %90, %88, %cst_61 {dimension_numbers = #tpu.dot_dimension_numbers<[1], [0], [0], [1], [0, 0, 1, 1], [], []>} : vector<2x2xf32>, vector<2x256xf32>, vector<2x256xf32> -> vector<2x256xf32>
    %92 = arith.addf %85, %91 : vector<2x256xf32>
    %c4 = arith.constant 4 : index
    %c0_62 = arith.constant 0 : index
    %c0_63 = arith.constant 0 : index
    %93 = vector.load %arg2[%c4, %c0_62, %c0_63] : memref<9x256x256xf32, #tpu.memory_space<vmem>>, vector<1x256x256xf32>
    %94 = vector.shape_cast %93 : vector<1x256x256xf32> to vector<256x256xf32>
    %cst_64 = arith.constant dense<0.000000e+00> : vector<2x256xf32>
    %95 = tpu.matmul %62, %94, %cst_64 {dimension_numbers = #tpu.dot_dimension_numbers<[1], [0], [0], [1], [0, 0, 1, 1], [], []>} : vector<2x256xf32>, vector<256x256xf32>, vector<2x256xf32> -> vector<2x256xf32>
    %c4_65 = arith.constant 4 : index
    %c0_66 = arith.constant 0 : index
    %c0_67 = arith.constant 0 : index
    %96 = vector.load %arg10[%c4_65, %c0_66, %c0_67] : memref<9x2x2xf32, #tpu.memory_space<vmem>>, vector<1x2x2xf32>
    %97 = vector.shape_cast %96 : vector<1x2x2xf32> to vector<2x2xf32>
    %cst_68 = arith.constant dense<0.000000e+00> : vector<2x256xf32>
    %98 = tpu.matmul %97, %95, %cst_68 {dimension_numbers = #tpu.dot_dimension_numbers<[1], [0], [0], [1], [0, 0, 1, 1], [], []>} : vector<2x2xf32>, vector<2x256xf32>, vector<2x256xf32> -> vector<2x256xf32>
    %99 = arith.addf %92, %98 : vector<2x256xf32>
    %c5 = arith.constant 5 : index
    %c0_69 = arith.constant 0 : index
    %c0_70 = arith.constant 0 : index
    %100 = vector.load %arg2[%c5, %c0_69, %c0_70] : memref<9x256x256xf32, #tpu.memory_space<vmem>>, vector<1x256x256xf32>
    %101 = vector.shape_cast %100 : vector<1x256x256xf32> to vector<256x256xf32>
    %cst_71 = arith.constant dense<0.000000e+00> : vector<2x256xf32>
    %102 = tpu.matmul %62, %101, %cst_71 {dimension_numbers = #tpu.dot_dimension_numbers<[1], [0], [0], [1], [0, 0, 1, 1], [], []>} : vector<2x256xf32>, vector<256x256xf32>, vector<2x256xf32> -> vector<2x256xf32>
    %c5_72 = arith.constant 5 : index
    %c0_73 = arith.constant 0 : index
    %c0_74 = arith.constant 0 : index
    %103 = vector.load %arg10[%c5_72, %c0_73, %c0_74] : memref<9x2x2xf32, #tpu.memory_space<vmem>>, vector<1x2x2xf32>
    %104 = vector.shape_cast %103 : vector<1x2x2xf32> to vector<2x2xf32>
    %cst_75 = arith.constant dense<0.000000e+00> : vector<2x256xf32>
    %105 = tpu.matmul %104, %102, %cst_75 {dimension_numbers = #tpu.dot_dimension_numbers<[1], [0], [0], [1], [0, 0, 1, 1], [], []>} : vector<2x2xf32>, vector<2x256xf32>, vector<2x256xf32> -> vector<2x256xf32>
    %106 = arith.addf %99, %105 : vector<2x256xf32>
    %c6 = arith.constant 6 : index
    %c0_76 = arith.constant 0 : index
    %c0_77 = arith.constant 0 : index
    %107 = vector.load %arg2[%c6, %c0_76, %c0_77] : memref<9x256x256xf32, #tpu.memory_space<vmem>>, vector<1x256x256xf32>
    %108 = vector.shape_cast %107 : vector<1x256x256xf32> to vector<256x256xf32>
    %cst_78 = arith.constant dense<0.000000e+00> : vector<2x256xf32>
    %109 = tpu.matmul %62, %108, %cst_78 {dimension_numbers = #tpu.dot_dimension_numbers<[1], [0], [0], [1], [0, 0, 1, 1], [], []>} : vector<2x256xf32>, vector<256x256xf32>, vector<2x256xf32> -> vector<2x256xf32>
    %c6_79 = arith.constant 6 : index
    %c0_80 = arith.constant 0 : index
    %c0_81 = arith.constant 0 : index
    %110 = vector.load %arg10[%c6_79, %c0_80, %c0_81] : memref<9x2x2xf32, #tpu.memory_space<vmem>>, vector<1x2x2xf32>
    %111 = vector.shape_cast %110 : vector<1x2x2xf32> to vector<2x2xf32>
    %cst_82 = arith.constant dense<0.000000e+00> : vector<2x256xf32>
    %112 = tpu.matmul %111, %109, %cst_82 {dimension_numbers = #tpu.dot_dimension_numbers<[1], [0], [0], [1], [0, 0, 1, 1], [], []>} : vector<2x2xf32>, vector<2x256xf32>, vector<2x256xf32> -> vector<2x256xf32>
    %113 = arith.addf %106, %112 : vector<2x256xf32>
    %c7 = arith.constant 7 : index
    %c0_83 = arith.constant 0 : index
    %c0_84 = arith.constant 0 : index
    %114 = vector.load %arg2[%c7, %c0_83, %c0_84] : memref<9x256x256xf32, #tpu.memory_space<vmem>>, vector<1x256x256xf32>
    %115 = vector.shape_cast %114 : vector<1x256x256xf32> to vector<256x256xf32>
    %cst_85 = arith.constant dense<0.000000e+00> : vector<2x256xf32>
    %116 = tpu.matmul %62, %115, %cst_85 {dimension_numbers = #tpu.dot_dimension_numbers<[1], [0], [0], [1], [0, 0, 1, 1], [], []>} : vector<2x256xf32>, vector<256x256xf32>, vector<2x256xf32> -> vector<2x256xf32>
    %c7_86 = arith.constant 7 : index
    %c0_87 = arith.constant 0 : index
    %c0_88 = arith.constant 0 : index
    %117 = vector.load %arg10[%c7_86, %c0_87, %c0_88] : memref<9x2x2xf32, #tpu.memory_space<vmem>>, vector<1x2x2xf32>
    %118 = vector.shape_cast %117 : vector<1x2x2xf32> to vector<2x2xf32>
    %cst_89 = arith.constant dense<0.000000e+00> : vector<2x256xf32>
    %119 = tpu.matmul %118, %116, %cst_89 {dimension_numbers = #tpu.dot_dimension_numbers<[1], [0], [0], [1], [0, 0, 1, 1], [], []>} : vector<2x2xf32>, vector<2x256xf32>, vector<2x256xf32> -> vector<2x256xf32>
    %120 = arith.addf %113, %119 : vector<2x256xf32>
    %c8 = arith.constant 8 : index
    %c0_90 = arith.constant 0 : index
    %c0_91 = arith.constant 0 : index
    %121 = vector.load %arg2[%c8, %c0_90, %c0_91] : memref<9x256x256xf32, #tpu.memory_space<vmem>>, vector<1x256x256xf32>
    %122 = vector.shape_cast %121 : vector<1x256x256xf32> to vector<256x256xf32>
    %cst_92 = arith.constant dense<0.000000e+00> : vector<2x256xf32>
    %123 = tpu.matmul %62, %122, %cst_92 {dimension_numbers = #tpu.dot_dimension_numbers<[1], [0], [0], [1], [0, 0, 1, 1], [], []>} : vector<2x256xf32>, vector<256x256xf32>, vector<2x256xf32> -> vector<2x256xf32>
    %c8_93 = arith.constant 8 : index
    %c0_94 = arith.constant 0 : index
    %c0_95 = arith.constant 0 : index
    %124 = vector.load %arg10[%c8_93, %c0_94, %c0_95] : memref<9x2x2xf32, #tpu.memory_space<vmem>>, vector<1x2x2xf32>
    %125 = vector.shape_cast %124 : vector<1x2x2xf32> to vector<2x2xf32>
    %cst_96 = arith.constant dense<0.000000e+00> : vector<2x256xf32>
    %126 = tpu.matmul %125, %123, %cst_96 {dimension_numbers = #tpu.dot_dimension_numbers<[1], [0], [0], [1], [0, 0, 1, 1], [], []>} : vector<2x2xf32>, vector<2x256xf32>, vector<2x256xf32> -> vector<2x256xf32>
    %127 = arith.addf %120, %126 : vector<2x256xf32>
    %128 = vector.broadcast %63 : vector<2x1xf32> to vector<2x256xf32>
    %129 = arith.addf %127, %128 : vector<2x256xf32>
    %c0_97 = arith.constant 0 : index
    %c0_98 = arith.constant 0 : index
    %130 = vector.load %arg12[%c0_97, %c0_98] : memref<2x1xf32, #tpu.memory_space<vmem>>, vector<2x1xf32>
    %c0_99 = arith.constant 0 : index
    %c0_100 = arith.constant 0 : index
    %131 = vector.load %arg13[%c0_99, %c0_100] : memref<2x1xf32, #tpu.memory_space<vmem>>, vector<2x1xf32>
    %cst_101 = arith.constant dense<0.000000e+00> : vector<2xf32>
    %132 = vector.multi_reduction <add>, %129, %cst_101 [1] : vector<2x256xf32> to vector<2xf32>
    %133 = vector.shape_cast %132 : vector<2xf32> to vector<2x1xf32>
    %cst_102 = arith.constant dense<0.000000e+00> : vector<1xf32>
    %134 = vector.multi_reduction <add>, %133, %cst_102 [0] : vector<2x1xf32> to vector<1xf32>
    %135 = vector.shape_cast %134 : vector<1xf32> to vector<1x1xf32>
    %cst_103 = arith.constant 5.120000e+02 : f32
    %136 = vector.broadcast %cst_103 : f32 to vector<1x1xf32>
    %137 = arith.divf %135, %136 : vector<1x1xf32>
    %138 = vector.broadcast %137 : vector<1x1xf32> to vector<2x256xf32>
    %139 = arith.subf %129, %138 : vector<2x256xf32>
    %140 = arith.mulf %139, %139 : vector<2x256xf32>
    %cst_104 = arith.constant dense<0.000000e+00> : vector<2xf32>
    %141 = vector.multi_reduction <add>, %140, %cst_104 [1] : vector<2x256xf32> to vector<2xf32>
    %142 = vector.shape_cast %141 : vector<2xf32> to vector<2x1xf32>
    %cst_105 = arith.constant dense<0.000000e+00> : vector<1xf32>
    %143 = vector.multi_reduction <add>, %142, %cst_105 [0] : vector<2x1xf32> to vector<1xf32>
    %144 = vector.shape_cast %143 : vector<1xf32> to vector<1x1xf32>
    %cst_106 = arith.constant 5.120000e+02 : f32
    %145 = vector.broadcast %cst_106 : f32 to vector<1x1xf32>
    %146 = arith.divf %144, %145 : vector<1x1xf32>
    %cst_107 = arith.constant 9.99999974E-6 : f32
    %147 = vector.broadcast %cst_107 : f32 to vector<1x1xf32>
    %148 = arith.addf %146, %147 : vector<1x1xf32>
    %149 = math.rsqrt %148 : vector<1x1xf32>
    %150 = vector.broadcast %149 : vector<1x1xf32> to vector<2x256xf32>
    %151 = arith.mulf %139, %150 : vector<2x256xf32>
    %152 = vector.broadcast %130 : vector<2x1xf32> to vector<2x256xf32>
    %153 = arith.mulf %151, %152 : vector<2x256xf32>
    %154 = vector.broadcast %131 : vector<2x1xf32> to vector<2x256xf32>
    %155 = arith.addf %153, %154 : vector<2x256xf32>
    %cst_108 = arith.constant 0.000000e+00 : f32
    %156 = vector.broadcast %cst_108 : f32 to vector<2x256xf32>
    %157 = arith.maximumf %155, %156 : vector<2x256xf32>
    %c0_109 = arith.constant 0 : index
    %c0_110 = arith.constant 0 : index
    %158 = vector.load %arg15[%c0_109, %c0_110] : memref<2x1xf32, #tpu.memory_space<vmem>>, vector<2x1xf32>
    %cst_111 = arith.constant 0.000000e+00 : f32
    %159 = vector.broadcast %cst_111 : f32 to vector<2x256xf32>
    %c0_112 = arith.constant 0 : index
    %c0_113 = arith.constant 0 : index
    %c0_114 = arith.constant 0 : index
    %160 = vector.load %arg2[%c0_112, %c0_113, %c0_114] : memref<9x256x256xf32, #tpu.memory_space<vmem>>, vector<1x256x256xf32>
    %161 = vector.shape_cast %160 : vector<1x256x256xf32> to vector<256x256xf32>
    %cst_115 = arith.constant dense<0.000000e+00> : vector<2x256xf32>
    %162 = tpu.matmul %157, %161, %cst_115 {dimension_numbers = #tpu.dot_dimension_numbers<[1], [0], [0], [1], [0, 0, 1, 1], [], []>} : vector<2x256xf32>, vector<256x256xf32>, vector<2x256xf32> -> vector<2x256xf32>
    %c0_116 = arith.constant 0 : index
    %c0_117 = arith.constant 0 : index
    %c0_118 = arith.constant 0 : index
    %163 = vector.load %arg14[%c0_116, %c0_117, %c0_118] : memref<9x2x2xf32, #tpu.memory_space<vmem>>, vector<1x2x2xf32>
    %164 = vector.shape_cast %163 : vector<1x2x2xf32> to vector<2x2xf32>
    %cst_119 = arith.constant dense<0.000000e+00> : vector<2x256xf32>
    %165 = tpu.matmul %164, %162, %cst_119 {dimension_numbers = #tpu.dot_dimension_numbers<[1], [0], [0], [1], [0, 0, 1, 1], [], []>} : vector<2x2xf32>, vector<2x256xf32>, vector<2x256xf32> -> vector<2x256xf32>
    %166 = arith.addf %159, %165 : vector<2x256xf32>
    %c1_120 = arith.constant 1 : index
    %c0_121 = arith.constant 0 : index
    %c0_122 = arith.constant 0 : index
    %167 = vector.load %arg2[%c1_120, %c0_121, %c0_122] : memref<9x256x256xf32, #tpu.memory_space<vmem>>, vector<1x256x256xf32>
    %168 = vector.shape_cast %167 : vector<1x256x256xf32> to vector<256x256xf32>
    %cst_123 = arith.constant dense<0.000000e+00> : vector<2x256xf32>
    %169 = tpu.matmul %157, %168, %cst_123 {dimension_numbers = #tpu.dot_dimension_numbers<[1], [0], [0], [1], [0, 0, 1, 1], [], []>} : vector<2x256xf32>, vector<256x256xf32>, vector<2x256xf32> -> vector<2x256xf32>
    %c1_124 = arith.constant 1 : index
    %c0_125 = arith.constant 0 : index
    %c0_126 = arith.constant 0 : index
    %170 = vector.load %arg14[%c1_124, %c0_125, %c0_126] : memref<9x2x2xf32, #tpu.memory_space<vmem>>, vector<1x2x2xf32>
    %171 = vector.shape_cast %170 : vector<1x2x2xf32> to vector<2x2xf32>
    %cst_127 = arith.constant dense<0.000000e+00> : vector<2x256xf32>
    %172 = tpu.matmul %171, %169, %cst_127 {dimension_numbers = #tpu.dot_dimension_numbers<[1], [0], [0], [1], [0, 0, 1, 1], [], []>} : vector<2x2xf32>, vector<2x256xf32>, vector<2x256xf32> -> vector<2x256xf32>
    %173 = arith.addf %166, %172 : vector<2x256xf32>
    %c2_128 = arith.constant 2 : index
    %c0_129 = arith.constant 0 : index
    %c0_130 = arith.constant 0 : index
    %174 = vector.load %arg2[%c2_128, %c0_129, %c0_130] : memref<9x256x256xf32, #tpu.memory_space<vmem>>, vector<1x256x256xf32>
    %175 = vector.shape_cast %174 : vector<1x256x256xf32> to vector<256x256xf32>
    %cst_131 = arith.constant dense<0.000000e+00> : vector<2x256xf32>
    %176 = tpu.matmul %157, %175, %cst_131 {dimension_numbers = #tpu.dot_dimension_numbers<[1], [0], [0], [1], [0, 0, 1, 1], [], []>} : vector<2x256xf32>, vector<256x256xf32>, vector<2x256xf32> -> vector<2x256xf32>
    %c2_132 = arith.constant 2 : index
    %c0_133 = arith.constant 0 : index
    %c0_134 = arith.constant 0 : index
    %177 = vector.load %arg14[%c2_132, %c0_133, %c0_134] : memref<9x2x2xf32, #tpu.memory_space<vmem>>, vector<1x2x2xf32>
    %178 = vector.shape_cast %177 : vector<1x2x2xf32> to vector<2x2xf32>
    %cst_135 = arith.constant dense<0.000000e+00> : vector<2x256xf32>
    %179 = tpu.matmul %178, %176, %cst_135 {dimension_numbers = #tpu.dot_dimension_numbers<[1], [0], [0], [1], [0, 0, 1, 1], [], []>} : vector<2x2xf32>, vector<2x256xf32>, vector<2x256xf32> -> vector<2x256xf32>
    %180 = arith.addf %173, %179 : vector<2x256xf32>
    %c3_136 = arith.constant 3 : index
    %c0_137 = arith.constant 0 : index
    %c0_138 = arith.constant 0 : index
    %181 = vector.load %arg2[%c3_136, %c0_137, %c0_138] : memref<9x256x256xf32, #tpu.memory_space<vmem>>, vector<1x256x256xf32>
    %182 = vector.shape_cast %181 : vector<1x256x256xf32> to vector<256x256xf32>
    %cst_139 = arith.constant dense<0.000000e+00> : vector<2x256xf32>
    %183 = tpu.matmul %157, %182, %cst_139 {dimension_numbers = #tpu.dot_dimension_numbers<[1], [0], [0], [1], [0, 0, 1, 1], [], []>} : vector<2x256xf32>, vector<256x256xf32>, vector<2x256xf32> -> vector<2x256xf32>
    %c3_140 = arith.constant 3 : index
    %c0_141 = arith.constant 0 : index
    %c0_142 = arith.constant 0 : index
    %184 = vector.load %arg14[%c3_140, %c0_141, %c0_142] : memref<9x2x2xf32, #tpu.memory_space<vmem>>, vector<1x2x2xf32>
    %185 = vector.shape_cast %184 : vector<1x2x2xf32> to vector<2x2xf32>
    %cst_143 = arith.constant dense<0.000000e+00> : vector<2x256xf32>
    %186 = tpu.matmul %185, %183, %cst_143 {dimension_numbers = #tpu.dot_dimension_numbers<[1], [0], [0], [1], [0, 0, 1, 1], [], []>} : vector<2x2xf32>, vector<2x256xf32>, vector<2x256xf32> -> vector<2x256xf32>
    %187 = arith.addf %180, %186 : vector<2x256xf32>
    %c4_144 = arith.constant 4 : index
    %c0_145 = arith.constant 0 : index
    %c0_146 = arith.constant 0 : index
    %188 = vector.load %arg2[%c4_144, %c0_145, %c0_146] : memref<9x256x256xf32, #tpu.memory_space<vmem>>, vector<1x256x256xf32>
    %189 = vector.shape_cast %188 : vector<1x256x256xf32> to vector<256x256xf32>
    %cst_147 = arith.constant dense<0.000000e+00> : vector<2x256xf32>
    %190 = tpu.matmul %157, %189, %cst_147 {dimension_numbers = #tpu.dot_dimension_numbers<[1], [0], [0], [1], [0, 0, 1, 1], [], []>} : vector<2x256xf32>, vector<256x256xf32>, vector<2x256xf32> -> vector<2x256xf32>
    %c4_148 = arith.constant 4 : index
    %c0_149 = arith.constant 0 : index
    %c0_150 = arith.constant 0 : index
    %191 = vector.load %arg14[%c4_148, %c0_149, %c0_150] : memref<9x2x2xf32, #tpu.memory_space<vmem>>, vector<1x2x2xf32>
    %192 = vector.shape_cast %191 : vector<1x2x2xf32> to vector<2x2xf32>
    %cst_151 = arith.constant dense<0.000000e+00> : vector<2x256xf32>
    %193 = tpu.matmul %192, %190, %cst_151 {dimension_numbers = #tpu.dot_dimension_numbers<[1], [0], [0], [1], [0, 0, 1, 1], [], []>} : vector<2x2xf32>, vector<2x256xf32>, vector<2x256xf32> -> vector<2x256xf32>
    %194 = arith.addf %187, %193 : vector<2x256xf32>
    %c5_152 = arith.constant 5 : index
    %c0_153 = arith.constant 0 : index
    %c0_154 = arith.constant 0 : index
    %195 = vector.load %arg2[%c5_152, %c0_153, %c0_154] : memref<9x256x256xf32, #tpu.memory_space<vmem>>, vector<1x256x256xf32>
    %196 = vector.shape_cast %195 : vector<1x256x256xf32> to vector<256x256xf32>
    %cst_155 = arith.constant dense<0.000000e+00> : vector<2x256xf32>
    %197 = tpu.matmul %157, %196, %cst_155 {dimension_numbers = #tpu.dot_dimension_numbers<[1], [0], [0], [1], [0, 0, 1, 1], [], []>} : vector<2x256xf32>, vector<256x256xf32>, vector<2x256xf32> -> vector<2x256xf32>
    %c5_156 = arith.constant 5 : index
    %c0_157 = arith.constant 0 : index
    %c0_158 = arith.constant 0 : index
    %198 = vector.load %arg14[%c5_156, %c0_157, %c0_158] : memref<9x2x2xf32, #tpu.memory_space<vmem>>, vector<1x2x2xf32>
    %199 = vector.shape_cast %198 : vector<1x2x2xf32> to vector<2x2xf32>
    %cst_159 = arith.constant dense<0.000000e+00> : vector<2x256xf32>
    %200 = tpu.matmul %199, %197, %cst_159 {dimension_numbers = #tpu.dot_dimension_numbers<[1], [0], [0], [1], [0, 0, 1, 1], [], []>} : vector<2x2xf32>, vector<2x256xf32>, vector<2x256xf32> -> vector<2x256xf32>
    %201 = arith.addf %194, %200 : vector<2x256xf32>
    %c6_160 = arith.constant 6 : index
    %c0_161 = arith.constant 0 : index
    %c0_162 = arith.constant 0 : index
    %202 = vector.load %arg2[%c6_160, %c0_161, %c0_162] : memref<9x256x256xf32, #tpu.memory_space<vmem>>, vector<1x256x256xf32>
    %203 = vector.shape_cast %202 : vector<1x256x256xf32> to vector<256x256xf32>
    %cst_163 = arith.constant dense<0.000000e+00> : vector<2x256xf32>
    %204 = tpu.matmul %157, %203, %cst_163 {dimension_numbers = #tpu.dot_dimension_numbers<[1], [0], [0], [1], [0, 0, 1, 1], [], []>} : vector<2x256xf32>, vector<256x256xf32>, vector<2x256xf32> -> vector<2x256xf32>
    %c6_164 = arith.constant 6 : index
    %c0_165 = arith.constant 0 : index
    %c0_166 = arith.constant 0 : index
    %205 = vector.load %arg14[%c6_164, %c0_165, %c0_166] : memref<9x2x2xf32, #tpu.memory_space<vmem>>, vector<1x2x2xf32>
    %206 = vector.shape_cast %205 : vector<1x2x2xf32> to vector<2x2xf32>
    %cst_167 = arith.constant dense<0.000000e+00> : vector<2x256xf32>
    %207 = tpu.matmul %206, %204, %cst_167 {dimension_numbers = #tpu.dot_dimension_numbers<[1], [0], [0], [1], [0, 0, 1, 1], [], []>} : vector<2x2xf32>, vector<2x256xf32>, vector<2x256xf32> -> vector<2x256xf32>
    %208 = arith.addf %201, %207 : vector<2x256xf32>
    %c7_168 = arith.constant 7 : index
    %c0_169 = arith.constant 0 : index
    %c0_170 = arith.constant 0 : index
    %209 = vector.load %arg2[%c7_168, %c0_169, %c0_170] : memref<9x256x256xf32, #tpu.memory_space<vmem>>, vector<1x256x256xf32>
    %210 = vector.shape_cast %209 : vector<1x256x256xf32> to vector<256x256xf32>
    %cst_171 = arith.constant dense<0.000000e+00> : vector<2x256xf32>
    %211 = tpu.matmul %157, %210, %cst_171 {dimension_numbers = #tpu.dot_dimension_numbers<[1], [0], [0], [1], [0, 0, 1, 1], [], []>} : vector<2x256xf32>, vector<256x256xf32>, vector<2x256xf32> -> vector<2x256xf32>
    %c7_172 = arith.constant 7 : index
    %c0_173 = arith.constant 0 : index
    %c0_174 = arith.constant 0 : index
    %212 = vector.load %arg14[%c7_172, %c0_173, %c0_174] : memref<9x2x2xf32, #tpu.memory_space<vmem>>, vector<1x2x2xf32>
    %213 = vector.shape_cast %212 : vector<1x2x2xf32> to vector<2x2xf32>
    %cst_175 = arith.constant dense<0.000000e+00> : vector<2x256xf32>
    %214 = tpu.matmul %213, %211, %cst_175 {dimension_numbers = #tpu.dot_dimension_numbers<[1], [0], [0], [1], [0, 0, 1, 1], [], []>} : vector<2x2xf32>, vector<2x256xf32>, vector<2x256xf32> -> vector<2x256xf32>
    %215 = arith.addf %208, %214 : vector<2x256xf32>
    %c8_176 = arith.constant 8 : index
    %c0_177 = arith.constant 0 : index
    %c0_178 = arith.constant 0 : index
    %216 = vector.load %arg2[%c8_176, %c0_177, %c0_178] : memref<9x256x256xf32, #tpu.memory_space<vmem>>, vector<1x256x256xf32>
    %217 = vector.shape_cast %216 : vector<1x256x256xf32> to vector<256x256xf32>
    %cst_179 = arith.constant dense<0.000000e+00> : vector<2x256xf32>
    %218 = tpu.matmul %157, %217, %cst_179 {dimension_numbers = #tpu.dot_dimension_numbers<[1], [0], [0], [1], [0, 0, 1, 1], [], []>} : vector<2x256xf32>, vector<256x256xf32>, vector<2x256xf32> -> vector<2x256xf32>
    %c8_180 = arith.constant 8 : index
    %c0_181 = arith.constant 0 : index
    %c0_182 = arith.constant 0 : index
    %219 = vector.load %arg14[%c8_180, %c0_181, %c0_182] : memref<9x2x2xf32, #tpu.memory_space<vmem>>, vector<1x2x2xf32>
    %220 = vector.shape_cast %219 : vector<1x2x2xf32> to vector<2x2xf32>
    %cst_183 = arith.constant dense<0.000000e+00> : vector<2x256xf32>
    %221 = tpu.matmul %220, %218, %cst_183 {dimension_numbers = #tpu.dot_dimension_numbers<[1], [0], [0], [1], [0, 0, 1, 1], [], []>} : vector<2x2xf32>, vector<2x256xf32>, vector<2x256xf32> -> vector<2x256xf32>
    %222 = arith.addf %215, %221 : vector<2x256xf32>
    %223 = vector.broadcast %158 : vector<2x1xf32> to vector<2x256xf32>
    %224 = arith.addf %222, %223 : vector<2x256xf32>
    %c0_184 = arith.constant 0 : index
    %c0_185 = arith.constant 0 : index
    %225 = vector.load %arg16[%c0_184, %c0_185] : memref<2x1xf32, #tpu.memory_space<vmem>>, vector<2x1xf32>
    %c0_186 = arith.constant 0 : index
    %c0_187 = arith.constant 0 : index
    %226 = vector.load %arg17[%c0_186, %c0_187] : memref<2x1xf32, #tpu.memory_space<vmem>>, vector<2x1xf32>
    %cst_188 = arith.constant dense<0.000000e+00> : vector<2xf32>
    %227 = vector.multi_reduction <add>, %224, %cst_188 [1] : vector<2x256xf32> to vector<2xf32>
    %228 = vector.shape_cast %227 : vector<2xf32> to vector<2x1xf32>
    %cst_189 = arith.constant dense<0.000000e+00> : vector<1xf32>
    %229 = vector.multi_reduction <add>, %228, %cst_189 [0] : vector<2x1xf32> to vector<1xf32>
    %230 = vector.shape_cast %229 : vector<1xf32> to vector<1x1xf32>
    %cst_190 = arith.constant 5.120000e+02 : f32
    %231 = vector.broadcast %cst_190 : f32 to vector<1x1xf32>
    %232 = arith.divf %230, %231 : vector<1x1xf32>
    %233 = vector.broadcast %232 : vector<1x1xf32> to vector<2x256xf32>
    %234 = arith.subf %224, %233 : vector<2x256xf32>
    %235 = arith.mulf %234, %234 : vector<2x256xf32>
    %cst_191 = arith.constant dense<0.000000e+00> : vector<2xf32>
    %236 = vector.multi_reduction <add>, %235, %cst_191 [1] : vector<2x256xf32> to vector<2xf32>
    %237 = vector.shape_cast %236 : vector<2xf32> to vector<2x1xf32>
    %cst_192 = arith.constant dense<0.000000e+00> : vector<1xf32>
    %238 = vector.multi_reduction <add>, %237, %cst_192 [0] : vector<2x1xf32> to vector<1xf32>
    %239 = vector.shape_cast %238 : vector<1xf32> to vector<1x1xf32>
    %cst_193 = arith.constant 5.120000e+02 : f32
    %240 = vector.broadcast %cst_193 : f32 to vector<1x1xf32>
    %241 = arith.divf %239, %240 : vector<1x1xf32>
    %cst_194 = arith.constant 9.99999974E-6 : f32
    %242 = vector.broadcast %cst_194 : f32 to vector<1x1xf32>
    %243 = arith.addf %241, %242 : vector<1x1xf32>
    %244 = math.rsqrt %243 : vector<1x1xf32>
    %245 = vector.broadcast %244 : vector<1x1xf32> to vector<2x256xf32>
    %246 = arith.mulf %234, %245 : vector<2x256xf32>
    %247 = vector.broadcast %225 : vector<2x1xf32> to vector<2x256xf32>
    %248 = arith.mulf %246, %247 : vector<2x256xf32>
    %249 = vector.broadcast %226 : vector<2x1xf32> to vector<2x256xf32>
    %250 = arith.addf %248, %249 : vector<2x256xf32>
    %cst_195 = arith.constant 0.000000e+00 : f32
    %251 = vector.broadcast %cst_195 : f32 to vector<2x256xf32>
    %252 = arith.maximumf %250, %251 : vector<2x256xf32>
    %c0_196 = arith.constant 0 : index
    %c0_197 = arith.constant 0 : index
    %253 = vector.load %arg18[%c0_196, %c0_197] : memref<16x2xf32, #tpu.memory_space<vmem>>, vector<16x2xf32>
    %c0_198 = arith.constant 0 : index
    %c0_199 = arith.constant 0 : index
    %254 = vector.load %arg19[%c0_198, %c0_199] : memref<16x1xf32, #tpu.memory_space<vmem>>, vector<16x1xf32>
    %cst_200 = arith.constant dense<0.000000e+00> : vector<16x256xf32>
    %255 = tpu.matmul %253, %252, %cst_200 {dimension_numbers = #tpu.dot_dimension_numbers<[1], [0], [0], [1], [0, 0, 1, 1], [], []>} : vector<16x2xf32>, vector<2x256xf32>, vector<16x256xf32> -> vector<16x256xf32>
    %256 = vector.broadcast %254 : vector<16x1xf32> to vector<16x256xf32>
    %257 = arith.addf %255, %256 : vector<16x256xf32>
    %c0_201 = arith.constant 0 : index
    %c0_202 = arith.constant 0 : index
    %258 = vector.load %arg20[%c0_201, %c0_202] : memref<8x8xf32, #tpu.memory_space<vmem>>, vector<8x8xf32>
    %c0_203 = arith.constant 0 : index
    %c0_204 = arith.constant 0 : index
    %259 = vector.load %arg21[%c0_203, %c0_204] : memref<8x1xf32, #tpu.memory_space<vmem>>, vector<8x1xf32>
    %cst_205 = arith.constant dense<0.000000e+00> : vector<8x256xf32>
    %260 = tpu.matmul %258, %29, %cst_205 {dimension_numbers = #tpu.dot_dimension_numbers<[1], [0], [0], [1], [0, 0, 1, 1], [], []>} : vector<8x8xf32>, vector<8x256xf32>, vector<8x256xf32> -> vector<8x256xf32>
    %261 = vector.broadcast %259 : vector<8x1xf32> to vector<8x256xf32>
    %262 = arith.addf %260, %261 : vector<8x256xf32>
    %263 = tpu.concatenate %29, %262 in 0 : vector<8x256xf32>, vector<8x256xf32> -> vector<16x256xf32>
    %264 = arith.addf %257, %263 : vector<16x256xf32>
    %c0_206 = arith.constant 0 : index
    %c0_207 = arith.constant 0 : index
    %265 = vector.load %arg3[%c0_206, %c0_207] : memref<256x64xf32, #tpu.memory_space<vmem>>, vector<256x64xf32>
    %cst_208 = arith.constant dense<0.000000e+00> : vector<16x64xf32>
    %266 = tpu.matmul %264, %265, %cst_208 {dimension_numbers = #tpu.dot_dimension_numbers<[1], [0], [0], [1], [0, 0, 1, 1], [], []>} : vector<16x256xf32>, vector<256x64xf32>, vector<16x64xf32> -> vector<16x64xf32>
    %c0_209 = arith.constant 0 : index
    %c0_210 = arith.constant 0 : index
    %c0_211 = arith.constant 0 : index
    %267 = vector.load %arg22[%c0_209, %c0_210, %c0_211] : memref<1x16x64xf32, #tpu.memory_space<vmem>>, vector<1x16x64xf32>
    %268 = vector.shape_cast %267 : vector<1x16x64xf32> to vector<16x64xf32>
    %269 = vector.shape_cast %266 : vector<16x64xf32> to vector<1x16x64xf32>
    tpu.vector_store %arg22[%c0_209, %c0_210, %c0_211], %269 {strides = array<i32>} : memref<1x16x64xf32, #tpu.memory_space<vmem>>, vector<1x16x64xf32>,
    return
  }
  func.func @transform_0(%arg0: i32) -> (i32, i32, i32) {
    %c0_i32 = arith.constant 0 : i32
    %c0_i32_0 = arith.constant 0 : i32
    %c0_i32_1 = arith.constant 0 : i32
    return %arg0, %c0_i32, %c0_i32_0 : i32, i32, i32
  }
  func.func @transform_1(%arg0: i32) -> (i32, i32, i32) {
    %c0_i32 = arith.constant 0 : i32
    %c0_i32_0 = arith.constant 0 : i32
    %c0_i32_1 = arith.constant 0 : i32
    %c0_i32_2 = arith.constant 0 : i32
    return %c0_i32, %c0_i32_0, %c0_i32_1 : i32, i32, i32
  }
  func.func @transform_2(%arg0: i32) -> (i32, i32) {
    %c0_i32 = arith.constant 0 : i32
    %c0_i32_0 = arith.constant 0 : i32
    %c0_i32_1 = arith.constant 0 : i32
    return %c0_i32, %c0_i32_0 : i32, i32
  }
  func.func @transform_3(%arg0: i32) -> (i32, i32) {
    %c0_i32 = arith.constant 0 : i32
    %c0_i32_0 = arith.constant 0 : i32
    %c0_i32_1 = arith.constant 0 : i32
    return %c0_i32, %c0_i32_0 : i32, i32
  }
  func.func @transform_4(%arg0: i32) -> (i32, i32) {
    %c0_i32 = arith.constant 0 : i32
    %c0_i32_0 = arith.constant 0 : i32
    %c0_i32_1 = arith.constant 0 : i32
    return %c0_i32, %c0_i32_0 : i32, i32
  }
  func.func @transform_5(%arg0: i32) -> (i32, i32) {
    %c0_i32 = arith.constant 0 : i32
    %c0_i32_0 = arith.constant 0 : i32
    %c0_i32_1 = arith.constant 0 : i32
    return %c0_i32, %c0_i32_0 : i32, i32
  }
  func.func @transform_6(%arg0: i32) -> (i32, i32) {
    %c0_i32 = arith.constant 0 : i32
    %c0_i32_0 = arith.constant 0 : i32
    %c0_i32_1 = arith.constant 0 : i32
    return %c0_i32, %c0_i32_0 : i32, i32
  }
  func.func @transform_7(%arg0: i32) -> (i32, i32) {
    %c0_i32 = arith.constant 0 : i32
    %c0_i32_0 = arith.constant 0 : i32
    %c0_i32_1 = arith.constant 0 : i32
    return %c0_i32, %c0_i32_0 : i32, i32
  }
  func.func @transform_8(%arg0: i32) -> (i32, i32) {
    %c0_i32 = arith.constant 0 : i32
    %c0_i32_0 = arith.constant 0 : i32
    %c0_i32_1 = arith.constant 0 : i32
    return %c0_i32, %c0_i32_0 : i32, i32
  }
  func.func @transform_9(%arg0: i32) -> (i32, i32, i32) {
    %c0_i32 = arith.constant 0 : i32
    %c0_i32_0 = arith.constant 0 : i32
    %c0_i32_1 = arith.constant 0 : i32
    %c0_i32_2 = arith.constant 0 : i32
    return %c0_i32, %c0_i32_0, %c0_i32_1 : i32, i32, i32
  }
  func.func @transform_10(%arg0: i32) -> (i32, i32) {
    %c0_i32 = arith.constant 0 : i32
    %c0_i32_0 = arith.constant 0 : i32
    %c0_i32_1 = arith.constant 0 : i32
    return %c0_i32, %c0_i32_0 : i32, i32
  }
  func.func @transform_11(%arg0: i32) -> (i32, i32) {
    %c0_i32 = arith.constant 0 : i32
    %c0_i32_0 = arith.constant 0 : i32
    %c0_i32_1 = arith.constant 0 : i32
    return %c0_i32, %c0_i32_0 : i32, i32
  }
  func.func @transform_12(%arg0: i32) -> (i32, i32) {
    %c0_i32 = arith.constant 0 : i32
    %c0_i32_0 = arith.constant 0 : i32
    %c0_i32_1 = arith.constant 0 : i32
    return %c0_i32, %c0_i32_0 : i32, i32
  }
  func.func @transform_13(%arg0: i32) -> (i32, i32, i32) {
    %c0_i32 = arith.constant 0 : i32
    %c0_i32_0 = arith.constant 0 : i32
    %c0_i32_1 = arith.constant 0 : i32
    %c0_i32_2 = arith.constant 0 : i32
    return %c0_i32, %c0_i32_0, %c0_i32_1 : i32, i32, i32
  }
  func.func @transform_14(%arg0: i32) -> (i32, i32) {
    %c0_i32 = arith.constant 0 : i32
    %c0_i32_0 = arith.constant 0 : i32
    %c0_i32_1 = arith.constant 0 : i32
    return %c0_i32, %c0_i32_0 : i32, i32
  }
  func.func @transform_15(%arg0: i32) -> (i32, i32) {
    %c0_i32 = arith.constant 0 : i32
    %c0_i32_0 = arith.constant 0 : i32
    %c0_i32_1 = arith.constant 0 : i32
    return %c0_i32, %c0_i32_0 : i32, i32
  }
  func.func @transform_16(%arg0: i32) -> (i32, i32) {
    %c0_i32 = arith.constant 0 : i32
    %c0_i32_0 = arith.constant 0 : i32
    %c0_i32_1 = arith.constant 0 : i32
    return %c0_i32, %c0_i32_0 : i32, i32
  }
  func.func @transform_17(%arg0: i32) -> (i32, i32) {
    %c0_i32 = arith.constant 0 : i32
    %c0_i32_0 = arith.constant 0 : i32
    %c0_i32_1 = arith.constant 0 : i32
    return %c0_i32, %c0_i32_0 : i32, i32
  }
  func.func @transform_18(%arg0: i32) -> (i32, i32) {
    %c0_i32 = arith.constant 0 : i32
    %c0_i32_0 = arith.constant 0 : i32
    %c0_i32_1 = arith.constant 0 : i32
    return %c0_i32, %c0_i32_0 : i32, i32
  }
  func.func @transform_19(%arg0: i32) -> (i32, i32) {
    %c0_i32 = arith.constant 0 : i32
    %c0_i32_0 = arith.constant 0 : i32
    %c0_i32_1 = arith.constant 0 : i32
    return %c0_i32, %c0_i32_0 : i32, i32
  }
  func.func @transform_20(%arg0: i32) -> (i32, i32) {
    %c0_i32 = arith.constant 0 : i32
    %c0_i32_0 = arith.constant 0 : i32
    %c0_i32_1 = arith.constant 0 : i32
    return %c0_i32, %c0_i32_0 : i32, i32
  }
  func.func @transform_21(%arg0: i32) -> (i32, i32, i32) {
    %c0_i32 = arith.constant 0 : i32
    %c0_i32_0 = arith.constant 0 : i32
    %c0_i32_1 = arith.constant 0 : i32
    return %arg0, %c0_i32, %c0_i32_0 : i32, i32, i32
  }
}

module attributes {stable_mosaic.version = 11 : i64} {
  func.func @kernel(%arg0: i32, %arg1: memref<1x8x256xf32, #tpu.memory_space<vmem>>, %arg2: memref<8x1xf32, #tpu.memory_space<vmem>>, %arg3: memref<8x1xf32, #tpu.memory_space<vmem>>, %arg4: memref<4x8xf32, #tpu.memory_space<vmem>>, %arg5: memref<4x1xf32, #tpu.memory_space<vmem>>, %arg6: memref<1x4x256xf32, #tpu.memory_space<vmem>>) attributes {dimension_semantics = [#tpu.dimension_semantics<parallel>], iteration_bounds = array<i64: 2>, scalar_prefetch = 0 : i64, scratch_operands = 0 : i64, tpu.core_type = #tpu.core_type<tc>, window_params = [{transform_indices = @transform_0, window_bounds = array<i64: 1, 8, 256>}, {pipeline_mode = #tpu.pipeline_mode<synchronous>, transform_indices = @transform_1, window_bounds = array<i64: 8, 1>}, {pipeline_mode = #tpu.pipeline_mode<synchronous>, transform_indices = @transform_2, window_bounds = array<i64: 8, 1>}, {pipeline_mode = #tpu.pipeline_mode<synchronous>, transform_indices = @transform_3, window_bounds = array<i64: 4, 8>}, {pipeline_mode = #tpu.pipeline_mode<synchronous>, transform_indices = @transform_4, window_bounds = array<i64: 4, 1>}, {transform_indices = @transform_5, window_bounds = array<i64: 1, 4, 256>}]} {
    %c0 = arith.constant 0 : index
    %c0_0 = arith.constant 0 : index
    %c0_1 = arith.constant 0 : index
    %0 = vector.load %arg1[%c0, %c0_0, %c0_1] : memref<1x8x256xf32, #tpu.memory_space<vmem>>, vector<1x8x256xf32>
    %1 = vector.shape_cast %0 : vector<1x8x256xf32> to vector<8x256xf32>
    %c0_2 = arith.constant 0 : index
    %c0_3 = arith.constant 0 : index
    %2 = vector.load %arg2[%c0_2, %c0_3] : memref<8x1xf32, #tpu.memory_space<vmem>>, vector<8x1xf32>
    %c0_4 = arith.constant 0 : index
    %c0_5 = arith.constant 0 : index
    %3 = vector.load %arg3[%c0_4, %c0_5] : memref<8x1xf32, #tpu.memory_space<vmem>>, vector<8x1xf32>
    %cst = arith.constant dense<0.000000e+00> : vector<8xf32>
    %4 = vector.multi_reduction <add>, %1, %cst [1] : vector<8x256xf32> to vector<8xf32>
    %5 = vector.shape_cast %4 : vector<8xf32> to vector<8x1xf32>
    %cst_6 = arith.constant dense<0.000000e+00> : vector<1xf32>
    %6 = vector.multi_reduction <add>, %5, %cst_6 [0] : vector<8x1xf32> to vector<1xf32>
    %7 = vector.shape_cast %6 : vector<1xf32> to vector<1x1xf32>
    %cst_7 = arith.constant 2.048000e+03 : f32
    %8 = vector.broadcast %cst_7 : f32 to vector<1x1xf32>
    %9 = arith.divf %7, %8 : vector<1x1xf32>
    %10 = vector.broadcast %9 : vector<1x1xf32> to vector<8x256xf32>
    %11 = arith.subf %1, %10 : vector<8x256xf32>
    %12 = arith.mulf %11, %11 : vector<8x256xf32>
    %cst_8 = arith.constant dense<0.000000e+00> : vector<8xf32>
    %13 = vector.multi_reduction <add>, %12, %cst_8 [1] : vector<8x256xf32> to vector<8xf32>
    %14 = vector.shape_cast %13 : vector<8xf32> to vector<8x1xf32>
    %cst_9 = arith.constant dense<0.000000e+00> : vector<1xf32>
    %15 = vector.multi_reduction <add>, %14, %cst_9 [0] : vector<8x1xf32> to vector<1xf32>
    %16 = vector.shape_cast %15 : vector<1xf32> to vector<1x1xf32>
    %cst_10 = arith.constant 2.048000e+03 : f32
    %17 = vector.broadcast %cst_10 : f32 to vector<1x1xf32>
    %18 = arith.divf %16, %17 : vector<1x1xf32>
    %cst_11 = arith.constant 9.99999974E-6 : f32
    %19 = vector.broadcast %cst_11 : f32 to vector<1x1xf32>
    %20 = arith.addf %18, %19 : vector<1x1xf32>
    %21 = math.rsqrt %20 : vector<1x1xf32>
    %22 = vector.broadcast %21 : vector<1x1xf32> to vector<8x256xf32>
    %23 = arith.mulf %11, %22 : vector<8x256xf32>
    %24 = vector.broadcast %2 : vector<8x1xf32> to vector<8x256xf32>
    %25 = arith.mulf %23, %24 : vector<8x256xf32>
    %26 = vector.broadcast %3 : vector<8x1xf32> to vector<8x256xf32>
    %27 = arith.addf %25, %26 : vector<8x256xf32>
    %cst_12 = arith.constant 0.000000e+00 : f32
    %28 = vector.broadcast %cst_12 : f32 to vector<8x256xf32>
    %29 = arith.maximumf %27, %28 : vector<8x256xf32>
    %c0_13 = arith.constant 0 : index
    %c0_14 = arith.constant 0 : index
    %30 = vector.load %arg4[%c0_13, %c0_14] : memref<4x8xf32, #tpu.memory_space<vmem>>, vector<4x8xf32>
    %c0_15 = arith.constant 0 : index
    %c0_16 = arith.constant 0 : index
    %31 = vector.load %arg5[%c0_15, %c0_16] : memref<4x1xf32, #tpu.memory_space<vmem>>, vector<4x1xf32>
    %cst_17 = arith.constant dense<0.000000e+00> : vector<4x256xf32>
    %32 = tpu.matmul %30, %29, %cst_17 {dimension_numbers = #tpu.dot_dimension_numbers<[1], [0], [0], [1], [0, 0, 1, 1], [], []>} : vector<4x8xf32>, vector<8x256xf32>, vector<4x256xf32> -> vector<4x256xf32>
    %33 = vector.broadcast %31 : vector<4x1xf32> to vector<4x256xf32>
    %34 = arith.addf %32, %33 : vector<4x256xf32>
    %c0_18 = arith.constant 0 : index
    %c0_19 = arith.constant 0 : index
    %c0_20 = arith.constant 0 : index
    %35 = vector.load %arg6[%c0_18, %c0_19, %c0_20] : memref<1x4x256xf32, #tpu.memory_space<vmem>>, vector<1x4x256xf32>
    %36 = vector.shape_cast %35 : vector<1x4x256xf32> to vector<4x256xf32>
    %37 = vector.shape_cast %34 : vector<4x256xf32> to vector<1x4x256xf32>
    tpu.vector_store %arg6[%c0_18, %c0_19, %c0_20], %37 {strides = array<i32>} : memref<1x4x256xf32, #tpu.memory_space<vmem>>, vector<1x4x256xf32>,
    return
  }
  func.func @transform_0(%arg0: i32) -> (i32, i32, i32) {
    %c0_i32 = arith.constant 0 : i32
    %c0_i32_0 = arith.constant 0 : i32
    %c0_i32_1 = arith.constant 0 : i32
    return %arg0, %c0_i32, %c0_i32_0 : i32, i32, i32
  }
  func.func @transform_1(%arg0: i32) -> (i32, i32) {
    %c0_i32 = arith.constant 0 : i32
    %c0_i32_0 = arith.constant 0 : i32
    %c0_i32_1 = arith.constant 0 : i32
    return %c0_i32, %c0_i32_0 : i32, i32
  }
  func.func @transform_2(%arg0: i32) -> (i32, i32) {
    %c0_i32 = arith.constant 0 : i32
    %c0_i32_0 = arith.constant 0 : i32
    %c0_i32_1 = arith.constant 0 : i32
    return %c0_i32, %c0_i32_0 : i32, i32
  }
  func.func @transform_3(%arg0: i32) -> (i32, i32) {
    %c0_i32 = arith.constant 0 : i32
    %c0_i32_0 = arith.constant 0 : i32
    %c0_i32_1 = arith.constant 0 : i32
    return %c0_i32, %c0_i32_0 : i32, i32
  }
  func.func @transform_4(%arg0: i32) -> (i32, i32) {
    %c0_i32 = arith.constant 0 : i32
    %c0_i32_0 = arith.constant 0 : i32
    %c0_i32_1 = arith.constant 0 : i32
    return %c0_i32, %c0_i32_0 : i32, i32
  }
  func.func @transform_5(%arg0: i32) -> (i32, i32, i32) {
    %c0_i32 = arith.constant 0 : i32
    %c0_i32_0 = arith.constant 0 : i32
    %c0_i32_1 = arith.constant 0 : i32
    return %arg0, %c0_i32, %c0_i32_0 : i32, i32, i32
  }
}

</mosaic_0001>

<bundles_post_ra>
// kernel: autoencoder_fwd.4
= control target key start
LH: loop header
LB: loop body
LE: loop exit
PB: predicated region body
PF: predicated region fallthrough
CT: control target
= control target key end

     0   :  { %8 = vsyncpa [#allocation3], 0  ;;  %s528_s0 = inlined_call_operand.vmem [shape: f32[2,4,256], index: 0, kind: input, shape index: {}]   ;;  %s529_s1 = inlined_call_operand.hbm [shape: f32[8,4], index: 1, kind: input, shape index: {}]   ;;  %s530_s2 = inlined_call_operand.hbm [shape: f32[8,1], index: 2, kind: input, shape index: {}]   ;;  %s531_s3 = inlined_call_operand.vmem [shape: f32[2,8,256], index: 3, kind: output, shape index: {}]  }
   0x1   :  { %9 = vsyncpa [#allocation5], 0  ;;  %s492_s12 = smov 0  }
   0x2 LB: > { %s126_s15 = sshll.u32 %s529_s1, 4  ;;  %s341_s16 = sadd.s32 4294967295, %s467_s12   ;;  %s467_s12 = sphi %s492_s12, %s15_s12   ;;  %s127_s15 = int_to_ptr.hbm [resolvable:$true] %s126_s15 }
   0x3   : > { %p343_p0 = scmp.ge.s32.totalorder %s467_s12, 1  ;;  %p114_p1 = scmp.lt.s32.totalorder %s467_s12, 3 }
   0x4   : > { %p377_p2 = scmp.eq.s32.totalorder %s341_s16, 0  ;;  %s469_s18 = smov [#allocation2]  }
   0x5   : > { %p503_p3 = pnand %p343_p0, %p114_p1  ;;  %s128_s19 = sshll.u32 %s469_s18, 4  ;;  %s129_s19 = int_to_ptr.vmem [resolvable:$true] %s128_s19 }
   0x6   : > { %s138_s22 = sshll.u32 %s530_s2, 4  ;;  %s470_s23 = smov [#allocation4]   ;;  %s139_s22 = int_to_ptr.hbm [resolvable:$true] %s138_s22 }
   0x7   : > { %p370_p4 = pneg %p503_p3  ;;  %s140_s24 = sshll.u32 %s470_s23, 4  ;;  %s141_s24 = int_to_ptr.vmem [resolvable:$true] %s140_s24 }
   0x8   : > { %161 = sbr.rel (%p503_p3) target bundleno = 161 (0xa1), region = 32 }
   0x9   : > { %p371_p5 = pnand %p377_p2, %p370_p4 }
   0xb   : > { %373 = dma.hbm_to_vmem [thread:$0]  (!%p371_p5), %s127_s15, 128, %s129_s19, [#allocation3]  }
   0xc   : > { %376 = dma.hbm_to_vmem [thread:$0]  (!%p371_p5), %s139_s22, 128, %s141_s24, [#allocation5]  }
   0xd   : > { %458 = dma.done.wait (%p377_p2), [#allocation3], 128  }
   0xe   : > { %460 = vsyncadd (%p377_p2), [#allocation3], 4294967168 }
   0xf   : > { %462 = dma.done.wait (%p377_p2), [#allocation5], 128  }
  0x10   : > { %464 = vsyncadd (%p377_p2), [#allocation5], 4294967168  ;;  %p191_p6 = scmp.lt.s32.totalorder %s341_s16, 1  ;;  %v471_v0 = vmov 0   ;;  %v203_v2 = vld [vmem:[#allocation4] sm:$0xff]  ;;  %vm217_vm0 = vcmask 1043456  }
  0x11   : > { %392 = vset.pattern.permute.xlu0 %v471_v0  ;;  %v202_v3 = vld [vmem:[#allocation2] sm:$0xff]  ;;  %vm213_vm1 = vcmask 31744  }
  0x12   : > { %s534_s16 = smov (!%p191_p6, %s341_s16), 1  ;;  %206 = vperm.xlu0 %392, %v203_v2  }
  0x13   : > { %s360_s25 = sshll.u32 %s534_s16, 3  ;;  %s361_s29 = sshll.u32 %s534_s16, 4 }
  0x14   : > { %s195_s28 = scalar_lea.vmem %s528_s0, %s360_s25  ;;  %s200_s5 = scalar_lea.vmem %s531_s3, %s361_s29 }
  0x15   : > { %v201_v1 = vld [vmem:[%s195_s28] sm:$0xff] }
  0x16   : > { %210 = vst [vmem:[#allocation1] ss:$2 sm:$0xff] %v201_v1 }
  0x1d   : > { %v211_v4 = vld.sshfl [vmem:[#allocation1] sm:$0xff pattern:$0x75316420]  ;;  %v212_v5 = vld.sshfl [vmem:[#allocation1 + $0x8] sm:$0xff pattern:$0x75316420] }
  0x1e   : > { %354 = vmatpush.msk.msra.mxu0 %vm217_vm0, %v211_v4  ;;  %356 = vmatpush.msk.msra.mxu1 %vm217_vm0, %v212_v5 }
  0x1f   : > { %355 = vmatmul.msk.f32.vlgmr.msra.gmra.mxu0 %vm213_vm1, %v202_v3  ;;  %357 = vmatmul.msk.f32.vlgmr.msra.gmra.mxu1 %vm213_vm1, %v202_v3 }
  0x84   : > { %v207_v6 = vpop.permute.xlu0 %206 }
  0x9c   : > { %v239_v7 = vpop.f32.mrf.mxu0  ;;  %v259_v8 = vpop.f32.mrf.mxu1 }
  0x9d   : > { %v240_v9 = vadd.f32 %v239_v7, %v207_v6  ;;  %v260_v10 = vadd.f32 %v259_v8, %v207_v6 }
  0x9f   : > { %262 = vst [vmem:[%s200_s5] sm:$0xff] %v240_v9 }
  0xa0   : > { %263 = vst [vmem:[%s200_s5 + $0x8] sm:$0xff] %v260_v10 }
  0xa1 PF: > { %s15_s12 = sadd.s32 1, %s467_s12  }
  0xa2   : > { %p12_p7 = scmp.ge.s32.totalorder %s15_s12, 4  }
  0xa4   :  { %14 = sbr.rel (!%p12_p7) target bundleno = 2 (0x2), region = 71 }
  0xa9   :  { %285 = vsyncpa [#allocation3], 1 }
  0xaa   :  { %287 = vsyncpa [#allocation3 + $0x1], 1 }
  0xab   :  { %288 = vsyncpa [#allocation5], 1 }

// kernel: autoencoder_fwd.7
= control target key start
LH: loop header
LB: loop body
LE: loop exit
PB: predicated region body
PF: predicated region fallthrough
CT: control target
= control target key end

     0   :  { %10 = vsyncpa [#allocation3], 0  ;;  %s831_s0 = inlined_call_operand.vmem [shape: f32[2,8,256], index: 0, kind: input, shape index: {}]   ;;  %s832_s1 = inlined_call_operand.hbm [shape: f32[8,1], index: 1, kind: input, shape index: {}]   ;;  %s833_s2 = inlined_call_operand.hbm [shape: f32[8,1], index: 2, kind: input, shape index: {}]   ;;  %s834_s3 = inlined_call_operand.hbm [shape: f32[4,8], index: 3, kind: input, shape index: {}]   ;;  %s835_s4 = inlined_call_operand.hbm [shape: f32[4,1], index: 4, kind: input, shape index: {}]   ;;  %s836_s5 = inlined_call_operand.vmem [shape: f32[2,4,256], index: 5, kind: output, shape index: {}]  }
   0x1   :  { %11 = vsyncpa [#allocation5], 0 }
   0x2   :  { %12 = vsyncpa [#allocation8], 0  ;;  %s759_s18 = smov 0  }
   0x3 LB: > { %s183_s21 = sshll.u32 %s833_s2, 4  ;;  %s768_s22 = sadd.s32 4294967295, %s721_s18   ;;  %s721_s18 = sphi %s759_s18, %s18_s18   ;;  %s184_s21 = int_to_ptr.hbm [resolvable:$true] %s183_s21 }
   0x4   : > { %p504_p0 = scmp.ge.s32.totalorder %s721_s18, 1  ;;  %p159_p1 = scmp.lt.s32.totalorder %s721_s18, 3 }
   0x5   : > { %p554_p2 = scmp.eq.s32.totalorder %s768_s22, 0  ;;  %s723_s24 = smov [#allocation4]  }
   0x6   : > { %p773_p3 = pnand %p504_p0, %p159_p1  ;;  %s185_s25 = sshll.u32 %s723_s24, 4  ;;  %s186_s25 = int_to_ptr.vmem [resolvable:$true] %s185_s25 }
   0x7   : > { %s171_s28 = sshll.u32 %s832_s1, 4  ;;  %s195_s6 = sshll.u32 %s834_s3, 4  ;;  %s172_s28 = int_to_ptr.hbm [resolvable:$true] %s171_s28  ;;  %s196_s6 = int_to_ptr.hbm [resolvable:$true] %s195_s6 }
   0x8   : > { %p541_p4 = pneg %p773_p3  ;;  %s724_s8 = smov [#allocation2]  }
   0x9   : > { %s173_s9 = sshll.u32 %s724_s8, 4  ;;  %s725_s10 = smov [#allocation6]   ;;  %s174_s9 = int_to_ptr.vmem [resolvable:$true] %s173_s9 }
   0xa   : > { %p787_p5 = pnand %p554_p2, %p541_p4  ;;  %s197_s11 = sshll.u32 %s725_s10, 4  ;;  %s198_s11 = int_to_ptr.vmem [resolvable:$true] %s197_s11 }
   0xb   : > { %s207_s14 = sshll.u32 %s835_s4, 4  ;;  %s726_s15 = smov [#allocation7]   ;;  %s208_s14 = int_to_ptr.hbm [resolvable:$true] %s207_s14 }
   0xc   : > { %547 = dma.hbm_to_vmem [thread:$0]  (!%p787_p5), %s184_s21, 128, %s186_s25, [#allocation5]  }
   0xd   : > { %544 = dma.hbm_to_vmem [thread:$0]  (!%p787_p5), %s172_s28, 128, %s174_s9, [#allocation3]  }
   0xe   : > { %550 = dma.hbm_to_vmem [thread:$0]  (!%p787_p5), %s196_s6, 64, %s198_s11, [#allocation5]  }
   0xf   : > { %s209_s16 = sshll.u32 %s726_s15, 4  ;;  %230 = sbr.rel (%p773_p3) target bundleno = 460 (0x1cc), region = 40  ;;  %s210_s16 = int_to_ptr.vmem [resolvable:$true] %s209_s16 }
  0x10   : > { %553 = dma.hbm_to_vmem [thread:$0]  (!%p787_p5), %s208_s14, 64, %s210_s16, [#allocation8]  }
  0x14   : > { %708 = dma.done.wait (%p554_p2), [#allocation3], 128  }
  0x15   : > { %710 = vsyncadd (%p554_p2), [#allocation3], 4294967168 }
  0x16   : > { %712 = dma.done.wait (%p554_p2), [#allocation5], 192  }
  0x17   : > { %714 = vsyncadd (%p554_p2), [#allocation5], 4294967104 }
  0x18   : > { %716 = dma.done.wait (%p554_p2), [#allocation8], 64  }
  0x19   : > { %718 = vsyncadd (%p554_p2), [#allocation8], 4294967232  ;;  %p274_p6 = scmp.lt.s32.totalorder %s768_s22, 1  ;;  %v727_v3 = vmov 2048.0   ;;  %v286_v4 = vld [vmem:[#allocation2] sm:$0xff]  ;;  %v728_v5 = vmov 0  }
  0x1a   : > { %579 = vrcp.f32 %v727_v3  ;;  %576 = vset.pattern.permute.xlu1 %v728_v5  ;;  %577 = vset.pattern.permute.xlu2 %v728_v5  ;;  %v287_v8 = vld [vmem:[#allocation4] sm:$0xff]  ;;  %v349_v33 = vld [vmem:[#allocation7] sm:$0xf]  ;;  %v348_v53 = vld [vmem:[#allocation6] sm:$0xf]  ;;  %vm355_vm4 = vcmask 64512  }
  0x1b   : > { %s840_s22 = smov (!%p274_p6, %s768_s22), 1  ;;  %334 = vperm.xlu1 %576, %v286_v4   ;;  %578 = vset.pattern.permute.xlu0 %v728_v5  ;;  %vm402_vm5 = vcmask 1043456  }
  0x1c   : > { %s523_s17 = sshll.u32 %s840_s22, 4  ;;  %352 = vperm.xlu2 %577, %v349_v33   ;;  %s524_s23 = sshll.u32 %s840_s22, 3 }
  0x1d   : > { %s278_s21 = scalar_lea.vmem %s831_s0, %s523_s17  ;;  %s283_s26 = scalar_lea.vmem %s836_s5, %s524_s23 }
  0x1e   : > { %v284_v0 = vld [vmem:[%s278_s21] sm:$0xff]  ;;  %v285_v1 = vld [vmem:[%s278_s21 + $0x8] sm:$0xff] }
  0x1f   : > { %v288_v2 = vadd.f32 %v285_v1, %v284_v0 }
  0x20   : > { %v580_v6 = vpop.eup %579 }
  0x21   : > { %289 = vadd.xlane.f32.xlu0 %v288_v2  ;;  %v298_v7 = vmul.f32 2048.0, %v580_v6  ;;  %vm302_vm0 = vweird.f32 %v580_v6 }
  0x23   : > { %v299_v9 = vsub.f32 1.0, %v298_v7  ;;  %341 = vperm.xlu1 %576, %v287_v8  }
  0x25   : > { %v300_v12 = vmul.f32 %v580_v6, %v299_v9 }
  0x27   : > { %v301_v15 = vadd.f32 %v580_v6, %v300_v12 }
  0x29   : > { %v303_v18 = vsel %vm302_vm0, %v580_v6, %v301_v15 }
  0x76   : > { %v353_v54 = vpop.permute.xlu2 %352 }
  0x8d   : > { %v335_v39 = vpop.permute.xlu1 %334 }
  0x94   : > { %v290_v10 = vpop.xlane.xlu0 %289 }
  0x95   : > { %v291_v11 = vrot.slane %v290_v10, 4  ;;  %v342_v48 = vpop.permute.xlu1 %341 }
  0x97   : > { %v292_v13 = vadd.f32 %v291_v11, %v290_v10 }
  0x99   : > { %v293_v14 = vrot.slane %v292_v13, 2 }
  0x9b   : > { %v294_v16 = vadd.f32 %v293_v14, %v292_v13 }
  0x9d   : > { %v295_v17 = vrot.slane %v294_v16, 1 }
  0x9f   : > { %v296_v19 = vadd.f32 %v295_v17, %v294_v16 }
  0xa1   : > { %v304_v20 = vmul.f32 %v303_v18, %v296_v19 }
  0xa3   : > { %v305_v21 = vsub.f32 %v284_v0, %v304_v20  ;;  %v306_v22 = vsub.f32 %v285_v1, %v304_v20 }
  0xa5   : > { %v307_v23 = vmul.f32 %v305_v21, %v305_v21  ;;  %v308_v24 = vmul.f32 %v306_v22, %v306_v22 }
  0xa7   : > { %v309_v25 = vadd.f32 %v308_v24, %v307_v23 }
  0xa9   : > { %310 = vadd.xlane.f32.xlu0 %v309_v25 }
 0x11c   : > { %v311_v26 = vpop.xlane.xlu0 %310 }
 0x11d   : > { %v312_v27 = vrot.slane %v311_v26, 4 }
 0x11f   : > { %v313_v28 = vadd.f32 %v312_v27, %v311_v26 }
 0x121   : > { %v314_v29 = vrot.slane %v313_v28, 2 }
 0x123   : > { %v315_v30 = vadd.f32 %v314_v29, %v313_v28 }
 0x125   : > { %v316_v31 = vrot.slane %v315_v30, 1 }
 0x127   : > { %v317_v32 = vadd.f32 %v316_v31, %v315_v30 }
 0x129   : > { %v318_v34 = vmul.f32 %v317_v32, %v303_v18 }
 0x12b   : > { %v319_v35 = vadd.f32 1e-05, %v318_v34 }
 0x12d   : > { %581 = vrsqrt.f32 %v319_v35  ;;  %vm326_vm2 = vweird.f32 %v319_v35 }
 0x133   : > { %v582_v36 = vpop.eup %581 }
 0x134   : > { %v321_v37 = vmul.f32 %v582_v36, %v319_v35  ;;  %vm327_vm1 = vweird.f32 %v582_v36 }
 0x135   : > { %vm328_vm3 = vmor %vm326_vm2, %vm327_vm1 }
 0x136   : > { %v322_v38 = vmul.f32 %v582_v36, %v321_v37 }
 0x138   : > { %v323_v40 = vmul.f32 0.5, %v322_v38 }
 0x13a   : > { %v324_v41 = vsub.f32 1.5, %v323_v40 }
 0x13c   : > { %v325_v42 = vmul.f32 %v582_v36, %v324_v41 }
 0x13e   : > { %v329_v43 = vsel %vm328_vm3, %v582_v36, %v325_v42 }
 0x13f   : > { %v330_v44 = vmul.f32 %v329_v43, %v305_v21  ;;  %v331_v45 = vmul.f32 %v329_v43, %v306_v22 }
 0x141   : > { %v337_v46 = vmul.f32 %v335_v39, %v330_v44  ;;  %v338_v47 = vmul.f32 %v335_v39, %v331_v45 }
 0x143   : > { %v344_v49 = vadd.f32 %v342_v48, %v337_v46  ;;  %v345_v50 = vadd.f32 %v342_v48, %v338_v47 }
 0x145   : > { %v346_v51 = vmax.f32 %v344_v49, 0.0  ;;  %v347_v52 = vmax.f32 %v345_v50, 0.0 }
 0x147   : > { %374 = vmatpush.msra.mxu0 %v346_v51  ;;  %394 = vmatpush.msra.mxu1 %v347_v52 }
 0x148   : > { %519 = vmatmul.msk.f32.vlgmr.msra.gmra.mxu0 %vm355_vm4, %v348_v53  ;;  %520 = vmatmul.msk.f32.vlgmr.msra.gmra.mxu1 %vm355_vm4, %v348_v53 }
 0x1c5   : > { %v376_v55 = vpop.f32.mrf.mxu0  ;;  %v396_v56 = vpop.f32.mrf.mxu1 }
 0x1c6   : > { %v397_v57 = vadd.f32 %v396_v56, %v353_v54  ;;  %v377_v58 = vadd.f32 %v376_v55, %v353_v54 }
 0x1c8   : > { %v401_v59 = vrot.slane %v397_v57, 4 }
 0x1ca   : > { %v403_v60 = vsel %vm402_vm5, %v377_v58, %v401_v59 }
 0x1cb   : > { %405 = vst [vmem:[%s283_s26] sm:$0xff] %v403_v60 }
 0x1cc PF: > { %s18_s18 = sadd.s32 1, %s721_s18  }
 0x1cd   : > { %p15_p7 = scmp.ge.s32.totalorder %s18_s18, 4  }
 0x1cf   :  { %17 = sbr.rel (!%p15_p7) target bundleno = 3 (0x3), region = 87 }
 0x1d4   :  { %427 = vsyncpa [#allocation3], 1 }
 0x1d5   :  { %429 = vsyncpa [#allocation3 + $0x1], 1 }
 0x1d6   :  { %430 = vsyncpa [#allocation5], 1 }
 0x1d7   :  { %431 = vsyncpa [#allocation8], 1 }

// kernel: autoencoder_fwd.6
= control target key start
LH: loop header
LB: loop body
LE: loop exit
PB: predicated region body
PF: predicated region fallthrough
CT: control target
= control target key end

     0   :  { %s4078_s0 = inlined_call_operand.vmem [shape: f32[2,16,64], index: 0, kind: input, shape index: {}]   ;;  %s4079_s1 = inlined_call_operand.hbm [shape: f32[9,64,64], index: 1, kind: input, shape index: {}]   ;;  %s4080_s2 = inlined_call_operand.hbm [shape: f32[64,256], index: 2, kind: input, shape index: {}]   ;;  %s4081_s3 = inlined_call_operand.hbm [shape: f32[16,1], index: 3, kind: input, shape index: {}]   ;;  %s4082_s4 = inlined_call_operand.hbm [shape: f32[16,1], index: 4, kind: input, shape index: {}]   ;;  %s4083_s5 = inlined_call_operand.hbm [shape: f32[4,16], index: 5, kind: input, shape index: {}]   ;;  %s4084_s6 = inlined_call_operand.hbm [shape: f32[4,1], index: 6, kind: input, shape index: {}]   ;;  %s4085_s7 = inlined_call_operand.hbm [shape: f32[4,1], index: 7, kind: input, shape index: {}]   ;;  %s4086_s8 = inlined_call_operand.hbm [shape: f32[4,1], index: 8, kind: input, shape index: {}]   ;;  %s4087_s9 = inlined_call_operand.hbm [shape: f32[9,4,4], index: 9, kind: input, shape index: {}]   ;;  %s4088_s10 = inlined_call_operand.hbm [shape: f32[4,1], index: 10, kind: input, shape index: {}]   ;;  %s4089_s11 = inlined_call_operand.hbm [shape: f32[4,1], index: 11, kind: input, shape index: {}]   ;;  %s4090_s12 = inlined_call_operand.hbm [shape: f32[4,1], index: 12, kind: input, shape index: {}]   ;;  %s4091_s13 = inlined_call_operand.hbm [shape: f32[9,4,4], index: 13, kind: input, shape index: {}]   ;;  %s4092_s14 = inlined_call_operand.hbm [shape: f32[4,1], index: 14, kind: input, shape index: {}]   ;;  %s4093_s15 = inlined_call_operand.hbm [shape: f32[4,1], index: 15, kind: input, shape index: {}]   ;;  %s4094_s16 = inlined_call_operand.hbm [shape: f32[4,1], index: 16, kind: input, shape index: {}]   ;;  %s4095_s17 = inlined_call_operand.hbm [shape: f32[8,4], index: 17, kind: input, shape index: {}]   ;;  %s4096_s18 = inlined_call_operand.hbm [shape: f32[8,1], index: 18, kind: input, shape index: {}]   ;;  %s4097_s19 = inlined_call_operand.vmem [shape: f32[2,8,256], index: 19, kind: output, shape index: {}]  }
   0x1   :  { %4123 = sst [smem:[#allocation59_spill]] %s4078_s0 }
   0x2   :  { %4124 = sst [smem:[#allocation60_spill]] %s4079_s1 }
   0x3   :  { %4125 = sst [smem:[#allocation61_spill]] %s4080_s2 }
   0x4   :  { %4126 = sst [smem:[#allocation62_spill]] %s4081_s3 }
   0x5   :  { %4127 = sst [smem:[#allocation63_spill]] %s4082_s4 }
   0x6   :  { %4128 = sst [smem:[#allocation64_spill]] %s4097_s19 }
   0x7   :  { %24 = vsyncpa [#allocation3], 0 }
   0x8   :  { %25 = vsyncpa [#allocation5], 0 }
   0x9   :  { %26 = vsyncpa [#allocation8], 0 }
   0xa   :  { %27 = vsyncpa [#allocation11], 0 }
   0xb   :  { %28 = vsyncpa [#allocation14], 0 }
   0xc   :  { %29 = vsyncpa [#allocation17], 0 }
   0xd   :  { %30 = vsyncpa [#allocation20], 0 }
   0xe   :  { %31 = vsyncpa [#allocation23], 0 }
   0xf   :  { %32 = vsyncpa [#allocation26], 0 }
  0x10   :  { %33 = vsyncpa [#allocation29], 0  ;;  %s3492_s0 = smov 0  }
  0x11 LB: > { %4129 = sst [smem:[#allocation40_spill]] %s3363_s0  ;;  %s3501_s22 = sadd.s32 4294967295, %s3363_s0   ;;  %s3363_s0 = sphi %s3492_s0, %s39_s0  }
  0x12   : > { %s4130_s21 = sld [smem:[#allocation61_spill]]  ;;  %p2458_p0 = scmp.ge.s32.totalorder %s3363_s0, 1 }
  0x13   : > { %4131 = sst [smem:[#allocation41_spill]] %s3501_s22  ;;  %p474_p1 = scmp.lt.s32.totalorder %s3363_s0, 3 }
  0x14   : > { %p2691_p2 = scmp.eq.s32.totalorder %s3501_s22, 0  ;;  %s3365_s23 = smov [#allocation4]  }
  0x15   : > { %p3506_p3 = pnand %p2458_p0, %p474_p1  ;;  %s501_s24 = sshll.u32 %s3365_s23, 4  ;;  %s502_s24 = int_to_ptr.vmem [resolvable:$true] %s501_s24 }
  0x16   : > { %s4134_s4 = sld [smem:[#allocation63_spill]]  ;;  %s3366_s28 = smov [#allocation7]  }
  0x17   : > { %p2636_p4 = pneg %p3506_p3  ;;  %s529_s29 = sshll.u32 %s3366_s28, 4  ;;  %s530_s29 = int_to_ptr.vmem [resolvable:$true] %s529_s29 }
  0x18   : > { %s499_s1 = sshll.u32 %s4130_s21, 4  ;;  %s3367_s30 = smov 256   ;;  %s500_s1 = int_to_ptr.hbm [resolvable:$true] %s499_s1 }
  0x19   : > { %p3514_p5 = pnand %p2691_p2, %p2636_p4  ;;  %s3368_s20 = smov 16  }
  0x1a   : > { %s554_s0 = sshll.u32 %s4084_s6, 4  ;;  %s4101_s19 = smov 128   ;;  %s555_s0 = int_to_ptr.hbm [resolvable:$true] %s554_s0 }
  0x1b   : > { %2642 = dma.hbm_to_vmem [thread:$0]  (!%p3514_p5), %s500_s1, 2048, %s502_s24, [#allocation5], %s3367_s30, %s3367_s30, %s3368_s20  }
  0x1c   : > { %s527_s27 = sshll.u32 %s4134_s4, 4  ;;  %s4103_s22 = smov 8   ;;  %s528_s27 = int_to_ptr.hbm [resolvable:$true] %s527_s27 }
  0x1d   : > { %2648 = dma.hbm_to_vmem [thread:$0]  (!%p3514_p5), %s528_s27, 256, %s530_s29, [#allocation8], %s4101_s19, %s4101_s19, %s4103_s22  }
  0x1e   : > { %s3371_s3 = smov [#allocation10]   ;;  %s578_s1 = sshll.u32 %s4086_s8, 4  ;;  %s579_s1 = int_to_ptr.hbm [resolvable:$true] %s578_s1 }
  0x1f   : > { %s556_s26 = sshll.u32 %s3371_s3, 4  ;;  %s604_s20 = sshll.u32 %s4088_s10, 4  ;;  %s557_s26 = int_to_ptr.vmem [resolvable:$true] %s556_s26  ;;  %s605_s20 = int_to_ptr.hbm [resolvable:$true] %s604_s20 }
  0x20   : > { %2654 = dma.hbm_to_vmem [thread:$0]  (!%p3514_p5), %s555_s0, 64, %s557_s26, [#allocation11]  }
  0x21   : > { %s3372_s21 = smov [#allocation13]   ;;  %s3373_s27 = smov [#allocation16]  }
  0x22   : > { %s580_s23 = sshll.u32 %s3372_s21, 4  ;;  %s606_s29 = sshll.u32 %s3373_s27, 4  ;;  %s581_s23 = int_to_ptr.vmem [resolvable:$true] %s580_s23  ;;  %s607_s29 = int_to_ptr.vmem [resolvable:$true] %s606_s29 }
  0x23   : > { %2660 = dma.hbm_to_vmem [thread:$0]  (!%p3514_p5), %s579_s1, 64, %s581_s23, [#allocation14]  }
  0x24   : > { %s628_s28 = sshll.u32 %s4090_s12, 4  ;;  %s654_s24 = sshll.u32 %s4092_s14, 4  ;;  %s629_s28 = int_to_ptr.hbm [resolvable:$true] %s628_s28  ;;  %s655_s24 = int_to_ptr.hbm [resolvable:$true] %s654_s24 }
  0x25   : > { %2666 = dma.hbm_to_vmem [thread:$0]  (!%p3514_p5), %s605_s20, 64, %s607_s29, [#allocation17]  }
  0x26   : > { %s3374_s30 = smov [#allocation19]   ;;  %s3375_s1 = smov [#allocation22]  }
  0x27   : > { %s630_s21 = sshll.u32 %s3374_s30, 4  ;;  %s656_s23 = sshll.u32 %s3375_s1, 4  ;;  %s631_s21 = int_to_ptr.vmem [resolvable:$true] %s630_s21  ;;  %s657_s23 = int_to_ptr.vmem [resolvable:$true] %s656_s23 }
  0x28   : > { %2672 = dma.hbm_to_vmem [thread:$0]  (!%p3514_p5), %s629_s28, 64, %s631_s21, [#allocation20]  }
  0x29   : > { %s678_s3 = sshll.u32 %s4094_s16, 4  ;;  %s4135_s0 = sld [smem:[#allocation60_spill]]  ;;  %s679_s3 = int_to_ptr.hbm [resolvable:$true] %s678_s3 }
  0x2a   : > { %2678 = dma.hbm_to_vmem [thread:$0]  (!%p3514_p5), %s655_s24, 64, %s657_s23, [#allocation23]  }
  0x2b   : > { %s3376_s30 = smov [#allocation25]   ;;  %s3377_s28 = smov [#allocation2]  }
  0x2c   : > { %s680_s19 = sshll.u32 %s3376_s30, 4  ;;  %s487_s21 = sshll.u32 %s3377_s28, 4  ;;  %s681_s19 = int_to_ptr.vmem [resolvable:$true] %s680_s19  ;;  %s488_s21 = int_to_ptr.vmem [resolvable:$true] %s487_s21 }
  0x2d   : > { %2684 = dma.hbm_to_vmem [thread:$0]  (!%p3514_p5), %s679_s3, 64, %s681_s19, [#allocation26]  }
  0x2e   : > { %s4136_s4 = sld [smem:[#allocation62_spill]]  ;;  %s4137_s24 = smov 8  }
  0x2f   : > { %s485_s26 = sshll.u32 %s4135_s0, 4  ;;  %s4138_s23 = smov 128   ;;  %s486_s26 = int_to_ptr.hbm [resolvable:$true] %s485_s26 }
  0x30   : > { %2639 = dma.hbm_to_vmem [thread:$0]  (!%p3514_p5), %s486_s26, 9216, %s488_s21, [#allocation3], %s4138_s23, %s4138_s23, %s4137_s24  }
  0x31   : > { %s542_s0 = sshll.u32 %s4083_s5, 4  ;;  %s3378_s30 = smov [#allocation6]   ;;  %s543_s0 = int_to_ptr.hbm [resolvable:$true] %s542_s0 }
  0x32   : > { %s515_s19 = sshll.u32 %s3378_s30, 4  ;;  %s3379_s3 = smov [#allocation9]   ;;  %s516_s19 = int_to_ptr.vmem [resolvable:$true] %s515_s19 }
  0x33   : > { %s544_s28 = sshll.u32 %s3379_s3, 4  ;;  %s566_s26 = sshll.u32 %s4085_s7, 4  ;;  %s545_s28 = int_to_ptr.vmem [resolvable:$true] %s544_s28  ;;  %s567_s26 = int_to_ptr.hbm [resolvable:$true] %s566_s26 }
  0x34   : > { %s513_s22 = sshll.u32 %s4136_s4, 4  ;;  %s589_s20 = sshll.u32 %s4087_s9, 4  ;;  %s514_s22 = int_to_ptr.hbm [resolvable:$true] %s513_s22  ;;  %s590_s20 = int_to_ptr.hbm [resolvable:$true] %s589_s20 }
  0x35   : > { %2645 = dma.hbm_to_vmem [thread:$0]  (!%p3514_p5), %s514_s22, 256, %s516_s19, [#allocation5], %s4138_s23, %s4138_s23, %s4137_s24  }
  0x36   : > { %2651 = dma.hbm_to_vmem [thread:$0]  (!%p3514_p5), %s543_s0, 64, %s545_s28, [#allocation8]  }
  0x37   : > { %s3380_s29 = smov [#allocation12]   ;;  %s3381_s22 = smov [#allocation15]  }
  0x38   : > { %s568_s30 = sshll.u32 %s3380_s29, 4  ;;  %s591_s24 = sshll.u32 %s3381_s22, 4  ;;  %s569_s30 = int_to_ptr.vmem [resolvable:$true] %s568_s30  ;;  %s592_s24 = int_to_ptr.vmem [resolvable:$true] %s591_s24 }
  0x39   : > { %2657 = dma.hbm_to_vmem [thread:$0]  (!%p3514_p5), %s567_s26, 64, %s569_s30, [#allocation11]  }
  0x3a   : > { %s3382_s23 = smov 64   ;;  %s3383_s19 = smov 4  }
  0x3b   : > { %2663 = dma.hbm_to_vmem [thread:$0]  (!%p3514_p5), %s590_s20, 576, %s592_s24, [#allocation14], %s3382_s23, %s3382_s23, %s3383_s19  }
  0x3c   : > { %s616_s28 = sshll.u32 %s4089_s11, 4  ;;  %s3384_s1 = smov [#allocation18]   ;;  %s617_s28 = int_to_ptr.hbm [resolvable:$true] %s616_s28 }
  0x3d   : > { %s618_s27 = sshll.u32 %s3384_s1, 4  ;;  %s639_s26 = sshll.u32 %s4091_s13, 4  ;;  %s619_s27 = int_to_ptr.vmem [resolvable:$true] %s618_s27  ;;  %s640_s26 = int_to_ptr.hbm [resolvable:$true] %s639_s26 }
  0x3e   : > { %2669 = dma.hbm_to_vmem [thread:$0]  (!%p3514_p5), %s617_s28, 64, %s619_s27, [#allocation17]  }
  0x3f   : > { %s3385_s29 = smov [#allocation21]   ;;  %s666_s24 = sshll.u32 %s4093_s15, 4  ;;  %s667_s24 = int_to_ptr.hbm [resolvable:$true] %s666_s24 }
  0x40   : > { %s641_s30 = sshll.u32 %s3385_s29, 4  ;;  %s690_s1 = sshll.u32 %s4095_s17, 4  ;;  %s642_s30 = int_to_ptr.vmem [resolvable:$true] %s641_s30  ;;  %s691_s1 = int_to_ptr.hbm [resolvable:$true] %s690_s1 }
  0x41   : > { %2675 = dma.hbm_to_vmem [thread:$0]  (!%p3514_p5), %s640_s26, 576, %s642_s30, [#allocation20], %s3382_s23, %s3382_s23, %s3383_s19  }
  0x42   : > { %s3386_s21 = smov [#allocation24]   ;;  %s3387_s28 = smov [#allocation27]  }
  0x43   : > { %s668_s4 = sshll.u32 %s3386_s21, 4  ;;  %s692_s27 = sshll.u32 %s3387_s28, 4  ;;  %s669_s4 = int_to_ptr.vmem [resolvable:$true] %s668_s4  ;;  %s693_s27 = int_to_ptr.vmem [resolvable:$true] %s692_s27 }
  0x44   : > { %2681 = dma.hbm_to_vmem [thread:$0]  (!%p3514_p5), %s667_s24, 64, %s669_s4, [#allocation23]  }
  0x45   : > { %s702_s22 = sshll.u32 %s4096_s18, 4  ;;  %s3388_s23 = smov [#allocation28]   ;;  %s703_s22 = int_to_ptr.hbm [resolvable:$true] %s702_s22 }
  0x46   : > { %2687 = dma.hbm_to_vmem [thread:$0]  (!%p3514_p5), %s691_s1, 128, %s693_s27, [#allocation26]  }
  0x47   : > { %s704_s19 = sshll.u32 %s3388_s23, 4  ;;  %725 = sbr.rel (%p3506_p3) target bundleno = 3107 (0xc23), region = 96  ;;  %s705_s19 = int_to_ptr.vmem [resolvable:$true] %s704_s19 }
  0x48   : > { %2690 = dma.hbm_to_vmem [thread:$0]  (!%p3514_p5), %s703_s22, 128, %s705_s19, [#allocation29]  }
  0x4c   : > { %s4139_s26 = sld [smem:[#allocation41_spill]] }
  0x4d   : > { %3322 = dma.done.wait (%p2691_p2), [#allocation3], 9216  }
  0x4e   : > { %3324 = vsyncadd (%p2691_p2), [#allocation3], 4294958080 }
  0x4f   : > { %3326 = dma.done.wait (%p2691_p2), [#allocation5], 2304  }
  0x50   : > { %3328 = vsyncadd (%p2691_p2), [#allocation5], 4294964992 }
  0x51   : > { %3330 = dma.done.wait (%p2691_p2), [#allocation8], 320  }
  0x52   : > { %3332 = vsyncadd (%p2691_p2), [#allocation8], 4294966976 }
  0x53   : > { %3334 = dma.done.wait (%p2691_p2), [#allocation11], 128  }
  0x54   : > { %3336 = vsyncadd (%p2691_p2), [#allocation11], 4294967168 }
  0x55   : > { %3338 = dma.done.wait (%p2691_p2), [#allocation14], 640  }
  0x56   : > { %3340 = vsyncadd (%p2691_p2), [#allocation14], 4294966656 }
  0x57   : > { %3342 = dma.done.wait (%p2691_p2), [#allocation17], 128  }
  0x58   : > { %3344 = vsyncadd (%p2691_p2), [#allocation17], 4294967168 }
  0x59   : > { %3346 = dma.done.wait (%p2691_p2), [#allocation20], 640  }
  0x5a   : > { %3348 = vsyncadd (%p2691_p2), [#allocation20], 4294966656 }
  0x5b   : > { %3350 = dma.done.wait (%p2691_p2), [#allocation23], 128  }
  0x5c   : > { %3352 = vsyncadd (%p2691_p2), [#allocation23], 4294967168 }
  0x5d   : > { %3354 = dma.done.wait (%p2691_p2), [#allocation26], 192  }
  0x5e   : > { %3356 = vsyncadd (%p2691_p2), [#allocation26], 4294967104 }
  0x5f   : > { %3358 = dma.done.wait (%p2691_p2), [#allocation29], 128  }
  0x60   : > { %3360 = vsyncadd (%p2691_p2), [#allocation29], 4294967168  ;;  %p867_p6 = scmp.lt.s32.totalorder %s4139_s26, 1  ;;  %s4140_s24 = sld [smem:[#allocation59_spill]]  ;;  %vm883_vm0 = vcmask 523264   ;;  %v3389_v4 = vmov 1024.0  }
  0x61   : > { %2765 = vrcp.f32 %v3389_v4  ;;  %v882_v8 = vld [vmem:[#allocation7 + $0x8] sm:$0xff]  ;;  %v880_v9 = vld [vmem:[#allocation6 + $0x8] sm:$0xff]  ;;  %v3390_v10 = vmov 0   ;;  %v879_v30 = vld [vmem:[#allocation6] sm:$0xff]  ;;  %vm969_vm5 = vcmask 130048   ;;  %vm995_vm6 = vcmask 519168  }
  0x62   : > { %s4179_s26 = smov (!%p867_p6, %s4139_s26), 1  ;;  %2763 = vset.pattern.permute.xlu0 %v3390_v10  ;;  %2764 = vset.pattern.permute.xlu1 %v3390_v10  ;;  %v993_v17 = vld [vmem:[#allocation12] sm:$0xf]  ;;  %v994_v24 = vld [vmem:[#allocation13] sm:$0xf]  ;;  %v881_v34 = vld [vmem:[#allocation7] sm:$0xff] }
  0x63   : > { %s2562_s2 = sshll.u32 %s4179_s26, 4  ;;  %2762 = vset.pattern.permute.xlu2 %v3390_v10  ;;  %v963_v33 = vld [vmem:[#allocation10] sm:$0xf]  ;;  %vm999_vm7 = vcmask 1043456   ;;  %vm1117_vm12 = vcmask 31744   ;;  %s4176_s21 = sld [smem:[#allocation64_spill]] }
  0x64   : > { %943 = vperm.xlu2 %2762, %v880_v9   ;;  %v3391_v9 = vmov 256.0  }
  0x66   : > { %s871_s0 = scalar_lea.vmem %s4140_s24, %s2562_s2 }
  0x67   : > { %v877_v0 = vld [vmem:[%s871_s0] sm:$0xff]  ;;  %v878_v2 = vld [vmem:[%s871_s0 + $0x8] sm:$0xff]  ;;  %v2766_v6 = vpop.eup %2765 }
  0x68   : > { %v884_v1 = vsel %vm883_vm0, %v877_v0, 0.0  ;;  %v887_v3 = vsel %vm883_vm0, %v878_v2, 0.0  ;;  %v898_v7 = vmul.f32 1024.0, %v2766_v6  ;;  %vm902_vm1 = vweird.f32 %v2766_v6 }
  0x69   : > { %885 = vadd.xlane.f32.xlu0 %v884_v1  ;;  %v962_v1 = vld [vmem:[#allocation9] sm:$0xf]  ;;  %s876_s4 = scalar_lea.vmem %s4176_s21, %s2562_s2 }
  0x6a   : > { %v899_v12 = vsub.f32 1.0, %v898_v7  ;;  %v1582_v7 = vld [vmem:[#allocation18] sm:$0xf] }
  0x6c   : > { %v900_v15 = vmul.f32 %v2766_v6, %v899_v12  ;;  %938 = vperm.xlu2 %2762, %v879_v30   ;;  %v3691_v30 = vld [vmem:[#allocation2 + $0x28] sm:$0xff] }
  0x6e   : > { %v901_v19 = vadd.f32 %v2766_v6, %v900_v15 }
  0x70   : > { %v903_v22 = vsel %vm902_vm1, %v2766_v6, %v901_v19  ;;  %v1053_v6 = vld [vmem:[#allocation16] sm:$0xf] }
  0x71   : > { %888 = vadd.xlane.f32.xlu0 %v887_v3 }
  0x74   : > { %966 = vperm.xlu2 %2762, %v963_v33   ;;  %v3700_v33 = vld [vmem:[#allocation2 + $0x10] sm:$0xff] }
  0x85   : > { %955 = vperm.xlu0 %2763, %v882_v8   ;;  %v1633_v8 = vld [vmem:[#allocation22] sm:$0xf] }
  0x8d   : > { %1042 = vperm.xlu0 %2763, %v993_v17  }
  0x95   : > { %1048 = vperm.xlu0 %2763, %v994_v24  }
  0xbe   : > { %v944_v48 = vpop.permute.xlu2 %943 }
  0xc6   : > { %v939_v56 = vpop.permute.xlu2 %938 }
  0xdc   : > { %v886_v5 = vpop.xlane.xlu0 %885 }
  0xe4   : > { %v889_v11 = vpop.xlane.xlu0 %888 }
  0xe5   : > { %v890_v13 = vadd.f32 %v889_v11, %v886_v5 }
  0xe7   : > { %v891_v14 = vrot.slane %v890_v13, 4 }
  0xe9   : > { %v892_v16 = vadd.f32 %v891_v14, %v890_v13 }
  0xeb   : > { %v893_v18 = vrot.slane %v892_v16, 2 }
  0xed   : > { %v894_v20 = vadd.f32 %v893_v18, %v892_v16 }
  0xef   : > { %v895_v21 = vrot.slane %v894_v20, 1 }
  0xf1   : > { %v896_v23 = vadd.f32 %v895_v21, %v894_v20 }
  0xf3   : > { %v904_v25 = vmul.f32 %v903_v22, %v896_v23 }
  0xf5   : > { %v905_v26 = vsub.f32 %v877_v0, %v904_v25  ;;  %v906_v29 = vsub.f32 %v878_v2, %v904_v25  ;;  %v967_v2 = vpop.permute.xlu2 %966 }
  0xf7   : > { %v907_v27 = vmul.f32 %v905_v26, %v905_v26  ;;  %v908_v31 = vmul.f32 %v906_v29, %v906_v29  ;;  %v956_v60 = vpop.permute.xlu0 %955 }
  0xf9   : > { %v909_v28 = vsel %vm883_vm0, %v907_v27, 0.0  ;;  %v912_v32 = vsel %vm883_vm0, %v908_v31, 0.0  ;;  %v3694_v31 = vld [vmem:[#allocation2 + $0x20] sm:$0xff] }
  0xfa   : > { %910 = vadd.xlane.f32.xlu1 %v909_v28  ;;  %v3685_v28 = vld [vmem:[#allocation2 + $0x38] sm:$0xff] }
 0x102   : > { %913 = vadd.xlane.f32.xlu1 %v912_v32  ;;  %v3697_v32 = vld [vmem:[#allocation2 + $0x18] sm:$0xff] }
 0x11b   : > { %950 = vperm.xlu1 %2764, %v881_v34   ;;  %v3703_v34 = vld [vmem:[#allocation2 + $0x8] sm:$0xff] }
 0x16d   : > { %v911_v35 = vpop.xlane.xlu1 %910 }
 0x175   : > { %v914_v36 = vpop.xlane.xlu1 %913 }
 0x176   : > { %v915_v37 = vadd.f32 %v914_v36, %v911_v35  ;;  %v3706_v35 = vld [vmem:[#allocation2] sm:$0xff]  ;;  %v3708_v36 = vld [vmem:[#allocation2 + $0x78] sm:$0xff] }
 0x177   : > { %1103 = vmatpush.msra.mxu2 %v3708_v36 }
 0x178   : > { %v916_v38 = vrot.slane %v915_v37, 4 }
 0x17a   : > { %v917_v39 = vadd.f32 %v916_v38, %v915_v37  ;;  %v3710_v37 = vld [vmem:[#allocation2 + $0xb8] sm:$0xff] }
 0x17b   : > { %v3714_v38 = vld [vmem:[#allocation2 + $0xf8] sm:$0xff]  ;;  %1187 = vmatpush.msra.mxu0 %v3710_v37 }
 0x17c   : > { %v918_v40 = vrot.slane %v917_v39, 2 }
 0x17e   : > { %v919_v41 = vadd.f32 %v918_v40, %v917_v39  ;;  %v3718_v39 = vld [vmem:[#allocation2 + $0x70] sm:$0xff] }
 0x17f   : > { %v3720_v40 = vld [vmem:[#allocation2 + $0xb0] sm:$0xff]  ;;  %1104 = vmatpush.msra.mxu2 %v3718_v39 }
 0x180   : > { %v920_v42 = vrot.slane %v919_v41, 1  ;;  %1188 = vmatpush.msra.mxu0 %v3720_v40 }
 0x182   : > { %v921_v43 = vadd.f32 %v920_v42, %v919_v41  ;;  %v3723_v41 = vld [vmem:[#allocation2 + $0xf0] sm:$0xff] }
 0x184   : > { %v922_v44 = vmul.f32 %v921_v43, %v903_v22  ;;  %v3727_v43 = vld [vmem:[#allocation2 + $0x68] sm:$0xff] }
 0x185   : > { %1105 = vmatpush.msra.mxu2 %v3727_v43 }
 0x186   : > { %v923_v45 = vadd.f32 1e-05, %v922_v44  ;;  %v3729_v44 = vld [vmem:[#allocation2 + $0xa8] sm:$0xff] }
 0x187   : > { %1189 = vmatpush.msra.mxu0 %v3729_v44 }
 0x188   : > { %2767 = vrsqrt.f32 %v923_v45  ;;  %vm930_vm3 = vweird.f32 %v923_v45 }
 0x189   : > { %2769 = vrcp.f32 %v3391_v9 }
 0x18d   : > { %v951_v57 = vpop.permute.xlu1 %950 }
 0x18e   : > { %v2768_v46 = vpop.eup %2767 }
 0x18f   : > { %v925_v47 = vmul.f32 %v2768_v46, %v923_v45  ;;  %vm931_vm2 = vweird.f32 %v2768_v46  ;;  %v2770_v10 = vpop.eup %2769 }
 0x190   : > { %vm932_vm4 = vmor %vm930_vm3, %vm931_vm2  ;;  %v1008_v11 = vmul.f32 256.0, %v2770_v10  ;;  %vm1012_vm8 = vweird.f32 %v2770_v10 }
 0x191   : > { %v926_v49 = vmul.f32 %v2768_v46, %v925_v47 }
 0x192   : > { %v1009_v12 = vsub.f32 1.0, %v1008_v11  ;;  %v1043_v11 = vpop.permute.xlu0 %1042 }
 0x193   : > { %v927_v50 = vmul.f32 0.5, %v926_v49  ;;  %v3739_v49 = vld [vmem:[#allocation2 + $0xa0] sm:$0xff] }
 0x194   : > { %v1010_v16 = vmul.f32 %v2770_v10, %v1009_v12  ;;  %1190 = vmatpush.msra.mxu0 %v3739_v49 }
 0x195   : > { %v928_v51 = vsub.f32 1.5, %v927_v50  ;;  %v3742_v50 = vld [vmem:[#allocation2 + $0xe0] sm:$0xff] }
 0x196   : > { %v1011_v19 = vadd.f32 %v2770_v10, %v1010_v16 }
 0x197   : > { %v929_v52 = vmul.f32 %v2768_v46, %v928_v51 }
 0x198   : > { %v3677_v22 = vsel %vm1012_vm8, %v2770_v10, %v1011_v19 }
 0x199   : > { %v933_v53 = vsel %vm932_vm4, %v2768_v46, %v929_v52  ;;  %v3733_v46 = vld [vmem:[#allocation2 + $0xe8] sm:$0xff]  ;;  %v3746_v52 = vld [vmem:[#allocation2 + $0x58] sm:$0xff] }
 0x19a   : > { %v935_v54 = vmul.f32 %v933_v53, %v906_v29  ;;  %v934_v55 = vmul.f32 %v933_v53, %v905_v26  ;;  %v3688_v29 = vld [vmem:[#allocation2 + $0x30] sm:$0xff]  ;;  %v3748_v53 = vld [vmem:[#allocation2 + $0x98] sm:$0xff] }
 0x19b   : > { %1191 = vmatpush.msra.mxu0 %v3748_v53 }
 0x19c   : > { %v947_v58 = vmul.f32 %v944_v48, %v935_v54  ;;  %v946_v59 = vmul.f32 %v939_v56, %v934_v55  ;;  %v3737_v48 = vld [vmem:[#allocation2 + $0x60] sm:$0xff]  ;;  %v3751_v54 = vld [vmem:[#allocation2 + $0xd8] sm:$0xff]  ;;  %v3755_v56 = vld [vmem:[#allocation2 + $0x50] sm:$0xff] }
 0x19d   : > { %1106 = vmatpush.msra.mxu2 %v3737_v48 }
 0x19e   : > { %v3670_v61 = vadd.f32 %v951_v57, %v946_v59  ;;  %v959_v62 = vadd.f32 %v956_v60, %v947_v58  ;;  %v3757_v57 = vld [vmem:[#allocation2 + $0x90] sm:$0xff]  ;;  %v3764_v60 = vld [vmem:[#allocation2 + $0x48] sm:$0xff] }
 0x19f   : > { %1107 = vmatpush.msra.mxu2 %v3746_v52  ;;  %v3760_v58 = vld [vmem:[#allocation2 + $0xd0] sm:$0xff]  ;;  %1192 = vmatpush.msra.mxu0 %v3757_v57 }
 0x1a0   : > { %4141 = vst [vmem:[#allocation42_spill] sm:$0xff] %v3670_v61  ;;  %v961_v63 = vmax.f32 %v959_v62, 0.0  ;;  %v4105_v0 = vmax.f32 %v3670_v61, 0.0  ;;  %v3766_v62 = vld [vmem:[#allocation2 + $0x88] sm:$0xff]  ;;  %v3892_v61 = vld [vmem:[#allocation2 + $0x218] sm:$0xff] }
 0x1a1   : > { %1108 = vmatpush.msra.mxu2 %v3755_v56  ;;  %1193 = vmatpush.msra.mxu0 %v3766_v62  ;;  %4154 = vst [vmem:[#allocation55_spill] sm:$0xff] %v3892_v61 }
 0x1a2   : > { %987 = vmatpush.msra.mxu1 %v961_v63  ;;  %v3769_v63 = vld [vmem:[#allocation2 + $0xc8] sm:$0xff] }
 0x1a3   : > { %1109 = vmatpush.msra.mxu2 %v3764_v60 }
 0x1a4   : > { %988 = vmatpush.msra.mxu1 %v4105_v0  ;;  %v3886_v0 = vld [vmem:[#allocation2 + $0x220] sm:$0xff] }
 0x1a5   : > { %2501 = vmatmul.msk.f32.vlgmr.msra.gmra.mxu1 %vm969_vm5, %v962_v1  ;;  %4153 = vst [vmem:[#allocation54_spill] sm:$0xff] %v3886_v0 }
 0x1a6   : > { %1073 = vmatpush.msrb.mxu1 %v3685_v28 }
 0x1a8   : > { %1074 = vmatpush.msrb.mxu1 %v3688_v29 }
 0x1aa   : > { %1075 = vmatpush.msrb.mxu1 %v3691_v30 }
 0x1ac   : > { %1076 = vmatpush.msrb.mxu1 %v3694_v31 }
 0x1ae   : > { %1077 = vmatpush.msrb.mxu1 %v3697_v32 }
 0x1b0   : > { %1078 = vmatpush.msrb.mxu1 %v3700_v33 }
 0x1b2   : > { %1079 = vmatpush.msrb.mxu1 %v3703_v34 }
 0x1b4   : > { %1080 = vmatpush.msrb.mxu1 %v3706_v35 }
 0x1b6   : > { %1245 = vmatpush.msra.mxu1 %v3714_v38 }
 0x1b8   : > { %1246 = vmatpush.msra.mxu1 %v3723_v41 }
 0x1ba   : > { %1247 = vmatpush.msra.mxu1 %v3733_v46 }
 0x1bc   : > { %1248 = vmatpush.msra.mxu1 %v3742_v50 }
 0x1be   : > { %1249 = vmatpush.msra.mxu1 %v3751_v54 }
 0x1c0   : > { %1250 = vmatpush.msra.mxu1 %v3760_v58 }
 0x1c2   : > { %1251 = vmatpush.msra.mxu1 %v3769_v63 }
 0x222   : > { %v990_v3 = vpop.f32.mrf.mxu1 }
 0x223   : > { %v991_v4 = vadd.f32 %v990_v3, %v967_v2  ;;  %v3773_v2 = vld [vmem:[#allocation2 + $0x40] sm:$0xff] }
 0x224   : > { %v3775_v3 = vld [vmem:[#allocation2 + $0x80] sm:$0xff]  ;;  %1110 = vmatpush.msra.mxu2 %v3773_v2 }
 0x225   : > { %v996_v5 = vsel %vm995_vm6, %v991_v4, 0.0  ;;  %1194 = vmatpush.msra.mxu0 %v3775_v3 }
 0x226   : > { %997 = vadd.xlane.f32.xlu2 %v996_v5  ;;  %v3779_v5 = vld [vmem:[#allocation2 + $0xc0] sm:$0xff] }
 0x227   : > { %1252 = vmatpush.msra.mxu1 %v3779_v5 }
 0x23e   : > { %1578 = vperm.xlu2 %2762, %v1053_v6  }
 0x246   : > { %1622 = vperm.xlu2 %2762, %v1582_v7  }
 0x24e   : > { %2077 = vperm.xlu2 %2762, %v1633_v8  }
 0x299   : > { %v998_v13 = vpop.xlane.xlu2 %997 }
 0x29a   : > { %v1000_v14 = vsel %vm999_vm7, %v998_v13, 0.0 }
 0x29b   : > { %v1001_v15 = vrot.slane %v1000_v14, 4 }
 0x29d   : > { %v1002_v17 = vadd.f32 %v1001_v15, %v1000_v14 }
 0x29f   : > { %v1003_v18 = vrot.slane %v1002_v17, 2 }
 0x2a1   : > { %v1004_v20 = vadd.f32 %v1003_v18, %v1002_v17  ;;  %v1049_v18 = vpop.permute.xlu0 %1048 }
 0x2a3   : > { %v1005_v21 = vrot.slane %v1004_v20, 1 }
 0x2a5   : > { %v1006_v23 = vadd.f32 %v1005_v21, %v1004_v20  ;;  %v3786_v21 = vld [vmem:[#allocation2 + $0x1b8] sm:$0xff] }
 0x2a6   : > { %4142 = vst [vmem:[#allocation43_spill] sm:$0xff] %v3786_v21 }
 0x2a7   : > { %v1014_v24 = vmul.f32 %v3677_v22, %v1006_v23  ;;  %v3792_v23 = vld [vmem:[#allocation2 + $0x1b0] sm:$0xff] }
 0x2a8   : > { %4143 = vst [vmem:[#allocation44_spill] sm:$0xff] %v3792_v23 }
 0x2a9   : > { %v3680_v25 = vsub.f32 %v991_v4, %v1014_v24  ;;  %v3797_v24 = vld [vmem:[#allocation2 + $0x1a8] sm:$0xff] }
 0x2aa   : > { %4144 = vst [vmem:[#allocation45_spill] sm:$0xff] %v3797_v24 }
 0x2ab   : > { %v1016_v26 = vmul.f32 %v3680_v25, %v3680_v25 }
 0x2ad   : > { %v1017_v27 = vsel %vm995_vm6, %v1016_v26, 0.0  ;;  %v3803_v26 = vld [vmem:[#allocation2 + $0x198] sm:$0xff] }
 0x2ae   : > { %1018 = vadd.xlane.f32.xlu1 %v1017_v27  ;;  %4146 = vst [vmem:[#allocation47_spill] sm:$0xff] %v3803_v26  ;;  %v3808_v27 = vld [vmem:[#allocation2 + $0x190] sm:$0xff] }
 0x2af   : > { %4147 = vst [vmem:[#allocation48_spill] sm:$0xff] %v3808_v27 }
 0x321   : > { %v1019_v42 = vpop.xlane.xlu1 %1018 }
 0x322   : > { %v1020_v45 = vsel %vm999_vm7, %v1019_v42, 0.0  ;;  %v3811_v42 = vld [vmem:[#allocation2 + $0x188] sm:$0xff] }
 0x323   : > { %v1021_v47 = vrot.slane %v1020_v45, 4  ;;  %4148 = vst [vmem:[#allocation49_spill] sm:$0xff] %v3811_v42 }
 0x325   : > { %v1022_v51 = vadd.f32 %v1021_v47, %v1020_v45  ;;  %v3814_v45 = vld [vmem:[#allocation2 + $0x180] sm:$0xff]  ;;  %v1085_v47 = vld [vmem:[#allocation15] sm:$0xf] }
 0x326   : > { %4149 = vst [vmem:[#allocation50_spill] sm:$0xff] %v3814_v45 }
 0x327   : > { %v1023_v55 = vrot.slane %v1022_v51, 2 }
 0x329   : > { %v1024_v59 = vadd.f32 %v1023_v55, %v1022_v51 }
 0x32b   : > { %v1025_v1 = vrot.slane %v1024_v59, 1 }
 0x32d   : > { %v1026_v4 = vadd.f32 %v1025_v1, %v1024_v59  ;;  %v3821_v59 = vld [vmem:[#allocation2 + $0x138] sm:$0xff]  ;;  %v3825_v1 = vld [vmem:[#allocation2 + $0x130] sm:$0xff] }
 0x32f   : > { %v1027_v6 = vmul.f32 %v1026_v4, %v3677_v22  ;;  %v3828_v4 = vld [vmem:[#allocation2 + $0x128] sm:$0xff] }
 0x331   : > { %v1028_v7 = vadd.f32 1e-05, %v1027_v6  ;;  %v1116_v6 = vld [vmem:[#allocation15 + $0x4] sm:$0xf] }
 0x333   : > { %2771 = vrsqrt.f32 %v1028_v7  ;;  %vm1035_vm10 = vweird.f32 %v1028_v7 }
 0x339   : > { %v2772_v8 = vpop.eup %2771 }
 0x33a   : > { %v1030_v9 = vmul.f32 %v2772_v8, %v1028_v7  ;;  %vm1036_vm9 = vweird.f32 %v2772_v8 }
 0x33b   : > { %vm1037_vm11 = vmor %vm1035_vm10, %vm1036_vm9 }
 0x33c   : > { %v1031_v10 = vmul.f32 %v2772_v8, %v1030_v9  ;;  %v3834_v9 = vld [vmem:[#allocation2 + $0x178] sm:$0xff] }
 0x33e   : > { %v1032_v12 = vmul.f32 0.5, %v1031_v10 }
 0x340   : > { %v1033_v13 = vsub.f32 1.5, %v1032_v12  ;;  %v3839_v12 = vld [vmem:[#allocation2 + $0x118] sm:$0xff] }
 0x342   : > { %v1034_v14 = vmul.f32 %v2772_v8, %v1033_v13  ;;  %v3841_v13 = vld [vmem:[#allocation2 + $0x170] sm:$0xff] }
 0x344   : > { %v1038_v15 = vsel %vm1037_vm11, %v2772_v8, %v1034_v14  ;;  %v3832_v8 = vld [vmem:[#allocation2 + $0x120] sm:$0xff]  ;;  %v3846_v14 = vld [vmem:[#allocation2 + $0x110] sm:$0xff] }
 0x345   : > { %v1039_v16 = vmul.f32 %v1038_v15, %v3680_v25  ;;  %v3800_v25 = vld [vmem:[#allocation2 + $0x1a0] sm:$0xff]  ;;  %v3848_v15 = vld [vmem:[#allocation2 + $0x168] sm:$0xff] }
 0x346   : > { %4145 = vst [vmem:[#allocation46_spill] sm:$0xff] %v3800_v25 }
 0x347   : > { %v1045_v17 = vmul.f32 %v1043_v11, %v1039_v16  ;;  %v1200_v11 = vld [vmem:[#allocation15 + $0x8] sm:$0xf]  ;;  %v3852_v16 = vld [vmem:[#allocation2 + $0x108] sm:$0xff] }
 0x349   : > { %v1051_v19 = vadd.f32 %v1049_v18, %v1045_v17  ;;  %v1258_v17 = vld [vmem:[#allocation15 + $0xc] sm:$0xf]  ;;  %v3856_v18 = vld [vmem:[#allocation2 + $0x160] sm:$0xff] }
 0x34b   : > { %v3784_v20 = vmax.f32 %v1051_v19, 0.0  ;;  %v3858_v19 = vld [vmem:[#allocation2 + $0x100] sm:$0xff] }
 0x34d   : > { %2502 = vmatmul.msk.f32.vlgmr.msrb.gmra.mxu1 %vm883_vm0, %v3784_v20  ;;  %2503 = vmatmul.msk.f32.vlgmr.msra.gmra.mxu2 %vm883_vm0, %v3784_v20 }
 0x34e   : > { %2508 = vmatmul.msk.f32.vlgmr.msra.gmra.mxu0 %vm883_vm0, %v3784_v20  ;;  %1419 = vmatpush.msrb.mxu1 %v3786_v21 }
 0x350   : > { %1420 = vmatpush.msrb.mxu1 %v3792_v23  ;;  %v3913_v23 = vld [vmem:[#allocation2 + $0x1f0] sm:$0xff] }
 0x352   : > { %1421 = vmatpush.msrb.mxu1 %v3797_v24 }
 0x354   : > { %1422 = vmatpush.msrb.mxu1 %v3800_v25  ;;  %v1316_v25 = vld [vmem:[#allocation15 + $0x10] sm:$0xf] }
 0x355   : > { %2511 = vmatmul.msk.f32.vlgmr.msra.gmra.mxu1 %vm883_vm0, %v3784_v20 }
 0x356   : > { %1423 = vmatpush.msrb.mxu1 %v3803_v26 }
 0x358   : > { %1424 = vmatpush.msrb.mxu1 %v3808_v27 }
 0x35a   : > { %1425 = vmatpush.msrb.mxu1 %v3811_v42 }
 0x35c   : > { %1426 = vmatpush.msrb.mxu1 %v3814_v45 }
 0x35d   : > { %2520 = vmatmul.msk.f32.vlgmr.msrb.gmra.mxu1 %vm883_vm0, %v3784_v20 }
 0x3ca   : > { %v1082_v51 = vpop.f32.mrf.mxu1 }
 0x3cb   : > { %v1196_v55 = vpop.f32.mrf.mxu0  ;;  %2506 = vmatpush.msk.msra.mxu3 %vm999_vm7, %v1082_v51 }
 0x3cc   : > { %2507 = vmatmul.msk.f32.vlgmr.msra.gmra.mxu3 %vm1117_vm12, %v1085_v47  ;;  %v3862_v47 = vld [vmem:[#allocation2 + $0x158] sm:$0xff] }
 0x3cd   : > { %2509 = vmatpush.msk.msrb.mxu3 %vm999_vm7, %v1196_v55  ;;  %v3866_v55 = vld [vmem:[#allocation2 + $0x238] sm:$0xff] }
 0x3ce   : > { %4150 = vst [vmem:[#allocation51_spill] sm:$0xff] %v3866_v55 }
 0x3cf   : > { %1303 = vmatpush.msra.mxu3 %v3821_v59 }
 0x3d0   : > { %v1112_v7 = vpop.f32.mrf.mxu2 }
 0x3d1   : > { %1304 = vmatpush.msra.mxu3 %v3825_v1  ;;  %2504 = vmatpush.msk.msrb.mxu2 %vm999_vm7, %v1112_v7  ;;  %v3874_v7 = vld [vmem:[#allocation2 + $0x230] sm:$0xff] }
 0x3d2   : > { %2505 = vmatmul.msk.f32.vlgmr.msrb.gmra.mxu2 %vm1117_vm12, %v1116_v6  ;;  %v1254_v10 = vpop.f32.mrf.mxu1  ;;  %v3868_v6 = vld [vmem:[#allocation2 + $0x150] sm:$0xff]  ;;  %4151 = vst [vmem:[#allocation52_spill] sm:$0xff] %v3874_v7 }
 0x3d3   : > { %1305 = vmatpush.msra.mxu3 %v3828_v4  ;;  %2512 = vmatpush.msk.msra.mxu2 %vm999_vm7, %v1254_v10  ;;  %v3876_v10 = vld [vmem:[#allocation2 + $0x148] sm:$0xff] }
 0x3d4   : > { %2510 = vmatmul.msk.f32.vlgmr.msrb.gmra.mxu3 %vm1117_vm12, %v1200_v11  ;;  %v3880_v11 = vld [vmem:[#allocation2 + $0x228] sm:$0xff] }
 0x3d5   : > { %1306 = vmatpush.msra.mxu3 %v3832_v8  ;;  %1361 = vmatpush.msrb.mxu2 %v3834_v9  ;;  %4152 = vst [vmem:[#allocation53_spill] sm:$0xff] %v3880_v11 }
 0x3d7   : > { %1307 = vmatpush.msra.mxu3 %v3839_v12  ;;  %1362 = vmatpush.msrb.mxu2 %v3841_v13 }
 0x3d9   : > { %1308 = vmatpush.msra.mxu3 %v3846_v14  ;;  %1363 = vmatpush.msrb.mxu2 %v3848_v15 }
 0x3da   : > { %2513 = vmatmul.msk.f32.vlgmr.msra.gmra.mxu2 %vm1117_vm12, %v1258_v17  ;;  %v1428_v51 = vpop.f32.mrf.mxu1  ;;  %v3882_v17 = vld [vmem:[#allocation2 + $0x140] sm:$0xff] }
 0x3db   : > { %1309 = vmatpush.msra.mxu3 %v3852_v16  ;;  %1364 = vmatpush.msrb.mxu2 %v3856_v18 }
 0x3dd   : > { %1310 = vmatpush.msra.mxu3 %v3858_v19  ;;  %1365 = vmatpush.msrb.mxu2 %v3862_v47 }
 0x3de   : > { %2514 = vmatmul.msk.f32.vlgmr.msra.gmra.mxu3 %vm883_vm0, %v3784_v20 }
 0x3df   : > { %2521 = vmatpush.msk.msrb.mxu3 %vm999_vm7, %v1428_v51  ;;  %1366 = vmatpush.msrb.mxu2 %v3868_v6  ;;  %v1432_v51 = vld [vmem:[#allocation15 + $0x18] sm:$0xf] }
 0x3e1   : > { %1535 = vmatpush.msra.mxu3 %v3866_v55  ;;  %1367 = vmatpush.msrb.mxu2 %v3876_v10  ;;  %v3896_v55 = vld [vmem:[#allocation2 + $0x210] sm:$0xff] }
 0x3e2   : > { %4155 = vst [vmem:[#allocation56_spill] sm:$0xff] %v3896_v55 }
 0x3e3   : > { %1536 = vmatpush.msra.mxu3 %v3874_v7  ;;  %1368 = vmatpush.msrb.mxu2 %v3882_v17  ;;  %v3899_v7 = vld [vmem:[#allocation2 + $0x208] sm:$0xff] }
 0x3e4   : > { %2517 = vmatmul.msk.f32.vlgmr.msrb.gmra.mxu2 %vm883_vm0, %v3784_v20  ;;  %4156 = vst [vmem:[#allocation57_spill] sm:$0xff] %v3899_v7 }
 0x3e5   : > { %1537 = vmatpush.msra.mxu3 %v3880_v11  ;;  %v3902_v11 = vld [vmem:[#allocation2 + $0x200] sm:$0xff] }
 0x3e6   : > { %2522 = vmatmul.msk.f32.vlgmr.msrb.gmra.mxu3 %vm1117_vm12, %v1432_v51  ;;  %4157 = vst [vmem:[#allocation58_spill] sm:$0xff] %v3902_v11 }
 0x3e7   : > { %1538 = vmatpush.msra.mxu3 %v3886_v0 }
 0x3e9   : > { %1539 = vmatpush.msra.mxu3 %v3892_v61 }
 0x3eb   : > { %1540 = vmatpush.msra.mxu3 %v3896_v55  ;;  %v3910_v55 = vld [vmem:[#allocation2 + $0x1f8] sm:$0xff] }
 0x3ed   : > { %1541 = vmatpush.msra.mxu3 %v3899_v7 }
 0x3ef   : > { %1542 = vmatpush.msra.mxu3 %v3902_v11  ;;  %v1374_v11 = vld [vmem:[#allocation15 + $0x14] sm:$0xf] }
 0x3f0   : > { %2526 = vmatmul.msk.f32.vlgmr.msra.gmra.mxu3 %vm883_vm0, %v3784_v20 }
 0x44f   : > { %v1167_v0 = vpop.f32.mrf.mxu3 }
 0x455   : > { %v1141_v45 = vpop.f32.mrf.mxu2 }
 0x456   : > { %v1168_v51 = vadd.f32 %v1167_v0, %v1141_v45  ;;  %v3917_v0 = vld [vmem:[#allocation2 + $0x1e8] sm:$0xff]  ;;  %v3933_v45 = vld [vmem:[#allocation2 + $0x1c0] sm:$0xff] }
 0x457   : > { %v1224_v42 = vpop.f32.mrf.mxu3 }
 0x458   : > { %v1227_v27 = vadd.f32 %v1224_v42, %v1168_v51  ;;  %v3930_v42 = vld [vmem:[#allocation2 + $0x1c8] sm:$0xff] }
 0x45d   : > { %v1282_v26 = vpop.f32.mrf.mxu2 }
 0x45e   : > { %v1285_v61 = vadd.f32 %v1282_v26, %v1227_v27  ;;  %v3926_v26 = vld [vmem:[#allocation2 + $0x1d0] sm:$0xff] }
 0x461   : > { %v1312_v24 = vpop.f32.mrf.mxu3 }
 0x462   : > { %2515 = vmatpush.msk.msrb.mxu0 %vm999_vm7, %v1312_v24  ;;  %v3920_v24 = vld [vmem:[#allocation2 + $0x1e0] sm:$0xff] }
 0x463   : > { %2516 = vmatmul.msk.f32.vlgmr.msrb.gmra.mxu0 %vm1117_vm12, %v1316_v25  ;;  %v3923_v25 = vld [vmem:[#allocation2 + $0x1d8] sm:$0xff] }
 0x467   : > { %v1370_v7 = vpop.f32.mrf.mxu2 }
 0x468   : > { %2518 = vmatpush.msk.msra.mxu0 %vm999_vm7, %v1370_v7  ;;  %v1548_v7 = vld [vmem:[#allocation15 + $0x20] sm:$0xf] }
 0x469   : > { %v1456_v21 = vpop.f32.mrf.mxu3 }
 0x46a   : > { %1477 = vmatpush.msrb.mxu0 %v3910_v55 }
 0x46b   : > { %2519 = vmatmul.msk.f32.vlgmr.msra.gmra.mxu0 %vm1117_vm12, %v1374_v11 }
 0x46c   : > { %1478 = vmatpush.msrb.mxu0 %v3913_v23 }
 0x46e   : > { %1479 = vmatpush.msrb.mxu0 %v3917_v0 }
 0x470   : > { %1480 = vmatpush.msrb.mxu0 %v3920_v24 }
 0x472   : > { %1481 = vmatpush.msrb.mxu0 %v3923_v25 }
 0x473   : > { %v1544_v27 = vpop.f32.mrf.mxu3 }
 0x474   : > { %2527 = vmatpush.msk.msra.mxu1 %vm999_vm7, %v1544_v27  ;;  %1482 = vmatpush.msrb.mxu0 %v3926_v26 }
 0x475   : > { %2528 = vmatmul.msk.f32.vlgmr.msra.gmra.mxu1 %vm1117_vm12, %v1548_v7 }
 0x476   : > { %1483 = vmatpush.msrb.mxu0 %v3930_v42 }
 0x478   : > { %1484 = vmatpush.msrb.mxu0 %v3933_v45 }
 0x479   : > { %2523 = vmatmul.msk.f32.vlgmr.msrb.gmra.mxu0 %vm883_vm0, %v3784_v20 }
 0x47a   : > { %1666 = vmatpush.msra.mxu0 %v3708_v36 }
 0x47c   : > { %1667 = vmatpush.msra.mxu0 %v3718_v39  ;;  %v1490_v39 = vld [vmem:[#allocation15 + $0x1c] sm:$0xf] }
 0x47e   : > { %1668 = vmatpush.msra.mxu0 %v3727_v43 }
 0x480   : > { %1669 = vmatpush.msra.mxu0 %v3737_v48 }
 0x482   : > { %1670 = vmatpush.msra.mxu0 %v3746_v52 }
 0x484   : > { %1671 = vmatpush.msra.mxu0 %v3755_v56 }
 0x486   : > { %1672 = vmatpush.msra.mxu0 %v3764_v60 }
 0x488   : > { %1673 = vmatpush.msra.mxu0 %v3773_v2 }
 0x4e0   : > { %v1340_v20 = vpop.f32.mrf.mxu0 }
 0x4e1   : > { %v1343_v11 = vadd.f32 %v1340_v20, %v1285_v61 }
 0x4e8   : > { %v1398_v36 = vpop.f32.mrf.mxu0 }
 0x4e9   : > { %v1401_v51 = vadd.f32 %v1398_v36, %v1343_v11 }
 0x4eb   : > { %v1459_v61 = vadd.f32 %v1456_v21, %v1401_v51  ;;  %v1583_v51 = vld [vmem:[#allocation19] sm:$0xf] }
 0x4f2   : > { %v1572_v48 = vpop.f32.mrf.mxu1 }
 0x4f6   : > { %v1486_v27 = vpop.f32.mrf.mxu0 }
 0x4f7   : > { %2524 = vmatpush.msk.msra.mxu2 %vm999_vm7, %v1486_v27  ;;  %v2133_v27 = vld [vmem:[#allocation28] sm:$0xff] }
 0x4f8   : > { %2525 = vmatmul.msk.f32.vlgmr.msra.gmra.mxu2 %vm1117_vm12, %v1490_v39  ;;  %v2081_v39 = vld [vmem:[#allocation24] sm:$0xf] }
 0x4f9   : > { %1645 = vmatpush.msrb.mxu2 %v3685_v28  ;;  %v1579_v28 = vpop.permute.xlu2 %1578 }
 0x4fb   : > { %1646 = vmatpush.msrb.mxu2 %v3688_v29 }
 0x4fd   : > { %1647 = vmatpush.msrb.mxu2 %v3691_v30 }
 0x4ff   : > { %1648 = vmatpush.msrb.mxu2 %v3694_v31 }
 0x501   : > { %1649 = vmatpush.msrb.mxu2 %v3697_v32 }
 0x503   : > { %1650 = vmatpush.msrb.mxu2 %v3700_v33 }
 0x505   : > { %1651 = vmatpush.msrb.mxu2 %v3703_v34 }
 0x507   : > { %1652 = vmatpush.msrb.mxu2 %v3706_v35 }
 0x57b   : > { %v1514_v43 = vpop.f32.mrf.mxu2 }
 0x57c   : > { %v1517_v52 = vadd.f32 %v1514_v43, %v1459_v61 }
 0x57e   : > { %v1575_v56 = vadd.f32 %v1572_v48, %v1517_v52 }
 0x580   : > { %v1581_v60 = vadd.f32 %v1579_v28, %v1575_v56 }
 0x582   : > { %v1584_v29 = vsel %vm995_vm6, %v1581_v60, 0.0 }
 0x583   : > { %1585 = vadd.xlane.f32.xlu0 %v1584_v29 }
 0x5f6   : > { %v1586_v30 = vpop.xlane.xlu0 %1585 }
 0x5f7   : > { %v1587_v31 = vsel %vm999_vm7, %v1586_v30, 0.0 }
 0x5f8   : > { %v1588_v32 = vrot.slane %v1587_v31, 4 }
 0x5fa   : > { %v1589_v2 = vadd.f32 %v1588_v32, %v1587_v31 }
 0x5fc   : > { %v1590_v33 = vrot.slane %v1589_v2, 2 }
 0x5fe   : > { %v1591_v7 = vadd.f32 %v1590_v33, %v1589_v2 }
 0x600   : > { %v1592_v34 = vrot.slane %v1591_v7, 1 }
 0x602   : > { %v1593_v20 = vadd.f32 %v1592_v34, %v1591_v7 }
 0x604   : > { %v1594_v35 = vmul.f32 %v1593_v20, %v3677_v22 }
 0x606   : > { %v1595_v21 = vsub.f32 %v1581_v60, %v1594_v35 }
 0x608   : > { %v1596_v11 = vmul.f32 %v1595_v21, %v1595_v21 }
 0x60a   : > { %v1597_v36 = vsel %vm995_vm6, %v1596_v11, 0.0 }
 0x60b   : > { %1598 = vadd.xlane.f32.xlu1 %v1597_v36  ;;  %v1623_v36 = vpop.permute.xlu2 %1622 }
 0x624   : > { %1628 = vperm.xlu1 %2764, %v1583_v51  }
 0x62c   : > { %2121 = vperm.xlu1 %2764, %v2081_v39  }
 0x634   : > { %2136 = vperm.xlu1 %2764, %v2133_v27  }
 0x67e   : > { %v1599_v61 = vpop.xlane.xlu1 %1598 }
 0x67f   : > { %v1600_v43 = vsel %vm999_vm7, %v1599_v61, 0.0 }
 0x680   : > { %v1601_v48 = vrot.slane %v1600_v43, 4 }
 0x682   : > { %v1602_v52 = vadd.f32 %v1601_v48, %v1600_v43  ;;  %v1679_v48 = vld [vmem:[#allocation21 + $0x4] sm:$0xf] }
 0x684   : > { %v1603_v56 = vrot.slane %v1602_v52, 2 }
 0x686   : > { %v1604_v28 = vadd.f32 %v1603_v56, %v1602_v52 }
 0x688   : > { %v1605_v29 = vrot.slane %v1604_v28, 1 }
 0x68a   : > { %v1606_v30 = vadd.f32 %v1605_v29, %v1604_v28  ;;  %v2047_v28 = vld [vmem:[#allocation21 + $0x20] sm:$0xf] }
 0x68c   : > { %v1607_v60 = vmul.f32 %v1606_v30, %v3677_v22 }
 0x68e   : > { %v1608_v31 = vadd.f32 1e-05, %v1607_v60 }
 0x690   : > { %2773 = vrsqrt.f32 %v1608_v31  ;;  %vm1615_vm14 = vweird.f32 %v1608_v31 }
 0x696   : > { %v2774_v32 = vpop.eup %2773  ;;  %v1629_v39 = vpop.permute.xlu1 %1628 }
 0x697   : > { %v1610_v2 = vmul.f32 %v2774_v32, %v1608_v31  ;;  %vm1616_vm13 = vweird.f32 %v2774_v32 }
 0x698   : > { %vm1617_vm15 = vmor %vm1615_vm14, %vm1616_vm13 }
 0x699   : > { %v1611_v33 = vmul.f32 %v2774_v32, %v1610_v2  ;;  %v2078_v2 = vpop.permute.xlu2 %2077 }
 0x69b   : > { %v1612_v7 = vmul.f32 0.5, %v1611_v33 }
 0x69d   : > { %v1613_v34 = vsub.f32 1.5, %v1612_v7 }
 0x69f   : > { %v1614_v20 = vmul.f32 %v2774_v32, %v1613_v34 }
 0x6a1   : > { %v1618_v35 = vsel %vm1617_vm15, %v2774_v32, %v1614_v20 }
 0x6a2   : > { %v1619_v11 = vmul.f32 %v1618_v35, %v1595_v21  ;;  %v1657_v21 = vld [vmem:[#allocation21] sm:$0xf] }
 0x6a4   : > { %v1625_v51 = vmul.f32 %v1623_v36, %v1619_v11 }
 0x6a6   : > { %v1631_v27 = vadd.f32 %v1629_v39, %v1625_v51 }
 0x6a8   : > { %v3964_v61 = vmax.f32 %v1631_v27, 0.0 }
 0x6aa   : > { %2529 = vmatmul.msk.f32.vlgmr.msrb.gmra.mxu2 %vm883_vm0, %v3964_v61  ;;  %2530 = vmatmul.msk.f32.vlgmr.msra.gmra.mxu0 %vm883_vm0, %v3964_v61 }
 0x727   : > { %v1675_v43 = vpop.f32.mrf.mxu0 }
 0x728   : > { %2531 = vmatpush.msk.msrb.mxu1 %vm999_vm7, %v1675_v43 }
 0x729   : > { %2532 = vmatmul.msk.f32.vlgmr.msrb.gmra.mxu1 %vm1117_vm12, %v1679_v48 }
 0x72a   : > { %1740 = vmatpush.msra.mxu1 %v3710_v37 }
 0x72c   : > { %1741 = vmatpush.msra.mxu1 %v3720_v40 }
 0x72d   : > { %v1654_v52 = vpop.f32.mrf.mxu2 }
 0x72e   : > { %1742 = vmatpush.msra.mxu1 %v3729_v44  ;;  %2533 = vmatpush.msk.msrb.mxu3 %vm999_vm7, %v1654_v52  ;;  %v2082_v52 = vld [vmem:[#allocation25] sm:$0xf] }
 0x72f   : > { %2534 = vmatmul.msk.f32.vlgmr.msrb.gmra.mxu3 %vm1117_vm12, %v1657_v21 }
 0x730   : > { %1743 = vmatpush.msra.mxu1 %v3739_v49  ;;  %1789 = vmatpush.msra.mxu3 %v3714_v38 }
 0x732   : > { %1744 = vmatpush.msra.mxu1 %v3748_v53  ;;  %1790 = vmatpush.msra.mxu3 %v3723_v41  ;;  %v1753_v41 = vld [vmem:[#allocation21 + $0x8] sm:$0xf]  ;;  %v1900_v53 = vld [vmem:[#allocation21 + $0x14] sm:$0xf] }
 0x734   : > { %1745 = vmatpush.msra.mxu1 %v3757_v57  ;;  %1791 = vmatpush.msra.mxu3 %v3733_v46  ;;  %v1802_v46 = vld [vmem:[#allocation21 + $0xc] sm:$0xf] }
 0x736   : > { %1746 = vmatpush.msra.mxu1 %v3766_v62  ;;  %1792 = vmatpush.msra.mxu3 %v3742_v50 }
 0x738   : > { %1747 = vmatpush.msra.mxu1 %v3775_v3  ;;  %1793 = vmatpush.msra.mxu3 %v3751_v54  ;;  %v4159_v3 = vld [vmem:[#allocation44_spill] sm:$0xff] }
 0x739   : > { %2535 = vmatmul.msk.f32.vlgmr.msra.gmra.mxu1 %vm883_vm0, %v3964_v61 }
 0x73a   : > { %1887 = vmatpush.msrb.mxu1 %v3834_v9  ;;  %1794 = vmatpush.msra.mxu3 %v3760_v58  ;;  %v1851_v58 = vld [vmem:[#allocation21 + $0x10] sm:$0xf] }
 0x73c   : > { %1888 = vmatpush.msrb.mxu1 %v3841_v13  ;;  %1795 = vmatpush.msra.mxu3 %v3769_v63  ;;  %v4158_v63 = vld [vmem:[#allocation43_spill] sm:$0xff] }
 0x73e   : > { %1889 = vmatpush.msrb.mxu1 %v3848_v15  ;;  %1796 = vmatpush.msra.mxu3 %v3779_v5 }
 0x73f   : > { %2538 = vmatmul.msk.f32.vlgmr.msra.gmra.mxu3 %vm883_vm0, %v3964_v61 }
 0x740   : > { %1890 = vmatpush.msrb.mxu1 %v3856_v18 }
 0x742   : > { %1891 = vmatpush.msrb.mxu1 %v3862_v47 }
 0x744   : > { %1892 = vmatpush.msrb.mxu1 %v3868_v6  ;;  %v4167_v6 = vld [vmem:[#allocation52_spill] sm:$0xff] }
 0x746   : > { %1893 = vmatpush.msrb.mxu1 %v3876_v10  ;;  %v4168_v10 = vld [vmem:[#allocation53_spill] sm:$0xff] }
 0x748   : > { %1894 = vmatpush.msrb.mxu1 %v3882_v17  ;;  %v4169_v17 = vld [vmem:[#allocation54_spill] sm:$0xff] }
 0x749   : > { %2544 = vmatmul.msk.f32.vlgmr.msrb.gmra.mxu1 %vm883_vm0, %v3964_v61 }
 0x7a6   : > { %v1703_v37 = vpop.f32.mrf.mxu1 }
 0x7b2   : > { %v1729_v38 = vpop.f32.mrf.mxu3 }
 0x7b3   : > { %v1730_v40 = vadd.f32 %v1729_v38, %v1703_v37 }
 0x7b6   : > { %v1749_v44 = vpop.f32.mrf.mxu1 }
 0x7b7   : > { %2536 = vmatpush.msk.msra.mxu2 %vm999_vm7, %v1749_v44 }
 0x7b8   : > { %2537 = vmatmul.msk.f32.vlgmr.msra.gmra.mxu2 %vm1117_vm12, %v1753_v41 }
 0x7b9   : > { %1838 = vmatpush.msrb.mxu2 %v3821_v59  ;;  %v4161_v59 = vld [vmem:[#allocation46_spill] sm:$0xff] }
 0x7bb   : > { %1839 = vmatpush.msrb.mxu2 %v3825_v1  ;;  %v4162_v1 = vld [vmem:[#allocation47_spill] sm:$0xff] }
 0x7bd   : > { %1840 = vmatpush.msrb.mxu2 %v3828_v4  ;;  %v4163_v4 = vld [vmem:[#allocation48_spill] sm:$0xff] }
 0x7bf   : > { %1841 = vmatpush.msrb.mxu2 %v3832_v8  ;;  %v4164_v8 = vld [vmem:[#allocation49_spill] sm:$0xff] }
 0x7c1   : > { %1842 = vmatpush.msrb.mxu2 %v3839_v12  ;;  %v4165_v12 = vld [vmem:[#allocation50_spill] sm:$0xff] }
 0x7c2   : > { %v1798_v49 = vpop.f32.mrf.mxu3 }
 0x7c3   : > { %1843 = vmatpush.msrb.mxu2 %v3846_v14  ;;  %2539 = vmatpush.msk.msrb.mxu0 %vm999_vm7, %v1798_v49  ;;  %v1998_v14 = vld [vmem:[#allocation21 + $0x1c] sm:$0xf] }
 0x7c4   : > { %2540 = vmatmul.msk.f32.vlgmr.msrb.gmra.mxu0 %vm1117_vm12, %v1802_v46 }
 0x7c5   : > { %1844 = vmatpush.msrb.mxu2 %v3852_v16 }
 0x7c6   : > { %v1896_v50 = vpop.f32.mrf.mxu1 }
 0x7c7   : > { %1845 = vmatpush.msrb.mxu2 %v3858_v19  ;;  %2545 = vmatpush.msk.msrb.mxu3 %vm999_vm7, %v1896_v50  ;;  %v1949_v19 = vld [vmem:[#allocation21 + $0x18] sm:$0xf] }
 0x7c8   : > { %2541 = vmatmul.msk.f32.vlgmr.msrb.gmra.mxu2 %vm883_vm0, %v3964_v61  ;;  %2546 = vmatmul.msk.f32.vlgmr.msrb.gmra.mxu3 %vm1117_vm12, %v1900_v53  ;;  %v2180_v53 = vld [vmem:[#allocation4 + $0x70] sm:$0xff] }
 0x7c9   : > { %1985 = vmatpush.msra.mxu3 %v3910_v55  ;;  %v4166_v55 = vld [vmem:[#allocation51_spill] sm:$0xff] }
 0x7cb   : > { %1986 = vmatpush.msra.mxu3 %v3913_v23  ;;  %v4160_v23 = vld [vmem:[#allocation45_spill] sm:$0xff] }
 0x7cd   : > { %1987 = vmatpush.msra.mxu3 %v3917_v0  ;;  %v4170_v0 = vld [vmem:[#allocation55_spill] sm:$0xff] }
 0x7cf   : > { %1988 = vmatpush.msra.mxu3 %v3920_v24  ;;  %v4171_v24 = vld [vmem:[#allocation56_spill] sm:$0xff] }
 0x7d1   : > { %1989 = vmatpush.msra.mxu3 %v3923_v25  ;;  %v4172_v25 = vld [vmem:[#allocation57_spill] sm:$0xff] }
 0x7d3   : > { %1990 = vmatpush.msra.mxu3 %v3926_v26  ;;  %v4173_v26 = vld [vmem:[#allocation58_spill] sm:$0xff] }
 0x7d5   : > { %1991 = vmatpush.msra.mxu3 %v3930_v42 }
 0x7d7   : > { %1992 = vmatpush.msra.mxu3 %v3933_v45 }
 0x7d8   : > { %2550 = vmatmul.msk.f32.vlgmr.msra.gmra.mxu3 %vm883_vm0, %v3964_v61 }
 0x7d9   : > { %2193 = vmatpush.msrb.mxu3 %v2180_v53 }
 0x83b   : > { %v1777_v54 = vpop.f32.mrf.mxu2 }
 0x83c   : > { %v1780_v57 = vadd.f32 %v1777_v54, %v1730_v40  ;;  %v2181_v54 = vld [vmem:[#allocation4 + $0x78] sm:$0xff] }
 0x841   : > { %v1826_v13 = vpop.f32.mrf.mxu0 }
 0x842   : > { %v1829_v15 = vadd.f32 %v1826_v13, %v1780_v57  ;;  %v2178_v57 = vld [vmem:[#allocation4 + $0x60] sm:$0xff] }
 0x843   : > { %2194 = vmatpush.msrb.mxu3 %v2178_v57 }
 0x84b   : > { %v1847_v62 = vpop.f32.mrf.mxu2  ;;  %v1924_v5 = vpop.f32.mrf.mxu3 }
 0x84c   : > { %2542 = vmatpush.msk.msra.mxu0 %vm999_vm7, %v1847_v62  ;;  %v2179_v62 = vld [vmem:[#allocation4 + $0x68] sm:$0xff] }
 0x84d   : > { %2543 = vmatmul.msk.f32.vlgmr.msra.gmra.mxu0 %vm1117_vm12, %v1851_v58 }
 0x84e   : > { %1936 = vmatpush.msrb.mxu0 %v4158_v63  ;;  %v2176_v63 = vld [vmem:[#allocation4 + $0x50] sm:$0xff] }
 0x84f   : > { %2195 = vmatpush.msrb.mxu3 %v2176_v63 }
 0x850   : > { %1937 = vmatpush.msrb.mxu0 %v4159_v3  ;;  %v2177_v3 = vld [vmem:[#allocation4 + $0x58] sm:$0xff] }
 0x852   : > { %1938 = vmatpush.msrb.mxu0 %v4160_v23  ;;  %v2174_v23 = vld [vmem:[#allocation4 + $0x40] sm:$0xff] }
 0x853   : > { %2196 = vmatpush.msrb.mxu3 %v2174_v23 }
 0x854   : > { %1939 = vmatpush.msrb.mxu0 %v4161_v59  ;;  %v2175_v59 = vld [vmem:[#allocation4 + $0x48] sm:$0xff] }
 0x856   : > { %1940 = vmatpush.msrb.mxu0 %v4162_v1  ;;  %v2172_v1 = vld [vmem:[#allocation4 + $0x30] sm:$0xff] }
 0x857   : > { %2197 = vmatpush.msrb.mxu3 %v2172_v1 }
 0x858   : > { %1941 = vmatpush.msrb.mxu0 %v4163_v4  ;;  %v2173_v4 = vld [vmem:[#allocation4 + $0x38] sm:$0xff] }
 0x85a   : > { %1942 = vmatpush.msrb.mxu0 %v4164_v8 }
 0x85b   : > { %v1994_v9 = vpop.f32.mrf.mxu3 }
 0x85c   : > { %2551 = vmatpush.msk.msra.mxu1 %vm999_vm7, %v1994_v9  ;;  %1943 = vmatpush.msrb.mxu0 %v4165_v12 }
 0x85d   : > { %2547 = vmatmul.msk.f32.vlgmr.msrb.gmra.mxu0 %vm883_vm0, %v3964_v61  ;;  %2552 = vmatmul.msk.f32.vlgmr.msra.gmra.mxu1 %vm1117_vm12, %v1998_v14 }
 0x8ca   : > { %v1875_v16 = vpop.f32.mrf.mxu0 }
 0x8cb   : > { %v1878_v18 = vadd.f32 %v1875_v16, %v1829_v15 }
 0x8cd   : > { %v1927_v42 = vadd.f32 %v1924_v5, %v1878_v18  ;;  %v2122_v18 = vpop.permute.xlu1 %2121 }
 0x8da   : > { %v1945_v47 = vpop.f32.mrf.mxu0  ;;  %v2022_v30 = vpop.f32.mrf.mxu1 }
 0x8db   : > { %2548 = vmatpush.msk.msra.mxu2 %vm999_vm7, %v1945_v47 }
 0x8dc   : > { %2549 = vmatmul.msk.f32.vlgmr.msra.gmra.mxu2 %vm1117_vm12, %v1949_v19 }
 0x8dd   : > { %2034 = vmatpush.msrb.mxu2 %v4166_v55 }
 0x8df   : > { %2035 = vmatpush.msrb.mxu2 %v4167_v6 }
 0x8e1   : > { %2036 = vmatpush.msrb.mxu2 %v4168_v10  ;;  %v2132_v10 = vld [vmem:[#allocation27] sm:$0xff] }
 0x8e3   : > { %2037 = vmatpush.msrb.mxu2 %v4169_v17  ;;  %v2170_v17 = vld [vmem:[#allocation4 + $0x20] sm:$0xff] }
 0x8e4   : > { %2198 = vmatpush.msrb.mxu3 %v2170_v17 }
 0x8e5   : > { %2038 = vmatpush.msrb.mxu2 %v4170_v0  ;;  %v2171_v0 = vld [vmem:[#allocation4 + $0x28] sm:$0xff] }
 0x8e7   : > { %2039 = vmatpush.msrb.mxu2 %v4171_v24  ;;  %v2168_v24 = vld [vmem:[#allocation4 + $0x10] sm:$0xff] }
 0x8e8   : > { %2199 = vmatpush.msrb.mxu3 %v2168_v24 }
 0x8e9   : > { %2040 = vmatpush.msrb.mxu2 %v4172_v25  ;;  %v2169_v25 = vld [vmem:[#allocation4 + $0x18] sm:$0xff] }
 0x8eb   : > { %2041 = vmatpush.msrb.mxu2 %v4173_v26  ;;  %v2166_v26 = vld [vmem:[#allocation4] sm:$0xff] }
 0x8ec   : > { %2553 = vmatmul.msk.f32.vlgmr.msrb.gmra.mxu2 %vm883_vm0, %v3964_v61  ;;  %2200 = vmatpush.msrb.mxu3 %v2166_v26 }
 0x95f   : > { %v1973_v45 = vpop.f32.mrf.mxu2 }
 0x960   : > { %v1976_v56 = vadd.f32 %v1973_v45, %v1927_v42  ;;  %v2167_v42 = vld [vmem:[#allocation4 + $0x8] sm:$0xff]  ;;  %v2137_v45 = vpop.permute.xlu1 %2136 }
 0x962   : > { %v2025_v60 = vadd.f32 %v2022_v30, %v1976_v56 }
 0x96f   : > { %v2043_v29 = vpop.f32.mrf.mxu2 }
 0x970   : > { %2554 = vmatpush.msk.msra.mxu0 %vm999_vm7, %v2043_v29  ;;  %v4174_v29 = vld [vmem:[#allocation42_spill] sm:$0xff] }
 0x971   : > { %2555 = vmatmul.msk.f32.vlgmr.msra.gmra.mxu0 %vm1117_vm12, %v2047_v28  ;;  %v4175_v30 = vmax.f32 %v4174_v29, 0.0 }
 0x972   : > { %2213 = vmatpush.msrb.mxu0 %v2181_v54 }
 0x974   : > { %2214 = vmatpush.msrb.mxu0 %v2179_v62 }
 0x976   : > { %2215 = vmatpush.msrb.mxu0 %v2177_v3 }
 0x978   : > { %2216 = vmatpush.msrb.mxu0 %v2175_v59 }
 0x97a   : > { %2217 = vmatpush.msrb.mxu0 %v2173_v4 }
 0x97c   : > { %2218 = vmatpush.msrb.mxu0 %v2171_v0 }
 0x97e   : > { %2219 = vmatpush.msrb.mxu0 %v2169_v25 }
 0x980   : > { %2220 = vmatpush.msrb.mxu0 %v2167_v42 }
 0x9ee   : > { %v2071_v31 = vpop.f32.mrf.mxu0 }
 0x9ef   : > { %v2074_v32 = vadd.f32 %v2071_v31, %v2025_v60 }
 0x9f1   : > { %v2080_v33 = vadd.f32 %v2078_v2, %v2074_v32 }
 0x9f3   : > { %v2083_v7 = vsel %vm995_vm6, %v2080_v33, 0.0 }
 0x9f4   : > { %2084 = vadd.xlane.f32.xlu2 %v2083_v7 }
 0xa67   : > { %v2085_v34 = vpop.xlane.xlu2 %2084 }
 0xa68   : > { %v2086_v20 = vsel %vm999_vm7, %v2085_v34, 0.0 }
 0xa69   : > { %v2087_v35 = vrot.slane %v2086_v20, 4 }
 0xa6b   : > { %v2088_v11 = vadd.f32 %v2087_v35, %v2086_v20 }
 0xa6d   : > { %v2089_v36 = vrot.slane %v2088_v11, 2 }
 0xa6f   : > { %v2090_v51 = vadd.f32 %v2089_v36, %v2088_v11 }
 0xa71   : > { %v2091_v39 = vrot.slane %v2090_v51, 1 }
 0xa73   : > { %v2092_v27 = vadd.f32 %v2091_v39, %v2090_v51 }
 0xa75   : > { %v2093_v61 = vmul.f32 %v2092_v27, %v3677_v22 }
 0xa77   : > { %v2094_v43 = vsub.f32 %v2080_v33, %v2093_v61 }
 0xa79   : > { %v2095_v48 = vmul.f32 %v2094_v43, %v2094_v43 }
 0xa7b   : > { %v2096_v21 = vsel %vm995_vm6, %v2095_v48, 0.0 }
 0xa7c   : > { %2097 = vadd.xlane.f32.xlu0 %v2096_v21 }
 0xa90   : > { %2127 = vperm.xlu0 %2763, %v2082_v52  }
 0xaef   : > { %v2098_v37 = vpop.xlane.xlu0 %2097 }
 0xaf0   : > { %v2099_v38 = vsel %vm999_vm7, %v2098_v37, 0.0 }
 0xaf1   : > { %v2100_v40 = vrot.slane %v2099_v38, 4 }
 0xaf3   : > { %v2101_v41 = vadd.f32 %v2100_v40, %v2099_v38 }
 0xaf5   : > { %v2102_v44 = vrot.slane %v2101_v41, 2 }
 0xaf7   : > { %v2103_v46 = vadd.f32 %v2102_v44, %v2101_v41 }
 0xaf9   : > { %v2104_v49 = vrot.slane %v2103_v46, 1 }
 0xafb   : > { %v2105_v50 = vadd.f32 %v2104_v49, %v2103_v46 }
 0xafd   : > { %v2106_v58 = vmul.f32 %v2105_v50, %v3677_v22 }
 0xaff   : > { %v2107_v5 = vadd.f32 1e-05, %v2106_v58 }
 0xb01   : > { %2775 = vrsqrt.f32 %v2107_v5  ;;  %vm2114_vm2 = vweird.f32 %v2107_v5 }
 0xb02   : > { %v2128_v47 = vpop.permute.xlu0 %2127 }
 0xb07   : > { %v2776_v22 = vpop.eup %2775 }
 0xb08   : > { %v2109_v8 = vmul.f32 %v2776_v22, %v2107_v5  ;;  %vm2115_vm1 = vweird.f32 %v2776_v22 }
 0xb09   : > { %vm2116_vm3 = vmor %vm2114_vm2, %vm2115_vm1 }
 0xb0a   : > { %v2110_v9 = vmul.f32 %v2776_v22, %v2109_v8 }
 0xb0c   : > { %v2111_v12 = vmul.f32 0.5, %v2110_v9 }
 0xb0e   : > { %v2112_v13 = vsub.f32 1.5, %v2111_v12 }
 0xb10   : > { %v2113_v14 = vmul.f32 %v2776_v22, %v2112_v13 }
 0xb12   : > { %v2117_v15 = vsel %vm2116_vm3, %v2776_v22, %v2113_v14 }
 0xb13   : > { %v2118_v16 = vmul.f32 %v2117_v15, %v2094_v43 }
 0xb15   : > { %v2124_v19 = vmul.f32 %v2122_v18, %v2118_v16 }
 0xb17   : > { %v2130_v55 = vadd.f32 %v2128_v47, %v2124_v19 }
 0xb19   : > { %v2131_v6 = vmax.f32 %v2130_v55, 0.0 }
 0xb1b   : > { %2556 = vmatpush.msk.msrb.mxu1 %vm999_vm7, %v2131_v6 }
 0xb1c   : > { %2557 = vmatmul.msk.f32.vlgmr.msrb.gmra.mxu1 %vm1117_vm12, %v2132_v10 }
 0xb99   : > { %v2162_v56 = vpop.f32.mrf.mxu1 }
 0xb9a   : > { %v2163_v28 = vadd.f32 %v2162_v56, %v2137_v45 }
 0xb9c   : > { %v2165_v60 = vadd.f32 %v2163_v28, %v4175_v30 }
 0xb9e   : > { %2558 = vmatmul.msk.f32.vlgmr.msrb.gmra.mxu3 %vm883_vm0, %v2165_v60  ;;  %2559 = vmatmul.msk.f32.vlgmr.msrb.gmra.mxu0 %vm883_vm0, %v2165_v60 }
 0xc1b   : > { %v2222_v31 = vpop.f32.mrf.mxu0 }
 0xc1c   : > { %2226 = vst [vmem:[%s876_s4 + $0x8] sm:$0xff] %v2222_v31 }
 0xc21   : > { %v2202_v32 = vpop.f32.mrf.mxu3 }
 0xc22   : > { %2225 = vst [vmem:[%s876_s4] sm:$0xff] %v2202_v32 }
 0xc23 PF: > { %s4177_s28 = sld [smem:[#allocation40_spill]] }
 0xc29   : > { %s39_s0 = sadd.s32 1, %s4177_s28  }
 0xc2a   : > { %p36_p7 = scmp.ge.s32.totalorder %s39_s0, 4  }
 0xc2c   :  { %38 = sbr.rel (!%p36_p7) target bundleno = 17 (0x11), region = 223 }
 0xc31   :  { %2248 = vsyncpa [#allocation3], 1 }
 0xc32   :  { %2250 = vsyncpa [#allocation3 + $0x1], 1 }
 0xc33   :  { %2251 = vsyncpa [#allocation5], 1 }
 0xc34   :  { %2252 = vsyncpa [#allocation8], 1 }
 0xc35   :  { %2253 = vsyncpa [#allocation11], 1 }
 0xc36   :  { %2254 = vsyncpa [#allocation14], 1 }
 0xc37   :  { %2255 = vsyncpa [#allocation17], 1 }
 0xc38   :  { %2256 = vsyncpa [#allocation20], 1 }
 0xc39   :  { %2257 = vsyncpa [#allocation23], 1 }
 0xc3a   :  { %2258 = vsyncpa [#allocation26], 1 }
 0xc3b   :  { %2259 = vsyncpa [#allocation29], 1 }

// kernel: autoencoder_fwd.5
= control target key start
LH: loop header
LB: loop body
LE: loop exit
PB: predicated region body
PF: predicated region fallthrough
CT: control target
= control target key end

     0   :  { %s6982_s0 = inlined_call_operand.vmem [shape: f32[2,8,256], index: 0, kind: input, shape index: {}]   ;;  %s6983_s1 = inlined_call_operand.hbm [shape: f32[9,256,256], index: 1, kind: input, shape index: {}]   ;;  %s6984_s2 = inlined_call_operand.hbm [shape: f32[256,64], index: 2, kind: input, shape index: {}]   ;;  %s6985_s3 = inlined_call_operand.hbm [shape: f32[8,1], index: 3, kind: input, shape index: {}]   ;;  %s6986_s4 = inlined_call_operand.hbm [shape: f32[8,1], index: 4, kind: input, shape index: {}]   ;;  %s6987_s5 = inlined_call_operand.hbm [shape: f32[2,8], index: 5, kind: input, shape index: {}]   ;;  %s6988_s6 = inlined_call_operand.hbm [shape: f32[2,1], index: 6, kind: input, shape index: {}]   ;;  %s6989_s7 = inlined_call_operand.hbm [shape: f32[2,1], index: 7, kind: input, shape index: {}]   ;;  %s6990_s8 = inlined_call_operand.hbm [shape: f32[2,1], index: 8, kind: input, shape index: {}]   ;;  %s6991_s9 = inlined_call_operand.hbm [shape: f32[9,2,2], index: 9, kind: input, shape index: {}]   ;;  %s6992_s10 = inlined_call_operand.hbm [shape: f32[2,1], index: 10, kind: input, shape index: {}]   ;;  %s6993_s11 = inlined_call_operand.hbm [shape: f32[2,1], index: 11, kind: input, shape index: {}]   ;;  %s6994_s12 = inlined_call_operand.hbm [shape: f32[2,1], index: 12, kind: input, shape index: {}]   ;;  %s6995_s13 = inlined_call_operand.hbm [shape: f32[9,2,2], index: 13, kind: input, shape index: {}]   ;;  %s6996_s14 = inlined_call_operand.hbm [shape: f32[2,1], index: 14, kind: input, shape index: {}]   ;;  %s6997_s15 = inlined_call_operand.hbm [shape: f32[2,1], index: 15, kind: input, shape index: {}]   ;;  %s6998_s16 = inlined_call_operand.hbm [shape: f32[2,1], index: 16, kind: input, shape index: {}]   ;;  %s6999_s17 = inlined_call_operand.hbm [shape: f32[16,2], index: 17, kind: input, shape index: {}]   ;;  %s7000_s18 = inlined_call_operand.hbm [shape: f32[16,1], index: 18, kind: input, shape index: {}]   ;;  %s7001_s19 = inlined_call_operand.hbm [shape: f32[8,8], index: 19, kind: input, shape index: {}]   ;;  %s7002_s20 = inlined_call_operand.hbm [shape: f32[8,1], index: 20, kind: input, shape index: {}]   ;;  %s7003_s21 = inlined_call_operand.vmem [shape: f32[2,16,64], index: 21, kind: output, shape index: {}]  }
   0x1   :  { %7008 = sst [smem:[#allocation47_spill]] %s6982_s0 }
   0x2   :  { %7009 = sst [smem:[#allocation48_spill]] %s6983_s1 }
   0x3   :  { %7010 = sst [smem:[#allocation49_spill]] %s6984_s2 }
   0x4   :  { %7011 = sst [smem:[#allocation50_spill]] %s6985_s3 }
   0x5   :  { %7012 = sst [smem:[#allocation51_spill]] %s6986_s4 }
   0x6   :  { %7013 = sst [smem:[#allocation52_spill]] %s6987_s5 }
   0x7   :  { %7014 = sst [smem:[#allocation53_spill]] %s6988_s6 }
   0x8   :  { %7015 = sst [smem:[#allocation54_spill]] %s6990_s8 }
   0x9   :  { %7016 = sst [smem:[#allocation55_spill]] %s6992_s10 }
   0xa   :  { %7017 = sst [smem:[#allocation56_spill]] %s7003_s21 }
   0xb   :  { %26 = vsyncpa [#allocation3], 0 }
   0xc   :  { %27 = vsyncpa [#allocation5], 0 }
   0xd   :  { %28 = vsyncpa [#allocation8], 0 }
   0xe   :  { %29 = vsyncpa [#allocation11], 0 }
   0xf   :  { %30 = vsyncpa [#allocation14], 0 }
  0x10   :  { %31 = vsyncpa [#allocation17], 0 }
  0x11   :  { %32 = vsyncpa [#allocation20], 0 }
  0x12   :  { %33 = vsyncpa [#allocation23], 0 }
  0x13   :  { %34 = vsyncpa [#allocation26], 0 }
  0x14   :  { %35 = vsyncpa [#allocation29], 0 }
  0x15   :  { %36 = vsyncpa [#allocation32], 0  ;;  %s6441_s2 = smov 0  }
  0x16 LB: > { %7018 = sst [smem:[#allocation44_spill]] %s6300_s2  ;;  %s6450_s28 = sadd.s32 4294967295, %s6300_s2   ;;  %s6300_s2 = sphi %s6441_s2, %s42_s2  }
  0x17   : > { %s7019_s27 = sld [smem:[#allocation49_spill]]  ;;  %p4708_p0 = scmp.ge.s32.totalorder %s6300_s2, 1 }
  0x18   : > { %7020 = sst [smem:[#allocation45_spill]] %s6450_s28  ;;  %p519_p1 = scmp.lt.s32.totalorder %s6300_s2, 3 }
  0x19   : > { %p4982_p2 = scmp.eq.s32.totalorder %s6450_s28, 0  ;;  %s6302_s0 = smov [#allocation4]  }
  0x1a   : > { %p6455_p3 = pnand %p4708_p0, %p519_p1  ;;  %s546_s4 = sshll.u32 %s6302_s0, 4  ;;  %s547_s4 = int_to_ptr.vmem [resolvable:$true] %s546_s4 }
  0x1b   : > { %s7023_s22 = sld [smem:[#allocation51_spill]]  ;;  %s6303_s24 = smov [#allocation7]  }
  0x1c   : > { %s7021_s29 = scalar_select %p6455_p3, 1, 0 }
  0x1d   : > { %s544_s3 = sshll.u32 %s7019_s27, 4  ;;  %p4921_p4 = pneg %p6455_p3  ;;  %s545_s3 = int_to_ptr.hbm [resolvable:$true] %s544_s3 }
  0x1e   : > { %7022 = sst [smem:[#allocation46_spill]] %s7021_s29  ;;  %s573_s25 = sshll.u32 %s6303_s24, 4  ;;  %s574_s25 = int_to_ptr.vmem [resolvable:$true] %s573_s25 }
  0x1f   : > { %p6466_p5 = pnand %p4982_p2, %p4921_p4  ;;  %s7025_s6 = sld [smem:[#allocation53_spill]] }
  0x20   : > { %s6304_s2 = smov 128   ;;  %s6305_s30 = smov 8  }
  0x21   : > { %s571_s23 = sshll.u32 %s7023_s22, 4  ;;  %s6306_s5 = smov [#allocation10]   ;;  %s572_s23 = int_to_ptr.hbm [resolvable:$true] %s571_s23 }
  0x22   : > { %4927 = dma.hbm_to_vmem [thread:$0]  (!%p6466_p5), %s545_s3, 4096, %s547_s4, [#allocation5], %s6304_s2, %s6304_s2, %s6305_s30  }
  0x23   : > { %4933 = dma.hbm_to_vmem [thread:$0]  (!%p6466_p5), %s572_s23, 128, %s574_s25, [#allocation8]  }
  0x24   : > { %s597_s22 = sshll.u32 %s6306_s5, 4  ;;  %s7026_s8 = sld [smem:[#allocation54_spill]]  ;;  %s598_s22 = int_to_ptr.vmem [resolvable:$true] %s597_s22 }
  0x25   : > { %s595_s0 = sshll.u32 %s7025_s6, 4  ;;  %s7027_s10 = sld [smem:[#allocation55_spill]]  ;;  %s596_s0 = int_to_ptr.hbm [resolvable:$true] %s595_s0 }
  0x26   : > { %4939 = dma.hbm_to_vmem [thread:$0]  (!%p6466_p5), %s596_s0, 32, %s598_s22, [#allocation11]  }
  0x27   : > { %s6307_s29 = smov [#allocation13]   ;;  %s6308_s4 = smov [#allocation16]  }
  0x28   : > { %s621_s3 = sshll.u32 %s6307_s29, 4  ;;  %s647_s23 = sshll.u32 %s6308_s4, 4  ;;  %s622_s3 = int_to_ptr.vmem [resolvable:$true] %s621_s3  ;;  %s648_s23 = int_to_ptr.vmem [resolvable:$true] %s647_s23 }
  0x29   : > { %s669_s5 = sshll.u32 %s6994_s12, 4  ;;  %s695_s22 = sshll.u32 %s6996_s14, 4  ;;  %s670_s5 = int_to_ptr.hbm [resolvable:$true] %s669_s5  ;;  %s696_s22 = int_to_ptr.hbm [resolvable:$true] %s695_s22 }
  0x2a   : > { %s619_s26 = sshll.u32 %s7026_s8, 4  ;;  %s6309_s29 = smov [#allocation19]   ;;  %s620_s26 = int_to_ptr.hbm [resolvable:$true] %s619_s26 }
  0x2b   : > { %s645_s28 = sshll.u32 %s7027_s10, 4  ;;  %s671_s24 = sshll.u32 %s6309_s29, 4  ;;  %s646_s28 = int_to_ptr.hbm [resolvable:$true] %s645_s28  ;;  %s672_s24 = int_to_ptr.vmem [resolvable:$true] %s671_s24 }
  0x2c   : > { %4945 = dma.hbm_to_vmem [thread:$0]  (!%p6466_p5), %s620_s26, 32, %s622_s3, [#allocation14]  }
  0x2d   : > { %4951 = dma.hbm_to_vmem [thread:$0]  (!%p6466_p5), %s646_s28, 32, %s648_s23, [#allocation17]  }
  0x2e   : > { %4957 = dma.hbm_to_vmem [thread:$0]  (!%p6466_p5), %s670_s5, 32, %s672_s24, [#allocation20]  }
  0x2f   : > { %s6310_s26 = smov [#allocation22]   ;;  %s719_s21 = sshll.u32 %s6998_s16, 4  ;;  %s720_s21 = int_to_ptr.hbm [resolvable:$true] %s719_s21 }
  0x30   : > { %s697_s27 = sshll.u32 %s6310_s26, 4  ;;  %s744_s25 = sshll.u32 %s7000_s18, 4  ;;  %s698_s27 = int_to_ptr.vmem [resolvable:$true] %s697_s27  ;;  %s745_s25 = int_to_ptr.hbm [resolvable:$true] %s744_s25 }
  0x31   : > { %4963 = dma.hbm_to_vmem [thread:$0]  (!%p6466_p5), %s696_s22, 32, %s698_s27, [#allocation23]  }
  0x32   : > { %s6311_s6 = smov [#allocation25]   ;;  %s6312_s5 = smov [#allocation28]  }
  0x33   : > { %s721_s0 = sshll.u32 %s6311_s6, 4  ;;  %s746_s29 = sshll.u32 %s6312_s5, 4  ;;  %s722_s0 = int_to_ptr.vmem [resolvable:$true] %s721_s0  ;;  %s747_s29 = int_to_ptr.vmem [resolvable:$true] %s746_s29 }
  0x34   : > { %4969 = dma.hbm_to_vmem [thread:$0]  (!%p6466_p5), %s720_s21, 32, %s722_s0, [#allocation26]  }
  0x35   : > { %s7028_s3 = sld [smem:[#allocation48_spill]]  ;;  %s6313_s22 = smov [#allocation2]  }
  0x36   : > { %4975 = dma.hbm_to_vmem [thread:$0]  (!%p6466_p5), %s745_s25, 256, %s747_s29, [#allocation29], %s6304_s2, %s6304_s2, %s6305_s30  }
  0x37   : > { %s532_s27 = sshll.u32 %s6313_s22, 4  ;;  %s7029_s21 = sld [smem:[#allocation50_spill]]  ;;  %s533_s27 = int_to_ptr.vmem [resolvable:$true] %s532_s27 }
  0x38   : > { %s6314_s0 = smov 256   ;;  %s6315_s5 = smov 16  }
  0x39   : > { %s6316_s24 = smov [#allocation6]   ;;  %s7030_s10 = sld [smem:[#allocation52_spill]] }
  0x3a   : > { %s561_s26 = sshll.u32 %s6316_s24, 4  ;;  %s607_s28 = sshll.u32 %s6989_s7, 4  ;;  %s562_s26 = int_to_ptr.vmem [resolvable:$true] %s561_s26  ;;  %s608_s28 = int_to_ptr.hbm [resolvable:$true] %s607_s28 }
  0x3b   : > { %s530_s4 = sshll.u32 %s7028_s3, 4  ;;  %s6317_s23 = smov [#allocation9]   ;;  %s531_s4 = int_to_ptr.hbm [resolvable:$true] %s530_s4 }
  0x3c   : > { %4924 = dma.hbm_to_vmem [thread:$0]  (!%p6466_p5), %s531_s4, 73728, %s533_s27, [#allocation3], %s6314_s0, %s6314_s0, %s6315_s5  }
  0x3d   : > { %s559_s6 = sshll.u32 %s7029_s21, 4  ;;  %s585_s21 = sshll.u32 %s6317_s23, 4  ;;  %s560_s6 = int_to_ptr.hbm [resolvable:$true] %s559_s6  ;;  %s586_s21 = int_to_ptr.vmem [resolvable:$true] %s585_s21 }
  0x3e   : > { %4930 = dma.hbm_to_vmem [thread:$0]  (!%p6466_p5), %s560_s6, 128, %s562_s26, [#allocation5]  }
  0x3f   : > { %s583_s25 = sshll.u32 %s7030_s10, 4  ;;  %s6318_s4 = smov [#allocation12]   ;;  %s584_s25 = int_to_ptr.hbm [resolvable:$true] %s583_s25 }
  0x40   : > { %4936 = dma.hbm_to_vmem [thread:$0]  (!%p6466_p5), %s584_s25, 32, %s586_s21, [#allocation8]  }
  0x41   : > { %s609_s27 = sshll.u32 %s6318_s4, 4  ;;  %s630_s10 = sshll.u32 %s6991_s9, 4  ;;  %s610_s27 = int_to_ptr.vmem [resolvable:$true] %s609_s27  ;;  %s631_s10 = int_to_ptr.hbm [resolvable:$true] %s630_s10 }
  0x42   : > { %4942 = dma.hbm_to_vmem [thread:$0]  (!%p6466_p5), %s608_s28, 32, %s610_s27, [#allocation11]  }
  0x43   : > { %s6319_s6 = smov [#allocation15]   ;;  %s657_s3 = sshll.u32 %s6993_s11, 4  ;;  %s658_s3 = int_to_ptr.hbm [resolvable:$true] %s657_s3 }
  0x44   : > { %s632_s5 = sshll.u32 %s6319_s6, 4  ;;  %s6320_s25 = smov 32   ;;  %s633_s5 = int_to_ptr.vmem [resolvable:$true] %s632_s5 }
  0x45   : > { %s6321_s29 = smov 2   ;;  %s6322_s22 = smov [#allocation18]  }
  0x46   : > { %4948 = dma.hbm_to_vmem [thread:$0]  (!%p6466_p5), %s631_s10, 288, %s633_s5, [#allocation14], %s6320_s25, %s6320_s25, %s6321_s29  }
  0x47   : > { %s659_s23 = sshll.u32 %s6322_s22, 4  ;;  %s680_s28 = sshll.u32 %s6995_s13, 4  ;;  %s660_s23 = int_to_ptr.vmem [resolvable:$true] %s659_s23  ;;  %s681_s28 = int_to_ptr.hbm [resolvable:$true] %s680_s28 }
  0x48   : > { %4954 = dma.hbm_to_vmem [thread:$0]  (!%p6466_p5), %s658_s3, 32, %s660_s23, [#allocation17]  }
  0x49   : > { %s707_s0 = sshll.u32 %s6997_s15, 4  ;;  %s6323_s6 = smov [#allocation21]   ;;  %s708_s0 = int_to_ptr.hbm [resolvable:$true] %s707_s0 }
  0x4a   : > { %s682_s24 = sshll.u32 %s6323_s6, 4  ;;  %s6324_s10 = smov [#allocation24]   ;;  %s683_s24 = int_to_ptr.vmem [resolvable:$true] %s682_s24 }
  0x4b   : > { %4960 = dma.hbm_to_vmem [thread:$0]  (!%p6466_p5), %s681_s28, 288, %s683_s24, [#allocation20], %s6320_s25, %s6320_s25, %s6321_s29  }
  0x4c   : > { %s709_s5 = sshll.u32 %s6324_s10, 4  ;;  %s730_s21 = sshll.u32 %s6999_s17, 4  ;;  %s710_s5 = int_to_ptr.vmem [resolvable:$true] %s709_s5  ;;  %s731_s21 = int_to_ptr.hbm [resolvable:$true] %s730_s21 }
  0x4d   : > { %4966 = dma.hbm_to_vmem [thread:$0]  (!%p6466_p5), %s708_s0, 32, %s710_s5, [#allocation23]  }
  0x4e   : > { %s759_s4 = sshll.u32 %s7001_s19, 4  ;;  %s6325_s27 = smov [#allocation27]   ;;  %s760_s4 = int_to_ptr.hbm [resolvable:$true] %s759_s4 }
  0x4f   : > { %s732_s8 = sshll.u32 %s6325_s27, 4  ;;  %s6326_s25 = smov [#allocation30]   ;;  %s733_s8 = int_to_ptr.vmem [resolvable:$true] %s732_s8 }
  0x50   : > { %4972 = dma.hbm_to_vmem [thread:$0]  (!%p6466_p5), %s731_s21, 256, %s733_s8, [#allocation26], %s6304_s2, %s6304_s2, %s6305_s30  }
  0x51   : > { %s761_s29 = sshll.u32 %s6326_s25, 4  ;;  %s771_s0 = sshll.u32 %s7002_s20, 4  ;;  %s762_s29 = int_to_ptr.vmem [resolvable:$true] %s761_s29  ;;  %s772_s0 = int_to_ptr.hbm [resolvable:$true] %s771_s0 }
  0x52   : > { %4978 = dma.hbm_to_vmem [thread:$0]  (!%p6466_p5), %s760_s4, 128, %s762_s29, [#allocation29]  }
  0x53   : > { %s6327_s24 = smov [#allocation31]   ;;  %794 = sbr.rel (%p6455_p3) target bundleno = 4565 (0x11d5), region = 104 }
  0x54   : > { %s773_s10 = sshll.u32 %s6327_s24, 4  ;;  %s7032_s26 = sld [smem:[#allocation45_spill]] (!%p6455_p3)  ;;  %s774_s10 = int_to_ptr.vmem [resolvable:$true] %s773_s10 }
  0x55   : > { %4981 = dma.hbm_to_vmem [thread:$0]  (!%p6466_p5), %s772_s0, 128, %s774_s10, [#allocation32]  }
  0x58   : > { %6255 = dma.done.wait (%p4982_p2), [#allocation3], 73728  }
  0x59   : > { %6257 = vsyncadd (%p4982_p2), [#allocation3], 4294893568 }
  0x5a   : > { %6259 = dma.done.wait (%p4982_p2), [#allocation5], 4224  }
  0x5b   : > { %6261 = vsyncadd (%p4982_p2), [#allocation5], 4294963072 }
  0x5c   : > { %6263 = dma.done.wait (%p4982_p2), [#allocation8], 160  }
  0x5d   : > { %6265 = vsyncadd (%p4982_p2), [#allocation8], 4294967136 }
  0x5e   : > { %6267 = dma.done.wait (%p4982_p2), [#allocation11], 64  }
  0x5f   : > { %6269 = vsyncadd (%p4982_p2), [#allocation11], 4294967232 }
  0x60   : > { %6271 = dma.done.wait (%p4982_p2), [#allocation14], 320  }
  0x61   : > { %6273 = vsyncadd (%p4982_p2), [#allocation14], 4294966976 }
  0x62   : > { %6275 = dma.done.wait (%p4982_p2), [#allocation17], 64  }
  0x63   : > { %6277 = vsyncadd (%p4982_p2), [#allocation17], 4294967232 }
  0x64   : > { %6279 = dma.done.wait (%p4982_p2), [#allocation20], 320  }
  0x65   : > { %6281 = vsyncadd (%p4982_p2), [#allocation20], 4294966976 }
  0x66   : > { %6283 = dma.done.wait (%p4982_p2), [#allocation23], 64  }
  0x67   : > { %6285 = vsyncadd (%p4982_p2), [#allocation23], 4294967232 }
  0x68   : > { %6287 = dma.done.wait (%p4982_p2), [#allocation26], 288  }
  0x69   : > { %6289 = vsyncadd (%p4982_p2), [#allocation26], 4294967008 }
  0x6a   : > { %6291 = dma.done.wait (%p4982_p2), [#allocation29], 384  }
  0x6b   : > { %6293 = vsyncadd (%p4982_p2), [#allocation29], 4294966912 }
  0x6c   : > { %6295 = dma.done.wait (%p4982_p2), [#allocation32], 128  }
  0x6d   : > { %6297 = vsyncadd (%p4982_p2), [#allocation32], 4294967168  ;;  %p950_p6 = scmp.lt.s32.totalorder %s7032_s26, 1  ;;  %s7033_s22 = sld [smem:[#allocation47_spill]]  ;;  %v6328_v3 = vmov 2048.0   ;;  %v962_v4 = vld [vmem:[#allocation6] sm:$0xff] }
  0x6e   : > { %5062 = vrcp.f32 %v6328_v3  ;;  %v6329_v5 = vmov 0   ;;  %v963_v8 = vld [vmem:[#allocation7] sm:$0xff]  ;;  %v1075_v14 = vld [vmem:[#allocation12] sm:$0x3]  ;;  %v1025_v35 = vld [vmem:[#allocation10] sm:$0x3] }
  0x6f   : > { %s7037_s26 = smov (!%p950_p6, %s7032_s26), 1  ;;  %5059 = vset.pattern.permute.xlu1 %v6329_v5  ;;  %5060 = vset.pattern.permute.xlu2 %v6329_v5  ;;  %v1144_v21 = vld [vmem:[#allocation16] sm:$0x3]  ;;  %v1024_v55 = vld [vmem:[#allocation9] sm:$0x3]  ;;  %vm1031_vm4 = vcmask 64512  }
  0x70   : > { %s4839_s2 = sshll.u32 %s7037_s26, 4  ;;  %1010 = vperm.xlu1 %5059, %v962_v4   ;;  %5061 = vset.pattern.permute.xlu0 %v6329_v5  ;;  %vm1077_vm5 = vcmask 1041408   ;;  %vm1437_vm10 = vcmask 15360   ;;  %s7034_s4 = sld [smem:[#allocation56_spill]] }
  0x71   : > { %1028 = vperm.xlu2 %5060, %v1025_v35   ;;  %v1206_v35 = vld [vmem:[#allocation2 + $0x1e8] sm:$0xff] }
  0x73   : > { %s954_s21 = scalar_lea.vmem %s7033_s22, %s4839_s2 }
  0x74   : > { %v960_v0 = vld [vmem:[%s954_s21] sm:$0xff]  ;;  %v961_v1 = vld [vmem:[%s954_s21 + $0x8] sm:$0xff]  ;;  %v5063_v6 = vpop.eup %5062 }
  0x75   : > { %v964_v2 = vadd.f32 %v961_v1, %v960_v0  ;;  %v974_v7 = vmul.f32 2048.0, %v5063_v6  ;;  %vm978_vm0 = vweird.f32 %v5063_v6 }
  0x76   : > { %s959_s27 = scalar_lea.vmem %s7034_s4, %s4839_s2 }
  0x77   : > { %965 = vadd.xlane.f32.xlu0 %v964_v2  ;;  %v975_v9 = vsub.f32 1.0, %v974_v7 }
  0x78   : > { %1017 = vperm.xlu1 %5059, %v963_v8  }
  0x79   : > { %v976_v12 = vmul.f32 %v5063_v6, %v975_v9 }
  0x7b   : > { %v977_v16 = vadd.f32 %v5063_v6, %v976_v12 }
  0x7d   : > { %v979_v19 = vsel %vm978_vm0, %v5063_v6, %v977_v16 }
  0x80   : > { %1130 = vperm.xlu1 %5059, %v1075_v14  }
  0x88   : > { %2924 = vperm.xlu1 %5059, %v1144_v21  }
  0xcb   : > { %v1029_v56 = vpop.permute.xlu2 %1028 }
  0xe2   : > { %v1011_v41 = vpop.permute.xlu1 %1010 }
  0xea   : > { %v966_v10 = vpop.xlane.xlu0 %965  ;;  %v1018_v50 = vpop.permute.xlu1 %1017 }
  0xeb   : > { %v967_v11 = vrot.slane %v966_v10, 4 }
  0xed   : > { %v968_v13 = vadd.f32 %v967_v11, %v966_v10 }
  0xef   : > { %v969_v15 = vrot.slane %v968_v13, 2 }
  0xf1   : > { %v970_v17 = vadd.f32 %v969_v15, %v968_v13 }
  0xf3   : > { %v971_v18 = vrot.slane %v970_v17, 1 }
  0xf5   : > { %v972_v20 = vadd.f32 %v971_v18, %v970_v17 }
  0xf7   : > { %v980_v22 = vmul.f32 %v979_v19, %v972_v20 }
  0xf9   : > { %v981_v23 = vsub.f32 %v960_v0, %v980_v22  ;;  %v982_v24 = vsub.f32 %v961_v1, %v980_v22  ;;  %v6330_v0 = vmov 512.0  }
  0xfb   : > { %v983_v25 = vmul.f32 %v981_v23, %v981_v23  ;;  %v984_v26 = vmul.f32 %v982_v24, %v982_v24 }
  0xfd   : > { %v985_v27 = vadd.f32 %v984_v26, %v983_v25  ;;  %v1173_v25 = vld [vmem:[#allocation2 + $0xe0] sm:$0xff] }
  0xfe   : > { %v1205_v26 = vld [vmem:[#allocation2 + $0x1e0] sm:$0xff] }
  0xff   : > { %986 = vadd.xlane.f32.xlu0 %v985_v27  ;;  %v1171_v27 = vld [vmem:[#allocation2 + $0xd0] sm:$0xff] }
 0x172   : > { %v987_v28 = vpop.xlane.xlu0 %986 }
 0x173   : > { %v988_v29 = vrot.slane %v987_v28, 4 }
 0x175   : > { %v989_v30 = vadd.f32 %v988_v29, %v987_v28  ;;  %v1203_v28 = vld [vmem:[#allocation2 + $0x1d0] sm:$0xff]  ;;  %v1176_v29 = vld [vmem:[#allocation2 + $0xf8] sm:$0xff] }
 0x177   : > { %v990_v31 = vrot.slane %v989_v30, 2 }
 0x179   : > { %v991_v32 = vadd.f32 %v990_v31, %v989_v30  ;;  %v1208_v30 = vld [vmem:[#allocation2 + $0x1f8] sm:$0xff]  ;;  %v1169_v31 = vld [vmem:[#allocation2 + $0xc0] sm:$0xff] }
 0x17b   : > { %v992_v33 = vrot.slane %v991_v32, 1 }
 0x17d   : > { %v993_v34 = vadd.f32 %v992_v33, %v991_v32  ;;  %v1201_v32 = vld [vmem:[#allocation2 + $0x1c0] sm:$0xff]  ;;  %v1174_v33 = vld [vmem:[#allocation2 + $0xe8] sm:$0xff] }
 0x17f   : > { %v994_v36 = vmul.f32 %v993_v34, %v979_v19  ;;  %v1167_v34 = vld [vmem:[#allocation2 + $0xb0] sm:$0xff] }
 0x181   : > { %v995_v37 = vadd.f32 1e-05, %v994_v36  ;;  %v1199_v36 = vld [vmem:[#allocation2 + $0x1b0] sm:$0xff] }
 0x183   : > { %5064 = vrsqrt.f32 %v995_v37  ;;  %vm1002_vm2 = vweird.f32 %v995_v37 }
 0x184   : > { %5066 = vrcp.f32 %v6330_v0  ;;  %v1153_v0 = vld [vmem:[#allocation2 + $0x40] sm:$0xff] }
 0x189   : > { %v5065_v38 = vpop.eup %5064 }
 0x18a   : > { %v997_v39 = vmul.f32 %v5065_v38, %v995_v37  ;;  %vm1003_vm1 = vweird.f32 %v5065_v38  ;;  %v5067_v1 = vpop.eup %5066  ;;  %v1172_v37 = vld [vmem:[#allocation2 + $0xd8] sm:$0xff] }
 0x18b   : > { %vm1004_vm3 = vmor %vm1002_vm2, %vm1003_vm1  ;;  %v1091_v2 = vmul.f32 512.0, %v5067_v1  ;;  %vm1095_vm6 = vweird.f32 %v5067_v1  ;;  %vm4455_vm1 = vcmask 523264  }
 0x18c   : > { %v998_v40 = vmul.f32 %v5065_v38, %v997_v39  ;;  %v1170_v39 = vld [vmem:[#allocation2 + $0xc8] sm:$0xff] }
 0x18d   : > { %v1092_v3 = vsub.f32 1.0, %v1091_v2  ;;  %v1162_v2 = vld [vmem:[#allocation2 + $0x88] sm:$0xff] }
 0x18e   : > { %v999_v42 = vmul.f32 0.5, %v998_v40  ;;  %v1202_v40 = vld [vmem:[#allocation2 + $0x1c8] sm:$0xff] }
 0x18f   : > { %v1093_v7 = vmul.f32 %v5067_v1, %v1092_v3  ;;  %v1194_v3 = vld [vmem:[#allocation2 + $0x188] sm:$0xff] }
 0x190   : > { %v1000_v43 = vsub.f32 1.5, %v999_v42  ;;  %v1197_v42 = vld [vmem:[#allocation2 + $0x1a0] sm:$0xff] }
 0x191   : > { %v1094_v10 = vadd.f32 %v5067_v1, %v1093_v7  ;;  %v1192_v7 = vld [vmem:[#allocation2 + $0x178] sm:$0xff] }
 0x192   : > { %v1001_v44 = vmul.f32 %v5065_v38, %v1000_v43  ;;  %v1168_v43 = vld [vmem:[#allocation2 + $0xb8] sm:$0xff] }
 0x193   : > { %v6640_v13 = vsel %vm1095_vm6, %v5067_v1, %v1094_v10  ;;  %v1185_v1 = vld [vmem:[#allocation2 + $0x140] sm:$0xff]  ;;  %v1158_v10 = vld [vmem:[#allocation2 + $0x68] sm:$0xff] }
 0x194   : > { %v1005_v45 = vsel %vm1004_vm3, %v5065_v38, %v1001_v44  ;;  %v1204_v38 = vld [vmem:[#allocation2 + $0x1d8] sm:$0xff] }
 0x195   : > { %v1006_v46 = vmul.f32 %v1005_v45, %v981_v23  ;;  %v1007_v47 = vmul.f32 %v1005_v45, %v982_v24  ;;  %v1175_v23 = vld [vmem:[#allocation2 + $0xf0] sm:$0xff]  ;;  %v1200_v44 = vld [vmem:[#allocation2 + $0x1b8] sm:$0xff] }
 0x196   : > { %v1207_v24 = vld [vmem:[#allocation2 + $0x1f0] sm:$0xff]  ;;  %1209 = vmatpush.msra.mxu2 %v1175_v23 }
 0x197   : > { %v1013_v48 = vmul.f32 %v1011_v41, %v1006_v46  ;;  %v1014_v49 = vmul.f32 %v1011_v41, %v1007_v47  ;;  %1229 = vmatpush.msra.mxu3 %v1207_v24  ;;  %v1165_v41 = vld [vmem:[#allocation2 + $0xa0] sm:$0xff]  ;;  %v1163_v45 = vld [vmem:[#allocation2 + $0x90] sm:$0xff]  ;;  %v1166_v47 = vld [vmem:[#allocation2 + $0xa8] sm:$0xff] }
 0x198   : > { %1210 = vmatpush.msra.mxu2 %v1173_v25  ;;  %v1195_v46 = vld [vmem:[#allocation2 + $0x190] sm:$0xff]  ;;  %v1152_v25 = vld [vmem:[#allocation2 + $0x38] sm:$0xff] }
 0x199   : > { %v1020_v51 = vadd.f32 %v1018_v50, %v1013_v48  ;;  %v1021_v52 = vadd.f32 %v1018_v50, %v1014_v49  ;;  %1230 = vmatpush.msra.mxu3 %v1205_v26  ;;  %v1198_v48 = vld [vmem:[#allocation2 + $0x1a8] sm:$0xff]  ;;  %v1161_v49 = vld [vmem:[#allocation2 + $0x80] sm:$0xff]  ;;  %v1321_v23 = vld [vmem:[#allocation2 + $0x2f0] sm:$0xff] }
 0x19a   : > { %1211 = vmatpush.msra.mxu2 %v1171_v27  ;;  %v1193_v50 = vld [vmem:[#allocation2 + $0x180] sm:$0xff]  ;;  %v1353_v24 = vld [vmem:[#allocation2 + $0x3f0] sm:$0xff]  ;;  %v1184_v26 = vld [vmem:[#allocation2 + $0x138] sm:$0xff] }
 0x19b   : > { %v6629_v53 = vmax.f32 %v1020_v51, 0.0  ;;  %v6631_v54 = vmax.f32 %v1021_v52, 0.0  ;;  %1231 = vmatpush.msra.mxu3 %v1203_v28  ;;  %v1076_v51 = vld [vmem:[#allocation13] sm:$0x3]  ;;  %v1319_v27 = vld [vmem:[#allocation2 + $0x2e0] sm:$0xff] }
 0x19c   : > { %1212 = vmatpush.msra.mxu2 %v1169_v31  ;;  %v1159_v52 = vld [vmem:[#allocation2 + $0x70] sm:$0xff]  ;;  %v1351_v28 = vld [vmem:[#allocation2 + $0x3e0] sm:$0xff] }
 0x19d   : > { %1050 = vmatpush.msra.mxu0 %v6629_v53  ;;  %1070 = vmatpush.msra.mxu1 %v6631_v54  ;;  %v1317_v31 = vld [vmem:[#allocation2 + $0x2d0] sm:$0xff] }
 0x19e   : > { %4755 = vmatmul.msk.f32.vlgmr.msra.gmra.mxu0 %vm1031_vm4, %v1024_v55  ;;  %4756 = vmatmul.msk.f32.vlgmr.msra.gmra.mxu1 %vm1031_vm4, %v1024_v55  ;;  %v1191_v55 = vld [vmem:[#allocation2 + $0x170] sm:$0xff] }
 0x19f   : > { %1249 = vmatpush.msrb.mxu0 %v1176_v29  ;;  %1269 = vmatpush.msrb.mxu1 %v1208_v30  ;;  %v1150_v29 = vld [vmem:[#allocation2 + $0x28] sm:$0xff] }
 0x1a0   : > { %1232 = vmatpush.msra.mxu3 %v1201_v32  ;;  %1213 = vmatpush.msra.mxu2 %v1167_v34  ;;  %v1182_v30 = vld [vmem:[#allocation2 + $0x128] sm:$0xff]  ;;  %v1349_v32 = vld [vmem:[#allocation2 + $0x3d0] sm:$0xff]  ;;  %v1180_v34 = vld [vmem:[#allocation2 + $0x118] sm:$0xff] }
 0x1a1   : > { %1250 = vmatpush.msrb.mxu0 %v1174_v33  ;;  %1270 = vmatpush.msrb.mxu1 %v1206_v35  ;;  %v1148_v33 = vld [vmem:[#allocation2 + $0x18] sm:$0xff]  ;;  %v1315_v35 = vld [vmem:[#allocation2 + $0x2c0] sm:$0xff] }
 0x1a2   : > { %1233 = vmatpush.msra.mxu3 %v1199_v36  ;;  %1214 = vmatpush.msra.mxu2 %v1165_v41  ;;  %v1347_v36 = vld [vmem:[#allocation2 + $0x3c0] sm:$0xff]  ;;  %v1322_v41 = vld [vmem:[#allocation2 + $0x2f8] sm:$0xff] }
 0x1a3   : > { %1251 = vmatpush.msrb.mxu0 %v1172_v37  ;;  %1271 = vmatpush.msrb.mxu1 %v1204_v38  ;;  %v1146_v37 = vld [vmem:[#allocation2 + $0x8] sm:$0xff] }
 0x1a4   : > { %1234 = vmatpush.msra.mxu3 %v1197_v42  ;;  %1215 = vmatpush.msra.mxu2 %v1163_v45  ;;  %v1178_v38 = vld [vmem:[#allocation2 + $0x108] sm:$0xff]  ;;  %v1354_v42 = vld [vmem:[#allocation2 + $0x3f8] sm:$0xff] }
 0x1a5   : > { %1252 = vmatpush.msrb.mxu0 %v1170_v39  ;;  %1272 = vmatpush.msrb.mxu1 %v1202_v40  ;;  %v1313_v39 = vld [vmem:[#allocation2 + $0x2b0] sm:$0xff]  ;;  %v1320_v45 = vld [vmem:[#allocation2 + $0x2e8] sm:$0xff] }
 0x1a6   : > { %1235 = vmatpush.msra.mxu3 %v1195_v46  ;;  %1216 = vmatpush.msra.mxu2 %v1161_v49  ;;  %v1345_v40 = vld [vmem:[#allocation2 + $0x3b0] sm:$0xff]  ;;  %v1352_v46 = vld [vmem:[#allocation2 + $0x3e8] sm:$0xff]  ;;  %v1318_v49 = vld [vmem:[#allocation2 + $0x2d8] sm:$0xff] }
 0x1a7   : > { %1253 = vmatpush.msrb.mxu0 %v1168_v43  ;;  %1273 = vmatpush.msrb.mxu1 %v1200_v44  ;;  %v1311_v43 = vld [vmem:[#allocation2 + $0x2a0] sm:$0xff] }
 0x1a8   : > { %1236 = vmatpush.msra.mxu3 %v1193_v50  ;;  %1217 = vmatpush.msra.mxu2 %v1159_v52  ;;  %v1343_v44 = vld [vmem:[#allocation2 + $0x3a0] sm:$0xff]  ;;  %v1350_v50 = vld [vmem:[#allocation2 + $0x3d8] sm:$0xff] }
 0x1a9   : > { %1254 = vmatpush.msrb.mxu0 %v1166_v47  ;;  %1274 = vmatpush.msrb.mxu1 %v1198_v48  ;;  %v1309_v47 = vld [vmem:[#allocation2 + $0x290] sm:$0xff]  ;;  %v1339_v52 = vld [vmem:[#allocation2 + $0x380] sm:$0xff] }
 0x1aa   : > { %1237 = vmatpush.msra.mxu3 %v1191_v55  ;;  %v1341_v48 = vld [vmem:[#allocation2 + $0x390] sm:$0xff]  ;;  %v1316_v55 = vld [vmem:[#allocation2 + $0x2c8] sm:$0xff] }
 0x21b   : > { %v1052_v57 = vpop.f32.mrf.mxu0  ;;  %v1072_v58 = vpop.f32.mrf.mxu1 }
 0x21c   : > { %v1053_v59 = vadd.f32 %v1052_v57, %v1029_v56  ;;  %v1073_v60 = vadd.f32 %v1072_v58, %v1029_v56  ;;  %v1157_v56 = vld [vmem:[#allocation2 + $0x60] sm:$0xff]  ;;  %v2930_v58 = vld [vmem:[#allocation19] sm:$0x3] }
 0x21d   : > { %v1189_v57 = vld [vmem:[#allocation2 + $0x160] sm:$0xff]  ;;  %1218 = vmatpush.msra.mxu2 %v1157_v56  ;;  %v1348_v56 = vld [vmem:[#allocation2 + $0x3c8] sm:$0xff] }
 0x21e   : > { %v1078_v61 = vsel %vm1077_vm5, %v1053_v59, 0.0  ;;  %v1079_v62 = vsel %vm1077_vm5, %v1073_v60, 0.0  ;;  %1238 = vmatpush.msra.mxu3 %v1189_v57  ;;  %v1305_v57 = vld [vmem:[#allocation2 + $0x270] sm:$0xff] }
 0x21f   : > { %v1080_v63 = vadd.f32 %v1079_v62, %v1078_v61  ;;  %v1187_v61 = vld [vmem:[#allocation2 + $0x150] sm:$0xff]  ;;  %v1164_v62 = vld [vmem:[#allocation2 + $0x98] sm:$0xff] }
 0x220   : > { %1239 = vmatpush.msra.mxu3 %v1187_v61  ;;  %1255 = vmatpush.msrb.mxu0 %v1164_v62  ;;  %v1303_v61 = vld [vmem:[#allocation2 + $0x260] sm:$0xff] }
 0x221   : > { %1081 = vadd.xlane.f32.xlu2 %v1080_v63  ;;  %v1196_v63 = vld [vmem:[#allocation2 + $0x198] sm:$0xff]  ;;  %v1335_v62 = vld [vmem:[#allocation2 + $0x360] sm:$0xff] }
 0x222   : > { %1275 = vmatpush.msrb.mxu1 %v1196_v63  ;;  %1240 = vmatpush.msra.mxu3 %v1185_v1  ;;  %v1312_v63 = vld [vmem:[#allocation2 + $0x2a8] sm:$0xff] }
 0x223   : > { %1256 = vmatpush.msrb.mxu0 %v1162_v2  ;;  %v1301_v2 = vld [vmem:[#allocation2 + $0x250] sm:$0xff] }
 0x224   : > { %1276 = vmatpush.msrb.mxu1 %v1194_v3  ;;  %v1333_v3 = vld [vmem:[#allocation2 + $0x350] sm:$0xff] }
 0x226   : > { %1277 = vmatpush.msrb.mxu1 %v1192_v7 }
 0x294   : > { %v1082_v4 = vpop.xlane.xlu2 %1081 }
 0x295   : > { %v1083_v5 = vsel %vm1077_vm5, %v1082_v4, 0.0  ;;  %v1151_v4 = vld [vmem:[#allocation2 + $0x30] sm:$0xff] }
 0x296   : > { %v1084_v6 = vrot.slane %v1083_v5, 4 }
 0x298   : > { %v1085_v8 = vadd.f32 %v1084_v6, %v1083_v5  ;;  %v1183_v5 = vld [vmem:[#allocation2 + $0x130] sm:$0xff]  ;;  %v1160_v6 = vld [vmem:[#allocation2 + $0x78] sm:$0xff] }
 0x299   : > { %1241 = vmatpush.msra.mxu3 %v1183_v5  ;;  %1257 = vmatpush.msrb.mxu0 %v1160_v6  ;;  %v1342_v6 = vld [vmem:[#allocation2 + $0x398] sm:$0xff] }
 0x29a   : > { %v1086_v9 = vrot.slane %v1085_v8, 2 }
 0x29b   : > { %1258 = vmatpush.msrb.mxu0 %v1158_v10  ;;  %v1308_v10 = vld [vmem:[#allocation2 + $0x288] sm:$0xff] }
 0x29c   : > { %v1087_v11 = vadd.f32 %v1086_v9, %v1085_v8  ;;  %v1149_v8 = vld [vmem:[#allocation2 + $0x20] sm:$0xff] }
 0x29d   : > { %v1181_v9 = vld [vmem:[#allocation2 + $0x120] sm:$0xff] }
 0x29e   : > { %v1088_v12 = vrot.slane %v1087_v11, 1  ;;  %1242 = vmatpush.msra.mxu3 %v1181_v9  ;;  %v1331_v9 = vld [vmem:[#allocation2 + $0x340] sm:$0xff] }
 0x2a0   : > { %v1089_v14 = vadd.f32 %v1088_v12, %v1087_v11  ;;  %v1190_v11 = vld [vmem:[#allocation2 + $0x168] sm:$0xff]  ;;  %v1147_v12 = vld [vmem:[#allocation2 + $0x10] sm:$0xff] }
 0x2a1   : > { %1278 = vmatpush.msrb.mxu1 %v1190_v11  ;;  %v1340_v11 = vld [vmem:[#allocation2 + $0x388] sm:$0xff] }
 0x2a2   : > { %v1097_v15 = vmul.f32 %v6640_v13, %v1089_v14  ;;  %v1179_v14 = vld [vmem:[#allocation2 + $0x110] sm:$0xff] }
 0x2a3   : > { %1243 = vmatpush.msra.mxu3 %v1179_v14  ;;  %v1297_v14 = vld [vmem:[#allocation2 + $0x230] sm:$0xff] }
 0x2a4   : > { %v6643_v16 = vsub.f32 %v1053_v59, %v1097_v15  ;;  %v6645_v17 = vsub.f32 %v1073_v60, %v1097_v15  ;;  %v2990_v59 = vld [vmem:[#allocation22] sm:$0x3]  ;;  %v1155_v60 = vld [vmem:[#allocation2 + $0x50] sm:$0xff]  ;;  %v1156_v15 = vld [vmem:[#allocation2 + $0x58] sm:$0xff] }
 0x2a5   : > { %1219 = vmatpush.msra.mxu2 %v1155_v60  ;;  %1259 = vmatpush.msrb.mxu0 %v1156_v15  ;;  %v1346_v60 = vld [vmem:[#allocation2 + $0x3b8] sm:$0xff]  ;;  %v1329_v15 = vld [vmem:[#allocation2 + $0x330] sm:$0xff] }
 0x2a6   : > { %v1100_v18 = vmul.f32 %v6643_v16, %v6643_v16  ;;  %v1101_v19 = vmul.f32 %v6645_v17, %v6645_v17 }
 0x2a7   : > { %1220 = vmatpush.msra.mxu2 %v1153_v0  ;;  %v1344_v0 = vld [vmem:[#allocation2 + $0x3a8] sm:$0xff] }
 0x2a8   : > { %v1102_v20 = vsel %vm1077_vm5, %v1100_v18, 0.0  ;;  %v1103_v21 = vsel %vm1077_vm5, %v1101_v19, 0.0  ;;  %v1188_v18 = vld [vmem:[#allocation2 + $0x158] sm:$0xff]  ;;  %v1145_v19 = vld [vmem:[#allocation2] sm:$0xff] }
 0x2a9   : > { %v1104_v22 = vadd.f32 %v1103_v21, %v1102_v20  ;;  %1221 = vmatpush.msra.mxu2 %v1151_v4  ;;  %1279 = vmatpush.msrb.mxu1 %v1188_v18  ;;  %v1177_v20 = vld [vmem:[#allocation2 + $0x100] sm:$0xff]  ;;  %v1154_v21 = vld [vmem:[#allocation2 + $0x48] sm:$0xff]  ;;  %v1310_v4 = vld [vmem:[#allocation2 + $0x298] sm:$0xff] }
 0x2aa   : > { %1244 = vmatpush.msra.mxu3 %v1177_v20  ;;  %1260 = vmatpush.msrb.mxu0 %v1154_v21  ;;  %v1306_v18 = vld [vmem:[#allocation2 + $0x278] sm:$0xff]  ;;  %v1295_v21 = vld [vmem:[#allocation2 + $0x220] sm:$0xff] }
 0x2ab   : > { %1105 = vadd.xlane.f32.xlu0 %v1104_v22  ;;  %1222 = vmatpush.msra.mxu2 %v1149_v8  ;;  %v1186_v22 = vld [vmem:[#allocation2 + $0x148] sm:$0xff]  ;;  %v1299_v8 = vld [vmem:[#allocation2 + $0x240] sm:$0xff] }
 0x2ac   : > { %1280 = vmatpush.msrb.mxu1 %v1186_v22  ;;  %1375 = vmatpush.msrb.mxu3 %v1353_v24  ;;  %v1327_v22 = vld [vmem:[#allocation2 + $0x320] sm:$0xff]  ;;  %v1336_v24 = vld [vmem:[#allocation2 + $0x368] sm:$0xff] }
 0x2ad   : > { %1223 = vmatpush.msra.mxu2 %v1147_v12  ;;  %1261 = vmatpush.msrb.mxu0 %v1152_v25 }
 0x2ae   : > { %1281 = vmatpush.msrb.mxu1 %v1184_v26  ;;  %1376 = vmatpush.msrb.mxu3 %v1351_v28  ;;  %v1293_v26 = vld [vmem:[#allocation2 + $0x210] sm:$0xff]  ;;  %v1302_v28 = vld [vmem:[#allocation2 + $0x258] sm:$0xff] }
 0x2af   : > { %1224 = vmatpush.msra.mxu2 %v1145_v19  ;;  %1262 = vmatpush.msrb.mxu0 %v1150_v29  ;;  %v1338_v19 = vld [vmem:[#allocation2 + $0x378] sm:$0xff] }
 0x2b0   : > { %1282 = vmatpush.msrb.mxu1 %v1182_v30  ;;  %1377 = vmatpush.msrb.mxu3 %v1349_v32  ;;  %v1334_v29 = vld [vmem:[#allocation2 + $0x358] sm:$0xff]  ;;  %v1323_v32 = vld [vmem:[#allocation2 + $0x300] sm:$0xff] }
 0x2b1   : > { %1355 = vmatpush.msrb.mxu2 %v1321_v23  ;;  %1263 = vmatpush.msrb.mxu0 %v1148_v33  ;;  %v1304_v23 = vld [vmem:[#allocation2 + $0x268] sm:$0xff] }
 0x2b2   : > { %1283 = vmatpush.msrb.mxu1 %v1180_v34  ;;  %1378 = vmatpush.msrb.mxu3 %v1347_v36  ;;  %v1300_v33 = vld [vmem:[#allocation2 + $0x248] sm:$0xff] }
 0x2b3   : > { %1356 = vmatpush.msrb.mxu2 %v1319_v27  ;;  %1264 = vmatpush.msrb.mxu0 %v1146_v37  ;;  %v1325_v27 = vld [vmem:[#allocation2 + $0x310] sm:$0xff]  ;;  %v1332_v34 = vld [vmem:[#allocation2 + $0x348] sm:$0xff]  ;;  %v1298_v37 = vld [vmem:[#allocation2 + $0x238] sm:$0xff] }
 0x2b4   : > { %1284 = vmatpush.msrb.mxu1 %v1178_v38  ;;  %1379 = vmatpush.msrb.mxu3 %v1345_v40  ;;  %v1330_v38 = vld [vmem:[#allocation2 + $0x338] sm:$0xff]  ;;  %v1296_v40 = vld [vmem:[#allocation2 + $0x228] sm:$0xff] }
 0x2b5   : > { %1357 = vmatpush.msrb.mxu2 %v1317_v31  ;;  %1395 = vmatpush.msra.mxu0 %v1322_v41  ;;  %v1291_v31 = vld [vmem:[#allocation2 + $0x200] sm:$0xff]  ;;  %v1328_v41 = vld [vmem:[#allocation2 + $0x328] sm:$0xff] }
 0x2b6   : > { %1415 = vmatpush.msra.mxu1 %v1354_v42  ;;  %1380 = vmatpush.msrb.mxu3 %v1343_v44  ;;  %v1294_v42 = vld [vmem:[#allocation2 + $0x218] sm:$0xff]  ;;  %v1292_v44 = vld [vmem:[#allocation2 + $0x208] sm:$0xff] }
 0x2b7   : > { %1358 = vmatpush.msrb.mxu2 %v1315_v35  ;;  %1396 = vmatpush.msra.mxu0 %v1320_v45  ;;  %v1324_v45 = vld [vmem:[#allocation2 + $0x308] sm:$0xff] }
 0x2b8   : > { %1416 = vmatpush.msra.mxu1 %v1352_v46  ;;  %1381 = vmatpush.msrb.mxu3 %v1341_v48 }
 0x2b9   : > { %1359 = vmatpush.msrb.mxu2 %v1313_v39  ;;  %1397 = vmatpush.msra.mxu0 %v1318_v49 }
 0x2ba   : > { %1417 = vmatpush.msra.mxu1 %v1350_v50  ;;  %1382 = vmatpush.msrb.mxu3 %v1339_v52 }
 0x2bb   : > { %1360 = vmatpush.msrb.mxu2 %v1311_v43  ;;  %1398 = vmatpush.msra.mxu0 %v1316_v55  ;;  %v1326_v43 = vld [vmem:[#allocation2 + $0x318] sm:$0xff] }
 0x2bc   : > { %1418 = vmatpush.msra.mxu1 %v1348_v56 }
 0x2bd   : > { %1361 = vmatpush.msrb.mxu2 %v1309_v47 }
 0x2be   : > { %1419 = vmatpush.msra.mxu1 %v1346_v60 }
 0x2bf   : > { %1137 = vperm.xlu0 %5061, %v1076_v51   ;;  %v1307_v51 = vld [vmem:[#allocation2 + $0x280] sm:$0xff] }
 0x2c0   : > { %1362 = vmatpush.msrb.mxu2 %v1307_v51  ;;  %1420 = vmatpush.msra.mxu1 %v1344_v0 }
 0x2c2   : > { %1363 = vmatpush.msrb.mxu2 %v1305_v57  ;;  %1421 = vmatpush.msra.mxu1 %v1342_v6  ;;  %v1131_v57 = vpop.permute.xlu1 %1130  ;;  %v1593_v6 = vld [vmem:[#allocation2 + $0x5c0] sm:$0xff] }
 0x2c4   : > { %1364 = vmatpush.msrb.mxu2 %v1303_v61  ;;  %1422 = vmatpush.msra.mxu1 %v1340_v11  ;;  %v1555_v11 = vld [vmem:[#allocation2 + $0x490] sm:$0xff] }
 0x2c6   : > { %1365 = vmatpush.msrb.mxu2 %v1301_v2  ;;  %1423 = vmatpush.msra.mxu1 %v1338_v19  ;;  %v1599_v2 = vld [vmem:[#allocation2 + $0x5f0] sm:$0xff] }
 0x2c7   : > { %2983 = vperm.xlu0 %5061, %v2930_v58   ;;  %v1337_v58 = vld [vmem:[#allocation2 + $0x370] sm:$0xff] }
 0x2c8   : > { %1383 = vmatpush.msrb.mxu3 %v1337_v58  ;;  %1366 = vmatpush.msrb.mxu2 %v1299_v8  ;;  %v1591_v8 = vld [vmem:[#allocation2 + $0x5b0] sm:$0xff] }
 0x2c9   : > { %1424 = vmatpush.msra.mxu1 %v1336_v24  ;;  %v1583_v19 = vld [vmem:[#allocation2 + $0x570] sm:$0xff]  ;;  %v1545_v24 = vld [vmem:[#allocation2 + $0x440] sm:$0xff] }
 0x2ca   : > { %1384 = vmatpush.msrb.mxu3 %v1335_v62  ;;  %1367 = vmatpush.msrb.mxu2 %v1297_v14  ;;  %v1553_v14 = vld [vmem:[#allocation2 + $0x480] sm:$0xff] }
 0x2cb   : > { %1425 = vmatpush.msra.mxu1 %v1334_v29  ;;  %v1573_v29 = vld [vmem:[#allocation2 + $0x520] sm:$0xff] }
 0x2cc   : > { %1385 = vmatpush.msrb.mxu3 %v1333_v3  ;;  %1368 = vmatpush.msrb.mxu2 %v1295_v21  ;;  %v1563_v3 = vld [vmem:[#allocation2 + $0x4d0] sm:$0xff]  ;;  %v1581_v21 = vld [vmem:[#allocation2 + $0x560] sm:$0xff] }
 0x2cd   : > { %1426 = vmatpush.msra.mxu1 %v1332_v34  ;;  %v1766_v34 = vld [vmem:[#allocation2 + $0x6f8] sm:$0xff] }
 0x2ce   : > { %1386 = vmatpush.msrb.mxu3 %v1331_v9  ;;  %1369 = vmatpush.msrb.mxu2 %v1293_v26  ;;  %v1557_v9 = vld [vmem:[#allocation2 + $0x4a0] sm:$0xff]  ;;  %v1543_v26 = vld [vmem:[#allocation2 + $0x430] sm:$0xff] }
 0x2cf   : > { %4185 = vperm.xlu0 %5061, %v2990_v59   ;;  %v1314_v59 = vld [vmem:[#allocation2 + $0x2b8] sm:$0xff]  ;;  %1427 = vmatpush.msra.mxu1 %v1330_v38 }
 0x2d0   : > { %1399 = vmatpush.msra.mxu0 %v1314_v59  ;;  %1387 = vmatpush.msrb.mxu3 %v1329_v15  ;;  %v1585_v15 = vld [vmem:[#allocation2 + $0x580] sm:$0xff]  ;;  %v1762_v38 = vld [vmem:[#allocation2 + $0x6d8] sm:$0xff] }
 0x2d1   : > { %1370 = vmatpush.msrb.mxu2 %v1291_v31  ;;  %1428 = vmatpush.msra.mxu1 %v1328_v41  ;;  %v1571_v31 = vld [vmem:[#allocation2 + $0x510] sm:$0xff]  ;;  %v1792_v41 = vld [vmem:[#allocation2 + $0x7c8] sm:$0xff] }
 0x2d2   : > { %1400 = vmatpush.msra.mxu0 %v1312_v63  ;;  %1388 = vmatpush.msrb.mxu3 %v1327_v22  ;;  %v1547_v22 = vld [vmem:[#allocation2 + $0x450] sm:$0xff] }
 0x2d3   : > { %1429 = vmatpush.msra.mxu1 %v1326_v43  ;;  %v1790_v43 = vld [vmem:[#allocation2 + $0x7b8] sm:$0xff] }
 0x2d4   : > { %1401 = vmatpush.msra.mxu0 %v1310_v4  ;;  %1389 = vmatpush.msrb.mxu3 %v1325_v27  ;;  %v1595_v4 = vld [vmem:[#allocation2 + $0x5d0] sm:$0xff] }
 0x2d5   : > { %1430 = vmatpush.msra.mxu1 %v1324_v45  ;;  %v1575_v27 = vld [vmem:[#allocation2 + $0x530] sm:$0xff]  ;;  %v1788_v45 = vld [vmem:[#allocation2 + $0x7a8] sm:$0xff] }
 0x2d6   : > { %1402 = vmatpush.msra.mxu0 %v1308_v10  ;;  %1390 = vmatpush.msrb.mxu3 %v1323_v32  ;;  %v1589_v10 = vld [vmem:[#allocation2 + $0x5a0] sm:$0xff] }
 0x2d7   : > { %v1537_v32 = vld [vmem:[#allocation2 + $0x400] sm:$0xff] }
 0x2d8   : > { %1403 = vmatpush.msra.mxu0 %v1306_v18  ;;  %v1551_v18 = vld [vmem:[#allocation2 + $0x470] sm:$0xff] }
 0x2da   : > { %1404 = vmatpush.msra.mxu0 %v1304_v23  ;;  %v1579_v23 = vld [vmem:[#allocation2 + $0x550] sm:$0xff] }
 0x2dc   : > { %1405 = vmatpush.msra.mxu0 %v1302_v28  ;;  %v1541_v28 = vld [vmem:[#allocation2 + $0x420] sm:$0xff] }
 0x2de   : > { %1406 = vmatpush.msra.mxu0 %v1300_v33  ;;  %v1569_v33 = vld [vmem:[#allocation2 + $0x500] sm:$0xff] }
 0x2e0   : > { %1407 = vmatpush.msra.mxu0 %v1298_v37  ;;  %v1796_v37 = vld [vmem:[#allocation2 + $0x7e8] sm:$0xff] }
 0x2e2   : > { %1408 = vmatpush.msra.mxu0 %v1296_v40  ;;  %v1760_v40 = vld [vmem:[#allocation2 + $0x6c8] sm:$0xff] }
 0x2e4   : > { %1409 = vmatpush.msra.mxu0 %v1294_v42  ;;  %v1758_v42 = vld [vmem:[#allocation2 + $0x6b8] sm:$0xff] }
 0x2e6   : > { %1410 = vmatpush.msra.mxu0 %v1292_v44  ;;  %v1756_v44 = vld [vmem:[#allocation2 + $0x6a8] sm:$0xff] }
 0x31e   : > { %v1106_v1 = vpop.xlane.xlu0 %1105 }
 0x31f   : > { %v1107_v5 = vsel %vm1077_vm5, %v1106_v1, 0.0  ;;  %v1567_v1 = vld [vmem:[#allocation2 + $0x4f0] sm:$0xff] }
 0x320   : > { %v1108_v7 = vrot.slane %v1107_v5, 4 }
 0x322   : > { %v1109_v12 = vadd.f32 %v1108_v7, %v1107_v5  ;;  %v1561_v5 = vld [vmem:[#allocation2 + $0x4c0] sm:$0xff]  ;;  %v1559_v7 = vld [vmem:[#allocation2 + $0x4b0] sm:$0xff] }
 0x324   : > { %v1110_v20 = vrot.slane %v1109_v12, 2 }
 0x326   : > { %v1111_v25 = vadd.f32 %v1110_v20, %v1109_v12  ;;  %v1587_v12 = vld [vmem:[#allocation2 + $0x590] sm:$0xff]  ;;  %v1549_v20 = vld [vmem:[#allocation2 + $0x460] sm:$0xff] }
 0x328   : > { %v1112_v30 = vrot.slane %v1111_v25, 1 }
 0x32a   : > { %v1113_v35 = vadd.f32 %v1112_v30, %v1111_v25  ;;  %v1577_v25 = vld [vmem:[#allocation2 + $0x540] sm:$0xff]  ;;  %v1539_v30 = vld [vmem:[#allocation2 + $0x410] sm:$0xff] }
 0x32c   : > { %v1114_v36 = vmul.f32 %v1113_v35, %v6640_v13  ;;  %v1798_v35 = vld [vmem:[#allocation2 + $0x7f8] sm:$0xff] }
 0x32e   : > { %v1115_v39 = vadd.f32 1e-05, %v1114_v36  ;;  %v1764_v36 = vld [vmem:[#allocation2 + $0x6e8] sm:$0xff] }
 0x330   : > { %5068 = vrsqrt.f32 %v1115_v39  ;;  %vm1122_vm8 = vweird.f32 %v1115_v39 }
 0x331   : > { %v1138_v60 = vpop.permute.xlu0 %1137 }
 0x336   : > { %v5069_v46 = vpop.eup %5068 }
 0x337   : > { %v1117_v47 = vmul.f32 %v5069_v46, %v1115_v39  ;;  %vm1123_vm7 = vweird.f32 %v5069_v46  ;;  %v1794_v39 = vld [vmem:[#allocation2 + $0x7d8] sm:$0xff] }
 0x338   : > { %vm1124_vm9 = vmor %vm1122_vm8, %vm1123_vm7 }
 0x339   : > { %v1118_v48 = vmul.f32 %v5069_v46, %v1117_v47  ;;  %v1786_v47 = vld [vmem:[#allocation2 + $0x798] sm:$0xff] }
 0x33b   : > { %v1119_v49 = vmul.f32 0.5, %v1118_v48  ;;  %v1752_v48 = vld [vmem:[#allocation2 + $0x688] sm:$0xff] }
 0x33d   : > { %v1120_v50 = vsub.f32 1.5, %v1119_v49  ;;  %v1784_v49 = vld [vmem:[#allocation2 + $0x788] sm:$0xff] }
 0x33f   : > { %v1121_v51 = vmul.f32 %v5069_v46, %v1120_v50  ;;  %v1750_v50 = vld [vmem:[#allocation2 + $0x678] sm:$0xff] }
 0x341   : > { %v1125_v52 = vsel %vm1124_vm9, %v5069_v46, %v1121_v51  ;;  %v1754_v46 = vld [vmem:[#allocation2 + $0x698] sm:$0xff] }
 0x342   : > { %v1126_v55 = vmul.f32 %v1125_v52, %v6643_v16  ;;  %v1127_v56 = vmul.f32 %v1125_v52, %v6645_v17  ;;  %v1565_v16 = vld [vmem:[#allocation2 + $0x4e0] sm:$0xff]  ;;  %v1782_v51 = vld [vmem:[#allocation2 + $0x778] sm:$0xff]  ;;  %v1748_v52 = vld [vmem:[#allocation2 + $0x668] sm:$0xff] }
 0x343   : > { %v1597_v17 = vld [vmem:[#allocation2 + $0x5e0] sm:$0xff] }
 0x344   : > { %v1133_v58 = vmul.f32 %v1131_v57, %v1126_v55  ;;  %v1134_v59 = vmul.f32 %v1131_v57, %v1127_v56  ;;  %v1780_v55 = vld [vmem:[#allocation2 + $0x768] sm:$0xff]  ;;  %v1746_v56 = vld [vmem:[#allocation2 + $0x658] sm:$0xff] }
 0x345   : > { %v1778_v57 = vld [vmem:[#allocation2 + $0x758] sm:$0xff] }
 0x346   : > { %v1140_v61 = vadd.f32 %v1138_v60, %v1133_v58  ;;  %v1141_v62 = vadd.f32 %v1138_v60, %v1134_v59  ;;  %v1744_v58 = vld [vmem:[#allocation2 + $0x648] sm:$0xff]  ;;  %v1742_v60 = vld [vmem:[#allocation2 + $0x638] sm:$0xff] }
 0x347   : > { %v1776_v59 = vld [vmem:[#allocation2 + $0x748] sm:$0xff] }
 0x348   : > { %v6657_v63 = vmax.f32 %v1140_v61, 0.0  ;;  %v6659_v0 = vmax.f32 %v1141_v62, 0.0  ;;  %v1774_v61 = vld [vmem:[#allocation2 + $0x738] sm:$0xff]  ;;  %v1740_v62 = vld [vmem:[#allocation2 + $0x628] sm:$0xff] }
 0x34a   : > { %1225 = vmatmul.f32.vlgmr.msra.gmra.mxu2 %v6657_v63  ;;  %1245 = vmatmul.f32.vlgmr.msra.gmra.mxu3 %v6659_v0 }
 0x34b   : > { %1265 = vmatmul.f32.vlgmr.msrb.gmra.mxu0 %v6657_v63  ;;  %1285 = vmatmul.f32.vlgmr.msrb.gmra.mxu1 %v6659_v0 }
 0x34c   : > { %1601 = vmatpush.msra.mxu2 %v1567_v1  ;;  %1621 = vmatpush.msra.mxu3 %v1599_v2  ;;  %v1772_v1 = vld [vmem:[#allocation2 + $0x728] sm:$0xff]  ;;  %v1738_v2 = vld [vmem:[#allocation2 + $0x618] sm:$0xff] }
 0x34e   : > { %1602 = vmatpush.msra.mxu2 %v1565_v16  ;;  %1622 = vmatpush.msra.mxu3 %v1597_v17  ;;  %v1770_v16 = vld [vmem:[#allocation2 + $0x718] sm:$0xff]  ;;  %v1736_v17 = vld [vmem:[#allocation2 + $0x608] sm:$0xff] }
 0x350   : > { %1603 = vmatpush.msra.mxu2 %v1563_v3  ;;  %1623 = vmatpush.msra.mxu3 %v1595_v4  ;;  %v1768_v3 = vld [vmem:[#allocation2 + $0x708] sm:$0xff]  ;;  %v1963_v4 = vld [vmem:[#allocation2 + $0x8f0] sm:$0xff] }
 0x352   : > { %1604 = vmatpush.msra.mxu2 %v1561_v5  ;;  %1624 = vmatpush.msra.mxu3 %v1593_v6  ;;  %v1995_v5 = vld [vmem:[#allocation2 + $0x9f0] sm:$0xff]  ;;  %v1961_v6 = vld [vmem:[#allocation2 + $0x8e0] sm:$0xff] }
 0x353   : > { %1371 = vmatmul.f32.vlgmr.msrb.gmra.mxu2 %v6657_v63  ;;  %1391 = vmatmul.f32.vlgmr.msrb.gmra.mxu3 %v6659_v0 }
 0x354   : > { %1411 = vmatmul.f32.vlgmr.msra.gmra.mxu0 %v6657_v63  ;;  %1431 = vmatmul.f32.vlgmr.msra.gmra.mxu1 %v6659_v0 }
 0x355   : > { %1605 = vmatpush.msra.mxu2 %v1559_v7  ;;  %1625 = vmatpush.msra.mxu3 %v1591_v8  ;;  %v1993_v7 = vld [vmem:[#allocation2 + $0x9e0] sm:$0xff]  ;;  %v1959_v8 = vld [vmem:[#allocation2 + $0x8d0] sm:$0xff] }
 0x357   : > { %1606 = vmatpush.msra.mxu2 %v1557_v9  ;;  %1626 = vmatpush.msra.mxu3 %v1589_v10  ;;  %v1991_v9 = vld [vmem:[#allocation2 + $0x9d0] sm:$0xff]  ;;  %v1957_v10 = vld [vmem:[#allocation2 + $0x8c0] sm:$0xff] }
 0x359   : > { %1607 = vmatpush.msra.mxu2 %v1555_v11  ;;  %1627 = vmatpush.msra.mxu3 %v1587_v12  ;;  %v1989_v11 = vld [vmem:[#allocation2 + $0x9c0] sm:$0xff]  ;;  %v1955_v12 = vld [vmem:[#allocation2 + $0x8b0] sm:$0xff] }
 0x35b   : > { %1608 = vmatpush.msra.mxu2 %v1553_v14  ;;  %1628 = vmatpush.msra.mxu3 %v1585_v15  ;;  %v1987_v14 = vld [vmem:[#allocation2 + $0x9b0] sm:$0xff]  ;;  %v1953_v15 = vld [vmem:[#allocation2 + $0x8a0] sm:$0xff] }
 0x35d   : > { %1609 = vmatpush.msra.mxu2 %v1551_v18  ;;  %1629 = vmatpush.msra.mxu3 %v1583_v19  ;;  %v1985_v18 = vld [vmem:[#allocation2 + $0x9a0] sm:$0xff]  ;;  %v1951_v19 = vld [vmem:[#allocation2 + $0x890] sm:$0xff] }
 0x35f   : > { %1610 = vmatpush.msra.mxu2 %v1549_v20  ;;  %1630 = vmatpush.msra.mxu3 %v1581_v21  ;;  %v1983_v20 = vld [vmem:[#allocation2 + $0x990] sm:$0xff]  ;;  %v1949_v21 = vld [vmem:[#allocation2 + $0x880] sm:$0xff] }
 0x361   : > { %1611 = vmatpush.msra.mxu2 %v1547_v22  ;;  %1631 = vmatpush.msra.mxu3 %v1579_v23  ;;  %v1981_v22 = vld [vmem:[#allocation2 + $0x980] sm:$0xff]  ;;  %v1947_v23 = vld [vmem:[#allocation2 + $0x870] sm:$0xff] }
 0x363   : > { %1612 = vmatpush.msra.mxu2 %v1545_v24  ;;  %1632 = vmatpush.msra.mxu3 %v1577_v25  ;;  %v1979_v24 = vld [vmem:[#allocation2 + $0x970] sm:$0xff]  ;;  %v1945_v25 = vld [vmem:[#allocation2 + $0x860] sm:$0xff] }
 0x365   : > { %1613 = vmatpush.msra.mxu2 %v1543_v26  ;;  %1633 = vmatpush.msra.mxu3 %v1575_v27  ;;  %v1977_v26 = vld [vmem:[#allocation2 + $0x960] sm:$0xff]  ;;  %v1943_v27 = vld [vmem:[#allocation2 + $0x850] sm:$0xff] }
 0x367   : > { %1614 = vmatpush.msra.mxu2 %v1541_v28  ;;  %1634 = vmatpush.msra.mxu3 %v1573_v29  ;;  %v1975_v28 = vld [vmem:[#allocation2 + $0x950] sm:$0xff]  ;;  %v1941_v29 = vld [vmem:[#allocation2 + $0x840] sm:$0xff] }
 0x369   : > { %1615 = vmatpush.msra.mxu2 %v1539_v30  ;;  %1635 = vmatpush.msra.mxu3 %v1571_v31  ;;  %v1973_v30 = vld [vmem:[#allocation2 + $0x940] sm:$0xff]  ;;  %v1939_v31 = vld [vmem:[#allocation2 + $0x830] sm:$0xff] }
 0x36b   : > { %1616 = vmatpush.msra.mxu2 %v1537_v32  ;;  %1636 = vmatpush.msra.mxu3 %v1569_v33  ;;  %v1971_v32 = vld [vmem:[#allocation2 + $0x930] sm:$0xff]  ;;  %v1937_v33 = vld [vmem:[#allocation2 + $0x820] sm:$0xff] }
 0x36c   : > { %1617 = vmatmul.f32.vlgmr.msra.gmra.mxu2 %v6657_v63  ;;  %1637 = vmatmul.f32.vlgmr.msra.gmra.mxu3 %v6659_v0 }
 0x36d   : > { %1839 = vmatpush.msrb.mxu2 %v1766_v34  ;;  %1859 = vmatpush.msrb.mxu3 %v1798_v35  ;;  %v1969_v34 = vld [vmem:[#allocation2 + $0x920] sm:$0xff]  ;;  %v1935_v35 = vld [vmem:[#allocation2 + $0x810] sm:$0xff] }
 0x36f   : > { %1840 = vmatpush.msrb.mxu2 %v1764_v36  ;;  %1860 = vmatpush.msrb.mxu3 %v1796_v37  ;;  %v1967_v36 = vld [vmem:[#allocation2 + $0x910] sm:$0xff]  ;;  %v1933_v37 = vld [vmem:[#allocation2 + $0x800] sm:$0xff] }
 0x371   : > { %1841 = vmatpush.msrb.mxu2 %v1762_v38  ;;  %1861 = vmatpush.msrb.mxu3 %v1794_v39  ;;  %v1965_v38 = vld [vmem:[#allocation2 + $0x900] sm:$0xff] }
 0x373   : > { %1842 = vmatpush.msrb.mxu2 %v1760_v40  ;;  %1862 = vmatpush.msrb.mxu3 %v1792_v41 }
 0x375   : > { %1843 = vmatpush.msrb.mxu2 %v1758_v42  ;;  %1863 = vmatpush.msrb.mxu3 %v1790_v43 }
 0x377   : > { %1844 = vmatpush.msrb.mxu2 %v1756_v44  ;;  %1864 = vmatpush.msrb.mxu3 %v1788_v45 }
 0x379   : > { %1845 = vmatpush.msrb.mxu2 %v1754_v46  ;;  %1865 = vmatpush.msrb.mxu3 %v1786_v47  ;;  %v1436_v46 = vld [vmem:[#allocation15 + $0x2] sm:$0x3] }
 0x37b   : > { %1846 = vmatpush.msrb.mxu2 %v1752_v48  ;;  %1866 = vmatpush.msrb.mxu3 %v1784_v49  ;;  %v1600_v48 = vld [vmem:[#allocation2 + $0x5f8] sm:$0xff] }
 0x37d   : > { %1847 = vmatpush.msrb.mxu2 %v1750_v50  ;;  %1867 = vmatpush.msrb.mxu3 %v1782_v51  ;;  %v1598_v51 = vld [vmem:[#allocation2 + $0x5e8] sm:$0xff] }
 0x37f   : > { %1848 = vmatpush.msrb.mxu2 %v1748_v52  ;;  %1868 = vmatpush.msrb.mxu3 %v1780_v55  ;;  %v1596_v55 = vld [vmem:[#allocation2 + $0x5d8] sm:$0xff] }
 0x381   : > { %1849 = vmatpush.msrb.mxu2 %v1746_v56  ;;  %1869 = vmatpush.msrb.mxu3 %v1778_v57  ;;  %v1568_v57 = vld [vmem:[#allocation2 + $0x4f8] sm:$0xff] }
 0x383   : > { %1850 = vmatpush.msrb.mxu2 %v1744_v58  ;;  %1870 = vmatpush.msrb.mxu3 %v1776_v59  ;;  %v1594_v58 = vld [vmem:[#allocation2 + $0x5c8] sm:$0xff]  ;;  %v1289_v59 = vld [vmem:[#allocation15] sm:$0x3] }
 0x385   : > { %1851 = vmatpush.msrb.mxu2 %v1742_v60  ;;  %1871 = vmatpush.msrb.mxu3 %v1774_v61  ;;  %v1566_v60 = vld [vmem:[#allocation2 + $0x4e8] sm:$0xff]  ;;  %v1592_v61 = vld [vmem:[#allocation2 + $0x5b8] sm:$0xff] }
 0x387   : > { %1852 = vmatpush.msrb.mxu2 %v1740_v62  ;;  %1872 = vmatpush.msrb.mxu3 %v1772_v1  ;;  %v1564_v62 = vld [vmem:[#allocation2 + $0x4d8] sm:$0xff]  ;;  %v1590_v1 = vld [vmem:[#allocation2 + $0x5a8] sm:$0xff] }
 0x389   : > { %1853 = vmatpush.msrb.mxu2 %v1738_v2  ;;  %1873 = vmatpush.msrb.mxu3 %v1770_v16  ;;  %v1562_v2 = vld [vmem:[#allocation2 + $0x4c8] sm:$0xff]  ;;  %v1588_v16 = vld [vmem:[#allocation2 + $0x598] sm:$0xff] }
 0x38b   : > { %1854 = vmatpush.msrb.mxu2 %v1736_v17  ;;  %1874 = vmatpush.msrb.mxu3 %v1768_v3  ;;  %v1560_v17 = vld [vmem:[#allocation2 + $0x4b8] sm:$0xff]  ;;  %v1586_v3 = vld [vmem:[#allocation2 + $0x588] sm:$0xff] }
 0x38c   : > { %1855 = vmatmul.f32.vlgmr.msrb.gmra.mxu2 %v6657_v63  ;;  %1875 = vmatmul.f32.vlgmr.msrb.gmra.mxu3 %v6659_v0 }
 0x38d   : > { %1997 = vmatpush.msra.mxu2 %v1963_v4  ;;  %2017 = vmatpush.msra.mxu3 %v1995_v5  ;;  %v1558_v4 = vld [vmem:[#allocation2 + $0x4a8] sm:$0xff]  ;;  %v1584_v5 = vld [vmem:[#allocation2 + $0x578] sm:$0xff] }
 0x38f   : > { %1998 = vmatpush.msra.mxu2 %v1961_v6  ;;  %2018 = vmatpush.msra.mxu3 %v1993_v7  ;;  %v1556_v6 = vld [vmem:[#allocation2 + $0x498] sm:$0xff]  ;;  %v1582_v7 = vld [vmem:[#allocation2 + $0x568] sm:$0xff] }
 0x391   : > { %1999 = vmatpush.msra.mxu2 %v1959_v8  ;;  %2019 = vmatpush.msra.mxu3 %v1991_v9  ;;  %v1554_v8 = vld [vmem:[#allocation2 + $0x488] sm:$0xff]  ;;  %v1580_v9 = vld [vmem:[#allocation2 + $0x558] sm:$0xff] }
 0x393   : > { %2000 = vmatpush.msra.mxu2 %v1957_v10  ;;  %2020 = vmatpush.msra.mxu3 %v1989_v11  ;;  %v1552_v10 = vld [vmem:[#allocation2 + $0x478] sm:$0xff]  ;;  %v1578_v11 = vld [vmem:[#allocation2 + $0x548] sm:$0xff] }
 0x395   : > { %2001 = vmatpush.msra.mxu2 %v1955_v12  ;;  %2021 = vmatpush.msra.mxu3 %v1987_v14  ;;  %v1550_v12 = vld [vmem:[#allocation2 + $0x468] sm:$0xff]  ;;  %v1576_v14 = vld [vmem:[#allocation2 + $0x538] sm:$0xff] }
 0x397   : > { %2002 = vmatpush.msra.mxu2 %v1953_v15  ;;  %2022 = vmatpush.msra.mxu3 %v1985_v18  ;;  %v1548_v15 = vld [vmem:[#allocation2 + $0x458] sm:$0xff]  ;;  %v1574_v18 = vld [vmem:[#allocation2 + $0x528] sm:$0xff] }
 0x399   : > { %2003 = vmatpush.msra.mxu2 %v1951_v19  ;;  %2023 = vmatpush.msra.mxu3 %v1983_v20  ;;  %v1546_v19 = vld [vmem:[#allocation2 + $0x448] sm:$0xff]  ;;  %v1572_v20 = vld [vmem:[#allocation2 + $0x518] sm:$0xff] }
 0x39b   : > { %2004 = vmatpush.msra.mxu2 %v1949_v21  ;;  %2024 = vmatpush.msra.mxu3 %v1981_v22  ;;  %v1544_v21 = vld [vmem:[#allocation2 + $0x438] sm:$0xff]  ;;  %v1570_v22 = vld [vmem:[#allocation2 + $0x508] sm:$0xff] }
 0x39d   : > { %2005 = vmatpush.msra.mxu2 %v1947_v23  ;;  %2025 = vmatpush.msra.mxu3 %v1979_v24  ;;  %v1542_v23 = vld [vmem:[#allocation2 + $0x428] sm:$0xff]  ;;  %v1540_v24 = vld [vmem:[#allocation2 + $0x418] sm:$0xff] }
 0x39f   : > { %2006 = vmatpush.msra.mxu2 %v1945_v25  ;;  %2026 = vmatpush.msra.mxu3 %v1977_v26 }
 0x3a1   : > { %2007 = vmatpush.msra.mxu2 %v1943_v27  ;;  %2027 = vmatpush.msra.mxu3 %v1975_v28  ;;  %v1538_v27 = vld [vmem:[#allocation2 + $0x408] sm:$0xff] }
 0x3a3   : > { %2008 = vmatpush.msra.mxu2 %v1941_v29  ;;  %2028 = vmatpush.msra.mxu3 %v1973_v30  ;;  %v1765_v29 = vld [vmem:[#allocation2 + $0x6f0] sm:$0xff]  ;;  %v1763_v30 = vld [vmem:[#allocation2 + $0x6e0] sm:$0xff] }
 0x3a5   : > { %2009 = vmatpush.msra.mxu2 %v1939_v31  ;;  %2029 = vmatpush.msra.mxu3 %v1971_v32  ;;  %v1761_v31 = vld [vmem:[#allocation2 + $0x6d0] sm:$0xff]  ;;  %v1759_v32 = vld [vmem:[#allocation2 + $0x6c0] sm:$0xff] }
 0x3a7   : > { %2010 = vmatpush.msra.mxu2 %v1937_v33  ;;  %2030 = vmatpush.msra.mxu3 %v1969_v34  ;;  %v6686_v33 = vld [vmem:[#allocation15 + $0x4] sm:$0x3]  ;;  %v1757_v34 = vld [vmem:[#allocation2 + $0x6b0] sm:$0xff] }
 0x3a9   : > { %2011 = vmatpush.msra.mxu2 %v1935_v35  ;;  %2031 = vmatpush.msra.mxu3 %v1967_v36  ;;  %v1755_v35 = vld [vmem:[#allocation2 + $0x6a0] sm:$0xff]  ;;  %v1753_v36 = vld [vmem:[#allocation2 + $0x690] sm:$0xff] }
 0x3ab   : > { %2012 = vmatpush.msra.mxu2 %v1933_v37  ;;  %2032 = vmatpush.msra.mxu3 %v1965_v38  ;;  %v1751_v37 = vld [vmem:[#allocation2 + $0x680] sm:$0xff]  ;;  %v1749_v38 = vld [vmem:[#allocation2 + $0x670] sm:$0xff] }
 0x3ac   : > { %2013 = vmatmul.f32.vlgmr.msra.gmra.mxu2 %v6657_v63  ;;  %2033 = vmatmul.f32.vlgmr.msra.gmra.mxu3 %v6659_v0 }
 0x3c8   : > { %v1266_v39 = vpop.f32.mrf.mxu0  ;;  %v1286_v40 = vpop.f32.mrf.mxu1 }
 0x3c9   : > { %v1287_v47 = vadd.f32 %v1286_v40, %v1266_v39  ;;  %v1747_v39 = vld [vmem:[#allocation2 + $0x660] sm:$0xff]  ;;  %v1745_v40 = vld [vmem:[#allocation2 + $0x650] sm:$0xff] }
 0x3cd   : > { %v1226_v41 = vpop.f32.mrf.mxu2  ;;  %v1246_v42 = vpop.f32.mrf.mxu3 }
 0x3ce   : > { %v1247_v56 = vadd.f32 %v1246_v42, %v1226_v41  ;;  %v1743_v41 = vld [vmem:[#allocation2 + $0x640] sm:$0xff]  ;;  %v1741_v42 = vld [vmem:[#allocation2 + $0x630] sm:$0xff] }
 0x3d1   : > { %v1412_v43 = vpop.f32.mrf.mxu0  ;;  %v1432_v44 = vpop.f32.mrf.mxu1 }
 0x3d2   : > { %v1433_v45 = vadd.f32 %v1432_v44, %v1412_v43  ;;  %v1739_v43 = vld [vmem:[#allocation2 + $0x620] sm:$0xff]  ;;  %v1737_v44 = vld [vmem:[#allocation2 + $0x610] sm:$0xff] }
 0x3d4   : > { %4759 = vmatpush.msk.msrb.mxu1 %vm1077_vm5, %v1433_v45  ;;  %v1735_v45 = vld [vmem:[#allocation2 + $0x600] sm:$0xff] }
 0x3d5   : > { %4760 = vmatmul.msk.f32.vlgmr.msrb.gmra.mxu1 %vm1437_vm10, %v1436_v46 }
 0x3d6   : > { %4763 = vmatpush.msk.msra.mxu1 %vm1077_vm5, %v1287_v47  ;;  %v1372_v49 = vpop.f32.mrf.mxu2  ;;  %v1392_v50 = vpop.f32.mrf.mxu3 }
 0x3d7   : > { %v1393_v52 = vadd.f32 %v1392_v50, %v1372_v49 }
 0x3d8   : > { %1661 = vmatpush.msrb.mxu1 %v1600_v48 }
 0x3d9   : > { %4757 = vmatpush.msk.msrb.mxu0 %vm1077_vm5, %v1393_v52  ;;  %v6695_v52 = vld [vmem:[#allocation15 + $0x8] sm:$0x3] }
 0x3da   : > { %1662 = vmatpush.msrb.mxu1 %v1598_v51  ;;  %4758 = vmatmul.msk.f32.vlgmr.msrb.gmra.mxu0 %vm1437_vm10, %v1436_v46  ;;  %v2162_v51 = vld [vmem:[#allocation2 + $0xaf8] sm:$0xff] }
 0x3db   : > { %4761 = vmatpush.msk.msra.mxu0 %vm1077_vm5, %v1247_v56  ;;  %v2158_v56 = vld [vmem:[#allocation2 + $0xad8] sm:$0xff] }
 0x3dc   : > { %1663 = vmatpush.msrb.mxu1 %v1596_v55  ;;  %v2160_v55 = vld [vmem:[#allocation2 + $0xae8] sm:$0xff] }
 0x3dd   : > { %1641 = vmatpush.msrb.mxu0 %v1568_v57  ;;  %4764 = vmatmul.msk.f32.vlgmr.msra.gmra.mxu1 %vm1437_vm10, %v1289_v59  ;;  %v2156_v57 = vld [vmem:[#allocation2 + $0xac8] sm:$0xff] }
 0x3de   : > { %1664 = vmatpush.msrb.mxu1 %v1594_v58  ;;  %v2154_v58 = vld [vmem:[#allocation2 + $0xab8] sm:$0xff] }
 0x3df   : > { %1642 = vmatpush.msrb.mxu0 %v1566_v60  ;;  %v2150_v60 = vld [vmem:[#allocation2 + $0xa98] sm:$0xff] }
 0x3e0   : > { %1665 = vmatpush.msrb.mxu1 %v1592_v61  ;;  %v2148_v61 = vld [vmem:[#allocation2 + $0xa88] sm:$0xff] }
 0x3e1   : > { %1643 = vmatpush.msrb.mxu0 %v1564_v62  ;;  %v2146_v62 = vld [vmem:[#allocation2 + $0xa78] sm:$0xff] }
 0x3e2   : > { %1666 = vmatpush.msrb.mxu1 %v1590_v1  ;;  %4762 = vmatmul.msk.f32.vlgmr.msra.gmra.mxu0 %vm1437_vm10, %v1289_v59  ;;  %v2152_v59 = vld [vmem:[#allocation2 + $0xaa8] sm:$0xff] }
 0x3e3   : > { %1644 = vmatpush.msrb.mxu0 %v1562_v2  ;;  %v2144_v1 = vld [vmem:[#allocation2 + $0xa68] sm:$0xff]  ;;  %v2142_v2 = vld [vmem:[#allocation2 + $0xa58] sm:$0xff] }
 0x3e4   : > { %1667 = vmatpush.msrb.mxu1 %v1588_v16  ;;  %v2140_v16 = vld [vmem:[#allocation2 + $0xa48] sm:$0xff] }
 0x3e5   : > { %1645 = vmatpush.msrb.mxu0 %v1560_v17  ;;  %v2138_v17 = vld [vmem:[#allocation2 + $0xa38] sm:$0xff] }
 0x3e6   : > { %1668 = vmatpush.msrb.mxu1 %v1586_v3  ;;  %v2136_v3 = vld [vmem:[#allocation2 + $0xa28] sm:$0xff] }
 0x3e7   : > { %1646 = vmatpush.msrb.mxu0 %v1558_v4  ;;  %v2134_v4 = vld [vmem:[#allocation2 + $0xa18] sm:$0xff] }
 0x3e8   : > { %1669 = vmatpush.msrb.mxu1 %v1584_v5  ;;  %v2132_v5 = vld [vmem:[#allocation2 + $0xa08] sm:$0xff] }
 0x3e9   : > { %1647 = vmatpush.msrb.mxu0 %v1556_v6  ;;  %v2359_v6 = vld [vmem:[#allocation2 + $0xcf0] sm:$0xff] }
 0x3ea   : > { %1670 = vmatpush.msrb.mxu1 %v1582_v7  ;;  %v2357_v7 = vld [vmem:[#allocation2 + $0xce0] sm:$0xff] }
 0x3eb   : > { %1648 = vmatpush.msrb.mxu0 %v1554_v8  ;;  %v2355_v8 = vld [vmem:[#allocation2 + $0xcd0] sm:$0xff] }
 0x3ec   : > { %1671 = vmatpush.msrb.mxu1 %v1580_v9  ;;  %v2353_v9 = vld [vmem:[#allocation2 + $0xcc0] sm:$0xff] }
 0x3ed   : > { %1649 = vmatpush.msrb.mxu0 %v1552_v10  ;;  %v2351_v10 = vld [vmem:[#allocation2 + $0xcb0] sm:$0xff] }
 0x3ee   : > { %1672 = vmatpush.msrb.mxu1 %v1578_v11  ;;  %v2349_v11 = vld [vmem:[#allocation2 + $0xca0] sm:$0xff] }
 0x3ef   : > { %1650 = vmatpush.msrb.mxu0 %v1550_v12  ;;  %v1618_v25 = vpop.f32.mrf.mxu2  ;;  %v1638_v26 = vpop.f32.mrf.mxu3  ;;  %v2347_v12 = vld [vmem:[#allocation2 + $0xc90] sm:$0xff] }
 0x3f0   : > { %1673 = vmatpush.msrb.mxu1 %v1576_v14  ;;  %v1639_v28 = vadd.f32 %v1638_v26, %v1618_v25  ;;  %v2345_v14 = vld [vmem:[#allocation2 + $0xc80] sm:$0xff]  ;;  %v2331_v25 = vld [vmem:[#allocation2 + $0xc10] sm:$0xff] }
 0x3f1   : > { %1651 = vmatpush.msrb.mxu0 %v1548_v15  ;;  %v2343_v15 = vld [vmem:[#allocation2 + $0xc70] sm:$0xff]  ;;  %v2329_v26 = vld [vmem:[#allocation2 + $0xc00] sm:$0xff] }
 0x3f2   : > { %1674 = vmatpush.msrb.mxu1 %v1574_v18  ;;  %v2341_v18 = vld [vmem:[#allocation2 + $0xc60] sm:$0xff] }
 0x3f3   : > { %1652 = vmatpush.msrb.mxu0 %v1546_v19  ;;  %v2339_v19 = vld [vmem:[#allocation2 + $0xc50] sm:$0xff] }
 0x3f4   : > { %1675 = vmatpush.msrb.mxu1 %v1572_v20 }
 0x3f5   : > { %1653 = vmatpush.msrb.mxu0 %v1544_v21 }
 0x3f6   : > { %1676 = vmatpush.msrb.mxu1 %v1570_v22  ;;  %v2337_v22 = vld [vmem:[#allocation2 + $0xc40] sm:$0xff] }
 0x3f7   : > { %1677 = vmatmul.f32.vlgmr.msrb.gmra.mxu1 %v6659_v0  ;;  %1654 = vmatpush.msrb.mxu0 %v1542_v23  ;;  %v2335_v23 = vld [vmem:[#allocation2 + $0xc30] sm:$0xff] }
 0x3f9   : > { %1655 = vmatpush.msrb.mxu0 %v1540_v24  ;;  %v2333_v24 = vld [vmem:[#allocation2 + $0xc20] sm:$0xff] }
 0x3fb   : > { %1656 = vmatpush.msrb.mxu0 %v1538_v27 }
 0x3fc   : > { %1657 = vmatmul.f32.vlgmr.msrb.gmra.mxu0 %v6657_v63 }
 0x3fd   : > { %4765 = vmatpush.msk.msra.mxu0 %vm1077_vm5, %v1639_v28 }
 0x3ff   : > { %1799 = vmatpush.msrb.mxu0 %v1765_v29 }
 0x401   : > { %1800 = vmatpush.msrb.mxu0 %v1763_v30 }
 0x403   : > { %1801 = vmatpush.msrb.mxu0 %v1761_v31 }
 0x404   : > { %4766 = vmatmul.msk.f32.vlgmr.msra.gmra.mxu0 %vm1437_vm10, %v6686_v33 }
 0x405   : > { %1802 = vmatpush.msrb.mxu0 %v1759_v32  ;;  %v1797_v32 = vld [vmem:[#allocation2 + $0x7f0] sm:$0xff] }
 0x407   : > { %1803 = vmatpush.msrb.mxu0 %v1757_v34  ;;  %v1795_v34 = vld [vmem:[#allocation2 + $0x7e0] sm:$0xff] }
 0x409   : > { %1804 = vmatpush.msrb.mxu0 %v1755_v35  ;;  %v1793_v35 = vld [vmem:[#allocation2 + $0x7d0] sm:$0xff] }
 0x40b   : > { %1805 = vmatpush.msrb.mxu0 %v1753_v36  ;;  %v1791_v36 = vld [vmem:[#allocation2 + $0x7c0] sm:$0xff] }
 0x40d   : > { %1806 = vmatpush.msrb.mxu0 %v1751_v37  ;;  %v1789_v37 = vld [vmem:[#allocation2 + $0x7b0] sm:$0xff] }
 0x40f   : > { %1807 = vmatpush.msrb.mxu0 %v1749_v38  ;;  %v6691_v46 = vpop.f32.mrf.mxu2  ;;  %v6693_v47 = vpop.f32.mrf.mxu3  ;;  %v1787_v38 = vld [vmem:[#allocation2 + $0x7a0] sm:$0xff] }
 0x411   : > { %1808 = vmatpush.msrb.mxu0 %v1747_v39  ;;  %v1785_v39 = vld [vmem:[#allocation2 + $0x790] sm:$0xff] }
 0x413   : > { %1809 = vmatpush.msrb.mxu0 %v1745_v40  ;;  %v1783_v40 = vld [vmem:[#allocation2 + $0x780] sm:$0xff] }
 0x415   : > { %1810 = vmatpush.msrb.mxu0 %v1743_v41  ;;  %v1781_v41 = vld [vmem:[#allocation2 + $0x770] sm:$0xff] }
 0x417   : > { %1811 = vmatpush.msrb.mxu0 %v1741_v42  ;;  %v1779_v42 = vld [vmem:[#allocation2 + $0x760] sm:$0xff] }
 0x419   : > { %1812 = vmatpush.msrb.mxu0 %v1739_v43  ;;  %v1777_v43 = vld [vmem:[#allocation2 + $0x750] sm:$0xff] }
 0x41b   : > { %1813 = vmatpush.msrb.mxu0 %v1737_v44  ;;  %v1773_v44 = vld [vmem:[#allocation2 + $0x730] sm:$0xff] }
 0x41d   : > { %1814 = vmatpush.msrb.mxu0 %v1735_v45  ;;  %v1771_v45 = vld [vmem:[#allocation2 + $0x720] sm:$0xff] }
 0x41e   : > { %1815 = vmatmul.f32.vlgmr.msrb.gmra.mxu0 %v6657_v63 }
 0x42f   : > { %v2014_v48 = vpop.f32.mrf.mxu2  ;;  %v2034_v49 = vpop.f32.mrf.mxu3 }
 0x430   : > { %v2035_v50 = vadd.f32 %v2034_v49, %v2014_v48  ;;  %v1769_v48 = vld [vmem:[#allocation2 + $0x710] sm:$0xff]  ;;  %v1767_v49 = vld [vmem:[#allocation2 + $0x700] sm:$0xff] }
 0x432   : > { %4773 = vmatpush.msk.msrb.mxu2 %vm1077_vm5, %v2035_v50  ;;  %v1877_v50 = vadd.f32 %v6693_v47, %v6691_v46  ;;  %v1986_v46 = vld [vmem:[#allocation2 + $0x9a8] sm:$0xff]  ;;  %v1984_v47 = vld [vmem:[#allocation2 + $0x998] sm:$0xff] }
 0x433   : > { %4774 = vmatmul.msk.f32.vlgmr.msrb.gmra.mxu2 %vm1437_vm10, %v6695_v52 }
 0x434   : > { %2235 = vmatpush.msra.mxu2 %v2162_v51  ;;  %v1996_v51 = vld [vmem:[#allocation2 + $0x9f8] sm:$0xff] }
 0x436   : > { %2236 = vmatpush.msra.mxu2 %v2160_v55  ;;  %v1994_v55 = vld [vmem:[#allocation2 + $0x9e8] sm:$0xff] }
 0x438   : > { %2237 = vmatpush.msra.mxu2 %v2158_v56  ;;  %v1992_v56 = vld [vmem:[#allocation2 + $0x9d8] sm:$0xff] }
 0x43a   : > { %2238 = vmatpush.msra.mxu2 %v2156_v57  ;;  %v1990_v57 = vld [vmem:[#allocation2 + $0x9c8] sm:$0xff] }
 0x43c   : > { %2239 = vmatpush.msra.mxu2 %v2154_v58  ;;  %v6717_v58 = vld [vmem:[#allocation15 + $0x6] sm:$0x3] }
 0x43e   : > { %2240 = vmatpush.msra.mxu2 %v2152_v59  ;;  %v1988_v59 = vld [vmem:[#allocation2 + $0x9b8] sm:$0xff] }
 0x440   : > { %2241 = vmatpush.msra.mxu2 %v2150_v60  ;;  %v1982_v60 = vld [vmem:[#allocation2 + $0x988] sm:$0xff] }
 0x442   : > { %2242 = vmatpush.msra.mxu2 %v2148_v61  ;;  %v1980_v61 = vld [vmem:[#allocation2 + $0x978] sm:$0xff] }
 0x444   : > { %2243 = vmatpush.msra.mxu2 %v2146_v62  ;;  %v1978_v62 = vld [vmem:[#allocation2 + $0x968] sm:$0xff] }
 0x446   : > { %2244 = vmatpush.msra.mxu2 %v2144_v1  ;;  %v1976_v1 = vld [vmem:[#allocation2 + $0x958] sm:$0xff] }
 0x448   : > { %2245 = vmatpush.msra.mxu2 %v2142_v2  ;;  %v1974_v2 = vld [vmem:[#allocation2 + $0x948] sm:$0xff] }
 0x44a   : > { %2246 = vmatpush.msra.mxu2 %v2140_v16  ;;  %v1972_v16 = vld [vmem:[#allocation2 + $0x938] sm:$0xff] }
 0x44c   : > { %2247 = vmatpush.msra.mxu2 %v2138_v17  ;;  %v1970_v17 = vld [vmem:[#allocation2 + $0x928] sm:$0xff] }
 0x44e   : > { %2248 = vmatpush.msra.mxu2 %v2136_v3  ;;  %v1968_v3 = vld [vmem:[#allocation2 + $0x918] sm:$0xff] }
 0x450   : > { %2249 = vmatpush.msra.mxu2 %v2134_v4  ;;  %v1966_v4 = vld [vmem:[#allocation2 + $0x908] sm:$0xff] }
 0x452   : > { %2250 = vmatpush.msra.mxu2 %v2132_v5  ;;  %v6701_v20 = vpop.f32.mrf.mxu1  ;;  %v2193_v5 = vld [vmem:[#allocation2 + $0xbf0] sm:$0xff] }
 0x453   : > { %2251 = vmatmul.f32.vlgmr.msra.gmra.mxu2 %v6657_v63 }
 0x454   : > { %2393 = vmatpush.msrb.mxu2 %v2359_v6  ;;  %v2191_v6 = vld [vmem:[#allocation2 + $0xbe0] sm:$0xff] }
 0x456   : > { %2394 = vmatpush.msrb.mxu2 %v2357_v7  ;;  %v2189_v7 = vld [vmem:[#allocation2 + $0xbd0] sm:$0xff] }
 0x457   : > { %v6703_v21 = vpop.f32.mrf.mxu0 }
 0x458   : > { %2395 = vmatpush.msrb.mxu2 %v2355_v8  ;;  %v2187_v8 = vld [vmem:[#allocation2 + $0xbc0] sm:$0xff] }
 0x45a   : > { %2396 = vmatpush.msrb.mxu2 %v2353_v9  ;;  %v6705_v27 = vpop.f32.mrf.mxu1  ;;  %v2185_v9 = vld [vmem:[#allocation2 + $0xbb0] sm:$0xff] }
 0x45c   : > { %2397 = vmatpush.msrb.mxu2 %v2351_v10  ;;  %v2183_v10 = vld [vmem:[#allocation2 + $0xba0] sm:$0xff] }
 0x45e   : > { %2398 = vmatpush.msrb.mxu2 %v2349_v11  ;;  %v2181_v11 = vld [vmem:[#allocation2 + $0xb90] sm:$0xff] }
 0x45f   : > { %v6707_v28 = vpop.f32.mrf.mxu0 }
 0x460   : > { %2399 = vmatpush.msrb.mxu2 %v2347_v12  ;;  %v2179_v12 = vld [vmem:[#allocation2 + $0xb80] sm:$0xff] }
 0x462   : > { %2400 = vmatpush.msrb.mxu2 %v2345_v14  ;;  %v2177_v14 = vld [vmem:[#allocation2 + $0xb70] sm:$0xff] }
 0x464   : > { %2401 = vmatpush.msrb.mxu2 %v2343_v15  ;;  %v2175_v15 = vld [vmem:[#allocation2 + $0xb60] sm:$0xff] }
 0x466   : > { %2402 = vmatpush.msrb.mxu2 %v2341_v18  ;;  %v2173_v18 = vld [vmem:[#allocation2 + $0xb50] sm:$0xff] }
 0x468   : > { %2403 = vmatpush.msrb.mxu2 %v2339_v19  ;;  %v2171_v19 = vld [vmem:[#allocation2 + $0xb40] sm:$0xff] }
 0x46a   : > { %2404 = vmatpush.msrb.mxu2 %v2337_v22  ;;  %v2169_v22 = vld [vmem:[#allocation2 + $0xb30] sm:$0xff] }
 0x46c   : > { %2405 = vmatpush.msrb.mxu2 %v2335_v23  ;;  %v2167_v23 = vld [vmem:[#allocation2 + $0xb20] sm:$0xff] }
 0x46e   : > { %2406 = vmatpush.msrb.mxu2 %v2333_v24  ;;  %v2165_v24 = vld [vmem:[#allocation2 + $0xb10] sm:$0xff] }
 0x470   : > { %2407 = vmatpush.msrb.mxu2 %v2331_v25  ;;  %v2163_v25 = vld [vmem:[#allocation2 + $0xb00] sm:$0xff] }
 0x472   : > { %2408 = vmatpush.msrb.mxu2 %v2329_v26 }
 0x473   : > { %2409 = vmatmul.f32.vlgmr.msrb.gmra.mxu2 %v6657_v63 }
 0x474   : > { %v1678_v29 = vpop.f32.mrf.mxu1 }
 0x479   : > { %v1658_v30 = vpop.f32.mrf.mxu0 }
 0x47a   : > { %v1679_v31 = vadd.f32 %v1678_v29, %v1658_v30 }
 0x47c   : > { %4767 = vmatpush.msk.msra.mxu1 %vm1077_vm5, %v1679_v31 }
 0x47d   : > { %4768 = vmatmul.msk.f32.vlgmr.msra.gmra.mxu1 %vm1437_vm10, %v6686_v33  ;;  %v1775_v33 = vld [vmem:[#allocation2 + $0x740] sm:$0xff] }
 0x47e   : > { %1819 = vmatpush.msrb.mxu1 %v1797_v32 }
 0x480   : > { %1820 = vmatpush.msrb.mxu1 %v1795_v34  ;;  %v1964_v34 = vld [vmem:[#allocation2 + $0x8f8] sm:$0xff] }
 0x481   : > { %v6723_v26 = vpop.f32.mrf.mxu0 }
 0x482   : > { %1821 = vmatpush.msrb.mxu1 %v1793_v35  ;;  %v1962_v35 = vld [vmem:[#allocation2 + $0x8e8] sm:$0xff] }
 0x484   : > { %1822 = vmatpush.msrb.mxu1 %v1791_v36  ;;  %v1960_v36 = vld [vmem:[#allocation2 + $0x8d8] sm:$0xff] }
 0x486   : > { %1823 = vmatpush.msrb.mxu1 %v1789_v37  ;;  %v1958_v37 = vld [vmem:[#allocation2 + $0x8c8] sm:$0xff] }
 0x488   : > { %1824 = vmatpush.msrb.mxu1 %v1787_v38  ;;  %v1956_v38 = vld [vmem:[#allocation2 + $0x8b8] sm:$0xff] }
 0x48a   : > { %1825 = vmatpush.msrb.mxu1 %v1785_v39  ;;  %v1954_v39 = vld [vmem:[#allocation2 + $0x8a8] sm:$0xff] }
 0x48c   : > { %1826 = vmatpush.msrb.mxu1 %v1783_v40  ;;  %v1952_v40 = vld [vmem:[#allocation2 + $0x898] sm:$0xff] }
 0x48e   : > { %1827 = vmatpush.msrb.mxu1 %v1781_v41  ;;  %v1950_v41 = vld [vmem:[#allocation2 + $0x888] sm:$0xff] }
 0x490   : > { %1828 = vmatpush.msrb.mxu1 %v1779_v42  ;;  %v1948_v42 = vld [vmem:[#allocation2 + $0x878] sm:$0xff] }
 0x492   : > { %1829 = vmatpush.msrb.mxu1 %v1777_v43  ;;  %v1946_v43 = vld [vmem:[#allocation2 + $0x868] sm:$0xff] }
 0x494   : > { %1830 = vmatpush.msrb.mxu1 %v1775_v33  ;;  %v1944_v33 = vld [vmem:[#allocation2 + $0x858] sm:$0xff] }
 0x496   : > { %1831 = vmatpush.msrb.mxu1 %v1773_v44  ;;  %v1942_v44 = vld [vmem:[#allocation2 + $0x848] sm:$0xff] }
 0x498   : > { %1832 = vmatpush.msrb.mxu1 %v1771_v45  ;;  %v1940_v45 = vld [vmem:[#allocation2 + $0x838] sm:$0xff] }
 0x49a   : > { %1833 = vmatpush.msrb.mxu1 %v1769_v48  ;;  %v1938_v48 = vld [vmem:[#allocation2 + $0x828] sm:$0xff] }
 0x49b   : > { %v1816_v30 = vpop.f32.mrf.mxu0 }
 0x49c   : > { %1834 = vmatpush.msrb.mxu1 %v1767_v49  ;;  %v1936_v49 = vld [vmem:[#allocation2 + $0x818] sm:$0xff] }
 0x49d   : > { %1835 = vmatmul.f32.vlgmr.msrb.gmra.mxu1 %v6659_v0 }
 0x49e   : > { %4771 = vmatpush.msk.msra.mxu1 %vm1077_vm5, %v1877_v50  ;;  %v1934_v50 = vld [vmem:[#allocation2 + $0x808] sm:$0xff] }
 0x4a0   : > { %2057 = vmatpush.msrb.mxu1 %v1996_v51  ;;  %v2161_v51 = vld [vmem:[#allocation2 + $0xaf0] sm:$0xff] }
 0x4a2   : > { %2058 = vmatpush.msrb.mxu1 %v1994_v55  ;;  %v2159_v55 = vld [vmem:[#allocation2 + $0xae0] sm:$0xff] }
 0x4a4   : > { %2059 = vmatpush.msrb.mxu1 %v1992_v56  ;;  %v2157_v56 = vld [vmem:[#allocation2 + $0xad0] sm:$0xff] }
 0x4a5   : > { %4772 = vmatmul.msk.f32.vlgmr.msra.gmra.mxu1 %vm1437_vm10, %v6717_v58 }
 0x4a6   : > { %2060 = vmatpush.msrb.mxu1 %v1990_v57  ;;  %v2155_v57 = vld [vmem:[#allocation2 + $0xac0] sm:$0xff] }
 0x4a8   : > { %2061 = vmatpush.msrb.mxu1 %v1988_v59  ;;  %v2151_v59 = vld [vmem:[#allocation2 + $0xaa0] sm:$0xff] }
 0x4aa   : > { %2062 = vmatpush.msrb.mxu1 %v1986_v46  ;;  %v2149_v46 = vld [vmem:[#allocation2 + $0xa90] sm:$0xff] }
 0x4ac   : > { %2063 = vmatpush.msrb.mxu1 %v1984_v47  ;;  %v2147_v47 = vld [vmem:[#allocation2 + $0xa80] sm:$0xff] }
 0x4ae   : > { %2064 = vmatpush.msrb.mxu1 %v1982_v60  ;;  %v2145_v60 = vld [vmem:[#allocation2 + $0xa70] sm:$0xff] }
 0x4b0   : > { %2065 = vmatpush.msrb.mxu1 %v1980_v61  ;;  %v2143_v61 = vld [vmem:[#allocation2 + $0xa60] sm:$0xff] }
 0x4b2   : > { %2066 = vmatpush.msrb.mxu1 %v1978_v62  ;;  %v2141_v62 = vld [vmem:[#allocation2 + $0xa50] sm:$0xff] }
 0x4b4   : > { %2067 = vmatpush.msrb.mxu1 %v1976_v1  ;;  %v2139_v1 = vld [vmem:[#allocation2 + $0xa40] sm:$0xff] }
 0x4b6   : > { %2068 = vmatpush.msrb.mxu1 %v1974_v2  ;;  %v2137_v2 = vld [vmem:[#allocation2 + $0xa30] sm:$0xff] }
 0x4b8   : > { %2069 = vmatpush.msrb.mxu1 %v1972_v16  ;;  %v2135_v16 = vld [vmem:[#allocation2 + $0xa20] sm:$0xff] }
 0x4ba   : > { %2070 = vmatpush.msrb.mxu1 %v1970_v17  ;;  %v2133_v17 = vld [vmem:[#allocation2 + $0xa10] sm:$0xff] }
 0x4bc   : > { %2071 = vmatpush.msrb.mxu1 %v1968_v3  ;;  %v2131_v3 = vld [vmem:[#allocation2 + $0xa00] sm:$0xff] }
 0x4be   : > { %2072 = vmatpush.msrb.mxu1 %v1966_v4 }
 0x4bf   : > { %2073 = vmatmul.f32.vlgmr.msrb.gmra.mxu1 %v6659_v0 }
 0x4c0   : > { %2215 = vmatpush.msra.mxu1 %v2193_v5 }
 0x4c2   : > { %2216 = vmatpush.msra.mxu1 %v2191_v6 }
 0x4c4   : > { %2217 = vmatpush.msra.mxu1 %v2189_v7 }
 0x4c6   : > { %2218 = vmatpush.msra.mxu1 %v2187_v8 }
 0x4c8   : > { %2219 = vmatpush.msra.mxu1 %v2185_v9  ;;  %v2194_v9 = vld [vmem:[#allocation2 + $0xbf8] sm:$0xff] }
 0x4ca   : > { %2220 = vmatpush.msra.mxu1 %v2183_v10  ;;  %v2192_v10 = vld [vmem:[#allocation2 + $0xbe8] sm:$0xff] }
 0x4cc   : > { %2221 = vmatpush.msra.mxu1 %v2181_v11  ;;  %v2190_v11 = vld [vmem:[#allocation2 + $0xbd8] sm:$0xff] }
 0x4ce   : > { %2222 = vmatpush.msra.mxu1 %v2179_v12  ;;  %v2188_v12 = vld [vmem:[#allocation2 + $0xbc8] sm:$0xff] }
 0x4d0   : > { %2223 = vmatpush.msra.mxu1 %v2177_v14  ;;  %v2186_v14 = vld [vmem:[#allocation2 + $0xbb8] sm:$0xff] }
 0x4d2   : > { %2224 = vmatpush.msra.mxu1 %v2175_v15  ;;  %v2184_v15 = vld [vmem:[#allocation2 + $0xba8] sm:$0xff] }
 0x4d4   : > { %2225 = vmatpush.msra.mxu1 %v2173_v18  ;;  %v2182_v18 = vld [vmem:[#allocation2 + $0xb98] sm:$0xff] }
 0x4d6   : > { %2226 = vmatpush.msra.mxu1 %v2171_v19  ;;  %v2180_v19 = vld [vmem:[#allocation2 + $0xb88] sm:$0xff] }
 0x4d8   : > { %2227 = vmatpush.msra.mxu1 %v2169_v22  ;;  %v2178_v22 = vld [vmem:[#allocation2 + $0xb78] sm:$0xff] }
 0x4da   : > { %2228 = vmatpush.msra.mxu1 %v2167_v23  ;;  %v2176_v23 = vld [vmem:[#allocation2 + $0xb68] sm:$0xff] }
 0x4dc   : > { %2229 = vmatpush.msra.mxu1 %v2165_v24  ;;  %v2174_v24 = vld [vmem:[#allocation2 + $0xb58] sm:$0xff] }
 0x4de   : > { %2230 = vmatpush.msra.mxu1 %v2163_v25  ;;  %v2170_v25 = vld [vmem:[#allocation2 + $0xb38] sm:$0xff] }
 0x4df   : > { %2231 = vmatmul.f32.vlgmr.msra.gmra.mxu1 %v6659_v0 }
 0x4fa   : > { %v6725_v29 = vpop.f32.mrf.mxu1 }
 0x51a   : > { %v1836_v31 = vpop.f32.mrf.mxu1 }
 0x51b   : > { %v1837_v32 = vadd.f32 %v1836_v31, %v1816_v30  ;;  %v2168_v30 = vld [vmem:[#allocation2 + $0xb28] sm:$0xff]  ;;  %v2166_v31 = vld [vmem:[#allocation2 + $0xb18] sm:$0xff] }
 0x51d   : > { %4769 = vmatpush.msk.msra.mxu0 %vm1077_vm5, %v1837_v32 }
 0x51e   : > { %4770 = vmatmul.msk.f32.vlgmr.msra.gmra.mxu0 %vm1437_vm10, %v6717_v58  ;;  %v2153_v58 = vld [vmem:[#allocation2 + $0xab0] sm:$0xff] }
 0x51f   : > { %2037 = vmatpush.msrb.mxu0 %v1964_v34 }
 0x521   : > { %2038 = vmatpush.msrb.mxu0 %v1962_v35  ;;  %v2164_v35 = vld [vmem:[#allocation2 + $0xb08] sm:$0xff] }
 0x522   : > { %v6732_v4 = vpop.f32.mrf.mxu1 }
 0x523   : > { %2039 = vmatpush.msrb.mxu0 %v1960_v36 }
 0x525   : > { %2040 = vmatpush.msrb.mxu0 %v1958_v37  ;;  %v6739_v37 = vld [vmem:[#allocation15 + $0xa] sm:$0x3] }
 0x527   : > { %2041 = vmatpush.msrb.mxu0 %v1956_v38  ;;  %v2391_v38 = vld [vmem:[#allocation2 + $0xdf0] sm:$0xff] }
 0x529   : > { %2042 = vmatpush.msrb.mxu0 %v1954_v39  ;;  %v2360_v39 = vld [vmem:[#allocation2 + $0xcf8] sm:$0xff] }
 0x52b   : > { %2043 = vmatpush.msrb.mxu0 %v1952_v40  ;;  %v2389_v40 = vld [vmem:[#allocation2 + $0xde0] sm:$0xff] }
 0x52d   : > { %2044 = vmatpush.msrb.mxu0 %v1950_v41  ;;  %v2358_v41 = vld [vmem:[#allocation2 + $0xce8] sm:$0xff] }
 0x52f   : > { %2045 = vmatpush.msrb.mxu0 %v1948_v42  ;;  %v2387_v42 = vld [vmem:[#allocation2 + $0xdd0] sm:$0xff] }
 0x531   : > { %2046 = vmatpush.msrb.mxu0 %v1946_v43  ;;  %v2356_v43 = vld [vmem:[#allocation2 + $0xcd8] sm:$0xff] }
 0x533   : > { %2047 = vmatpush.msrb.mxu0 %v1944_v33  ;;  %v2385_v33 = vld [vmem:[#allocation2 + $0xdc0] sm:$0xff] }
 0x535   : > { %2048 = vmatpush.msrb.mxu0 %v1942_v44  ;;  %v2354_v44 = vld [vmem:[#allocation2 + $0xcc8] sm:$0xff] }
 0x537   : > { %2049 = vmatpush.msrb.mxu0 %v1940_v45  ;;  %v2383_v45 = vld [vmem:[#allocation2 + $0xdb0] sm:$0xff] }
 0x539   : > { %2050 = vmatpush.msrb.mxu0 %v1938_v48  ;;  %v2352_v48 = vld [vmem:[#allocation2 + $0xcb8] sm:$0xff] }
 0x53b   : > { %2051 = vmatpush.msrb.mxu0 %v1936_v49  ;;  %v2381_v49 = vld [vmem:[#allocation2 + $0xda0] sm:$0xff] }
 0x53c   : > { %v2074_v6 = vpop.f32.mrf.mxu1 }
 0x53d   : > { %2052 = vmatpush.msrb.mxu0 %v1934_v50  ;;  %v2350_v50 = vld [vmem:[#allocation2 + $0xca8] sm:$0xff] }
 0x53e   : > { %2053 = vmatmul.f32.vlgmr.msrb.gmra.mxu0 %v6657_v63 }
 0x53f   : > { %2195 = vmatpush.msra.mxu0 %v2161_v51  ;;  %v2379_v51 = vld [vmem:[#allocation2 + $0xd90] sm:$0xff] }
 0x541   : > { %2196 = vmatpush.msra.mxu0 %v2159_v55  ;;  %v2348_v55 = vld [vmem:[#allocation2 + $0xc98] sm:$0xff] }
 0x543   : > { %2197 = vmatpush.msra.mxu0 %v2157_v56  ;;  %v2377_v56 = vld [vmem:[#allocation2 + $0xd80] sm:$0xff] }
 0x545   : > { %2198 = vmatpush.msra.mxu0 %v2155_v57  ;;  %v2346_v57 = vld [vmem:[#allocation2 + $0xc88] sm:$0xff] }
 0x547   : > { %2199 = vmatpush.msra.mxu0 %v2153_v58  ;;  %v2375_v58 = vld [vmem:[#allocation2 + $0xd70] sm:$0xff] }
 0x549   : > { %2200 = vmatpush.msra.mxu0 %v2151_v59  ;;  %v2344_v59 = vld [vmem:[#allocation2 + $0xc78] sm:$0xff] }
 0x54b   : > { %2201 = vmatpush.msra.mxu0 %v2149_v46  ;;  %v2373_v46 = vld [vmem:[#allocation2 + $0xd60] sm:$0xff] }
 0x54d   : > { %2202 = vmatpush.msra.mxu0 %v2147_v47  ;;  %v2342_v47 = vld [vmem:[#allocation2 + $0xc68] sm:$0xff] }
 0x54f   : > { %2203 = vmatpush.msra.mxu0 %v2145_v60  ;;  %v2371_v60 = vld [vmem:[#allocation2 + $0xd50] sm:$0xff] }
 0x551   : > { %2204 = vmatpush.msra.mxu0 %v2143_v61  ;;  %v2340_v61 = vld [vmem:[#allocation2 + $0xc58] sm:$0xff] }
 0x553   : > { %2205 = vmatpush.msra.mxu0 %v2141_v62  ;;  %v2369_v62 = vld [vmem:[#allocation2 + $0xd40] sm:$0xff] }
 0x555   : > { %2206 = vmatpush.msra.mxu0 %v2139_v1  ;;  %v2338_v1 = vld [vmem:[#allocation2 + $0xc48] sm:$0xff] }
 0x557   : > { %2207 = vmatpush.msra.mxu0 %v2137_v2  ;;  %v2367_v2 = vld [vmem:[#allocation2 + $0xd30] sm:$0xff] }
 0x559   : > { %2208 = vmatpush.msra.mxu0 %v2135_v16  ;;  %v2336_v16 = vld [vmem:[#allocation2 + $0xc38] sm:$0xff] }
 0x55b   : > { %2209 = vmatpush.msra.mxu0 %v2133_v17  ;;  %v2365_v17 = vld [vmem:[#allocation2 + $0xd20] sm:$0xff] }
 0x55c   : > { %v2232_v32 = vpop.f32.mrf.mxu1 }
 0x55d   : > { %2210 = vmatpush.msra.mxu0 %v2131_v3  ;;  %v2334_v3 = vld [vmem:[#allocation2 + $0xc28] sm:$0xff] }
 0x55e   : > { %2211 = vmatmul.f32.vlgmr.msra.gmra.mxu0 %v6657_v63 }
 0x59b   : > { %v6734_v5 = vpop.f32.mrf.mxu0 }
 0x5bb   : > { %v2054_v7 = vpop.f32.mrf.mxu0 }
 0x5bc   : > { %v2075_v8 = vadd.f32 %v2074_v6, %v2054_v7  ;;  %v2363_v6 = vld [vmem:[#allocation2 + $0xd10] sm:$0xff]  ;;  %v2332_v7 = vld [vmem:[#allocation2 + $0xc18] sm:$0xff] }
 0x5be   : > { %4775 = vmatpush.msk.msrb.mxu3 %vm1077_vm5, %v2075_v8  ;;  %v2361_v8 = vld [vmem:[#allocation2 + $0xd00] sm:$0xff] }
 0x5bf   : > { %4776 = vmatmul.msk.f32.vlgmr.msrb.gmra.mxu3 %vm1437_vm10, %v6695_v52  ;;  %v2172_v52 = vld [vmem:[#allocation2 + $0xb48] sm:$0xff] }
 0x5c0   : > { %2255 = vmatpush.msra.mxu3 %v2194_v9  ;;  %v2330_v9 = vld [vmem:[#allocation2 + $0xc08] sm:$0xff] }
 0x5c2   : > { %2256 = vmatpush.msra.mxu3 %v2192_v10  ;;  %v2557_v10 = vld [vmem:[#allocation2 + $0xef0] sm:$0xff] }
 0x5c4   : > { %2257 = vmatpush.msra.mxu3 %v2190_v11  ;;  %v2555_v11 = vld [vmem:[#allocation2 + $0xee0] sm:$0xff] }
 0x5c6   : > { %2258 = vmatpush.msra.mxu3 %v2188_v12  ;;  %v2553_v12 = vld [vmem:[#allocation2 + $0xed0] sm:$0xff] }
 0x5c8   : > { %2259 = vmatpush.msra.mxu3 %v2186_v14  ;;  %v2551_v14 = vld [vmem:[#allocation2 + $0xec0] sm:$0xff] }
 0x5ca   : > { %2260 = vmatpush.msra.mxu3 %v2184_v15  ;;  %v2549_v15 = vld [vmem:[#allocation2 + $0xeb0] sm:$0xff] }
 0x5cc   : > { %2261 = vmatpush.msra.mxu3 %v2182_v18  ;;  %v2547_v18 = vld [vmem:[#allocation2 + $0xea0] sm:$0xff] }
 0x5ce   : > { %2262 = vmatpush.msra.mxu3 %v2180_v19  ;;  %v2545_v19 = vld [vmem:[#allocation2 + $0xe90] sm:$0xff] }
 0x5d0   : > { %2263 = vmatpush.msra.mxu3 %v2178_v22  ;;  %v2543_v22 = vld [vmem:[#allocation2 + $0xe80] sm:$0xff] }
 0x5d2   : > { %2264 = vmatpush.msra.mxu3 %v2176_v23  ;;  %v2541_v23 = vld [vmem:[#allocation2 + $0xe70] sm:$0xff] }
 0x5d4   : > { %2265 = vmatpush.msra.mxu3 %v2174_v24  ;;  %v2539_v24 = vld [vmem:[#allocation2 + $0xe60] sm:$0xff] }
 0x5d6   : > { %2266 = vmatpush.msra.mxu3 %v2172_v52  ;;  %v2537_v52 = vld [vmem:[#allocation2 + $0xe50] sm:$0xff] }
 0x5d8   : > { %2267 = vmatpush.msra.mxu3 %v2170_v25  ;;  %v2535_v25 = vld [vmem:[#allocation2 + $0xe40] sm:$0xff] }
 0x5da   : > { %2268 = vmatpush.msra.mxu3 %v2168_v30  ;;  %v2533_v30 = vld [vmem:[#allocation2 + $0xe30] sm:$0xff] }
 0x5db   : > { %v2212_v34 = vpop.f32.mrf.mxu0 }
 0x5dc   : > { %v2233_v36 = vadd.f32 %v2232_v32, %v2212_v34  ;;  %2269 = vmatpush.msra.mxu3 %v2166_v31  ;;  %v2531_v31 = vld [vmem:[#allocation2 + $0xe20] sm:$0xff]  ;;  %v2529_v32 = vld [vmem:[#allocation2 + $0xe10] sm:$0xff] }
 0x5dd   : > { %v2527_v34 = vld [vmem:[#allocation2 + $0xe00] sm:$0xff] }
 0x5de   : > { %2270 = vmatpush.msra.mxu3 %v2164_v35  ;;  %4777 = vmatpush.msk.msrb.mxu0 %vm1077_vm5, %v2233_v36  ;;  %v1534_v35 = vadd.f32 %v6705_v27, %v6701_v20 }
 0x5df   : > { %2271 = vmatmul.f32.vlgmr.msra.gmra.mxu3 %v6659_v0  ;;  %4778 = vmatmul.msk.f32.vlgmr.msrb.gmra.mxu0 %vm1437_vm10, %v6739_v37 }
 0x5e0   : > { %2413 = vmatpush.msrb.mxu3 %v2391_v38  ;;  %2433 = vmatpush.msra.mxu0 %v2360_v39  ;;  %v1733_v36 = vadd.f32 %v6725_v29, %v1534_v35  ;;  %v2565_v35 = vld [vmem:[#allocation2 + $0xf30] sm:$0xff] }
 0x5e2   : > { %2414 = vmatpush.msrb.mxu3 %v2389_v40  ;;  %2434 = vmatpush.msra.mxu0 %v2358_v41  ;;  %v1931_v38 = vadd.f32 %v6732_v4, %v1733_v36  ;;  %v1514_v41 = vadd.f32 %v6707_v28, %v6703_v21  ;;  %v2390_v4 = vld [vmem:[#allocation2 + $0xde8] sm:$0xff]  ;;  %v2388_v21 = vld [vmem:[#allocation2 + $0xdd8] sm:$0xff] }
 0x5e3   : > { %v2386_v28 = vld [vmem:[#allocation2 + $0xdc8] sm:$0xff]  ;;  %v2534_v36 = vld [vmem:[#allocation2 + $0xe38] sm:$0xff] }
 0x5e4   : > { %2415 = vmatpush.msrb.mxu3 %v2387_v42  ;;  %2435 = vmatpush.msra.mxu0 %v2356_v43  ;;  %v1732_v42 = vadd.f32 %v6723_v26, %v1514_v41  ;;  %v2384_v26 = vld [vmem:[#allocation2 + $0xdb8] sm:$0xff]  ;;  %v2561_v41 = vld [vmem:[#allocation2 + $0xf10] sm:$0xff] }
 0x5e6   : > { %2416 = vmatpush.msrb.mxu3 %v2385_v33  ;;  %2436 = vmatpush.msra.mxu0 %v2354_v44  ;;  %v1930_v43 = vadd.f32 %v6734_v5, %v1732_v42  ;;  %v2105_v33 = vpop.f32.mrf.mxu2  ;;  %v2382_v5 = vld [vmem:[#allocation2 + $0xda8] sm:$0xff]  ;;  %v2530_v42 = vld [vmem:[#allocation2 + $0xe18] sm:$0xff] }
 0x5e8   : > { %2417 = vmatpush.msrb.mxu3 %v2383_v45  ;;  %2437 = vmatpush.msra.mxu0 %v2352_v48  ;;  %v2128_v44 = vadd.f32 %v2105_v33, %v1930_v43  ;;  %v2559_v43 = vld [vmem:[#allocation2 + $0xf00] sm:$0xff]  ;;  %v2528_v33 = vld [vmem:[#allocation2 + $0xe08] sm:$0xff] }
 0x5ea   : > { %2418 = vmatpush.msrb.mxu3 %v2381_v49  ;;  %2438 = vmatpush.msra.mxu0 %v2350_v50  ;;  %v2392_v49 = vld [vmem:[#allocation2 + $0xdf8] sm:$0xff] }
 0x5eb   : > { %v2380_v50 = vld [vmem:[#allocation2 + $0xd98] sm:$0xff] }
 0x5ec   : > { %2419 = vmatpush.msrb.mxu3 %v2379_v51  ;;  %2439 = vmatpush.msra.mxu0 %v2348_v55  ;;  %v2378_v51 = vld [vmem:[#allocation2 + $0xd88] sm:$0xff]  ;;  %v2376_v55 = vld [vmem:[#allocation2 + $0xd78] sm:$0xff] }
 0x5ee   : > { %2420 = vmatpush.msrb.mxu3 %v2377_v56  ;;  %2440 = vmatpush.msra.mxu0 %v2346_v57  ;;  %v2252_v20 = vpop.f32.mrf.mxu2  ;;  %v2374_v56 = vld [vmem:[#allocation2 + $0xd68] sm:$0xff]  ;;  %v2372_v57 = vld [vmem:[#allocation2 + $0xd58] sm:$0xff] }
 0x5f0   : > { %2421 = vmatpush.msrb.mxu3 %v2375_v58  ;;  %2441 = vmatpush.msra.mxu0 %v2344_v59  ;;  %v2368_v58 = vld [vmem:[#allocation2 + $0xd38] sm:$0xff]  ;;  %v2366_v59 = vld [vmem:[#allocation2 + $0xd28] sm:$0xff] }
 0x5f2   : > { %2422 = vmatpush.msrb.mxu3 %v2373_v46  ;;  %2442 = vmatpush.msra.mxu0 %v2342_v47  ;;  %v2364_v46 = vld [vmem:[#allocation2 + $0xd18] sm:$0xff] }
 0x5f4   : > { %2423 = vmatpush.msrb.mxu3 %v2371_v60  ;;  %2443 = vmatpush.msra.mxu0 %v2340_v61  ;;  %v2362_v61 = vld [vmem:[#allocation2 + $0xd08] sm:$0xff] }
 0x5f6   : > { %2424 = vmatpush.msrb.mxu3 %v2369_v62  ;;  %2444 = vmatpush.msra.mxu0 %v2338_v1  ;;  %v2410_v47 = vpop.f32.mrf.mxu2  ;;  %v6763_v1 = vld [vmem:[#allocation15 + $0xc] sm:$0x3] }
 0x5f8   : > { %2425 = vmatpush.msrb.mxu3 %v2367_v2  ;;  %2445 = vmatpush.msra.mxu0 %v2336_v16  ;;  %v2589_v2 = vld [vmem:[#allocation2 + $0xff0] sm:$0xff]  ;;  %v2558_v16 = vld [vmem:[#allocation2 + $0xef8] sm:$0xff] }
 0x5fa   : > { %2426 = vmatpush.msrb.mxu3 %v2365_v17  ;;  %2446 = vmatpush.msra.mxu0 %v2334_v3  ;;  %v2587_v17 = vld [vmem:[#allocation2 + $0xfe0] sm:$0xff]  ;;  %v2556_v3 = vld [vmem:[#allocation2 + $0xee8] sm:$0xff] }
 0x5fc   : > { %2427 = vmatpush.msrb.mxu3 %v2363_v6  ;;  %2447 = vmatpush.msra.mxu0 %v2332_v7  ;;  %v2585_v6 = vld [vmem:[#allocation2 + $0xfd0] sm:$0xff]  ;;  %v2554_v7 = vld [vmem:[#allocation2 + $0xed8] sm:$0xff] }
 0x5fe   : > { %2428 = vmatpush.msrb.mxu3 %v2361_v8  ;;  %2448 = vmatpush.msra.mxu0 %v2330_v9  ;;  %v2583_v8 = vld [vmem:[#allocation2 + $0xfc0] sm:$0xff]  ;;  %v2552_v9 = vld [vmem:[#allocation2 + $0xec8] sm:$0xff] }
 0x5ff   : > { %2429 = vmatmul.f32.vlgmr.msrb.gmra.mxu3 %v6659_v0  ;;  %2449 = vmatmul.f32.vlgmr.msra.gmra.mxu0 %v6657_v63 }
 0x600   : > { %2591 = vmatpush.msrb.mxu0 %v2557_v10  ;;  %v2581_v10 = vld [vmem:[#allocation2 + $0xfb0] sm:$0xff] }
 0x602   : > { %2592 = vmatpush.msrb.mxu0 %v2555_v11  ;;  %v2550_v11 = vld [vmem:[#allocation2 + $0xeb8] sm:$0xff] }
 0x604   : > { %2593 = vmatpush.msrb.mxu0 %v2553_v12  ;;  %v2579_v12 = vld [vmem:[#allocation2 + $0xfa0] sm:$0xff] }
 0x606   : > { %2594 = vmatpush.msrb.mxu0 %v2551_v14  ;;  %v2548_v14 = vld [vmem:[#allocation2 + $0xea8] sm:$0xff] }
 0x608   : > { %2595 = vmatpush.msrb.mxu0 %v2549_v15  ;;  %v2577_v15 = vld [vmem:[#allocation2 + $0xf90] sm:$0xff] }
 0x60a   : > { %2596 = vmatpush.msrb.mxu0 %v2547_v18  ;;  %v2546_v18 = vld [vmem:[#allocation2 + $0xe98] sm:$0xff] }
 0x60c   : > { %2597 = vmatpush.msrb.mxu0 %v2545_v19  ;;  %v2575_v19 = vld [vmem:[#allocation2 + $0xf80] sm:$0xff] }
 0x60e   : > { %2598 = vmatpush.msrb.mxu0 %v2543_v22  ;;  %v2544_v22 = vld [vmem:[#allocation2 + $0xe88] sm:$0xff] }
 0x610   : > { %2599 = vmatpush.msrb.mxu0 %v2541_v23  ;;  %v2573_v23 = vld [vmem:[#allocation2 + $0xf70] sm:$0xff] }
 0x612   : > { %2600 = vmatpush.msrb.mxu0 %v2539_v24  ;;  %v2542_v24 = vld [vmem:[#allocation2 + $0xe78] sm:$0xff] }
 0x614   : > { %2601 = vmatpush.msrb.mxu0 %v2537_v52  ;;  %v2571_v52 = vld [vmem:[#allocation2 + $0xf60] sm:$0xff] }
 0x616   : > { %2602 = vmatpush.msrb.mxu0 %v2535_v25  ;;  %v2540_v25 = vld [vmem:[#allocation2 + $0xe68] sm:$0xff] }
 0x618   : > { %2603 = vmatpush.msrb.mxu0 %v2533_v30  ;;  %v2569_v30 = vld [vmem:[#allocation2 + $0xf50] sm:$0xff] }
 0x61a   : > { %2604 = vmatpush.msrb.mxu0 %v2531_v31  ;;  %v2538_v31 = vld [vmem:[#allocation2 + $0xe58] sm:$0xff] }
 0x61c   : > { %2605 = vmatpush.msrb.mxu0 %v2529_v32  ;;  %v2567_v32 = vld [vmem:[#allocation2 + $0xf40] sm:$0xff] }
 0x61e   : > { %2606 = vmatpush.msrb.mxu0 %v2527_v34  ;;  %v2536_v34 = vld [vmem:[#allocation2 + $0xe48] sm:$0xff] }
 0x61f   : > { %2607 = vmatmul.f32.vlgmr.msrb.gmra.mxu0 %v6657_v63 }
 0x642   : > { %v2125_v39 = vpop.f32.mrf.mxu3 }
 0x643   : > { %v6752_v40 = vadd.f32 %v2125_v39, %v1931_v38  ;;  %v2563_v38 = vld [vmem:[#allocation2 + $0xf20] sm:$0xff]  ;;  %v2532_v39 = vld [vmem:[#allocation2 + $0xe28] sm:$0xff] }
 0x65c   : > { %v2303_v45 = vpop.f32.mrf.mxu0 }
 0x65d   : > { %v6758_v48 = vadd.f32 %v2303_v45, %v2128_v44  ;;  %v2755_v44 = vld [vmem:[#allocation2 + $0x10f0] sm:$0xff]  ;;  %v2753_v45 = vld [vmem:[#allocation2 + $0x10e0] sm:$0xff] }
 0x662   : > { %v2272_v27 = vpop.f32.mrf.mxu3 }
 0x663   : > { %v2273_v29 = vadd.f32 %v2272_v27, %v2252_v20  ;;  %v2751_v20 = vld [vmem:[#allocation2 + $0x10d0] sm:$0xff]  ;;  %v2749_v27 = vld [vmem:[#allocation2 + $0x10c0] sm:$0xff] }
 0x665   : > { %4779 = vmatpush.msk.msrb.mxu1 %vm1077_vm5, %v2273_v29  ;;  %v2747_v29 = vld [vmem:[#allocation2 + $0x10b0] sm:$0xff] }
 0x666   : > { %4780 = vmatmul.msk.f32.vlgmr.msrb.gmra.mxu1 %vm1437_vm10, %v6739_v37  ;;  %v2370_v37 = vld [vmem:[#allocation2 + $0xd48] sm:$0xff] }
 0x667   : > { %2453 = vmatpush.msra.mxu1 %v2392_v49  ;;  %v2745_v49 = vld [vmem:[#allocation2 + $0x10a0] sm:$0xff] }
 0x669   : > { %2454 = vmatpush.msra.mxu1 %v2390_v4  ;;  %v2743_v4 = vld [vmem:[#allocation2 + $0x1090] sm:$0xff] }
 0x66b   : > { %2455 = vmatpush.msra.mxu1 %v2388_v21  ;;  %v2741_v21 = vld [vmem:[#allocation2 + $0x1080] sm:$0xff] }
 0x66d   : > { %2456 = vmatpush.msra.mxu1 %v2386_v28  ;;  %v2739_v28 = vld [vmem:[#allocation2 + $0x1070] sm:$0xff] }
 0x66f   : > { %2457 = vmatpush.msra.mxu1 %v2384_v26  ;;  %v2737_v26 = vld [vmem:[#allocation2 + $0x1060] sm:$0xff] }
 0x671   : > { %2458 = vmatpush.msra.mxu1 %v2382_v5  ;;  %v2735_v5 = vld [vmem:[#allocation2 + $0x1050] sm:$0xff] }
 0x673   : > { %2459 = vmatpush.msra.mxu1 %v2380_v50  ;;  %v2733_v50 = vld [vmem:[#allocation2 + $0x1040] sm:$0xff] }
 0x675   : > { %2460 = vmatpush.msra.mxu1 %v2378_v51  ;;  %v2731_v51 = vld [vmem:[#allocation2 + $0x1030] sm:$0xff] }
 0x677   : > { %2461 = vmatpush.msra.mxu1 %v2376_v55  ;;  %v2729_v55 = vld [vmem:[#allocation2 + $0x1020] sm:$0xff] }
 0x679   : > { %2462 = vmatpush.msra.mxu1 %v2374_v56  ;;  %v2727_v56 = vld [vmem:[#allocation2 + $0x1010] sm:$0xff] }
 0x67b   : > { %2463 = vmatpush.msra.mxu1 %v2372_v57  ;;  %v2725_v57 = vld [vmem:[#allocation2 + $0x1000] sm:$0xff] }
 0x67d   : > { %2464 = vmatpush.msra.mxu1 %v2370_v37 }
 0x67f   : > { %2465 = vmatpush.msra.mxu1 %v2368_v58 }
 0x681   : > { %2466 = vmatpush.msra.mxu1 %v2366_v59  ;;  %v2450_v59 = vpop.f32.mrf.mxu0 }
 0x682   : > { %v2430_v60 = vpop.f32.mrf.mxu3 }
 0x683   : > { %v2431_v62 = vadd.f32 %v2430_v60, %v2410_v47  ;;  %2467 = vmatpush.msra.mxu1 %v2364_v46  ;;  %v2590_v60 = vld [vmem:[#allocation2 + $0xff8] sm:$0xff] }
 0x685   : > { %2468 = vmatpush.msra.mxu1 %v2362_v61  ;;  %4781 = vmatpush.msk.msra.mxu2 %vm1077_vm5, %v2431_v62  ;;  %v2588_v61 = vld [vmem:[#allocation2 + $0xfe8] sm:$0xff] }
 0x686   : > { %2469 = vmatmul.f32.vlgmr.msra.gmra.mxu1 %v6659_v0  ;;  %4782 = vmatmul.msk.f32.vlgmr.msra.gmra.mxu2 %vm1437_vm10, %v6763_v1 }
 0x687   : > { %2611 = vmatpush.msrb.mxu1 %v2589_v2  ;;  %2631 = vmatpush.msrb.mxu2 %v2558_v16  ;;  %v2586_v2 = vld [vmem:[#allocation2 + $0xfd8] sm:$0xff] }
 0x689   : > { %2612 = vmatpush.msrb.mxu1 %v2587_v17  ;;  %2632 = vmatpush.msrb.mxu2 %v2556_v3  ;;  %v2584_v17 = vld [vmem:[#allocation2 + $0xfc8] sm:$0xff] }
 0x68a   : > { %v2580_v3 = vld [vmem:[#allocation2 + $0xfa8] sm:$0xff] }
 0x68b   : > { %2613 = vmatpush.msrb.mxu1 %v2585_v6  ;;  %2633 = vmatpush.msrb.mxu2 %v2554_v7  ;;  %v2578_v6 = vld [vmem:[#allocation2 + $0xf98] sm:$0xff]  ;;  %v2576_v7 = vld [vmem:[#allocation2 + $0xf88] sm:$0xff] }
 0x68d   : > { %2614 = vmatpush.msrb.mxu1 %v2583_v8  ;;  %2634 = vmatpush.msrb.mxu2 %v2552_v9  ;;  %v2574_v8 = vld [vmem:[#allocation2 + $0xf78] sm:$0xff] }
 0x68e   : > { %v2570_v9 = vld [vmem:[#allocation2 + $0xf58] sm:$0xff] }
 0x68f   : > { %2615 = vmatpush.msrb.mxu1 %v2581_v10  ;;  %2635 = vmatpush.msrb.mxu2 %v2550_v11  ;;  %v2568_v10 = vld [vmem:[#allocation2 + $0xf48] sm:$0xff] }
 0x690   : > { %v2564_v11 = vld [vmem:[#allocation2 + $0xf28] sm:$0xff] }
 0x691   : > { %2616 = vmatpush.msrb.mxu1 %v2579_v12  ;;  %2636 = vmatpush.msrb.mxu2 %v2548_v14  ;;  %v2562_v12 = vld [vmem:[#allocation2 + $0xf18] sm:$0xff] }
 0x693   : > { %2617 = vmatpush.msrb.mxu1 %v2577_v15  ;;  %2637 = vmatpush.msrb.mxu2 %v2546_v18  ;;  %v2560_v18 = vld [vmem:[#allocation2 + $0xf08] sm:$0xff] }
 0x695   : > { %2618 = vmatpush.msrb.mxu1 %v2575_v19  ;;  %2638 = vmatpush.msrb.mxu2 %v2544_v22  ;;  %v6781_v22 = vld [vmem:[#allocation15 + $0xe] sm:$0x3] }
 0x697   : > { %2619 = vmatpush.msrb.mxu1 %v2573_v23  ;;  %2639 = vmatpush.msrb.mxu2 %v2542_v24  ;;  %v2787_v23 = vld [vmem:[#allocation2 + $0x11f0] sm:$0xff]  ;;  %v2756_v24 = vld [vmem:[#allocation2 + $0x10f8] sm:$0xff] }
 0x699   : > { %2620 = vmatpush.msrb.mxu1 %v2571_v52  ;;  %2640 = vmatpush.msrb.mxu2 %v2540_v25  ;;  %v2785_v52 = vld [vmem:[#allocation2 + $0x11e0] sm:$0xff]  ;;  %v2754_v25 = vld [vmem:[#allocation2 + $0x10e8] sm:$0xff] }
 0x69b   : > { %2621 = vmatpush.msrb.mxu1 %v2569_v30  ;;  %2641 = vmatpush.msrb.mxu2 %v2538_v31  ;;  %v2783_v30 = vld [vmem:[#allocation2 + $0x11d0] sm:$0xff]  ;;  %v2752_v31 = vld [vmem:[#allocation2 + $0x10d8] sm:$0xff] }
 0x69c   : > { %v2608_v14 = vpop.f32.mrf.mxu0 }
 0x69d   : > { %2622 = vmatpush.msrb.mxu1 %v2567_v32  ;;  %2642 = vmatpush.msrb.mxu2 %v2536_v34  ;;  %v2781_v32 = vld [vmem:[#allocation2 + $0x11c0] sm:$0xff]  ;;  %v2750_v34 = vld [vmem:[#allocation2 + $0x10c8] sm:$0xff] }
 0x69f   : > { %2623 = vmatpush.msrb.mxu1 %v2565_v35  ;;  %2643 = vmatpush.msrb.mxu2 %v2534_v36  ;;  %v2779_v35 = vld [vmem:[#allocation2 + $0x11b0] sm:$0xff]  ;;  %v2748_v36 = vld [vmem:[#allocation2 + $0x10b8] sm:$0xff] }
 0x6a1   : > { %2624 = vmatpush.msrb.mxu1 %v2563_v38  ;;  %2644 = vmatpush.msrb.mxu2 %v2532_v39  ;;  %v2777_v38 = vld [vmem:[#allocation2 + $0x11a0] sm:$0xff]  ;;  %v2746_v39 = vld [vmem:[#allocation2 + $0x10a8] sm:$0xff] }
 0x6a3   : > { %2625 = vmatpush.msrb.mxu1 %v2561_v41  ;;  %2645 = vmatpush.msrb.mxu2 %v2530_v42  ;;  %v2775_v41 = vld [vmem:[#allocation2 + $0x1190] sm:$0xff]  ;;  %v2744_v42 = vld [vmem:[#allocation2 + $0x1098] sm:$0xff] }
 0x6a5   : > { %2626 = vmatpush.msrb.mxu1 %v2559_v43  ;;  %2646 = vmatpush.msrb.mxu2 %v2528_v33  ;;  %v2773_v43 = vld [vmem:[#allocation2 + $0x1180] sm:$0xff]  ;;  %v2742_v33 = vld [vmem:[#allocation2 + $0x1088] sm:$0xff] }
 0x6a6   : > { %2627 = vmatmul.f32.vlgmr.msrb.gmra.mxu1 %v6659_v0  ;;  %2647 = vmatmul.f32.vlgmr.msrb.gmra.mxu2 %v6657_v63 }
 0x6a7   : > { %2789 = vmatpush.msra.mxu2 %v2755_v44  ;;  %v2771_v44 = vld [vmem:[#allocation2 + $0x1170] sm:$0xff] }
 0x6a9   : > { %2790 = vmatpush.msra.mxu2 %v2753_v45  ;;  %v2740_v45 = vld [vmem:[#allocation2 + $0x1078] sm:$0xff] }
 0x6ab   : > { %2791 = vmatpush.msra.mxu2 %v2751_v20  ;;  %v2769_v20 = vld [vmem:[#allocation2 + $0x1160] sm:$0xff] }
 0x6ad   : > { %2792 = vmatpush.msra.mxu2 %v2749_v27  ;;  %v2738_v27 = vld [vmem:[#allocation2 + $0x1068] sm:$0xff] }
 0x6af   : > { %2793 = vmatpush.msra.mxu2 %v2747_v29  ;;  %v2767_v29 = vld [vmem:[#allocation2 + $0x1150] sm:$0xff] }
 0x6b1   : > { %2794 = vmatpush.msra.mxu2 %v2745_v49  ;;  %v2736_v49 = vld [vmem:[#allocation2 + $0x1058] sm:$0xff] }
 0x6b3   : > { %2795 = vmatpush.msra.mxu2 %v2743_v4  ;;  %v2765_v4 = vld [vmem:[#allocation2 + $0x1140] sm:$0xff] }
 0x6b5   : > { %2796 = vmatpush.msra.mxu2 %v2741_v21  ;;  %v2734_v21 = vld [vmem:[#allocation2 + $0x1048] sm:$0xff] }
 0x6b7   : > { %2797 = vmatpush.msra.mxu2 %v2739_v28  ;;  %v2763_v28 = vld [vmem:[#allocation2 + $0x1130] sm:$0xff] }
 0x6b9   : > { %2798 = vmatpush.msra.mxu2 %v2737_v26  ;;  %v2732_v26 = vld [vmem:[#allocation2 + $0x1038] sm:$0xff] }
 0x6bb   : > { %2799 = vmatpush.msra.mxu2 %v2735_v5  ;;  %v2761_v5 = vld [vmem:[#allocation2 + $0x1120] sm:$0xff] }
 0x6bd   : > { %2800 = vmatpush.msra.mxu2 %v2733_v50  ;;  %v2730_v50 = vld [vmem:[#allocation2 + $0x1028] sm:$0xff] }
 0x6bf   : > { %2801 = vmatpush.msra.mxu2 %v2731_v51  ;;  %v2759_v51 = vld [vmem:[#allocation2 + $0x1110] sm:$0xff] }
 0x6c1   : > { %2802 = vmatpush.msra.mxu2 %v2729_v55  ;;  %v2728_v55 = vld [vmem:[#allocation2 + $0x1018] sm:$0xff] }
 0x6c3   : > { %2803 = vmatpush.msra.mxu2 %v2727_v56  ;;  %v2757_v56 = vld [vmem:[#allocation2 + $0x1100] sm:$0xff] }
 0x6c5   : > { %2804 = vmatpush.msra.mxu2 %v2725_v57  ;;  %v2726_v57 = vld [vmem:[#allocation2 + $0x1008] sm:$0xff] }
 0x6c6   : > { %2805 = vmatmul.f32.vlgmr.msra.gmra.mxu2 %v6657_v63 }
 0x6e3   : > { %v2323_v37 = vpop.f32.mrf.mxu1 }
 0x6e4   : > { %v6773_v58 = vadd.f32 %v2323_v37, %v6752_v40  ;;  %v2582_v40 = vld [vmem:[#allocation2 + $0xfb8] sm:$0xff]  ;;  %v5074_v37 = vld [vmem:[#allocation2 + $0xf0] sm:$0xff] }
 0x703   : > { %v2470_v46 = vpop.f32.mrf.mxu1 }
 0x704   : > { %v2471_v47 = vadd.f32 %v2470_v46, %v2450_v59  ;;  %v5075_v59 = vld [vmem:[#allocation2 + $0xe0] sm:$0xff]  ;;  %v5076_v46 = vld [vmem:[#allocation2 + $0xd0] sm:$0xff] }
 0x706   : > { %4783 = vmatpush.msk.msra.mxu3 %vm1077_vm5, %v2471_v47  ;;  %v5077_v47 = vld [vmem:[#allocation2 + $0xc0] sm:$0xff] }
 0x707   : > { %4784 = vmatmul.msk.f32.vlgmr.msra.gmra.mxu3 %vm1437_vm10, %v6763_v1  ;;  %v2572_v1 = vld [vmem:[#allocation2 + $0xf68] sm:$0xff] }
 0x708   : > { %2651 = vmatpush.msrb.mxu3 %v2590_v60  ;;  %v5078_v60 = vld [vmem:[#allocation2 + $0xb0] sm:$0xff] }
 0x709   : > { %v2501_v62 = vpop.f32.mrf.mxu2 }
 0x70a   : > { %v6779_v16 = vadd.f32 %v2501_v62, %v6758_v48  ;;  %2652 = vmatpush.msrb.mxu3 %v2588_v61  ;;  %v2566_v48 = vld [vmem:[#allocation2 + $0xf38] sm:$0xff]  ;;  %v5079_v61 = vld [vmem:[#allocation2 + $0xa0] sm:$0xff]  ;;  %v5080_v62 = vld [vmem:[#allocation2 + $0x90] sm:$0xff] }
 0x70c   : > { %2653 = vmatpush.msrb.mxu3 %v2586_v2  ;;  %v5081_v2 = vld [vmem:[#allocation2 + $0x80] sm:$0xff] }
 0x70e   : > { %2654 = vmatpush.msrb.mxu3 %v2584_v17  ;;  %v5082_v17 = vld [vmem:[#allocation2 + $0x70] sm:$0xff] }
 0x710   : > { %2655 = vmatpush.msrb.mxu3 %v2582_v40  ;;  %v5083_v40 = vld [vmem:[#allocation2 + $0x60] sm:$0xff] }
 0x712   : > { %2656 = vmatpush.msrb.mxu3 %v2580_v3  ;;  %v5085_v3 = vld [vmem:[#allocation2 + $0x40] sm:$0xff] }
 0x714   : > { %2657 = vmatpush.msrb.mxu3 %v2578_v6  ;;  %v5086_v6 = vld [vmem:[#allocation2 + $0x30] sm:$0xff] }
 0x716   : > { %2658 = vmatpush.msrb.mxu3 %v2576_v7  ;;  %v5087_v7 = vld [vmem:[#allocation2 + $0x20] sm:$0xff] }
 0x718   : > { %2659 = vmatpush.msrb.mxu3 %v2574_v8  ;;  %v5088_v8 = vld [vmem:[#allocation2 + $0x10] sm:$0xff] }
 0x71a   : > { %2660 = vmatpush.msrb.mxu3 %v2572_v1  ;;  %v5089_v1 = vld [vmem:[#allocation2] sm:$0xff] }
 0x71c   : > { %2661 = vmatpush.msrb.mxu3 %v2570_v9  ;;  %v5090_v9 = vld [vmem:[#allocation2 + $0x2f0] sm:$0xff] }
 0x71e   : > { %2662 = vmatpush.msrb.mxu3 %v2568_v10  ;;  %v5091_v10 = vld [vmem:[#allocation2 + $0x2e0] sm:$0xff] }
 0x720   : > { %2663 = vmatpush.msrb.mxu3 %v2566_v48  ;;  %v5092_v48 = vld [vmem:[#allocation2 + $0x2d0] sm:$0xff] }
 0x722   : > { %2664 = vmatpush.msrb.mxu3 %v2564_v11  ;;  %v5093_v11 = vld [vmem:[#allocation2 + $0x2c0] sm:$0xff] }
 0x723   : > { %v2628_v15 = vpop.f32.mrf.mxu1 }
 0x724   : > { %v2629_v19 = vadd.f32 %v2628_v15, %v2608_v14  ;;  %2665 = vmatpush.msrb.mxu3 %v2562_v12  ;;  %v5094_v12 = vld [vmem:[#allocation2 + $0x2b0] sm:$0xff]  ;;  %v5095_v14 = vld [vmem:[#allocation2 + $0x2a0] sm:$0xff] }
 0x725   : > { %v5096_v15 = vld [vmem:[#allocation2 + $0x290] sm:$0xff] }
 0x726   : > { %2666 = vmatpush.msrb.mxu3 %v2560_v18  ;;  %4785 = vmatpush.msk.msra.mxu0 %vm1077_vm5, %v2629_v19  ;;  %v5097_v18 = vld [vmem:[#allocation2 + $0x280] sm:$0xff]  ;;  %v5098_v19 = vld [vmem:[#allocation2 + $0x270] sm:$0xff] }
 0x727   : > { %2667 = vmatmul.f32.vlgmr.msrb.gmra.mxu3 %v6659_v0  ;;  %4786 = vmatmul.msk.f32.vlgmr.msra.gmra.mxu0 %vm1437_vm10, %v6781_v22 }
 0x728   : > { %2809 = vmatpush.msra.mxu3 %v2787_v23  ;;  %2829 = vmatpush.msrb.mxu0 %v2756_v24  ;;  %v5099_v23 = vld [vmem:[#allocation2 + $0x260] sm:$0xff]  ;;  %v5100_v24 = vld [vmem:[#allocation2 + $0x250] sm:$0xff] }
 0x72a   : > { %2810 = vmatpush.msra.mxu3 %v2785_v52  ;;  %2830 = vmatpush.msrb.mxu0 %v2754_v25  ;;  %v5101_v52 = vld [vmem:[#allocation2 + $0x240] sm:$0xff]  ;;  %v5102_v25 = vld [vmem:[#allocation2 + $0x230] sm:$0xff] }
 0x72c   : > { %2811 = vmatpush.msra.mxu3 %v2783_v30  ;;  %2831 = vmatpush.msrb.mxu0 %v2752_v31  ;;  %v5103_v30 = vld [vmem:[#allocation2 + $0x220] sm:$0xff]  ;;  %v5104_v31 = vld [vmem:[#allocation2 + $0x210] sm:$0xff] }
 0x72e   : > { %2812 = vmatpush.msra.mxu3 %v2781_v32  ;;  %2832 = vmatpush.msrb.mxu0 %v2750_v34  ;;  %v5105_v32 = vld [vmem:[#allocation2 + $0x200] sm:$0xff] }
 0x730   : > { %2813 = vmatpush.msra.mxu3 %v2779_v35  ;;  %2833 = vmatpush.msrb.mxu0 %v2748_v36 }
 0x732   : > { %2814 = vmatpush.msra.mxu3 %v2777_v38  ;;  %2834 = vmatpush.msrb.mxu0 %v2746_v39  ;;  %v2648_v39 = vpop.f32.mrf.mxu2 }
 0x734   : > { %2815 = vmatpush.msra.mxu3 %v2775_v41  ;;  %2835 = vmatpush.msrb.mxu0 %v2744_v42 }
 0x736   : > { %2816 = vmatpush.msra.mxu3 %v2773_v43  ;;  %2836 = vmatpush.msrb.mxu0 %v2742_v33  ;;  %v2788_v43 = vld [vmem:[#allocation2 + $0x11f8] sm:$0xff]  ;;  %v2786_v33 = vld [vmem:[#allocation2 + $0x11e8] sm:$0xff] }
 0x738   : > { %2817 = vmatpush.msra.mxu3 %v2771_v44  ;;  %2837 = vmatpush.msrb.mxu0 %v2740_v45  ;;  %v2784_v44 = vld [vmem:[#allocation2 + $0x11d8] sm:$0xff]  ;;  %v2782_v45 = vld [vmem:[#allocation2 + $0x11c8] sm:$0xff] }
 0x73a   : > { %2818 = vmatpush.msra.mxu3 %v2769_v20  ;;  %2838 = vmatpush.msrb.mxu0 %v2738_v27  ;;  %v2778_v20 = vld [vmem:[#allocation2 + $0x11a8] sm:$0xff] }
 0x73b   : > { %v2774_v27 = vld [vmem:[#allocation2 + $0x1188] sm:$0xff] }
 0x73c   : > { %2819 = vmatpush.msra.mxu3 %v2767_v29  ;;  %2839 = vmatpush.msrb.mxu0 %v2736_v49  ;;  %v2772_v29 = vld [vmem:[#allocation2 + $0x1178] sm:$0xff]  ;;  %v2770_v49 = vld [vmem:[#allocation2 + $0x1168] sm:$0xff] }
 0x73e   : > { %2820 = vmatpush.msra.mxu3 %v2765_v4  ;;  %2840 = vmatpush.msrb.mxu0 %v2734_v21  ;;  %v2768_v4 = vld [vmem:[#allocation2 + $0x1158] sm:$0xff] }
 0x73f   : > { %v2764_v21 = vld [vmem:[#allocation2 + $0x1138] sm:$0xff] }
 0x740   : > { %2821 = vmatpush.msra.mxu3 %v2763_v28  ;;  %2841 = vmatpush.msrb.mxu0 %v2732_v26  ;;  %v2762_v28 = vld [vmem:[#allocation2 + $0x1128] sm:$0xff]  ;;  %v2760_v26 = vld [vmem:[#allocation2 + $0x1118] sm:$0xff] }
 0x742   : > { %2822 = vmatpush.msra.mxu3 %v2761_v5  ;;  %2842 = vmatpush.msrb.mxu0 %v2730_v50 }
 0x744   : > { %2823 = vmatpush.msra.mxu3 %v2759_v51  ;;  %2843 = vmatpush.msrb.mxu0 %v2728_v55  ;;  %v2758_v51 = vld [vmem:[#allocation2 + $0x1108] sm:$0xff] }
 0x746   : > { %2824 = vmatpush.msra.mxu3 %v2757_v56  ;;  %2844 = vmatpush.msrb.mxu0 %v2726_v57  ;;  %v6798_v56 = vld [vmem:[#allocation15 + $0x10] sm:$0x3]  ;;  %v5106_v57 = vld [vmem:[#allocation2 + $0x1f0] sm:$0xff] }
 0x747   : > { %2825 = vmatmul.f32.vlgmr.msra.gmra.mxu3 %v6659_v0  ;;  %2845 = vmatmul.f32.vlgmr.msrb.gmra.mxu0 %v6657_v63  ;;  %v5084_v63 = vld [vmem:[#allocation2 + $0x50] sm:$0xff] }
 0x748   : > { %2991 = vmatpush.msra.mxu0 %v5074_v37  ;;  %v5107_v37 = vld [vmem:[#allocation2 + $0xf8] sm:$0xff] }
 0x749   : > { %v2806_v5 = vpop.f32.mrf.mxu2 }
 0x74a   : > { %2992 = vmatpush.msra.mxu0 %v5075_v59  ;;  %v5108_v59 = vld [vmem:[#allocation2 + $0x1e0] sm:$0xff] }
 0x74c   : > { %2993 = vmatpush.msra.mxu0 %v5076_v46  ;;  %v5109_v46 = vld [vmem:[#allocation2 + $0xe8] sm:$0xff] }
 0x74e   : > { %2994 = vmatpush.msra.mxu0 %v5077_v47  ;;  %v5110_v47 = vld [vmem:[#allocation2 + $0x1d0] sm:$0xff] }
 0x750   : > { %2995 = vmatpush.msra.mxu0 %v5078_v60  ;;  %v5111_v60 = vld [vmem:[#allocation2 + $0xd8] sm:$0xff] }
 0x752   : > { %2996 = vmatpush.msra.mxu0 %v5079_v61  ;;  %v5112_v61 = vld [vmem:[#allocation2 + $0x1c0] sm:$0xff] }
 0x754   : > { %2997 = vmatpush.msra.mxu0 %v5080_v62  ;;  %v5113_v62 = vld [vmem:[#allocation2 + $0xc8] sm:$0xff] }
 0x756   : > { %2998 = vmatpush.msra.mxu0 %v5081_v2  ;;  %v5115_v2 = vld [vmem:[#allocation2 + $0xb8] sm:$0xff] }
 0x758   : > { %2999 = vmatpush.msra.mxu0 %v5082_v17  ;;  %v5116_v17 = vld [vmem:[#allocation2 + $0x1a0] sm:$0xff] }
 0x75a   : > { %3000 = vmatpush.msra.mxu0 %v5083_v40  ;;  %v5117_v40 = vld [vmem:[#allocation2 + $0xa8] sm:$0xff] }
 0x75c   : > { %3001 = vmatpush.msra.mxu0 %v5084_v63  ;;  %v5118_v63 = vld [vmem:[#allocation2 + $0x190] sm:$0xff] }
 0x75e   : > { %3002 = vmatpush.msra.mxu0 %v5085_v3  ;;  %v5119_v3 = vld [vmem:[#allocation2 + $0x98] sm:$0xff] }
 0x760   : > { %3003 = vmatpush.msra.mxu0 %v5086_v6  ;;  %v5120_v6 = vld [vmem:[#allocation2 + $0x180] sm:$0xff] }
 0x762   : > { %3004 = vmatpush.msra.mxu0 %v5087_v7  ;;  %v5121_v7 = vld [vmem:[#allocation2 + $0x88] sm:$0xff] }
 0x764   : > { %3005 = vmatpush.msra.mxu0 %v5088_v8  ;;  %v5122_v8 = vld [vmem:[#allocation2 + $0x170] sm:$0xff] }
 0x766   : > { %3006 = vmatpush.msra.mxu0 %v5089_v1  ;;  %v5123_v1 = vld [vmem:[#allocation2 + $0x78] sm:$0xff] }
 0x768   : > { %3072 = vmatpush.msrb.mxu0 %v5090_v9  ;;  %v5124_v9 = vld [vmem:[#allocation2 + $0x160] sm:$0xff] }
 0x76a   : > { %3073 = vmatpush.msrb.mxu0 %v5091_v10  ;;  %v5125_v10 = vld [vmem:[#allocation2 + $0x68] sm:$0xff] }
 0x76c   : > { %3074 = vmatpush.msrb.mxu0 %v5092_v48  ;;  %v5126_v48 = vld [vmem:[#allocation2 + $0x150] sm:$0xff] }
 0x76e   : > { %3075 = vmatpush.msrb.mxu0 %v5093_v11  ;;  %v5127_v11 = vld [vmem:[#allocation2 + $0x58] sm:$0xff] }
 0x770   : > { %3076 = vmatpush.msrb.mxu0 %v5094_v12  ;;  %v5128_v12 = vld [vmem:[#allocation2 + $0x140] sm:$0xff] }
 0x772   : > { %3077 = vmatpush.msrb.mxu0 %v5095_v14  ;;  %v5129_v14 = vld [vmem:[#allocation2 + $0x48] sm:$0xff] }
 0x774   : > { %3078 = vmatpush.msrb.mxu0 %v5096_v15  ;;  %v5130_v15 = vld [vmem:[#allocation2 + $0x130] sm:$0xff] }
 0x776   : > { %3079 = vmatpush.msrb.mxu0 %v5097_v18  ;;  %v5131_v18 = vld [vmem:[#allocation2 + $0x38] sm:$0xff] }
 0x778   : > { %3080 = vmatpush.msrb.mxu0 %v5098_v19  ;;  %v5132_v19 = vld [vmem:[#allocation2 + $0x120] sm:$0xff] }
 0x77a   : > { %3081 = vmatpush.msrb.mxu0 %v5099_v23  ;;  %v5133_v23 = vld [vmem:[#allocation2 + $0x28] sm:$0xff] }
 0x77c   : > { %3082 = vmatpush.msrb.mxu0 %v5100_v24  ;;  %v5134_v24 = vld [vmem:[#allocation2 + $0x110] sm:$0xff] }
 0x77e   : > { %3083 = vmatpush.msrb.mxu0 %v5101_v52  ;;  %v5135_v52 = vld [vmem:[#allocation2 + $0x18] sm:$0xff] }
 0x780   : > { %3084 = vmatpush.msrb.mxu0 %v5102_v25  ;;  %v5136_v25 = vld [vmem:[#allocation2 + $0x100] sm:$0xff] }
 0x782   : > { %3085 = vmatpush.msrb.mxu0 %v5103_v30  ;;  %v5137_v30 = vld [vmem:[#allocation2 + $0x8] sm:$0xff] }
 0x784   : > { %3086 = vmatpush.msrb.mxu0 %v5104_v31  ;;  %v5138_v31 = vld [vmem:[#allocation2 + $0x3f0] sm:$0xff] }
 0x786   : > { %3087 = vmatpush.msrb.mxu0 %v5105_v32  ;;  %v5139_v32 = vld [vmem:[#allocation2 + $0x2f8] sm:$0xff] }
 0x78a   : > { %v2521_v34 = vpop.f32.mrf.mxu3 }
 0x78b   : > { %v6790_v35 = vadd.f32 %v2521_v34, %v6773_v58  ;;  %v2780_v58 = vld [vmem:[#allocation2 + $0x11b8] sm:$0xff]  ;;  %v5140_v34 = vld [vmem:[#allocation2 + $0x3e0] sm:$0xff] }
 0x7a4   : > { %v2699_v36 = vpop.f32.mrf.mxu0 }
 0x7a5   : > { %v6793_v38 = vadd.f32 %v2699_v36, %v6779_v16  ;;  %v2776_v16 = vld [vmem:[#allocation2 + $0x1198] sm:$0xff]  ;;  %v5141_v36 = vld [vmem:[#allocation2 + $0x2e8] sm:$0xff] }
 0x7aa   : > { %v2668_v41 = vpop.f32.mrf.mxu3 }
 0x7ab   : > { %v2669_v42 = vadd.f32 %v2668_v41, %v2648_v39  ;;  %v5142_v39 = vld [vmem:[#allocation2 + $0x3d0] sm:$0xff]  ;;  %v5143_v41 = vld [vmem:[#allocation2 + $0x2d8] sm:$0xff] }
 0x7ad   : > { %4787 = vmatpush.msk.msra.mxu1 %vm1077_vm5, %v2669_v42  ;;  %v5144_v42 = vld [vmem:[#allocation2 + $0x3c0] sm:$0xff] }
 0x7ae   : > { %4788 = vmatmul.msk.f32.vlgmr.msra.gmra.mxu1 %vm1437_vm10, %v6781_v22  ;;  %v2766_v22 = vld [vmem:[#allocation2 + $0x1148] sm:$0xff] }
 0x7af   : > { %2849 = vmatpush.msrb.mxu1 %v2788_v43  ;;  %v5145_v43 = vld [vmem:[#allocation2 + $0x2c8] sm:$0xff] }
 0x7b1   : > { %2850 = vmatpush.msrb.mxu1 %v2786_v33  ;;  %v5146_v33 = vld [vmem:[#allocation2 + $0x3b0] sm:$0xff] }
 0x7b3   : > { %2851 = vmatpush.msrb.mxu1 %v2784_v44  ;;  %v5147_v44 = vld [vmem:[#allocation2 + $0x2b8] sm:$0xff] }
 0x7b5   : > { %2852 = vmatpush.msrb.mxu1 %v2782_v45  ;;  %v5148_v45 = vld [vmem:[#allocation2 + $0x3a0] sm:$0xff] }
 0x7b7   : > { %2853 = vmatpush.msrb.mxu1 %v2780_v58  ;;  %v5149_v58 = vld [vmem:[#allocation2 + $0x2a8] sm:$0xff] }
 0x7b9   : > { %2854 = vmatpush.msrb.mxu1 %v2778_v20  ;;  %v5150_v20 = vld [vmem:[#allocation2 + $0x390] sm:$0xff] }
 0x7bb   : > { %2855 = vmatpush.msrb.mxu1 %v2776_v16  ;;  %v5151_v16 = vld [vmem:[#allocation2 + $0x298] sm:$0xff] }
 0x7bd   : > { %2856 = vmatpush.msrb.mxu1 %v2774_v27  ;;  %v5152_v27 = vld [vmem:[#allocation2 + $0x380] sm:$0xff] }
 0x7bf   : > { %2857 = vmatpush.msrb.mxu1 %v2772_v29  ;;  %v5153_v29 = vld [vmem:[#allocation2 + $0x288] sm:$0xff] }
 0x7c1   : > { %2858 = vmatpush.msrb.mxu1 %v2770_v49  ;;  %v5154_v49 = vld [vmem:[#allocation2 + $0x370] sm:$0xff] }
 0x7c3   : > { %2859 = vmatpush.msrb.mxu1 %v2768_v4  ;;  %v5155_v4 = vld [vmem:[#allocation2 + $0x278] sm:$0xff] }
 0x7c5   : > { %2860 = vmatpush.msrb.mxu1 %v2766_v22  ;;  %v5156_v22 = vld [vmem:[#allocation2 + $0x360] sm:$0xff] }
 0x7c7   : > { %2861 = vmatpush.msrb.mxu1 %v2764_v21  ;;  %v5157_v21 = vld [vmem:[#allocation2 + $0x268] sm:$0xff] }
 0x7c9   : > { %2862 = vmatpush.msrb.mxu1 %v2762_v28  ;;  %v5158_v28 = vld [vmem:[#allocation2 + $0x350] sm:$0xff] }
 0x7ca   : > { %v2826_v50 = vpop.f32.mrf.mxu3 }
 0x7cb   : > { %v2827_v55 = vadd.f32 %v2826_v50, %v2806_v5  ;;  %2863 = vmatpush.msrb.mxu1 %v2760_v26  ;;  %v5159_v26 = vld [vmem:[#allocation2 + $0x258] sm:$0xff]  ;;  %v5160_v5 = vld [vmem:[#allocation2 + $0x340] sm:$0xff]  ;;  %v5161_v50 = vld [vmem:[#allocation2 + $0x248] sm:$0xff] }
 0x7cd   : > { %2864 = vmatpush.msrb.mxu1 %v2758_v51  ;;  %4789 = vmatpush.msk.msrb.mxu2 %vm1077_vm5, %v2827_v55  ;;  %v5162_v51 = vld [vmem:[#allocation2 + $0x330] sm:$0xff]  ;;  %v5163_v55 = vld [vmem:[#allocation2 + $0x238] sm:$0xff] }
 0x7ce   : > { %2865 = vmatmul.f32.vlgmr.msrb.gmra.mxu1 %v6659_v0  ;;  %4790 = vmatmul.msk.f32.vlgmr.msrb.gmra.mxu2 %vm1437_vm10, %v6798_v56  ;;  %v5114_v0 = vld [vmem:[#allocation2 + $0x1b0] sm:$0xff] }
 0x7cf   : > { %3011 = vmatpush.msra.mxu1 %v5106_v57  ;;  %3031 = vmatpush.msra.mxu2 %v5107_v37  ;;  %v5164_v57 = vld [vmem:[#allocation2 + $0x320] sm:$0xff]  ;;  %v5165_v37 = vld [vmem:[#allocation2 + $0x228] sm:$0xff] }
 0x7d1   : > { %3012 = vmatpush.msra.mxu1 %v5108_v59  ;;  %3032 = vmatpush.msra.mxu2 %v5109_v46  ;;  %v5166_v59 = vld [vmem:[#allocation2 + $0x310] sm:$0xff]  ;;  %v5167_v46 = vld [vmem:[#allocation2 + $0x218] sm:$0xff] }
 0x7d3   : > { %3013 = vmatpush.msra.mxu1 %v5110_v47  ;;  %3033 = vmatpush.msra.mxu2 %v5111_v60  ;;  %v5168_v47 = vld [vmem:[#allocation2 + $0x300] sm:$0xff]  ;;  %v5169_v60 = vld [vmem:[#allocation2 + $0x208] sm:$0xff] }
 0x7d5   : > { %3014 = vmatpush.msra.mxu1 %v5112_v61  ;;  %3034 = vmatpush.msra.mxu2 %v5113_v62 }
 0x7d7   : > { %3015 = vmatpush.msra.mxu1 %v5114_v0  ;;  %3035 = vmatpush.msra.mxu2 %v5115_v2  ;;  %v2846_v0 = vpop.f32.mrf.mxu0 }
 0x7d9   : > { %3016 = vmatpush.msra.mxu1 %v5116_v17  ;;  %3036 = vmatpush.msra.mxu2 %v5117_v40  ;;  %v5170_v40 = vld [vmem:[#allocation2 + $0x1f8] sm:$0xff] }
 0x7db   : > { %3017 = vmatpush.msra.mxu1 %v5118_v63  ;;  %3037 = vmatpush.msra.mxu2 %v5119_v3  ;;  %v5171_v63 = vld [vmem:[#allocation2 + $0x1e8] sm:$0xff]  ;;  %v5172_v3 = vld [vmem:[#allocation2 + $0x1d8] sm:$0xff] }
 0x7dd   : > { %3018 = vmatpush.msra.mxu1 %v5120_v6  ;;  %3038 = vmatpush.msra.mxu2 %v5121_v7  ;;  %v5173_v6 = vld [vmem:[#allocation2 + $0x1c8] sm:$0xff]  ;;  %v5174_v7 = vld [vmem:[#allocation2 + $0x1b8] sm:$0xff] }
 0x7df   : > { %3019 = vmatpush.msra.mxu1 %v5122_v8  ;;  %3039 = vmatpush.msra.mxu2 %v5123_v1  ;;  %v5176_v8 = vld [vmem:[#allocation2 + $0x198] sm:$0xff]  ;;  %v5177_v1 = vld [vmem:[#allocation2 + $0x188] sm:$0xff] }
 0x7e1   : > { %3020 = vmatpush.msra.mxu1 %v5124_v9  ;;  %3040 = vmatpush.msra.mxu2 %v5125_v10  ;;  %v5178_v9 = vld [vmem:[#allocation2 + $0x178] sm:$0xff]  ;;  %v5179_v10 = vld [vmem:[#allocation2 + $0x168] sm:$0xff] }
 0x7e3   : > { %3021 = vmatpush.msra.mxu1 %v5126_v48  ;;  %3041 = vmatpush.msra.mxu2 %v5127_v11  ;;  %v5181_v48 = vld [vmem:[#allocation2 + $0x148] sm:$0xff]  ;;  %v5182_v11 = vld [vmem:[#allocation2 + $0x138] sm:$0xff] }
 0x7e5   : > { %3022 = vmatpush.msra.mxu1 %v5128_v12  ;;  %3042 = vmatpush.msra.mxu2 %v5129_v14  ;;  %v5183_v12 = vld [vmem:[#allocation2 + $0x128] sm:$0xff]  ;;  %v5184_v14 = vld [vmem:[#allocation2 + $0x118] sm:$0xff] }
 0x7e7   : > { %3023 = vmatpush.msra.mxu1 %v5130_v15  ;;  %3043 = vmatpush.msra.mxu2 %v5131_v18  ;;  %v5185_v15 = vld [vmem:[#allocation2 + $0x108] sm:$0xff]  ;;  %v5186_v18 = vld [vmem:[#allocation2 + $0x3f8] sm:$0xff] }
 0x7e9   : > { %3024 = vmatpush.msra.mxu1 %v5132_v19  ;;  %3044 = vmatpush.msra.mxu2 %v5133_v23  ;;  %v5187_v19 = vld [vmem:[#allocation2 + $0x3e8] sm:$0xff]  ;;  %v5188_v23 = vld [vmem:[#allocation2 + $0x3d8] sm:$0xff] }
 0x7eb   : > { %3025 = vmatpush.msra.mxu1 %v5134_v24  ;;  %3045 = vmatpush.msra.mxu2 %v5135_v52  ;;  %v5189_v24 = vld [vmem:[#allocation2 + $0x3c8] sm:$0xff]  ;;  %v5190_v52 = vld [vmem:[#allocation2 + $0x3b8] sm:$0xff] }
 0x7ed   : > { %3026 = vmatpush.msra.mxu1 %v5136_v25  ;;  %3046 = vmatpush.msra.mxu2 %v5137_v30  ;;  %v5191_v25 = vld [vmem:[#allocation2 + $0x3a8] sm:$0xff]  ;;  %v5192_v30 = vld [vmem:[#allocation2 + $0x398] sm:$0xff] }
 0x7ef   : > { %3092 = vmatpush.msrb.mxu1 %v5138_v31  ;;  %3112 = vmatpush.msrb.mxu2 %v5139_v32  ;;  %v5193_v31 = vld [vmem:[#allocation2 + $0x388] sm:$0xff]  ;;  %v5194_v32 = vld [vmem:[#allocation2 + $0x378] sm:$0xff] }
 0x7f1   : > { %3093 = vmatpush.msrb.mxu1 %v5140_v34  ;;  %3113 = vmatpush.msrb.mxu2 %v5141_v36  ;;  %v5195_v34 = vld [vmem:[#allocation2 + $0x368] sm:$0xff]  ;;  %v5196_v36 = vld [vmem:[#allocation2 + $0x358] sm:$0xff] }
 0x7f3   : > { %3094 = vmatpush.msrb.mxu1 %v5142_v39  ;;  %3114 = vmatpush.msrb.mxu2 %v5143_v41  ;;  %v5197_v39 = vld [vmem:[#allocation2 + $0x348] sm:$0xff]  ;;  %v5198_v41 = vld [vmem:[#allocation2 + $0x338] sm:$0xff] }
 0x7f5   : > { %3095 = vmatpush.msrb.mxu1 %v5144_v42  ;;  %3115 = vmatpush.msrb.mxu2 %v5145_v43  ;;  %v5199_v42 = vld [vmem:[#allocation2 + $0x328] sm:$0xff]  ;;  %v5200_v43 = vld [vmem:[#allocation2 + $0x318] sm:$0xff] }
 0x7f7   : > { %3096 = vmatpush.msrb.mxu1 %v5146_v33  ;;  %3116 = vmatpush.msrb.mxu2 %v5147_v44  ;;  %v5201_v33 = vld [vmem:[#allocation2 + $0x308] sm:$0xff] }
 0x7f9   : > { %3097 = vmatpush.msrb.mxu1 %v5148_v45  ;;  %3117 = vmatpush.msrb.mxu2 %v5149_v58  ;;  %v2925_v58 = vpop.permute.xlu1 %2924 }
 0x7fb   : > { %3098 = vmatpush.msrb.mxu1 %v5150_v20  ;;  %3118 = vmatpush.msrb.mxu2 %v5151_v16 }
 0x7fd   : > { %3099 = vmatpush.msrb.mxu1 %v5152_v27  ;;  %3119 = vmatpush.msrb.mxu2 %v5153_v29 }
 0x7ff   : > { %3100 = vmatpush.msrb.mxu1 %v5154_v49  ;;  %3120 = vmatpush.msrb.mxu2 %v5155_v4 }
 0x801   : > { %3101 = vmatpush.msrb.mxu1 %v5156_v22  ;;  %3121 = vmatpush.msrb.mxu2 %v5157_v21 }
 0x803   : > { %3102 = vmatpush.msrb.mxu1 %v5158_v28  ;;  %3122 = vmatpush.msrb.mxu2 %v5159_v26 }
 0x805   : > { %3103 = vmatpush.msrb.mxu1 %v5160_v5  ;;  %3123 = vmatpush.msrb.mxu2 %v5161_v50 }
 0x807   : > { %3104 = vmatpush.msrb.mxu1 %v5162_v51  ;;  %3124 = vmatpush.msrb.mxu2 %v5163_v55 }
 0x809   : > { %3105 = vmatpush.msrb.mxu1 %v5164_v57  ;;  %3125 = vmatpush.msrb.mxu2 %v5165_v37 }
 0x80b   : > { %3106 = vmatpush.msrb.mxu1 %v5166_v59  ;;  %3126 = vmatpush.msrb.mxu2 %v5167_v46 }
 0x80d   : > { %3107 = vmatpush.msrb.mxu1 %v5168_v47  ;;  %3127 = vmatpush.msrb.mxu2 %v5169_v60 }
 0x82b   : > { %v2719_v61 = vpop.f32.mrf.mxu1 }
 0x82c   : > { %v6805_v62 = vadd.f32 %v2719_v61, %v6790_v35  ;;  %v5175_v35 = vld [vmem:[#allocation2 + $0x1a8] sm:$0xff] }
 0x84b   : > { %v2866_v2 = vpop.f32.mrf.mxu1 }
 0x84c   : > { %v2867_v17 = vadd.f32 %v2866_v2, %v2846_v0  ;;  %v2929_v0 = vld [vmem:[#allocation18] sm:$0x3]  ;;  %v4190_v2 = vld [vmem:[#allocation24] sm:$0x3] }
 0x84e   : > { %4791 = vmatpush.msk.msrb.mxu3 %vm1077_vm5, %v2867_v17  ;;  %v4253_v17 = vld [vmem:[#allocation28] sm:$0xff] }
 0x84f   : > { %4792 = vmatmul.msk.f32.vlgmr.msrb.gmra.mxu3 %vm1437_vm10, %v6798_v56  ;;  %v5180_v56 = vld [vmem:[#allocation2 + $0x158] sm:$0xff] }
 0x850   : > { %3051 = vmatpush.msra.mxu3 %v5170_v40  ;;  %v4254_v40 = vld [vmem:[#allocation28 + $0x8] sm:$0xff] }
 0x851   : > { %v2897_v44 = vpop.f32.mrf.mxu2 }
 0x852   : > { %3052 = vmatpush.msra.mxu3 %v5171_v63  ;;  %v2920_v45 = vadd.f32 %v2897_v44, %v6793_v38  ;;  %v4324_v63 = vld [vmem:[#allocation31] sm:$0xff] }
 0x853   : > { %v6832_v44 = vld [vmem:[#allocation21] sm:$0x3] }
 0x854   : > { %3053 = vmatpush.msra.mxu3 %v5172_v3  ;;  %v2927_v16 = vadd.f32 %v2925_v58, %v2920_v45  ;;  %v5202_v45 = vld [vmem:[#allocation2 + $0x4f8] sm:$0xff] }
 0x856   : > { %3054 = vmatpush.msra.mxu3 %v5173_v6  ;;  %v2931_v49 = vsel %vm1077_vm5, %v2927_v16, 0.0 }
 0x858   : > { %3055 = vmatpush.msra.mxu3 %v5174_v7 }
 0x85a   : > { %3056 = vmatpush.msra.mxu3 %v5175_v35 }
 0x85c   : > { %3057 = vmatpush.msra.mxu3 %v5176_v8 }
 0x85e   : > { %3058 = vmatpush.msra.mxu3 %v5177_v1 }
 0x860   : > { %3059 = vmatpush.msra.mxu3 %v5178_v9 }
 0x862   : > { %3060 = vmatpush.msra.mxu3 %v5179_v10 }
 0x864   : > { %3061 = vmatpush.msra.mxu3 %v5180_v56 }
 0x866   : > { %3062 = vmatpush.msra.mxu3 %v5181_v48 }
 0x868   : > { %3063 = vmatpush.msra.mxu3 %v5182_v11 }
 0x86a   : > { %3064 = vmatpush.msra.mxu3 %v5183_v12 }
 0x86c   : > { %3065 = vmatpush.msra.mxu3 %v5184_v14 }
 0x86e   : > { %3066 = vmatpush.msra.mxu3 %v5185_v15 }
 0x870   : > { %3132 = vmatpush.msrb.mxu3 %v5186_v18 }
 0x872   : > { %3133 = vmatpush.msrb.mxu3 %v5187_v19 }
 0x874   : > { %3134 = vmatpush.msrb.mxu3 %v5188_v23 }
 0x876   : > { %3135 = vmatpush.msrb.mxu3 %v5189_v24 }
 0x878   : > { %3136 = vmatpush.msrb.mxu3 %v5190_v52 }
 0x87a   : > { %3137 = vmatpush.msrb.mxu3 %v5191_v25 }
 0x87c   : > { %3138 = vmatpush.msrb.mxu3 %v5192_v30 }
 0x87e   : > { %3139 = vmatpush.msrb.mxu3 %v5193_v31 }
 0x880   : > { %3140 = vmatpush.msrb.mxu3 %v5194_v32  ;;  %v2984_v32 = vpop.permute.xlu0 %2983 }
 0x882   : > { %3141 = vmatpush.msrb.mxu3 %v5195_v34 }
 0x884   : > { %3142 = vmatpush.msrb.mxu3 %v5196_v36 }
 0x886   : > { %3143 = vmatpush.msrb.mxu3 %v5197_v39 }
 0x888   : > { %3144 = vmatpush.msrb.mxu3 %v5198_v41 }
 0x88a   : > { %3145 = vmatpush.msrb.mxu3 %v5199_v42 }
 0x88c   : > { %3146 = vmatpush.msrb.mxu3 %v5200_v43 }
 0x88e   : > { %3147 = vmatpush.msrb.mxu3 %v5201_v33 }
 0x8d2   : > { %v2917_v20 = vpop.f32.mrf.mxu3 }
 0x8d3   : > { %v2921_v27 = vadd.f32 %v2917_v20, %v6805_v62 }
 0x8d5   : > { %v2928_v29 = vadd.f32 %v2925_v58, %v2921_v27  ;;  %v5203_v58 = vld [vmem:[#allocation2 + $0x4e8] sm:$0xff] }
 0x8d7   : > { %v2932_v4 = vsel %vm1077_vm5, %v2928_v29, 0.0 }
 0x8d8   : > { %v2933_v22 = vadd.f32 %v2932_v4, %v2931_v49  ;;  %v5204_v4 = vld [vmem:[#allocation2 + $0x4d8] sm:$0xff] }
 0x8da   : > { %2934 = vadd.xlane.f32.xlu1 %v2933_v22 }
 0x94d   : > { %v2935_v21 = vpop.xlane.xlu1 %2934 }
 0x94e   : > { %v2936_v28 = vsel %vm1077_vm5, %v2935_v21, 0.0  ;;  %v5205_v21 = vld [vmem:[#allocation2 + $0x4c8] sm:$0xff] }
 0x94f   : > { %v2937_v26 = vrot.slane %v2936_v28, 4 }
 0x951   : > { %v2938_v5 = vadd.f32 %v2937_v26, %v2936_v28  ;;  %v6838_v28 = vld [vmem:[#allocation21 + $0x2] sm:$0x3]  ;;  %v5206_v26 = vld [vmem:[#allocation2 + $0x5f8] sm:$0xff] }
 0x953   : > { %v2939_v50 = vrot.slane %v2938_v5, 2 }
 0x955   : > { %v2940_v51 = vadd.f32 %v2939_v50, %v2938_v5  ;;  %v5207_v5 = vld [vmem:[#allocation2 + $0x4f0] sm:$0xff]  ;;  %v5208_v50 = vld [vmem:[#allocation2 + $0x4b8] sm:$0xff] }
 0x957   : > { %v2941_v38 = vrot.slane %v2940_v51, 1 }
 0x959   : > { %v2942_v55 = vadd.f32 %v2941_v38, %v2940_v51  ;;  %v5209_v51 = vld [vmem:[#allocation2 + $0x5e8] sm:$0xff]  ;;  %v5210_v38 = vld [vmem:[#allocation2 + $0x4e0] sm:$0xff] }
 0x95b   : > { %v2943_v57 = vmul.f32 %v2942_v55, %v6640_v13  ;;  %v5211_v55 = vld [vmem:[#allocation2 + $0x4a8] sm:$0xff] }
 0x95d   : > { %v2944_v37 = vsub.f32 %v2927_v16, %v2943_v57  ;;  %v2945_v59 = vsub.f32 %v2928_v29, %v2943_v57 }
 0x95f   : > { %v2946_v46 = vmul.f32 %v2944_v37, %v2944_v37  ;;  %v2947_v47 = vmul.f32 %v2945_v59, %v2945_v59 }
 0x961   : > { %v2948_v60 = vsel %vm1077_vm5, %v2946_v46, 0.0  ;;  %v2949_v61 = vsel %vm1077_vm5, %v2947_v47, 0.0  ;;  %v5213_v47 = vld [vmem:[#allocation2 + $0x4d0] sm:$0xff] }
 0x962   : > { %v2950_v62 = vadd.f32 %v2949_v61, %v2948_v60  ;;  %v5214_v60 = vld [vmem:[#allocation2 + $0x498] sm:$0xff]  ;;  %v5215_v61 = vld [vmem:[#allocation2 + $0x5c8] sm:$0xff] }
 0x964   : > { %2951 = vadd.xlane.f32.xlu2 %v2950_v62  ;;  %v5216_v62 = vld [vmem:[#allocation2 + $0x4c0] sm:$0xff] }
 0x97c   : > { %2976 = vperm.xlu2 %5060, %v2929_v0   ;;  %v5217_v0 = vld [vmem:[#allocation2 + $0x5f0] sm:$0xff] }
 0x984   : > { %4237 = vperm.xlu2 %5060, %v4190_v2   ;;  %v5218_v2 = vld [vmem:[#allocation2 + $0x488] sm:$0xff] }
 0x98c   : > { %4257 = vperm.xlu2 %5060, %v4253_v17   ;;  %v5219_v17 = vld [vmem:[#allocation2 + $0x5b8] sm:$0xff] }
 0x994   : > { %4262 = vperm.xlu2 %5060, %v4254_v40   ;;  %v5220_v40 = vld [vmem:[#allocation2 + $0x4b0] sm:$0xff] }
 0x99c   : > { %4327 = vperm.xlu2 %5060, %v4324_v63   ;;  %v5221_v63 = vld [vmem:[#allocation2 + $0x5e0] sm:$0xff] }
 0x9d7   : > { %v2952_v3 = vpop.xlane.xlu2 %2951 }
 0x9d8   : > { %v2953_v6 = vsel %vm1077_vm5, %v2952_v3, 0.0  ;;  %v5222_v3 = vld [vmem:[#allocation2 + $0x478] sm:$0xff] }
 0x9d9   : > { %v2954_v7 = vrot.slane %v2953_v6, 4 }
 0x9db   : > { %v2955_v35 = vadd.f32 %v2954_v7, %v2953_v6  ;;  %v5223_v6 = vld [vmem:[#allocation2 + $0x5a8] sm:$0xff]  ;;  %v5224_v7 = vld [vmem:[#allocation2 + $0x4a0] sm:$0xff] }
 0x9dd   : > { %v2956_v8 = vrot.slane %v2955_v35, 2 }
 0x9df   : > { %v2957_v1 = vadd.f32 %v2956_v8, %v2955_v35  ;;  %v2977_v25 = vpop.permute.xlu2 %2976  ;;  %v5225_v35 = vld [vmem:[#allocation2 + $0x5d0] sm:$0xff]  ;;  %v5226_v8 = vld [vmem:[#allocation2 + $0x468] sm:$0xff] }
 0x9e1   : > { %v2958_v9 = vrot.slane %v2957_v1, 1 }
 0x9e3   : > { %v2959_v10 = vadd.f32 %v2958_v9, %v2957_v1  ;;  %v5227_v1 = vld [vmem:[#allocation2 + $0x598] sm:$0xff]  ;;  %v5228_v9 = vld [vmem:[#allocation2 + $0x490] sm:$0xff] }
 0x9e5   : > { %v2960_v56 = vmul.f32 %v2959_v10, %v6640_v13  ;;  %v5229_v10 = vld [vmem:[#allocation2 + $0x5c0] sm:$0xff] }
 0x9e7   : > { %v2961_v48 = vadd.f32 1e-05, %v2960_v56  ;;  %v5230_v56 = vld [vmem:[#allocation2 + $0x458] sm:$0xff] }
 0x9e9   : > { %5070 = vrsqrt.f32 %v2961_v48  ;;  %vm2968_vm12 = vweird.f32 %v2961_v48 }
 0x9ef   : > { %v5071_v11 = vpop.eup %5070 }
 0x9f0   : > { %v2963_v12 = vmul.f32 %v5071_v11, %v2961_v48  ;;  %vm2969_vm11 = vweird.f32 %v5071_v11  ;;  %v5231_v48 = vld [vmem:[#allocation2 + $0x588] sm:$0xff] }
 0x9f1   : > { %vm2970_vm13 = vmor %vm2968_vm12, %vm2969_vm11 }
 0x9f2   : > { %v2964_v14 = vmul.f32 %v5071_v11, %v2963_v12  ;;  %v5233_v12 = vld [vmem:[#allocation2 + $0x5b0] sm:$0xff] }
 0x9f4   : > { %v2965_v15 = vmul.f32 0.5, %v2964_v14  ;;  %v5234_v14 = vld [vmem:[#allocation2 + $0x448] sm:$0xff] }
 0x9f6   : > { %v2966_v18 = vsub.f32 1.5, %v2965_v15  ;;  %v5235_v15 = vld [vmem:[#allocation2 + $0x578] sm:$0xff] }
 0x9f8   : > { %v2967_v19 = vmul.f32 %v5071_v11, %v2966_v18  ;;  %v5236_v18 = vld [vmem:[#allocation2 + $0x470] sm:$0xff] }
 0x9fa   : > { %v2971_v23 = vsel %vm2970_vm13, %v5071_v11, %v2967_v19  ;;  %v5232_v11 = vld [vmem:[#allocation2 + $0x480] sm:$0xff] }
 0x9fb   : > { %v2972_v24 = vmul.f32 %v2971_v23, %v2944_v37  ;;  %v2973_v52 = vmul.f32 %v2971_v23, %v2945_v59  ;;  %v5212_v59 = vld [vmem:[#allocation2 + $0x5d8] sm:$0xff]  ;;  %v5237_v19 = vld [vmem:[#allocation2 + $0x5a0] sm:$0xff] }
 0x9fc   : > { %v5238_v23 = vld [vmem:[#allocation2 + $0x438] sm:$0xff] }
 0x9fd   : > { %v2979_v30 = vmul.f32 %v2977_v25, %v2972_v24  ;;  %v2980_v31 = vmul.f32 %v2977_v25, %v2973_v52  ;;  %v5239_v24 = vld [vmem:[#allocation2 + $0x568] sm:$0xff]  ;;  %v5240_v52 = vld [vmem:[#allocation2 + $0x460] sm:$0xff]  ;;  %v5241_v25 = vld [vmem:[#allocation2 + $0x590] sm:$0xff] }
 0x9ff   : > { %v2986_v34 = vadd.f32 %v2984_v32, %v2979_v30  ;;  %v2987_v36 = vadd.f32 %v2984_v32, %v2980_v31  ;;  %v5242_v30 = vld [vmem:[#allocation2 + $0x428] sm:$0xff]  ;;  %v5243_v31 = vld [vmem:[#allocation2 + $0x558] sm:$0xff]  ;;  %v5244_v32 = vld [vmem:[#allocation2 + $0x450] sm:$0xff] }
 0xa01   : > { %v6820_v39 = vmax.f32 %v2986_v34, 0.0  ;;  %v6822_v41 = vmax.f32 %v2987_v36, 0.0  ;;  %v5245_v34 = vld [vmem:[#allocation2 + $0x580] sm:$0xff]  ;;  %v5246_v36 = vld [vmem:[#allocation2 + $0x418] sm:$0xff] }
 0xa03   : > { %3007 = vmatmul.f32.vlgmr.msra.gmra.mxu0 %v6820_v39  ;;  %3027 = vmatmul.f32.vlgmr.msra.gmra.mxu1 %v6822_v41 }
 0xa04   : > { %3047 = vmatmul.f32.vlgmr.msra.gmra.mxu2 %v6820_v39  ;;  %3067 = vmatmul.f32.vlgmr.msra.gmra.mxu3 %v6822_v41 }
 0xa0b   : > { %3088 = vmatmul.f32.vlgmr.msrb.gmra.mxu0 %v6820_v39  ;;  %3108 = vmatmul.f32.vlgmr.msrb.gmra.mxu1 %v6822_v41 }
 0xa0c   : > { %3128 = vmatmul.f32.vlgmr.msrb.gmra.mxu2 %v6820_v39  ;;  %3148 = vmatmul.f32.vlgmr.msrb.gmra.mxu3 %v6822_v41 }
 0xa80   : > { %v3008_v42 = vpop.f32.mrf.mxu0  ;;  %v3028_v43 = vpop.f32.mrf.mxu1 }
 0xa81   : > { %v3029_v33 = vadd.f32 %v3028_v43, %v3008_v42  ;;  %v5247_v42 = vld [vmem:[#allocation2 + $0x548] sm:$0xff]  ;;  %v5248_v43 = vld [vmem:[#allocation2 + $0x440] sm:$0xff] }
 0xa83   : > { %4797 = vmatpush.msk.msra.mxu2 %vm1077_vm5, %v3029_v33  ;;  %v5249_v33 = vld [vmem:[#allocation2 + $0x570] sm:$0xff] }
 0xa84   : > { %4798 = vmatmul.msk.f32.vlgmr.msra.gmra.mxu2 %vm1437_vm10, %v6832_v44 }
 0xa85   : > { %3292 = vmatpush.msrb.mxu2 %v5202_v45  ;;  %v5250_v45 = vld [vmem:[#allocation2 + $0x408] sm:$0xff] }
 0xa87   : > { %3293 = vmatpush.msrb.mxu2 %v5203_v58  ;;  %v3048_v20 = vpop.f32.mrf.mxu2  ;;  %v3068_v16 = vpop.f32.mrf.mxu3  ;;  %v5251_v58 = vld [vmem:[#allocation2 + $0x538] sm:$0xff] }
 0xa88   : > { %v3069_v27 = vadd.f32 %v3068_v16, %v3048_v20  ;;  %v3089_v29 = vpop.f32.mrf.mxu0  ;;  %v3109_v49 = vpop.f32.mrf.mxu1  ;;  %v5252_v20 = vld [vmem:[#allocation2 + $0x430] sm:$0xff] }
 0xa89   : > { %3294 = vmatpush.msrb.mxu2 %v5204_v4  ;;  %v3110_v22 = vadd.f32 %v3109_v49, %v3089_v29  ;;  %v5253_v16 = vld [vmem:[#allocation2 + $0x6f0] sm:$0xff]  ;;  %v5255_v29 = vld [vmem:[#allocation2 + $0x528] sm:$0xff]  ;;  %v5256_v49 = vld [vmem:[#allocation2 + $0x420] sm:$0xff] }
 0xa8a   : > { %4799 = vmatpush.msk.msra.mxu3 %vm1077_vm5, %v3069_v27  ;;  %v5254_v27 = vld [vmem:[#allocation2 + $0x560] sm:$0xff] }
 0xa8b   : > { %3295 = vmatpush.msrb.mxu2 %v5205_v21  ;;  %4793 = vmatpush.msk.msra.mxu0 %vm1077_vm5, %v3110_v22  ;;  %v5257_v4 = vld [vmem:[#allocation2 + $0x6e0] sm:$0xff]  ;;  %v5259_v22 = vld [vmem:[#allocation2 + $0x518] sm:$0xff]  ;;  %v5260_v21 = vld [vmem:[#allocation2 + $0x410] sm:$0xff] }
 0xa8c   : > { %3312 = vmatpush.msrb.mxu3 %v5206_v26  ;;  %4794 = vmatmul.msk.f32.vlgmr.msra.gmra.mxu0 %vm1437_vm10, %v6838_v28  ;;  %v5261_v26 = vld [vmem:[#allocation2 + $0x6d0] sm:$0xff] }
 0xa8d   : > { %3252 = vmatpush.msrb.mxu0 %v5207_v5  ;;  %3296 = vmatpush.msrb.mxu2 %v5208_v50  ;;  %v5262_v5 = vld [vmem:[#allocation2 + $0x540] sm:$0xff]  ;;  %v5263_v50 = vld [vmem:[#allocation2 + $0x508] sm:$0xff] }
 0xa8e   : > { %3313 = vmatpush.msrb.mxu3 %v5209_v51  ;;  %v5264_v51 = vld [vmem:[#allocation2 + $0x6c0] sm:$0xff] }
 0xa8f   : > { %3253 = vmatpush.msrb.mxu0 %v5210_v38  ;;  %3297 = vmatpush.msrb.mxu2 %v5211_v55  ;;  %v3129_v57 = vpop.f32.mrf.mxu2  ;;  %v3149_v37 = vpop.f32.mrf.mxu3  ;;  %v5265_v38 = vld [vmem:[#allocation2 + $0x7f0] sm:$0xff]  ;;  %v5266_v55 = vld [vmem:[#allocation2 + $0x400] sm:$0xff] }
 0xa90   : > { %3314 = vmatpush.msrb.mxu3 %v5212_v59  ;;  %v3150_v46 = vadd.f32 %v3149_v37, %v3129_v57  ;;  %v5267_v57 = vld [vmem:[#allocation2 + $0x530] sm:$0xff]  ;;  %v5269_v59 = vld [vmem:[#allocation2 + $0x7e0] sm:$0xff] }
 0xa91   : > { %3254 = vmatpush.msrb.mxu0 %v5213_v47  ;;  %3298 = vmatpush.msrb.mxu2 %v5214_v60  ;;  %v5268_v37 = vld [vmem:[#allocation2 + $0x6b0] sm:$0xff]  ;;  %v5271_v47 = vld [vmem:[#allocation2 + $0x6a0] sm:$0xff] }
 0xa92   : > { %3315 = vmatpush.msrb.mxu3 %v5215_v61  ;;  %4795 = vmatpush.msk.msra.mxu1 %vm1077_vm5, %v3150_v46  ;;  %v5270_v46 = vld [vmem:[#allocation2 + $0x520] sm:$0xff]  ;;  %v5273_v60 = vld [vmem:[#allocation2 + $0x510] sm:$0xff] }
 0xa93   : > { %3255 = vmatpush.msrb.mxu0 %v5216_v62  ;;  %3299 = vmatpush.msrb.mxu2 %v5218_v2  ;;  %v5274_v61 = vld [vmem:[#allocation2 + $0x690] sm:$0xff]  ;;  %v5275_v62 = vld [vmem:[#allocation2 + $0x7c0] sm:$0xff] }
 0xa94   : > { %3272 = vmatpush.msrb.mxu1 %v5217_v0  ;;  %3316 = vmatpush.msrb.mxu3 %v5219_v17  ;;  %v5276_v0 = vld [vmem:[#allocation2 + $0x500] sm:$0xff]  ;;  %v5278_v17 = vld [vmem:[#allocation2 + $0x7b0] sm:$0xff] }
 0xa95   : > { %3256 = vmatpush.msrb.mxu0 %v5220_v40  ;;  %3300 = vmatpush.msrb.mxu2 %v5222_v3  ;;  %v5277_v2 = vld [vmem:[#allocation2 + $0x680] sm:$0xff]  ;;  %v5279_v40 = vld [vmem:[#allocation2 + $0x670] sm:$0xff] }
 0xa96   : > { %3273 = vmatpush.msrb.mxu1 %v5221_v63  ;;  %3317 = vmatpush.msrb.mxu3 %v5223_v6  ;;  %v5280_v63 = vld [vmem:[#allocation2 + $0x7a0] sm:$0xff]  ;;  %v5282_v6 = vld [vmem:[#allocation2 + $0x790] sm:$0xff] }
 0xa97   : > { %3257 = vmatpush.msrb.mxu0 %v5224_v7  ;;  %3301 = vmatpush.msrb.mxu2 %v5226_v8  ;;  %v5281_v3 = vld [vmem:[#allocation2 + $0x660] sm:$0xff]  ;;  %v5283_v7 = vld [vmem:[#allocation2 + $0x650] sm:$0xff] }
 0xa98   : > { %3274 = vmatpush.msrb.mxu1 %v5225_v35  ;;  %3318 = vmatpush.msrb.mxu3 %v5227_v1  ;;  %v5284_v35 = vld [vmem:[#allocation2 + $0x780] sm:$0xff]  ;;  %v5286_v1 = vld [vmem:[#allocation2 + $0x770] sm:$0xff] }
 0xa99   : > { %3258 = vmatpush.msrb.mxu0 %v5228_v9  ;;  %3302 = vmatpush.msrb.mxu2 %v5230_v56  ;;  %v5285_v8 = vld [vmem:[#allocation2 + $0x640] sm:$0xff]  ;;  %v5287_v9 = vld [vmem:[#allocation2 + $0x630] sm:$0xff] }
 0xa9a   : > { %3275 = vmatpush.msrb.mxu1 %v5229_v10  ;;  %3319 = vmatpush.msrb.mxu3 %v5231_v48  ;;  %v5288_v10 = vld [vmem:[#allocation2 + $0x760] sm:$0xff]  ;;  %v5290_v48 = vld [vmem:[#allocation2 + $0x750] sm:$0xff] }
 0xa9b   : > { %3259 = vmatpush.msrb.mxu0 %v5232_v11  ;;  %3303 = vmatpush.msrb.mxu2 %v5234_v14  ;;  %v5289_v56 = vld [vmem:[#allocation2 + $0x620] sm:$0xff]  ;;  %v5291_v11 = vld [vmem:[#allocation2 + $0x610] sm:$0xff] }
 0xa9c   : > { %3276 = vmatpush.msrb.mxu1 %v5233_v12  ;;  %3320 = vmatpush.msrb.mxu3 %v5235_v15  ;;  %v5292_v12 = vld [vmem:[#allocation2 + $0x740] sm:$0xff]  ;;  %v5294_v15 = vld [vmem:[#allocation2 + $0x730] sm:$0xff] }
 0xa9d   : > { %3260 = vmatpush.msrb.mxu0 %v5236_v18  ;;  %3304 = vmatpush.msrb.mxu2 %v5238_v23  ;;  %v5293_v14 = vld [vmem:[#allocation2 + $0x600] sm:$0xff] }
 0xa9e   : > { %3277 = vmatpush.msrb.mxu1 %v5237_v19  ;;  %3321 = vmatpush.msrb.mxu3 %v5239_v24  ;;  %v5295_v18 = vld [vmem:[#allocation2 + $0x720] sm:$0xff]  ;;  %v5296_v19 = vld [vmem:[#allocation2 + $0x710] sm:$0xff] }
 0xa9f   : > { %3261 = vmatpush.msrb.mxu0 %v5240_v52  ;;  %3305 = vmatpush.msrb.mxu2 %v5242_v30  ;;  %v5297_v23 = vld [vmem:[#allocation2 + $0x700] sm:$0xff] }
 0xaa0   : > { %3278 = vmatpush.msrb.mxu1 %v5241_v25  ;;  %3322 = vmatpush.msrb.mxu3 %v5243_v31 }
 0xaa1   : > { %3262 = vmatpush.msrb.mxu0 %v5244_v32  ;;  %3306 = vmatpush.msrb.mxu2 %v5246_v36 }
 0xaa2   : > { %3279 = vmatpush.msrb.mxu1 %v5245_v34  ;;  %3323 = vmatpush.msrb.mxu3 %v5247_v42 }
 0xaa3   : > { %3263 = vmatpush.msrb.mxu0 %v5248_v43  ;;  %4800 = vmatmul.msk.f32.vlgmr.msra.gmra.mxu3 %vm1437_vm10, %v6832_v44  ;;  %v5258_v44 = vld [vmem:[#allocation2 + $0x550] sm:$0xff] }
 0xaa4   : > { %3280 = vmatpush.msrb.mxu1 %v5249_v33  ;;  %3307 = vmatpush.msrb.mxu2 %v5250_v45  ;;  %v3333_v43 = vld [vmem:[#allocation21 + $0x4] sm:$0x3] }
 0xaa5   : > { %3324 = vmatpush.msrb.mxu3 %v5251_v58  ;;  %3308 = vmatmul.f32.vlgmr.msrb.gmra.mxu2 %v6820_v39 }
 0xaa6   : > { %3264 = vmatpush.msrb.mxu0 %v5252_v20  ;;  %3385 = vmatpush.msra.mxu2 %v5253_v16  ;;  %v5298_v20 = vld [vmem:[#allocation2 + $0x7f8] sm:$0xff]  ;;  %v5299_v16 = vld [vmem:[#allocation2 + $0x7e8] sm:$0xff] }
 0xaa7   : > { %3281 = vmatpush.msrb.mxu1 %v5254_v27  ;;  %3325 = vmatpush.msrb.mxu3 %v5255_v29  ;;  %v5300_v27 = vld [vmem:[#allocation2 + $0x6f8] sm:$0xff] }
 0xaa8   : > { %3265 = vmatpush.msrb.mxu0 %v5256_v49  ;;  %3386 = vmatpush.msra.mxu2 %v5257_v4  ;;  %v5301_v29 = vld [vmem:[#allocation2 + $0x7d8] sm:$0xff]  ;;  %v5302_v49 = vld [vmem:[#allocation2 + $0x6e8] sm:$0xff] }
 0xaa9   : > { %3282 = vmatpush.msrb.mxu1 %v5258_v44  ;;  %3326 = vmatpush.msrb.mxu3 %v5259_v22  ;;  %v5303_v4 = vld [vmem:[#allocation2 + $0x7c8] sm:$0xff]  ;;  %v5304_v44 = vld [vmem:[#allocation2 + $0x6d8] sm:$0xff] }
 0xaaa   : > { %3266 = vmatpush.msrb.mxu0 %v5260_v21  ;;  %3387 = vmatpush.msra.mxu2 %v5261_v26  ;;  %v5305_v22 = vld [vmem:[#allocation2 + $0x7b8] sm:$0xff]  ;;  %v5306_v21 = vld [vmem:[#allocation2 + $0x6c8] sm:$0xff] }
 0xaab   : > { %3283 = vmatpush.msrb.mxu1 %v5262_v5  ;;  %3327 = vmatpush.msrb.mxu3 %v5263_v50  ;;  %v5307_v26 = vld [vmem:[#allocation2 + $0x7a8] sm:$0xff]  ;;  %v5308_v5 = vld [vmem:[#allocation2 + $0x6b8] sm:$0xff] }
 0xaac   : > { %4796 = vmatmul.msk.f32.vlgmr.msra.gmra.mxu1 %vm1437_vm10, %v6838_v28  ;;  %3328 = vmatmul.f32.vlgmr.msrb.gmra.mxu3 %v6822_v41  ;;  %v5272_v28 = vld [vmem:[#allocation2 + $0x7d0] sm:$0xff]  ;;  %v5309_v50 = vld [vmem:[#allocation2 + $0x798] sm:$0xff] }
 0xaad   : > { %3388 = vmatpush.msra.mxu2 %v5264_v51  ;;  %3405 = vmatpush.msra.mxu3 %v5265_v38  ;;  %v5310_v51 = vld [vmem:[#allocation2 + $0x6a8] sm:$0xff] }
 0xaae   : > { %3267 = vmatpush.msrb.mxu0 %v5266_v55  ;;  %3284 = vmatpush.msrb.mxu1 %v5267_v57  ;;  %v5311_v38 = vld [vmem:[#allocation2 + $0x788] sm:$0xff]  ;;  %v5312_v55 = vld [vmem:[#allocation2 + $0x698] sm:$0xff] }
 0xaaf   : > { %3268 = vmatmul.f32.vlgmr.msrb.gmra.mxu0 %v6820_v39  ;;  %3389 = vmatpush.msra.mxu2 %v5268_v37  ;;  %v5313_v57 = vld [vmem:[#allocation2 + $0x778] sm:$0xff]  ;;  %v5314_v37 = vld [vmem:[#allocation2 + $0x688] sm:$0xff] }
 0xab0   : > { %3406 = vmatpush.msra.mxu3 %v5269_v59  ;;  %3285 = vmatpush.msrb.mxu1 %v5270_v46  ;;  %v5315_v59 = vld [vmem:[#allocation2 + $0x768] sm:$0xff]  ;;  %v5316_v46 = vld [vmem:[#allocation2 + $0x678] sm:$0xff] }
 0xab1   : > { %3390 = vmatpush.msra.mxu2 %v5271_v47  ;;  %v5317_v47 = vld [vmem:[#allocation2 + $0x758] sm:$0xff] }
 0xab2   : > { %3407 = vmatpush.msra.mxu3 %v5272_v28  ;;  %3286 = vmatpush.msrb.mxu1 %v5273_v60  ;;  %v5318_v28 = vld [vmem:[#allocation2 + $0x668] sm:$0xff] }
 0xab3   : > { %3391 = vmatpush.msra.mxu2 %v5274_v61  ;;  %v5319_v60 = vld [vmem:[#allocation2 + $0x748] sm:$0xff]  ;;  %v5320_v61 = vld [vmem:[#allocation2 + $0x658] sm:$0xff] }
 0xab4   : > { %3408 = vmatpush.msra.mxu3 %v5275_v62  ;;  %3287 = vmatpush.msrb.mxu1 %v5276_v0  ;;  %v5321_v62 = vld [vmem:[#allocation2 + $0x738] sm:$0xff]  ;;  %v5322_v0 = vld [vmem:[#allocation2 + $0x648] sm:$0xff] }
 0xab5   : > { %3288 = vmatmul.f32.vlgmr.msrb.gmra.mxu1 %v6822_v41  ;;  %3392 = vmatpush.msra.mxu2 %v5277_v2  ;;  %v5323_v2 = vld [vmem:[#allocation2 + $0x728] sm:$0xff] }
 0xab6   : > { %3409 = vmatpush.msra.mxu3 %v5278_v17  ;;  %v5324_v17 = vld [vmem:[#allocation2 + $0x638] sm:$0xff] }
 0xab7   : > { %3393 = vmatpush.msra.mxu2 %v5279_v40 }
 0xab8   : > { %3410 = vmatpush.msra.mxu3 %v5280_v63 }
 0xab9   : > { %3394 = vmatpush.msra.mxu2 %v5281_v3  ;;  %v5325_v3 = vld [vmem:[#allocation2 + $0x718] sm:$0xff] }
 0xaba   : > { %3411 = vmatpush.msra.mxu3 %v5282_v6 }
 0xabb   : > { %3395 = vmatpush.msra.mxu2 %v5283_v7  ;;  %v5326_v7 = vld [vmem:[#allocation2 + $0x628] sm:$0xff] }
 0xabc   : > { %3412 = vmatpush.msra.mxu3 %v5284_v35  ;;  %v6862_v35 = vld [vmem:[#allocation21 + $0x6] sm:$0x3] }
 0xabd   : > { %3396 = vmatpush.msra.mxu2 %v5285_v8  ;;  %v5327_v8 = vld [vmem:[#allocation2 + $0x708] sm:$0xff] }
 0xabe   : > { %3413 = vmatpush.msra.mxu3 %v5286_v1  ;;  %v5328_v1 = vld [vmem:[#allocation2 + $0x618] sm:$0xff] }
 0xabf   : > { %3397 = vmatpush.msra.mxu2 %v5287_v9  ;;  %v5329_v9 = vld [vmem:[#allocation2 + $0x9f0] sm:$0xff] }
 0xac0   : > { %3414 = vmatpush.msra.mxu3 %v5288_v10  ;;  %v5330_v10 = vld [vmem:[#allocation2 + $0x8f8] sm:$0xff] }
 0xac1   : > { %3398 = vmatpush.msra.mxu2 %v5289_v56  ;;  %v5331_v56 = vld [vmem:[#allocation2 + $0x608] sm:$0xff] }
 0xac2   : > { %3415 = vmatpush.msra.mxu3 %v5290_v48  ;;  %v5332_v48 = vld [vmem:[#allocation2 + $0x9e0] sm:$0xff] }
 0xac3   : > { %3399 = vmatpush.msra.mxu2 %v5291_v11  ;;  %v5333_v11 = vld [vmem:[#allocation2 + $0x8f0] sm:$0xff] }
 0xac4   : > { %3416 = vmatpush.msra.mxu3 %v5292_v12  ;;  %v5334_v12 = vld [vmem:[#allocation2 + $0x8e8] sm:$0xff] }
 0xac5   : > { %3400 = vmatpush.msra.mxu2 %v5293_v14  ;;  %v5335_v14 = vld [vmem:[#allocation2 + $0x9d0] sm:$0xff] }
 0xac6   : > { %3417 = vmatpush.msra.mxu3 %v5294_v15  ;;  %3401 = vmatmul.f32.vlgmr.msra.gmra.mxu2 %v6820_v39  ;;  %v5336_v15 = vld [vmem:[#allocation2 + $0x8e0] sm:$0xff] }
 0xac8   : > { %3418 = vmatpush.msra.mxu3 %v5295_v18  ;;  %v5337_v18 = vld [vmem:[#allocation2 + $0x8d8] sm:$0xff] }
 0xaca   : > { %3419 = vmatpush.msra.mxu3 %v5296_v19  ;;  %v5338_v19 = vld [vmem:[#allocation2 + $0x9c0] sm:$0xff] }
 0xacc   : > { %3420 = vmatpush.msra.mxu3 %v5297_v23  ;;  %v5339_v23 = vld [vmem:[#allocation2 + $0x8d0] sm:$0xff] }
 0xacd   : > { %3421 = vmatmul.f32.vlgmr.msra.gmra.mxu3 %v6822_v41 }
 0xb07   : > { %v3229_v24 = vpop.f32.mrf.mxu2 }
 0xb09   : > { %v3180_v52 = vpop.f32.mrf.mxu0 }
 0xb0a   : > { %v6854_v25 = vadd.f32 %v3229_v24, %v3180_v52  ;;  %v5340_v24 = vld [vmem:[#allocation2 + $0x8c8] sm:$0xff]  ;;  %v5341_v52 = vld [vmem:[#allocation2 + $0x9b0] sm:$0xff] }
 0xb26   : > { %v3249_v30 = vpop.f32.mrf.mxu3 }
 0xb28   : > { %v3309_v34 = vpop.f32.mrf.mxu2 }
 0xb29   : > { %v3200_v31 = vpop.f32.mrf.mxu1 }
 0xb2a   : > { %v6856_v32 = vadd.f32 %v3249_v30, %v3200_v31  ;;  %v5342_v30 = vld [vmem:[#allocation2 + $0x8c0] sm:$0xff]  ;;  %v5343_v31 = vld [vmem:[#allocation2 + $0x8b8] sm:$0xff] }
 0xb2c   : > { %v3269_v33 = vpop.f32.mrf.mxu0 }
 0xb2f   : > { %v3329_v36 = vpop.f32.mrf.mxu3 }
 0xb30   : > { %v3330_v42 = vadd.f32 %v3329_v36, %v3309_v34  ;;  %v5344_v34 = vld [vmem:[#allocation2 + $0x9a0] sm:$0xff]  ;;  %v5345_v36 = vld [vmem:[#allocation2 + $0x8b0] sm:$0xff] }
 0xb32   : > { %v3289_v45 = vpop.f32.mrf.mxu1  ;;  %4803 = vmatpush.msk.msra.mxu1 %vm1077_vm5, %v3330_v42  ;;  %v5346_v42 = vld [vmem:[#allocation2 + $0x8a8] sm:$0xff] }
 0xb33   : > { %v3290_v58 = vadd.f32 %v3289_v45, %v3269_v33  ;;  %4804 = vmatmul.msk.f32.vlgmr.msra.gmra.mxu1 %vm1437_vm10, %v3333_v43  ;;  %v5348_v33 = vld [vmem:[#allocation2 + $0x8a0] sm:$0xff]  ;;  %v5349_v45 = vld [vmem:[#allocation2 + $0x898] sm:$0xff] }
 0xb34   : > { %3445 = vmatpush.msrb.mxu1 %v5298_v20  ;;  %v5351_v20 = vld [vmem:[#allocation2 + $0x890] sm:$0xff] }
 0xb35   : > { %4801 = vmatpush.msk.msra.mxu0 %vm1077_vm5, %v3290_v58  ;;  %v5350_v58 = vld [vmem:[#allocation2 + $0x980] sm:$0xff] }
 0xb36   : > { %4802 = vmatmul.msk.f32.vlgmr.msra.gmra.mxu0 %vm1437_vm10, %v3333_v43  ;;  %3446 = vmatpush.msrb.mxu1 %v5299_v16  ;;  %v5347_v43 = vld [vmem:[#allocation2 + $0x990] sm:$0xff]  ;;  %v5352_v16 = vld [vmem:[#allocation2 + $0x888] sm:$0xff] }
 0xb37   : > { %3425 = vmatpush.msrb.mxu0 %v5300_v27  ;;  %v5353_v27 = vld [vmem:[#allocation2 + $0x970] sm:$0xff] }
 0xb38   : > { %3447 = vmatpush.msrb.mxu1 %v5301_v29  ;;  %v5354_v29 = vld [vmem:[#allocation2 + $0x880] sm:$0xff] }
 0xb39   : > { %3426 = vmatpush.msrb.mxu0 %v5302_v49  ;;  %v5355_v49 = vld [vmem:[#allocation2 + $0x878] sm:$0xff] }
 0xb3a   : > { %3448 = vmatpush.msrb.mxu1 %v5303_v4  ;;  %v5356_v4 = vld [vmem:[#allocation2 + $0x960] sm:$0xff] }
 0xb3b   : > { %3427 = vmatpush.msrb.mxu0 %v5304_v44  ;;  %v5357_v44 = vld [vmem:[#allocation2 + $0x870] sm:$0xff] }
 0xb3c   : > { %3449 = vmatpush.msrb.mxu1 %v5305_v22  ;;  %v5358_v22 = vld [vmem:[#allocation2 + $0x868] sm:$0xff] }
 0xb3d   : > { %3428 = vmatpush.msrb.mxu0 %v5306_v21  ;;  %v5359_v21 = vld [vmem:[#allocation2 + $0x950] sm:$0xff] }
 0xb3e   : > { %3450 = vmatpush.msrb.mxu1 %v5307_v26  ;;  %v5360_v26 = vld [vmem:[#allocation2 + $0x860] sm:$0xff] }
 0xb3f   : > { %3429 = vmatpush.msrb.mxu0 %v5308_v5  ;;  %v5361_v5 = vld [vmem:[#allocation2 + $0x858] sm:$0xff] }
 0xb40   : > { %3451 = vmatpush.msrb.mxu1 %v5309_v50  ;;  %v5362_v50 = vld [vmem:[#allocation2 + $0x940] sm:$0xff] }
 0xb41   : > { %3430 = vmatpush.msrb.mxu0 %v5310_v51  ;;  %v5363_v51 = vld [vmem:[#allocation2 + $0x850] sm:$0xff] }
 0xb42   : > { %3452 = vmatpush.msrb.mxu1 %v5311_v38  ;;  %v5364_v38 = vld [vmem:[#allocation2 + $0x848] sm:$0xff] }
 0xb43   : > { %3431 = vmatpush.msrb.mxu0 %v5312_v55  ;;  %v5365_v55 = vld [vmem:[#allocation2 + $0x930] sm:$0xff] }
 0xb44   : > { %3453 = vmatpush.msrb.mxu1 %v5313_v57  ;;  %v5366_v57 = vld [vmem:[#allocation2 + $0x840] sm:$0xff] }
 0xb45   : > { %3432 = vmatpush.msrb.mxu0 %v5314_v37  ;;  %v5367_v37 = vld [vmem:[#allocation2 + $0x838] sm:$0xff] }
 0xb46   : > { %3454 = vmatpush.msrb.mxu1 %v5315_v59  ;;  %v5368_v59 = vld [vmem:[#allocation2 + $0x920] sm:$0xff] }
 0xb47   : > { %3433 = vmatpush.msrb.mxu0 %v5316_v46  ;;  %v5369_v46 = vld [vmem:[#allocation2 + $0x830] sm:$0xff] }
 0xb48   : > { %3455 = vmatpush.msrb.mxu1 %v5317_v47  ;;  %v5370_v47 = vld [vmem:[#allocation2 + $0x828] sm:$0xff] }
 0xb49   : > { %3434 = vmatpush.msrb.mxu0 %v5318_v28  ;;  %v3402_v40 = vpop.f32.mrf.mxu2  ;;  %v5371_v28 = vld [vmem:[#allocation2 + $0x910] sm:$0xff] }
 0xb4a   : > { %3456 = vmatpush.msrb.mxu1 %v5319_v60  ;;  %v5372_v60 = vld [vmem:[#allocation2 + $0x820] sm:$0xff] }
 0xb4b   : > { %3435 = vmatpush.msrb.mxu0 %v5320_v61  ;;  %v5373_v61 = vld [vmem:[#allocation2 + $0x818] sm:$0xff] }
 0xb4c   : > { %3457 = vmatpush.msrb.mxu1 %v5321_v62  ;;  %v5374_v62 = vld [vmem:[#allocation2 + $0x900] sm:$0xff] }
 0xb4d   : > { %3436 = vmatpush.msrb.mxu0 %v5322_v0  ;;  %v5375_v0 = vld [vmem:[#allocation2 + $0x810] sm:$0xff] }
 0xb4e   : > { %3458 = vmatpush.msrb.mxu1 %v5323_v2  ;;  %v5376_v2 = vld [vmem:[#allocation2 + $0x808] sm:$0xff] }
 0xb4f   : > { %3437 = vmatpush.msrb.mxu0 %v5324_v17  ;;  %v5377_v17 = vld [vmem:[#allocation2 + $0xaf0] sm:$0xff] }
 0xb50   : > { %v3422_v63 = vpop.f32.mrf.mxu3  ;;  %3459 = vmatpush.msrb.mxu1 %v5325_v3  ;;  %v5380_v3 = vld [vmem:[#allocation2 + $0xad0] sm:$0xff] }
 0xb51   : > { %v3423_v6 = vadd.f32 %v3422_v63, %v3402_v40  ;;  %3438 = vmatpush.msrb.mxu0 %v5326_v7  ;;  %v5378_v40 = vld [vmem:[#allocation2 + $0x800] sm:$0xff]  ;;  %v5382_v7 = vld [vmem:[#allocation2 + $0xab0] sm:$0xff] }
 0xb52   : > { %3460 = vmatpush.msrb.mxu1 %v5327_v8  ;;  %v5379_v63 = vld [vmem:[#allocation2 + $0xae0] sm:$0xff] }
 0xb53   : > { %3439 = vmatpush.msrb.mxu0 %v5328_v1  ;;  %4805 = vmatpush.msk.msrb.mxu2 %vm1077_vm5, %v3423_v6  ;;  %v5381_v6 = vld [vmem:[#allocation2 + $0xac0] sm:$0xff]  ;;  %v5384_v1 = vld [vmem:[#allocation2 + $0xa90] sm:$0xff] }
 0xb54   : > { %3461 = vmatmul.f32.vlgmr.msrb.gmra.mxu1 %v6822_v41  ;;  %4806 = vmatmul.msk.f32.vlgmr.msrb.gmra.mxu2 %vm1437_vm10, %v6862_v35  ;;  %v5383_v8 = vld [vmem:[#allocation2 + $0xaa0] sm:$0xff] }
 0xb55   : > { %3538 = vmatpush.msra.mxu1 %v5329_v9  ;;  %3558 = vmatpush.msra.mxu2 %v5330_v10  ;;  %v5385_v9 = vld [vmem:[#allocation2 + $0xa80] sm:$0xff]  ;;  %v5386_v10 = vld [vmem:[#allocation2 + $0xa70] sm:$0xff] }
 0xb56   : > { %3440 = vmatpush.msrb.mxu0 %v5331_v56  ;;  %v5387_v56 = vld [vmem:[#allocation2 + $0xa60] sm:$0xff] }
 0xb57   : > { %3441 = vmatmul.f32.vlgmr.msrb.gmra.mxu0 %v6820_v39  ;;  %3539 = vmatpush.msra.mxu1 %v5332_v48  ;;  %v5388_v48 = vld [vmem:[#allocation2 + $0xa50] sm:$0xff] }
 0xb58   : > { %3518 = vmatpush.msra.mxu0 %v5333_v11  ;;  %3559 = vmatpush.msra.mxu2 %v5334_v12  ;;  %v5389_v11 = vld [vmem:[#allocation2 + $0xa40] sm:$0xff]  ;;  %v5390_v12 = vld [vmem:[#allocation2 + $0xa30] sm:$0xff] }
 0xb59   : > { %3540 = vmatpush.msra.mxu1 %v5335_v14  ;;  %v5391_v14 = vld [vmem:[#allocation2 + $0xa20] sm:$0xff] }
 0xb5a   : > { %3519 = vmatpush.msra.mxu0 %v5336_v15  ;;  %3560 = vmatpush.msra.mxu2 %v5337_v18  ;;  %v5392_v15 = vld [vmem:[#allocation2 + $0xa10] sm:$0xff]  ;;  %v5393_v18 = vld [vmem:[#allocation2 + $0xa00] sm:$0xff] }
 0xb5b   : > { %3541 = vmatpush.msra.mxu1 %v5338_v19 }
 0xb5c   : > { %3520 = vmatpush.msra.mxu0 %v5339_v23  ;;  %3561 = vmatpush.msra.mxu2 %v5340_v24 }
 0xb5d   : > { %3542 = vmatpush.msra.mxu1 %v5341_v52 }
 0xb5e   : > { %3521 = vmatpush.msra.mxu0 %v5342_v30  ;;  %3562 = vmatpush.msra.mxu2 %v5343_v31 }
 0xb5f   : > { %3543 = vmatpush.msra.mxu1 %v5344_v34 }
 0xb60   : > { %3522 = vmatpush.msra.mxu0 %v5345_v36  ;;  %3563 = vmatpush.msra.mxu2 %v5346_v42 }
 0xb61   : > { %3544 = vmatpush.msra.mxu1 %v5347_v43  ;;  %v5394_v43 = vld [vmem:[#allocation2 + $0x9f8] sm:$0xff] }
 0xb62   : > { %3523 = vmatpush.msra.mxu0 %v5348_v33  ;;  %3564 = vmatpush.msra.mxu2 %v5349_v45  ;;  %v5395_v33 = vld [vmem:[#allocation2 + $0x9e8] sm:$0xff] }
 0xb63   : > { %3545 = vmatpush.msra.mxu1 %v5350_v58  ;;  %v5397_v45 = vld [vmem:[#allocation2 + $0x9c8] sm:$0xff] }
 0xb64   : > { %3524 = vmatpush.msra.mxu0 %v5351_v20  ;;  %3565 = vmatpush.msra.mxu2 %v5352_v16  ;;  %v5399_v58 = vld [vmem:[#allocation2 + $0x9a8] sm:$0xff]  ;;  %v5400_v20 = vld [vmem:[#allocation2 + $0x998] sm:$0xff] }
 0xb65   : > { %3546 = vmatpush.msra.mxu1 %v5353_v27  ;;  %v5401_v16 = vld [vmem:[#allocation2 + $0x988] sm:$0xff]  ;;  %v5402_v27 = vld [vmem:[#allocation2 + $0x978] sm:$0xff] }
 0xb66   : > { %3525 = vmatpush.msra.mxu0 %v5354_v29  ;;  %3566 = vmatpush.msra.mxu2 %v5355_v49  ;;  %v5403_v29 = vld [vmem:[#allocation2 + $0x968] sm:$0xff] }
 0xb67   : > { %3547 = vmatpush.msra.mxu1 %v5356_v4  ;;  %v5405_v49 = vld [vmem:[#allocation2 + $0x948] sm:$0xff]  ;;  %v5406_v4 = vld [vmem:[#allocation2 + $0x938] sm:$0xff] }
 0xb68   : > { %3526 = vmatpush.msra.mxu0 %v5357_v44  ;;  %3567 = vmatpush.msra.mxu2 %v5358_v22  ;;  %v5407_v44 = vld [vmem:[#allocation2 + $0x928] sm:$0xff] }
 0xb69   : > { %3548 = vmatpush.msra.mxu1 %v5359_v21 }
 0xb6a   : > { %3527 = vmatpush.msra.mxu0 %v5360_v26  ;;  %3568 = vmatpush.msra.mxu2 %v5361_v5  ;;  %v5408_v5 = vld [vmem:[#allocation2 + $0x918] sm:$0xff] }
 0xb6b   : > { %3549 = vmatpush.msra.mxu1 %v5362_v50  ;;  %v6882_v50 = vld [vmem:[#allocation21 + $0x8] sm:$0x3] }
 0xb6c   : > { %3528 = vmatpush.msra.mxu0 %v5363_v51  ;;  %3569 = vmatpush.msra.mxu2 %v5364_v38  ;;  %v5409_v51 = vld [vmem:[#allocation2 + $0x908] sm:$0xff]  ;;  %v5410_v38 = vld [vmem:[#allocation2 + $0xbf0] sm:$0xff] }
 0xb6d   : > { %3550 = vmatpush.msra.mxu1 %v5365_v55  ;;  %v5411_v55 = vld [vmem:[#allocation2 + $0xaf8] sm:$0xff] }
 0xb6e   : > { %3529 = vmatpush.msra.mxu0 %v5366_v57  ;;  %3570 = vmatpush.msra.mxu2 %v5367_v37  ;;  %v5412_v57 = vld [vmem:[#allocation2 + $0xbe0] sm:$0xff]  ;;  %v5413_v37 = vld [vmem:[#allocation2 + $0xae8] sm:$0xff] }
 0xb6f   : > { %3551 = vmatpush.msra.mxu1 %v5368_v59  ;;  %v5414_v59 = vld [vmem:[#allocation2 + $0xbd0] sm:$0xff] }
 0xb70   : > { %3530 = vmatpush.msra.mxu0 %v5369_v46  ;;  %3571 = vmatpush.msra.mxu2 %v5370_v47  ;;  %v5415_v46 = vld [vmem:[#allocation2 + $0xad8] sm:$0xff]  ;;  %v5416_v47 = vld [vmem:[#allocation2 + $0xbc0] sm:$0xff] }
 0xb71   : > { %3552 = vmatpush.msra.mxu1 %v5371_v28  ;;  %v5417_v28 = vld [vmem:[#allocation2 + $0xac8] sm:$0xff] }
 0xb72   : > { %3531 = vmatpush.msra.mxu0 %v5372_v60  ;;  %3572 = vmatpush.msra.mxu2 %v5373_v61  ;;  %v5418_v60 = vld [vmem:[#allocation2 + $0xbb0] sm:$0xff]  ;;  %v5419_v61 = vld [vmem:[#allocation2 + $0xab8] sm:$0xff] }
 0xb73   : > { %3553 = vmatpush.msra.mxu1 %v5374_v62  ;;  %v5420_v62 = vld [vmem:[#allocation2 + $0xba0] sm:$0xff] }
 0xb74   : > { %3532 = vmatpush.msra.mxu0 %v5375_v0  ;;  %3573 = vmatpush.msra.mxu2 %v5376_v2  ;;  %v5421_v0 = vld [vmem:[#allocation2 + $0xaa8] sm:$0xff]  ;;  %v5422_v2 = vld [vmem:[#allocation2 + $0xb90] sm:$0xff] }
 0xb75   : > { %3554 = vmatmul.f32.vlgmr.msra.gmra.mxu1 %v6822_v41  ;;  %3574 = vmatmul.f32.vlgmr.msra.gmra.mxu2 %v6820_v39 }
 0xb76   : > { %3651 = vmatpush.msrb.mxu2 %v5377_v17  ;;  %3533 = vmatpush.msra.mxu0 %v5378_v40  ;;  %v5423_v17 = vld [vmem:[#allocation2 + $0xa98] sm:$0xff]  ;;  %v5424_v40 = vld [vmem:[#allocation2 + $0xb80] sm:$0xff] }
 0xb77   : > { %3534 = vmatmul.f32.vlgmr.msra.gmra.mxu0 %v6820_v39 }
 0xb78   : > { %3652 = vmatpush.msrb.mxu2 %v5379_v63  ;;  %v5425_v63 = vld [vmem:[#allocation2 + $0xa88] sm:$0xff] }
 0xb7a   : > { %3653 = vmatpush.msrb.mxu2 %v5380_v3  ;;  %v5426_v3 = vld [vmem:[#allocation2 + $0xb70] sm:$0xff] }
 0xb7c   : > { %3654 = vmatpush.msrb.mxu2 %v5381_v6  ;;  %v5427_v6 = vld [vmem:[#allocation2 + $0xa78] sm:$0xff] }
 0xb7e   : > { %3655 = vmatpush.msrb.mxu2 %v5382_v7  ;;  %v5428_v7 = vld [vmem:[#allocation2 + $0xb60] sm:$0xff] }
 0xb80   : > { %3656 = vmatpush.msrb.mxu2 %v5383_v8  ;;  %v5429_v8 = vld [vmem:[#allocation2 + $0xa68] sm:$0xff] }
 0xb82   : > { %3657 = vmatpush.msrb.mxu2 %v5384_v1  ;;  %v5430_v1 = vld [vmem:[#allocation2 + $0xb50] sm:$0xff] }
 0xb84   : > { %3658 = vmatpush.msrb.mxu2 %v5385_v9  ;;  %v5431_v9 = vld [vmem:[#allocation2 + $0xa58] sm:$0xff] }
 0xb86   : > { %3659 = vmatpush.msrb.mxu2 %v5386_v10  ;;  %v5432_v10 = vld [vmem:[#allocation2 + $0xb40] sm:$0xff] }
 0xb88   : > { %3660 = vmatpush.msrb.mxu2 %v5387_v56  ;;  %v5433_v56 = vld [vmem:[#allocation2 + $0xa48] sm:$0xff] }
 0xb8a   : > { %3661 = vmatpush.msrb.mxu2 %v5388_v48  ;;  %v5434_v48 = vld [vmem:[#allocation2 + $0xb30] sm:$0xff] }
 0xb8c   : > { %3662 = vmatpush.msrb.mxu2 %v5389_v11  ;;  %v5435_v11 = vld [vmem:[#allocation2 + $0xa38] sm:$0xff] }
 0xb8e   : > { %3663 = vmatpush.msrb.mxu2 %v5390_v12  ;;  %v5436_v12 = vld [vmem:[#allocation2 + $0xb20] sm:$0xff] }
 0xb90   : > { %3664 = vmatpush.msrb.mxu2 %v5391_v14  ;;  %v5437_v14 = vld [vmem:[#allocation2 + $0xa28] sm:$0xff] }
 0xb92   : > { %3665 = vmatpush.msrb.mxu2 %v5392_v15  ;;  %v5438_v15 = vld [vmem:[#allocation2 + $0xb10] sm:$0xff] }
 0xb94   : > { %3666 = vmatpush.msrb.mxu2 %v5393_v18  ;;  %v5439_v18 = vld [vmem:[#allocation2 + $0xa18] sm:$0xff] }
 0xb95   : > { %3667 = vmatmul.f32.vlgmr.msrb.gmra.mxu2 %v6820_v39 }
 0xbb0   : > { %v3380_v19 = vpop.f32.mrf.mxu1 }
 0xbb1   : > { %v6874_v23 = vadd.f32 %v3380_v19, %v6856_v32  ;;  %v5396_v32 = vld [vmem:[#allocation2 + $0x9d8] sm:$0xff]  ;;  %v5440_v19 = vld [vmem:[#allocation2 + $0xb00] sm:$0xff] }
 0xbb3   : > { %v3360_v24 = vpop.f32.mrf.mxu0 }
 0xbb4   : > { %v3383_v52 = vadd.f32 %v3360_v24, %v6854_v25  ;;  %v5398_v25 = vld [vmem:[#allocation2 + $0x9b8] sm:$0xff]  ;;  %v5441_v24 = vld [vmem:[#allocation2 + $0xa08] sm:$0xff] }
 0xbd1   : > { %v3462_v30 = vpop.f32.mrf.mxu1 }
 0xbd4   : > { %v3442_v31 = vpop.f32.mrf.mxu0 }
 0xbd5   : > { %v3463_v34 = vadd.f32 %v3462_v30, %v3442_v31  ;;  %v5443_v30 = vld [vmem:[#allocation2 + $0xce0] sm:$0xff]  ;;  %v5444_v31 = vld [vmem:[#allocation2 + $0xcd0] sm:$0xff] }
 0xbd7   : > { %4807 = vmatpush.msk.msrb.mxu3 %vm1077_vm5, %v3463_v34  ;;  %v3493_v36 = vpop.f32.mrf.mxu2  ;;  %v5445_v34 = vld [vmem:[#allocation2 + $0xcc0] sm:$0xff] }
 0xbd8   : > { %v6878_v42 = vadd.f32 %v3493_v36, %v3383_v52  ;;  %4808 = vmatmul.msk.f32.vlgmr.msrb.gmra.mxu3 %vm1437_vm10, %v6862_v35  ;;  %v5404_v35 = vld [vmem:[#allocation2 + $0x958] sm:$0xff]  ;;  %v5442_v52 = vld [vmem:[#allocation2 + $0xcf0] sm:$0xff] }
 0xbd9   : > { %3578 = vmatpush.msra.mxu3 %v5394_v43  ;;  %v5446_v36 = vld [vmem:[#allocation2 + $0xcb0] sm:$0xff]  ;;  %v5447_v43 = vld [vmem:[#allocation2 + $0xca0] sm:$0xff] }
 0xbdb   : > { %3579 = vmatpush.msra.mxu3 %v5395_v33  ;;  %v5448_v33 = vld [vmem:[#allocation2 + $0xc90] sm:$0xff] }
 0xbdd   : > { %3580 = vmatpush.msra.mxu3 %v5396_v32  ;;  %v5449_v32 = vld [vmem:[#allocation2 + $0xc80] sm:$0xff] }
 0xbdf   : > { %3581 = vmatpush.msra.mxu3 %v5397_v45  ;;  %v5450_v45 = vld [vmem:[#allocation2 + $0xc70] sm:$0xff] }
 0xbe1   : > { %3582 = vmatpush.msra.mxu3 %v5398_v25  ;;  %v5451_v25 = vld [vmem:[#allocation2 + $0xc60] sm:$0xff] }
 0xbe3   : > { %3583 = vmatpush.msra.mxu3 %v5399_v58  ;;  %v5452_v58 = vld [vmem:[#allocation2 + $0xc50] sm:$0xff] }
 0xbe5   : > { %3584 = vmatpush.msra.mxu3 %v5400_v20  ;;  %v5453_v20 = vld [vmem:[#allocation2 + $0xc40] sm:$0xff] }
 0xbe7   : > { %3585 = vmatpush.msra.mxu3 %v5401_v16  ;;  %v5454_v16 = vld [vmem:[#allocation2 + $0xc30] sm:$0xff] }
 0xbe9   : > { %3586 = vmatpush.msra.mxu3 %v5402_v27  ;;  %v5455_v27 = vld [vmem:[#allocation2 + $0xc20] sm:$0xff] }
 0xbeb   : > { %3587 = vmatpush.msra.mxu3 %v5403_v29  ;;  %v5456_v29 = vld [vmem:[#allocation2 + $0xc10] sm:$0xff] }
 0xbed   : > { %3588 = vmatpush.msra.mxu3 %v5404_v35  ;;  %v5457_v35 = vld [vmem:[#allocation2 + $0xc00] sm:$0xff] }
 0xbef   : > { %3589 = vmatpush.msra.mxu3 %v5405_v49 }
 0xbf1   : > { %3590 = vmatpush.msra.mxu3 %v5406_v4 }
 0xbf2   : > { %v3555_v22 = vpop.f32.mrf.mxu1 }
 0xbf3   : > { %3591 = vmatpush.msra.mxu3 %v5407_v44 }
 0xbf4   : > { %v3535_v21 = vpop.f32.mrf.mxu0 }
 0xbf5   : > { %v3556_v26 = vadd.f32 %v3555_v22, %v3535_v21  ;;  %3592 = vmatpush.msra.mxu3 %v5408_v5 }
 0xbf7   : > { %3593 = vmatpush.msra.mxu3 %v5409_v51  ;;  %4809 = vmatpush.msk.msrb.mxu0 %vm1077_vm5, %v3556_v26  ;;  %v5458_v51 = vld [vmem:[#allocation2 + $0xbf8] sm:$0xff] }
 0xbf8   : > { %3594 = vmatmul.f32.vlgmr.msra.gmra.mxu3 %v6822_v41  ;;  %4810 = vmatmul.msk.f32.vlgmr.msrb.gmra.mxu0 %vm1437_vm10, %v6882_v50  ;;  %v3575_v21 = vpop.f32.mrf.mxu2 }
 0xbf9   : > { %3671 = vmatpush.msrb.mxu3 %v5410_v38  ;;  %3691 = vmatpush.msra.mxu0 %v5411_v55  ;;  %v5459_v38 = vld [vmem:[#allocation2 + $0xbe8] sm:$0xff]  ;;  %v5460_v55 = vld [vmem:[#allocation2 + $0xbd8] sm:$0xff] }
 0xbfb   : > { %3672 = vmatpush.msrb.mxu3 %v5412_v57  ;;  %3692 = vmatpush.msra.mxu0 %v5413_v37  ;;  %v5462_v57 = vld [vmem:[#allocation2 + $0xbb8] sm:$0xff] }
 0xbfc   : > { %v5464_v37 = vld [vmem:[#allocation2 + $0xb98] sm:$0xff] }
 0xbfd   : > { %3673 = vmatpush.msrb.mxu3 %v5414_v59  ;;  %3693 = vmatpush.msra.mxu0 %v5415_v46  ;;  %v5465_v59 = vld [vmem:[#allocation2 + $0xb88] sm:$0xff]  ;;  %v5466_v46 = vld [vmem:[#allocation2 + $0xb78] sm:$0xff] }
 0xbff   : > { %3674 = vmatpush.msrb.mxu3 %v5416_v47  ;;  %3694 = vmatpush.msra.mxu0 %v5417_v28  ;;  %v5467_v47 = vld [vmem:[#allocation2 + $0xb68] sm:$0xff] }
 0xc00   : > { %v5469_v28 = vld [vmem:[#allocation2 + $0xb48] sm:$0xff] }
 0xc01   : > { %3675 = vmatpush.msrb.mxu3 %v5418_v60  ;;  %3695 = vmatpush.msra.mxu0 %v5419_v61  ;;  %v5470_v60 = vld [vmem:[#allocation2 + $0xb38] sm:$0xff]  ;;  %v5471_v61 = vld [vmem:[#allocation2 + $0xb28] sm:$0xff] }
 0xc03   : > { %3676 = vmatpush.msrb.mxu3 %v5420_v62  ;;  %3696 = vmatpush.msra.mxu0 %v5421_v0 }
 0xc05   : > { %3677 = vmatpush.msrb.mxu3 %v5422_v2  ;;  %3697 = vmatpush.msra.mxu0 %v5423_v17  ;;  %v5472_v17 = vld [vmem:[#allocation2 + $0xb18] sm:$0xff] }
 0xc07   : > { %3678 = vmatpush.msrb.mxu3 %v5424_v40  ;;  %3698 = vmatpush.msra.mxu0 %v5425_v63  ;;  %v6900_v40 = vld [vmem:[#allocation21 + $0xa] sm:$0x3]  ;;  %v5473_v63 = vld [vmem:[#allocation2 + $0xb08] sm:$0xff] }
 0xc09   : > { %3679 = vmatpush.msrb.mxu3 %v5426_v3  ;;  %3699 = vmatpush.msra.mxu0 %v5427_v6  ;;  %v5474_v3 = vld [vmem:[#allocation2 + $0xdf0] sm:$0xff]  ;;  %v5475_v6 = vld [vmem:[#allocation2 + $0xcf8] sm:$0xff] }
 0xc0b   : > { %3680 = vmatpush.msrb.mxu3 %v5428_v7  ;;  %3700 = vmatpush.msra.mxu0 %v5429_v8  ;;  %v5476_v7 = vld [vmem:[#allocation2 + $0xde0] sm:$0xff]  ;;  %v5477_v8 = vld [vmem:[#allocation2 + $0xce8] sm:$0xff] }
 0xc0d   : > { %3681 = vmatpush.msrb.mxu3 %v5430_v1  ;;  %3701 = vmatpush.msra.mxu0 %v5431_v9  ;;  %v5478_v1 = vld [vmem:[#allocation2 + $0xdd0] sm:$0xff]  ;;  %v5479_v9 = vld [vmem:[#allocation2 + $0xcd8] sm:$0xff] }
 0xc0f   : > { %3682 = vmatpush.msrb.mxu3 %v5432_v10  ;;  %3702 = vmatpush.msra.mxu0 %v5433_v56  ;;  %v5480_v10 = vld [vmem:[#allocation2 + $0xdc0] sm:$0xff]  ;;  %v5481_v56 = vld [vmem:[#allocation2 + $0xcc8] sm:$0xff] }
 0xc11   : > { %3683 = vmatpush.msrb.mxu3 %v5434_v48  ;;  %3703 = vmatpush.msra.mxu0 %v5435_v11  ;;  %v5482_v48 = vld [vmem:[#allocation2 + $0xdb0] sm:$0xff]  ;;  %v5483_v11 = vld [vmem:[#allocation2 + $0xcb8] sm:$0xff] }
 0xc13   : > { %3684 = vmatpush.msrb.mxu3 %v5436_v12  ;;  %3704 = vmatpush.msra.mxu0 %v5437_v14  ;;  %v5484_v12 = vld [vmem:[#allocation2 + $0xda0] sm:$0xff]  ;;  %v5485_v14 = vld [vmem:[#allocation2 + $0xca8] sm:$0xff] }
 0xc15   : > { %3685 = vmatpush.msrb.mxu3 %v5438_v15  ;;  %3705 = vmatpush.msra.mxu0 %v5439_v18  ;;  %v5486_v15 = vld [vmem:[#allocation2 + $0xd90] sm:$0xff]  ;;  %v5487_v18 = vld [vmem:[#allocation2 + $0xc98] sm:$0xff] }
 0xc17   : > { %3686 = vmatpush.msrb.mxu3 %v5440_v19  ;;  %3706 = vmatpush.msra.mxu0 %v5441_v24  ;;  %v5488_v19 = vld [vmem:[#allocation2 + $0xd80] sm:$0xff]  ;;  %v5489_v24 = vld [vmem:[#allocation2 + $0xc88] sm:$0xff] }
 0xc18   : > { %3687 = vmatmul.f32.vlgmr.msrb.gmra.mxu3 %v6822_v41  ;;  %3707 = vmatmul.f32.vlgmr.msra.gmra.mxu0 %v6820_v39  ;;  %v3668_v62 = vpop.f32.mrf.mxu2 }
 0xc19   : > { %3784 = vmatpush.msrb.mxu0 %v5442_v52  ;;  %v5490_v52 = vld [vmem:[#allocation2 + $0xd70] sm:$0xff] }
 0xc1b   : > { %3785 = vmatpush.msrb.mxu0 %v5443_v30  ;;  %v5491_v30 = vld [vmem:[#allocation2 + $0xc78] sm:$0xff] }
 0xc1d   : > { %3786 = vmatpush.msrb.mxu0 %v5444_v31  ;;  %v5492_v31 = vld [vmem:[#allocation2 + $0xd60] sm:$0xff] }
 0xc1f   : > { %3787 = vmatpush.msrb.mxu0 %v5445_v34  ;;  %v5493_v34 = vld [vmem:[#allocation2 + $0xc68] sm:$0xff] }
 0xc21   : > { %3788 = vmatpush.msrb.mxu0 %v5446_v36  ;;  %v5494_v36 = vld [vmem:[#allocation2 + $0xd50] sm:$0xff] }
 0xc23   : > { %3789 = vmatpush.msrb.mxu0 %v5447_v43  ;;  %v5495_v43 = vld [vmem:[#allocation2 + $0xc58] sm:$0xff] }
 0xc25   : > { %3790 = vmatpush.msrb.mxu0 %v5448_v33  ;;  %v5496_v33 = vld [vmem:[#allocation2 + $0xd40] sm:$0xff] }
 0xc27   : > { %3791 = vmatpush.msrb.mxu0 %v5449_v32  ;;  %v5497_v32 = vld [vmem:[#allocation2 + $0xc48] sm:$0xff] }
 0xc29   : > { %3792 = vmatpush.msrb.mxu0 %v5450_v45  ;;  %v5498_v45 = vld [vmem:[#allocation2 + $0xd30] sm:$0xff] }
 0xc2b   : > { %3793 = vmatpush.msrb.mxu0 %v5451_v25  ;;  %v5499_v25 = vld [vmem:[#allocation2 + $0xc38] sm:$0xff] }
 0xc2d   : > { %3794 = vmatpush.msrb.mxu0 %v5452_v58  ;;  %v5500_v58 = vld [vmem:[#allocation2 + $0xd20] sm:$0xff] }
 0xc2f   : > { %3795 = vmatpush.msrb.mxu0 %v5453_v20  ;;  %v5501_v20 = vld [vmem:[#allocation2 + $0xc28] sm:$0xff] }
 0xc31   : > { %3796 = vmatpush.msrb.mxu0 %v5454_v16  ;;  %v5502_v16 = vld [vmem:[#allocation2 + $0xd10] sm:$0xff] }
 0xc33   : > { %3797 = vmatpush.msrb.mxu0 %v5455_v27  ;;  %v5503_v27 = vld [vmem:[#allocation2 + $0xc18] sm:$0xff] }
 0xc35   : > { %3798 = vmatpush.msrb.mxu0 %v5456_v29  ;;  %v5504_v29 = vld [vmem:[#allocation2 + $0xd00] sm:$0xff] }
 0xc37   : > { %3799 = vmatpush.msrb.mxu0 %v5457_v35  ;;  %v5505_v35 = vld [vmem:[#allocation2 + $0xc08] sm:$0xff] }
 0xc38   : > { %3800 = vmatmul.f32.vlgmr.msrb.gmra.mxu0 %v6820_v39 }
 0xc5b   : > { %v3513_v49 = vpop.f32.mrf.mxu3 }
 0xc5c   : > { %v6892_v4 = vadd.f32 %v3513_v49, %v6874_v23  ;;  %v5461_v23 = vld [vmem:[#allocation2 + $0xbc8] sm:$0xff]  ;;  %v5506_v49 = vld [vmem:[#allocation2 + $0xef0] sm:$0xff] }
 0xc75   : > { %v3626_v44 = vpop.f32.mrf.mxu0 }
 0xc76   : > { %v6895_v22 = vadd.f32 %v3626_v44, %v6878_v42  ;;  %v5463_v42 = vld [vmem:[#allocation2 + $0xba8] sm:$0xff]  ;;  %v5507_v44 = vld [vmem:[#allocation2 + $0xee0] sm:$0xff] }
 0xc7b   : > { %v3595_v26 = vpop.f32.mrf.mxu3 }
 0xc7c   : > { %v3596_v5 = vadd.f32 %v3595_v26, %v3575_v21  ;;  %v5508_v21 = vld [vmem:[#allocation2 + $0xed0] sm:$0xff]  ;;  %v5509_v26 = vld [vmem:[#allocation2 + $0xec0] sm:$0xff] }
 0xc7e   : > { %4811 = vmatpush.msk.msrb.mxu1 %vm1077_vm5, %v3596_v5  ;;  %v5510_v5 = vld [vmem:[#allocation2 + $0xeb0] sm:$0xff] }
 0xc7f   : > { %4812 = vmatmul.msk.f32.vlgmr.msrb.gmra.mxu1 %vm1437_vm10, %v6882_v50  ;;  %v5468_v50 = vld [vmem:[#allocation2 + $0xb58] sm:$0xff] }
 0xc80   : > { %3711 = vmatpush.msra.mxu1 %v5458_v51  ;;  %v5511_v51 = vld [vmem:[#allocation2 + $0xea0] sm:$0xff] }
 0xc82   : > { %3712 = vmatpush.msra.mxu1 %v5459_v38  ;;  %v5512_v38 = vld [vmem:[#allocation2 + $0xe90] sm:$0xff] }
 0xc84   : > { %3713 = vmatpush.msra.mxu1 %v5460_v55  ;;  %v5513_v55 = vld [vmem:[#allocation2 + $0xe80] sm:$0xff] }
 0xc86   : > { %3714 = vmatpush.msra.mxu1 %v5461_v23  ;;  %v5514_v23 = vld [vmem:[#allocation2 + $0xe70] sm:$0xff] }
 0xc88   : > { %3715 = vmatpush.msra.mxu1 %v5462_v57  ;;  %v5515_v57 = vld [vmem:[#allocation2 + $0xe60] sm:$0xff] }
 0xc8a   : > { %3716 = vmatpush.msra.mxu1 %v5463_v42  ;;  %v5516_v42 = vld [vmem:[#allocation2 + $0xe50] sm:$0xff] }
 0xc8c   : > { %3717 = vmatpush.msra.mxu1 %v5464_v37  ;;  %v5517_v37 = vld [vmem:[#allocation2 + $0xe40] sm:$0xff] }
 0xc8e   : > { %3718 = vmatpush.msra.mxu1 %v5465_v59  ;;  %v5518_v59 = vld [vmem:[#allocation2 + $0xe30] sm:$0xff] }
 0xc90   : > { %3719 = vmatpush.msra.mxu1 %v5466_v46  ;;  %v5519_v46 = vld [vmem:[#allocation2 + $0xe20] sm:$0xff] }
 0xc92   : > { %3720 = vmatpush.msra.mxu1 %v5467_v47  ;;  %v5520_v47 = vld [vmem:[#allocation2 + $0xe10] sm:$0xff] }
 0xc94   : > { %3721 = vmatpush.msra.mxu1 %v5468_v50  ;;  %v5521_v50 = vld [vmem:[#allocation2 + $0xe00] sm:$0xff] }
 0xc96   : > { %3722 = vmatpush.msra.mxu1 %v5469_v28 }
 0xc98   : > { %3723 = vmatpush.msra.mxu1 %v5470_v60 }
 0xc9a   : > { %3724 = vmatpush.msra.mxu1 %v5471_v61  ;;  %v3708_v61 = vpop.f32.mrf.mxu0 }
 0xc9b   : > { %v3688_v0 = vpop.f32.mrf.mxu3 }
 0xc9c   : > { %v3689_v2 = vadd.f32 %v3688_v0, %v3668_v62  ;;  %3725 = vmatpush.msra.mxu1 %v5472_v17 }
 0xc9e   : > { %3726 = vmatpush.msra.mxu1 %v5473_v63  ;;  %4813 = vmatpush.msk.msra.mxu2 %vm1077_vm5, %v3689_v2  ;;  %v5522_v2 = vld [vmem:[#allocation2 + $0xdf8] sm:$0xff] }
 0xc9f   : > { %3727 = vmatmul.f32.vlgmr.msra.gmra.mxu1 %v6822_v41  ;;  %4814 = vmatmul.msk.f32.vlgmr.msra.gmra.mxu2 %vm1437_vm10, %v6900_v40 }
 0xca0   : > { %3804 = vmatpush.msrb.mxu1 %v5474_v3  ;;  %3824 = vmatpush.msrb.mxu2 %v5475_v6  ;;  %v5523_v3 = vld [vmem:[#allocation2 + $0xde8] sm:$0xff]  ;;  %v5524_v6 = vld [vmem:[#allocation2 + $0xdd8] sm:$0xff] }
 0xca2   : > { %3805 = vmatpush.msrb.mxu1 %v5476_v7  ;;  %3825 = vmatpush.msrb.mxu2 %v5477_v8  ;;  %v5526_v7 = vld [vmem:[#allocation2 + $0xdb8] sm:$0xff]  ;;  %v5527_v8 = vld [vmem:[#allocation2 + $0xda8] sm:$0xff] }
 0xca4   : > { %3806 = vmatpush.msrb.mxu1 %v5478_v1  ;;  %3826 = vmatpush.msrb.mxu2 %v5479_v9  ;;  %v5528_v1 = vld [vmem:[#allocation2 + $0xd98] sm:$0xff]  ;;  %v5529_v9 = vld [vmem:[#allocation2 + $0xd88] sm:$0xff] }
 0xca6   : > { %3807 = vmatpush.msrb.mxu1 %v5480_v10  ;;  %3827 = vmatpush.msrb.mxu2 %v5481_v56  ;;  %v5531_v10 = vld [vmem:[#allocation2 + $0xd68] sm:$0xff] }
 0xca7   : > { %v5533_v56 = vld [vmem:[#allocation2 + $0xd48] sm:$0xff] }
 0xca8   : > { %3808 = vmatpush.msrb.mxu1 %v5482_v48  ;;  %3828 = vmatpush.msrb.mxu2 %v5483_v11  ;;  %v5534_v48 = vld [vmem:[#allocation2 + $0xd38] sm:$0xff]  ;;  %v5535_v11 = vld [vmem:[#allocation2 + $0xd28] sm:$0xff] }
 0xcaa   : > { %3809 = vmatpush.msrb.mxu1 %v5484_v12  ;;  %3829 = vmatpush.msrb.mxu2 %v5485_v14 }
 0xcac   : > { %3810 = vmatpush.msrb.mxu1 %v5486_v15  ;;  %3830 = vmatpush.msrb.mxu2 %v5487_v18  ;;  %v5536_v18 = vld [vmem:[#allocation2 + $0xd18] sm:$0xff] }
 0xcae   : > { %3811 = vmatpush.msrb.mxu1 %v5488_v19  ;;  %3831 = vmatpush.msrb.mxu2 %v5489_v24  ;;  %v6918_v19 = vld [vmem:[#allocation21 + $0xc] sm:$0x3]  ;;  %v5537_v24 = vld [vmem:[#allocation2 + $0xd08] sm:$0xff] }
 0xcb0   : > { %3812 = vmatpush.msrb.mxu1 %v5490_v52  ;;  %3832 = vmatpush.msrb.mxu2 %v5491_v30  ;;  %v5538_v52 = vld [vmem:[#allocation2 + $0xff0] sm:$0xff]  ;;  %v5539_v30 = vld [vmem:[#allocation2 + $0xef8] sm:$0xff] }
 0xcb2   : > { %3813 = vmatpush.msrb.mxu1 %v5492_v31  ;;  %3833 = vmatpush.msrb.mxu2 %v5493_v34  ;;  %v5540_v31 = vld [vmem:[#allocation2 + $0xfe0] sm:$0xff]  ;;  %v5541_v34 = vld [vmem:[#allocation2 + $0xee8] sm:$0xff] }
 0xcb4   : > { %3814 = vmatpush.msrb.mxu1 %v5494_v36  ;;  %3834 = vmatpush.msrb.mxu2 %v5495_v43  ;;  %v5542_v36 = vld [vmem:[#allocation2 + $0xfd0] sm:$0xff]  ;;  %v5543_v43 = vld [vmem:[#allocation2 + $0xed8] sm:$0xff] }
 0xcb5   : > { %v3801_v12 = vpop.f32.mrf.mxu0 }
 0xcb6   : > { %3815 = vmatpush.msrb.mxu1 %v5496_v33  ;;  %3835 = vmatpush.msrb.mxu2 %v5497_v32  ;;  %v5544_v33 = vld [vmem:[#allocation2 + $0xfc0] sm:$0xff]  ;;  %v5545_v32 = vld [vmem:[#allocation2 + $0xec8] sm:$0xff] }
 0xcb8   : > { %3816 = vmatpush.msrb.mxu1 %v5498_v45  ;;  %3836 = vmatpush.msrb.mxu2 %v5499_v25  ;;  %v5546_v45 = vld [vmem:[#allocation2 + $0xfb0] sm:$0xff]  ;;  %v5547_v25 = vld [vmem:[#allocation2 + $0xeb8] sm:$0xff] }
 0xcba   : > { %3817 = vmatpush.msrb.mxu1 %v5500_v58  ;;  %3837 = vmatpush.msrb.mxu2 %v5501_v20  ;;  %v5548_v58 = vld [vmem:[#allocation2 + $0xfa0] sm:$0xff]  ;;  %v5549_v20 = vld [vmem:[#allocation2 + $0xea8] sm:$0xff] }
 0xcbc   : > { %3818 = vmatpush.msrb.mxu1 %v5502_v16  ;;  %3838 = vmatpush.msrb.mxu2 %v5503_v27  ;;  %v5550_v16 = vld [vmem:[#allocation2 + $0xf90] sm:$0xff]  ;;  %v5551_v27 = vld [vmem:[#allocation2 + $0xe98] sm:$0xff] }
 0xcbe   : > { %3819 = vmatpush.msrb.mxu1 %v5504_v29  ;;  %3839 = vmatpush.msrb.mxu2 %v5505_v35  ;;  %v5552_v29 = vld [vmem:[#allocation2 + $0xf80] sm:$0xff]  ;;  %v5553_v35 = vld [vmem:[#allocation2 + $0xe88] sm:$0xff] }
 0xcbf   : > { %3820 = vmatmul.f32.vlgmr.msrb.gmra.mxu1 %v6822_v41  ;;  %3840 = vmatmul.f32.vlgmr.msrb.gmra.mxu2 %v6820_v39 }
 0xcc0   : > { %3917 = vmatpush.msra.mxu2 %v5506_v49  ;;  %v5554_v49 = vld [vmem:[#allocation2 + $0xf70] sm:$0xff] }
 0xcc2   : > { %3918 = vmatpush.msra.mxu2 %v5507_v44  ;;  %v5555_v44 = vld [vmem:[#allocation2 + $0xe78] sm:$0xff] }
 0xcc4   : > { %3919 = vmatpush.msra.mxu2 %v5508_v21  ;;  %v5556_v21 = vld [vmem:[#allocation2 + $0xf60] sm:$0xff] }
 0xcc6   : > { %3920 = vmatpush.msra.mxu2 %v5509_v26  ;;  %v5557_v26 = vld [vmem:[#allocation2 + $0xe68] sm:$0xff] }
 0xcc8   : > { %3921 = vmatpush.msra.mxu2 %v5510_v5  ;;  %v5558_v5 = vld [vmem:[#allocation2 + $0xf50] sm:$0xff] }
 0xcca   : > { %3922 = vmatpush.msra.mxu2 %v5511_v51  ;;  %v5559_v51 = vld [vmem:[#allocation2 + $0xe58] sm:$0xff] }
 0xccc   : > { %3923 = vmatpush.msra.mxu2 %v5512_v38  ;;  %v5560_v38 = vld [vmem:[#allocation2 + $0xf40] sm:$0xff] }
 0xcce   : > { %3924 = vmatpush.msra.mxu2 %v5513_v55  ;;  %v5561_v55 = vld [vmem:[#allocation2 + $0xe48] sm:$0xff] }
 0xcd0   : > { %3925 = vmatpush.msra.mxu2 %v5514_v23  ;;  %v5562_v23 = vld [vmem:[#allocation2 + $0xf30] sm:$0xff] }
 0xcd2   : > { %3926 = vmatpush.msra.mxu2 %v5515_v57  ;;  %v5563_v57 = vld [vmem:[#allocation2 + $0xe38] sm:$0xff] }
 0xcd4   : > { %3927 = vmatpush.msra.mxu2 %v5516_v42  ;;  %v5564_v42 = vld [vmem:[#allocation2 + $0xf20] sm:$0xff] }
 0xcd6   : > { %3928 = vmatpush.msra.mxu2 %v5517_v37  ;;  %v5565_v37 = vld [vmem:[#allocation2 + $0xe28] sm:$0xff] }
 0xcd8   : > { %3929 = vmatpush.msra.mxu2 %v5518_v59  ;;  %v5566_v59 = vld [vmem:[#allocation2 + $0xf10] sm:$0xff] }
 0xcda   : > { %3930 = vmatpush.msra.mxu2 %v5519_v46  ;;  %v5567_v46 = vld [vmem:[#allocation2 + $0xe18] sm:$0xff] }
 0xcdc   : > { %3931 = vmatpush.msra.mxu2 %v5520_v47  ;;  %v5568_v47 = vld [vmem:[#allocation2 + $0xf00] sm:$0xff] }
 0xcde   : > { %3932 = vmatpush.msra.mxu2 %v5521_v50  ;;  %v5569_v50 = vld [vmem:[#allocation2 + $0xe08] sm:$0xff] }
 0xcdf   : > { %3933 = vmatmul.f32.vlgmr.msra.gmra.mxu2 %v6820_v39 }
 0xcfc   : > { %v3646_v28 = vpop.f32.mrf.mxu1 }
 0xcfd   : > { %v6910_v60 = vadd.f32 %v3646_v28, %v6892_v4  ;;  %v5525_v4 = vld [vmem:[#allocation2 + $0xdc8] sm:$0xff]  ;;  %v5570_v28 = vld [vmem:[#allocation2 + $0x10f0] sm:$0xff] }
 0xd1c   : > { %v3728_v62 = vpop.f32.mrf.mxu1 }
 0xd1d   : > { %v3729_v0 = vadd.f32 %v3728_v62, %v3708_v61  ;;  %v5571_v61 = vld [vmem:[#allocation2 + $0x10e0] sm:$0xff]  ;;  %v5572_v62 = vld [vmem:[#allocation2 + $0x10d0] sm:$0xff] }
 0xd1f   : > { %4815 = vmatpush.msk.msra.mxu3 %vm1077_vm5, %v3729_v0  ;;  %v5573_v0 = vld [vmem:[#allocation2 + $0x10c0] sm:$0xff] }
 0xd20   : > { %4816 = vmatmul.msk.f32.vlgmr.msra.gmra.mxu3 %vm1437_vm10, %v6900_v40  ;;  %v5530_v40 = vld [vmem:[#allocation2 + $0xd78] sm:$0xff] }
 0xd21   : > { %3844 = vmatpush.msrb.mxu3 %v5522_v2  ;;  %v5574_v2 = vld [vmem:[#allocation2 + $0x10b0] sm:$0xff] }
 0xd22   : > { %v3759_v17 = vpop.f32.mrf.mxu2 }
 0xd23   : > { %v6916_v63 = vadd.f32 %v3759_v17, %v6895_v22  ;;  %3845 = vmatpush.msrb.mxu3 %v5523_v3  ;;  %v5532_v22 = vld [vmem:[#allocation2 + $0xd58] sm:$0xff]  ;;  %v5575_v17 = vld [vmem:[#allocation2 + $0x10a0] sm:$0xff]  ;;  %v5576_v3 = vld [vmem:[#allocation2 + $0x1090] sm:$0xff] }
 0xd25   : > { %3846 = vmatpush.msrb.mxu3 %v5524_v6  ;;  %v5577_v6 = vld [vmem:[#allocation2 + $0x1080] sm:$0xff] }
 0xd27   : > { %3847 = vmatpush.msrb.mxu3 %v5525_v4  ;;  %v5578_v4 = vld [vmem:[#allocation2 + $0x1070] sm:$0xff] }
 0xd29   : > { %3848 = vmatpush.msrb.mxu3 %v5526_v7  ;;  %v5579_v7 = vld [vmem:[#allocation2 + $0x1060] sm:$0xff] }
 0xd2b   : > { %3849 = vmatpush.msrb.mxu3 %v5527_v8  ;;  %v5580_v8 = vld [vmem:[#allocation2 + $0x1050] sm:$0xff] }
 0xd2d   : > { %3850 = vmatpush.msrb.mxu3 %v5528_v1  ;;  %v5581_v1 = vld [vmem:[#allocation2 + $0x1040] sm:$0xff] }
 0xd2f   : > { %3851 = vmatpush.msrb.mxu3 %v5529_v9  ;;  %v5582_v9 = vld [vmem:[#allocation2 + $0x1030] sm:$0xff] }
 0xd31   : > { %3852 = vmatpush.msrb.mxu3 %v5530_v40  ;;  %v5583_v40 = vld [vmem:[#allocation2 + $0x1020] sm:$0xff] }
 0xd33   : > { %3853 = vmatpush.msrb.mxu3 %v5531_v10  ;;  %v5584_v10 = vld [vmem:[#allocation2 + $0x1010] sm:$0xff] }
 0xd35   : > { %3854 = vmatpush.msrb.mxu3 %v5532_v22  ;;  %v5585_v22 = vld [vmem:[#allocation2 + $0x1000] sm:$0xff] }
 0xd37   : > { %3855 = vmatpush.msrb.mxu3 %v5533_v56 }
 0xd39   : > { %3856 = vmatpush.msrb.mxu3 %v5534_v48 }
 0xd3b   : > { %3857 = vmatpush.msrb.mxu3 %v5535_v11 }
 0xd3c   : > { %v3821_v14 = vpop.f32.mrf.mxu1 }
 0xd3d   : > { %v3822_v15 = vadd.f32 %v3821_v14, %v3801_v12  ;;  %3858 = vmatpush.msrb.mxu3 %v5536_v18 }
 0xd3f   : > { %3859 = vmatpush.msrb.mxu3 %v5537_v24  ;;  %4817 = vmatpush.msk.msra.mxu0 %vm1077_vm5, %v3822_v15  ;;  %v5586_v24 = vld [vmem:[#allocation2 + $0xff8] sm:$0xff] }
 0xd40   : > { %3860 = vmatmul.f32.vlgmr.msrb.gmra.mxu3 %v6822_v41  ;;  %4818 = vmatmul.msk.f32.vlgmr.msra.gmra.mxu0 %vm1437_vm10, %v6918_v19 }
 0xd41   : > { %3937 = vmatpush.msra.mxu3 %v5538_v52  ;;  %3957 = vmatpush.msrb.mxu0 %v5539_v30  ;;  %v5587_v52 = vld [vmem:[#allocation2 + $0xfe8] sm:$0xff]  ;;  %v5588_v30 = vld [vmem:[#allocation2 + $0xfd8] sm:$0xff] }
 0xd42   : > { %v3841_v14 = vpop.f32.mrf.mxu2 }
 0xd43   : > { %3938 = vmatpush.msra.mxu3 %v5540_v31  ;;  %3958 = vmatpush.msrb.mxu0 %v5541_v34  ;;  %v5590_v31 = vld [vmem:[#allocation2 + $0xfb8] sm:$0xff] }
 0xd44   : > { %v5592_v34 = vld [vmem:[#allocation2 + $0xf98] sm:$0xff] }
 0xd45   : > { %3939 = vmatpush.msra.mxu3 %v5542_v36  ;;  %3959 = vmatpush.msrb.mxu0 %v5543_v43  ;;  %v5593_v36 = vld [vmem:[#allocation2 + $0xf88] sm:$0xff]  ;;  %v5594_v43 = vld [vmem:[#allocation2 + $0xf78] sm:$0xff] }
 0xd47   : > { %3940 = vmatpush.msra.mxu3 %v5544_v33  ;;  %3960 = vmatpush.msrb.mxu0 %v5545_v32  ;;  %v5595_v33 = vld [vmem:[#allocation2 + $0xf68] sm:$0xff] }
 0xd48   : > { %v5597_v32 = vld [vmem:[#allocation2 + $0xf48] sm:$0xff] }
 0xd49   : > { %3941 = vmatpush.msra.mxu3 %v5546_v45  ;;  %3961 = vmatpush.msrb.mxu0 %v5547_v25  ;;  %v5598_v45 = vld [vmem:[#allocation2 + $0xf38] sm:$0xff]  ;;  %v5599_v25 = vld [vmem:[#allocation2 + $0xf28] sm:$0xff] }
 0xd4b   : > { %3942 = vmatpush.msra.mxu3 %v5548_v58  ;;  %3962 = vmatpush.msrb.mxu0 %v5549_v20 }
 0xd4d   : > { %3943 = vmatpush.msra.mxu3 %v5550_v16  ;;  %3963 = vmatpush.msrb.mxu0 %v5551_v27  ;;  %v5600_v27 = vld [vmem:[#allocation2 + $0xf18] sm:$0xff] }
 0xd4f   : > { %3944 = vmatpush.msra.mxu3 %v5552_v29  ;;  %3964 = vmatpush.msrb.mxu0 %v5553_v35  ;;  %v6936_v29 = vld [vmem:[#allocation21 + $0xe] sm:$0x3]  ;;  %v5601_v35 = vld [vmem:[#allocation2 + $0xf08] sm:$0xff] }
 0xd51   : > { %3945 = vmatpush.msra.mxu3 %v5554_v49  ;;  %3965 = vmatpush.msrb.mxu0 %v5555_v44  ;;  %v5602_v49 = vld [vmem:[#allocation2 + $0x11f0] sm:$0xff]  ;;  %v5603_v44 = vld [vmem:[#allocation2 + $0x10f8] sm:$0xff] }
 0xd53   : > { %3946 = vmatpush.msra.mxu3 %v5556_v21  ;;  %3966 = vmatpush.msrb.mxu0 %v5557_v26  ;;  %v5604_v21 = vld [vmem:[#allocation2 + $0x11e0] sm:$0xff]  ;;  %v5605_v26 = vld [vmem:[#allocation2 + $0x10e8] sm:$0xff] }
 0xd55   : > { %3947 = vmatpush.msra.mxu3 %v5558_v5  ;;  %3967 = vmatpush.msrb.mxu0 %v5559_v51  ;;  %v5606_v5 = vld [vmem:[#allocation2 + $0x11d0] sm:$0xff]  ;;  %v5607_v51 = vld [vmem:[#allocation2 + $0x10d8] sm:$0xff] }
 0xd57   : > { %3948 = vmatpush.msra.mxu3 %v5560_v38  ;;  %3968 = vmatpush.msrb.mxu0 %v5561_v55  ;;  %v5608_v38 = vld [vmem:[#allocation2 + $0x11c0] sm:$0xff]  ;;  %v5609_v55 = vld [vmem:[#allocation2 + $0x10c8] sm:$0xff] }
 0xd59   : > { %3949 = vmatpush.msra.mxu3 %v5562_v23  ;;  %3969 = vmatpush.msrb.mxu0 %v5563_v57  ;;  %v5610_v23 = vld [vmem:[#allocation2 + $0x11b0] sm:$0xff]  ;;  %v5611_v57 = vld [vmem:[#allocation2 + $0x10b8] sm:$0xff] }
 0xd5b   : > { %3950 = vmatpush.msra.mxu3 %v5564_v42  ;;  %3970 = vmatpush.msrb.mxu0 %v5565_v37  ;;  %v5612_v42 = vld [vmem:[#allocation2 + $0x11a0] sm:$0xff]  ;;  %v5613_v37 = vld [vmem:[#allocation2 + $0x10a8] sm:$0xff] }
 0xd5d   : > { %3951 = vmatpush.msra.mxu3 %v5566_v59  ;;  %3971 = vmatpush.msrb.mxu0 %v5567_v46  ;;  %v5614_v59 = vld [vmem:[#allocation2 + $0x1190] sm:$0xff]  ;;  %v5615_v46 = vld [vmem:[#allocation2 + $0x1098] sm:$0xff] }
 0xd5f   : > { %3952 = vmatpush.msra.mxu3 %v5568_v47  ;;  %3972 = vmatpush.msrb.mxu0 %v5569_v50  ;;  %v5616_v47 = vld [vmem:[#allocation2 + $0x1180] sm:$0xff]  ;;  %v5617_v50 = vld [vmem:[#allocation2 + $0x1088] sm:$0xff] }
 0xd60   : > { %3953 = vmatmul.f32.vlgmr.msra.gmra.mxu3 %v6822_v41  ;;  %3973 = vmatmul.f32.vlgmr.msrb.gmra.mxu0 %v6820_v39 }
 0xd61   : > { %4050 = vmatpush.msra.mxu0 %v5570_v28  ;;  %v5618_v28 = vld [vmem:[#allocation2 + $0x1170] sm:$0xff] }
 0xd62   : > { %v3934_v58 = vpop.f32.mrf.mxu2 }
 0xd63   : > { %4051 = vmatpush.msra.mxu0 %v5571_v61  ;;  %v5619_v61 = vld [vmem:[#allocation2 + $0x1078] sm:$0xff] }
 0xd65   : > { %4052 = vmatpush.msra.mxu0 %v5572_v62  ;;  %v5620_v62 = vld [vmem:[#allocation2 + $0x1160] sm:$0xff] }
 0xd67   : > { %4053 = vmatpush.msra.mxu0 %v5573_v0  ;;  %v5621_v0 = vld [vmem:[#allocation2 + $0x1068] sm:$0xff] }
 0xd69   : > { %4054 = vmatpush.msra.mxu0 %v5574_v2  ;;  %v5622_v2 = vld [vmem:[#allocation2 + $0x1150] sm:$0xff] }
 0xd6b   : > { %4055 = vmatpush.msra.mxu0 %v5575_v17  ;;  %v5623_v17 = vld [vmem:[#allocation2 + $0x1058] sm:$0xff] }
 0xd6d   : > { %4056 = vmatpush.msra.mxu0 %v5576_v3  ;;  %v5624_v3 = vld [vmem:[#allocation2 + $0x1140] sm:$0xff] }
 0xd6f   : > { %4057 = vmatpush.msra.mxu0 %v5577_v6  ;;  %v5625_v6 = vld [vmem:[#allocation2 + $0x1048] sm:$0xff] }
 0xd71   : > { %4058 = vmatpush.msra.mxu0 %v5578_v4  ;;  %v5626_v4 = vld [vmem:[#allocation2 + $0x1130] sm:$0xff] }
 0xd73   : > { %4059 = vmatpush.msra.mxu0 %v5579_v7  ;;  %v5627_v7 = vld [vmem:[#allocation2 + $0x1038] sm:$0xff] }
 0xd75   : > { %4060 = vmatpush.msra.mxu0 %v5580_v8  ;;  %v5628_v8 = vld [vmem:[#allocation2 + $0x1120] sm:$0xff] }
 0xd77   : > { %4061 = vmatpush.msra.mxu0 %v5581_v1  ;;  %v5629_v1 = vld [vmem:[#allocation2 + $0x1028] sm:$0xff] }
 0xd79   : > { %4062 = vmatpush.msra.mxu0 %v5582_v9  ;;  %v5630_v9 = vld [vmem:[#allocation2 + $0x1110] sm:$0xff] }
 0xd7b   : > { %4063 = vmatpush.msra.mxu0 %v5583_v40  ;;  %v5631_v40 = vld [vmem:[#allocation2 + $0x1018] sm:$0xff] }
 0xd7d   : > { %4064 = vmatpush.msra.mxu0 %v5584_v10  ;;  %v5632_v10 = vld [vmem:[#allocation2 + $0x1100] sm:$0xff] }
 0xd7f   : > { %4065 = vmatpush.msra.mxu0 %v5585_v22  ;;  %v5633_v22 = vld [vmem:[#allocation2 + $0x1008] sm:$0xff] }
 0xd80   : > { %4066 = vmatmul.f32.vlgmr.msra.gmra.mxu0 %v6820_v39 }
 0xda3   : > { %v3779_v56 = vpop.f32.mrf.mxu3 }
 0xda4   : > { %v6928_v48 = vadd.f32 %v3779_v56, %v6910_v60  ;;  %v5589_v60 = vld [vmem:[#allocation2 + $0xfc8] sm:$0xff] }
 0xdbd   : > { %v3892_v11 = vpop.f32.mrf.mxu0 }
 0xdbe   : > { %v6931_v12 = vadd.f32 %v3892_v11, %v6916_v63  ;;  %v5591_v63 = vld [vmem:[#allocation2 + $0xfa8] sm:$0xff] }
 0xdc3   : > { %v3861_v15 = vpop.f32.mrf.mxu3 }
 0xdc4   : > { %v3862_v18 = vadd.f32 %v3861_v15, %v3841_v14 }
 0xdc6   : > { %4819 = vmatpush.msk.msra.mxu1 %vm1077_vm5, %v3862_v18 }
 0xdc7   : > { %4820 = vmatmul.msk.f32.vlgmr.msra.gmra.mxu1 %vm1437_vm10, %v6918_v19  ;;  %v5596_v19 = vld [vmem:[#allocation2 + $0xf58] sm:$0xff] }
 0xdc8   : > { %3977 = vmatpush.msrb.mxu1 %v5586_v24  ;;  %v5634_v24 = vld [vmem:[#allocation2 + $0x11f8] sm:$0xff] }
 0xdca   : > { %3978 = vmatpush.msrb.mxu1 %v5587_v52 }
 0xdcc   : > { %3979 = vmatpush.msrb.mxu1 %v5588_v30 }
 0xdce   : > { %3980 = vmatpush.msrb.mxu1 %v5589_v60  ;;  %v5635_v60 = vld [vmem:[#allocation2 + $0x11e8] sm:$0xff] }
 0xdd0   : > { %3981 = vmatpush.msrb.mxu1 %v5590_v31  ;;  %v5636_v31 = vld [vmem:[#allocation2 + $0x11d8] sm:$0xff] }
 0xdd2   : > { %3982 = vmatpush.msrb.mxu1 %v5591_v63  ;;  %v5639_v63 = vld [vmem:[#allocation2 + $0x11a8] sm:$0xff] }
 0xdd4   : > { %3983 = vmatpush.msrb.mxu1 %v5592_v34  ;;  %v5640_v34 = vld [vmem:[#allocation2 + $0x1198] sm:$0xff] }
 0xdd6   : > { %3984 = vmatpush.msrb.mxu1 %v5593_v36  ;;  %v5641_v36 = vld [vmem:[#allocation2 + $0x1188] sm:$0xff] }
 0xdd8   : > { %3985 = vmatpush.msrb.mxu1 %v5594_v43  ;;  %v5642_v43 = vld [vmem:[#allocation2 + $0x1178] sm:$0xff] }
 0xdda   : > { %3986 = vmatpush.msrb.mxu1 %v5595_v33  ;;  %v5643_v33 = vld [vmem:[#allocation2 + $0x1168] sm:$0xff] }
 0xddc   : > { %3987 = vmatpush.msrb.mxu1 %v5596_v19  ;;  %v5644_v19 = vld [vmem:[#allocation2 + $0x1158] sm:$0xff] }
 0xddd   : > { %v3974_v14 = vpop.f32.mrf.mxu0 }
 0xdde   : > { %3988 = vmatpush.msrb.mxu1 %v5597_v32  ;;  %v5646_v32 = vld [vmem:[#allocation2 + $0x1138] sm:$0xff] }
 0xde0   : > { %3989 = vmatpush.msrb.mxu1 %v5598_v45  ;;  %v5647_v45 = vld [vmem:[#allocation2 + $0x1128] sm:$0xff] }
 0xde2   : > { %3990 = vmatpush.msrb.mxu1 %v5599_v25 }
 0xde3   : > { %v3954_v20 = vpop.f32.mrf.mxu3 }
 0xde4   : > { %v3955_v16 = vadd.f32 %v3954_v20, %v3934_v58  ;;  %3991 = vmatpush.msrb.mxu1 %v5600_v27  ;;  %v4131_v27 = vld [vmem:[#allocation21 + $0x10] sm:$0x3] }
 0xde6   : > { %3992 = vmatpush.msrb.mxu1 %v5601_v35  ;;  %4821 = vmatpush.msk.msrb.mxu2 %vm1077_vm5, %v3955_v16  ;;  %v5648_v16 = vld [vmem:[#allocation2 + $0x1118] sm:$0xff]  ;;  %v4323_v35 = vld [vmem:[#allocation30] sm:$0xff] }
 0xde7   : > { %3993 = vmatmul.f32.vlgmr.msrb.gmra.mxu1 %v6822_v41  ;;  %4822 = vmatmul.msk.f32.vlgmr.msrb.gmra.mxu2 %vm1437_vm10, %v6936_v29 }
 0xde8   : > { %4070 = vmatpush.msra.mxu1 %v5602_v49  ;;  %4090 = vmatpush.msra.mxu2 %v5603_v44 }
 0xdea   : > { %4071 = vmatpush.msra.mxu1 %v5604_v21  ;;  %4091 = vmatpush.msra.mxu2 %v5605_v26 }
 0xdec   : > { %4072 = vmatpush.msra.mxu1 %v5606_v5  ;;  %4092 = vmatpush.msra.mxu2 %v5607_v51 }
 0xdee   : > { %4073 = vmatpush.msra.mxu1 %v5608_v38  ;;  %4093 = vmatpush.msra.mxu2 %v5609_v55  ;;  %v4186_v38 = vpop.permute.xlu0 %4185 }
 0xdf0   : > { %4074 = vmatpush.msra.mxu1 %v5610_v23  ;;  %4094 = vmatpush.msra.mxu2 %v5611_v57 }
 0xdf2   : > { %4075 = vmatpush.msra.mxu1 %v5612_v42  ;;  %4095 = vmatpush.msra.mxu2 %v5613_v37 }
 0xdf4   : > { %4076 = vmatpush.msra.mxu1 %v5614_v59  ;;  %4096 = vmatpush.msra.mxu2 %v5615_v46 }
 0xdf6   : > { %4077 = vmatpush.msra.mxu1 %v5616_v47  ;;  %4097 = vmatpush.msra.mxu2 %v5617_v50  ;;  %v4191_v47 = vld [vmem:[#allocation25] sm:$0x3] }
 0xdf8   : > { %4078 = vmatpush.msra.mxu1 %v5618_v28  ;;  %4098 = vmatpush.msra.mxu2 %v5619_v61 }
 0xdfa   : > { %4079 = vmatpush.msra.mxu1 %v5620_v62  ;;  %4099 = vmatpush.msra.mxu2 %v5621_v0 }
 0xdfc   : > { %4080 = vmatpush.msra.mxu1 %v5622_v2  ;;  %4100 = vmatpush.msra.mxu2 %v5623_v17 }
 0xdfd   : > { %v4067_v25 = vpop.f32.mrf.mxu0 }
 0xdfe   : > { %4081 = vmatpush.msra.mxu1 %v5624_v3  ;;  %4101 = vmatpush.msra.mxu2 %v5625_v6 }
 0xe00   : > { %4082 = vmatpush.msra.mxu1 %v5626_v4  ;;  %4102 = vmatpush.msra.mxu2 %v5627_v7 }
 0xe02   : > { %4083 = vmatpush.msra.mxu1 %v5628_v8  ;;  %4103 = vmatpush.msra.mxu2 %v5629_v1 }
 0xe04   : > { %4084 = vmatpush.msra.mxu1 %v5630_v9  ;;  %4104 = vmatpush.msra.mxu2 %v5631_v40 }
 0xe06   : > { %4085 = vmatpush.msra.mxu1 %v5632_v10  ;;  %4105 = vmatpush.msra.mxu2 %v5633_v22 }
 0xe07   : > { %4086 = vmatmul.f32.vlgmr.msra.gmra.mxu1 %v6822_v41  ;;  %4106 = vmatmul.f32.vlgmr.msra.gmra.mxu2 %v6820_v39  ;;  %v5637_v39 = vld [vmem:[#allocation2 + $0x11c8] sm:$0xff] }
 0xe44   : > { %v3912_v56 = vpop.f32.mrf.mxu1 }
 0xe45   : > { %v3916_v11 = vadd.f32 %v3912_v56, %v6928_v48  ;;  %v5638_v48 = vld [vmem:[#allocation2 + $0x11b8] sm:$0xff] }
 0xe64   : > { %v3994_v15 = vpop.f32.mrf.mxu1 }
 0xe65   : > { %v3995_v18 = vadd.f32 %v3994_v15, %v3974_v14 }
 0xe67   : > { %4823 = vmatpush.msk.msrb.mxu3 %vm1077_vm5, %v3995_v18 }
 0xe68   : > { %4824 = vmatmul.msk.f32.vlgmr.msrb.gmra.mxu3 %vm1437_vm10, %v6936_v29  ;;  %v5649_v29 = vld [vmem:[#allocation2 + $0x1108] sm:$0xff] }
 0xe69   : > { %4110 = vmatpush.msra.mxu3 %v5634_v24 }
 0xe6a   : > { %v4025_v52 = vpop.f32.mrf.mxu2 }
 0xe6b   : > { %v4048_v30 = vadd.f32 %v4025_v52, %v6931_v12  ;;  %4111 = vmatpush.msra.mxu3 %v5635_v60  ;;  %v5645_v12 = vld [vmem:[#allocation2 + $0x1148] sm:$0xff] }
 0xe6d   : > { %4112 = vmatpush.msra.mxu3 %v5636_v31 }
 0xe6f   : > { %4113 = vmatpush.msra.mxu3 %v5637_v39 }
 0xe71   : > { %4114 = vmatpush.msra.mxu3 %v5638_v48 }
 0xe73   : > { %4115 = vmatpush.msra.mxu3 %v5639_v63 }
 0xe75   : > { %4116 = vmatpush.msra.mxu3 %v5640_v34 }
 0xe77   : > { %4117 = vmatpush.msra.mxu3 %v5641_v36 }
 0xe79   : > { %4118 = vmatpush.msra.mxu3 %v5642_v43 }
 0xe7b   : > { %4119 = vmatpush.msra.mxu3 %v5643_v33 }
 0xe7d   : > { %4120 = vmatpush.msra.mxu3 %v5644_v19 }
 0xe7f   : > { %4121 = vmatpush.msra.mxu3 %v5645_v12  ;;  %v4238_v12 = vpop.permute.xlu2 %4237 }
 0xe81   : > { %4122 = vmatpush.msra.mxu3 %v5646_v32 }
 0xe83   : > { %4123 = vmatpush.msra.mxu3 %v5647_v45 }
 0xe84   : > { %v4087_v58 = vpop.f32.mrf.mxu1 }
 0xe85   : > { %v4088_v20 = vadd.f32 %v4087_v58, %v4067_v25  ;;  %4124 = vmatpush.msra.mxu3 %v5648_v16 }
 0xe87   : > { %4125 = vmatpush.msra.mxu3 %v5649_v29  ;;  %4825 = vmatpush.msk.msrb.mxu0 %vm1077_vm5, %v4088_v20  ;;  %v4392_v29 = vld [vmem:[#allocation4 + $0x78] sm:$0xff] }
 0xe88   : > { %4126 = vmatmul.f32.vlgmr.msra.gmra.mxu3 %v6822_v41  ;;  %4826 = vmatmul.msk.f32.vlgmr.msrb.gmra.mxu0 %vm1437_vm10, %v4131_v27 }
 0xe89   : > { %4348 = vmatpush.msra.mxu0 %v6629_v53 }
 0xe8a   : > { %v4107_v21 = vpop.f32.mrf.mxu2 }
 0xe90   : > { %4835 = vmatmul.msk.f32.vlgmr.msra.gmra.mxu0 %vm1031_vm4, %v4323_v35 }
 0xeeb   : > { %v4045_v49 = vpop.f32.mrf.mxu3 }
 0xeec   : > { %v4049_v44 = vadd.f32 %v4045_v49, %v3916_v11  ;;  %v4391_v49 = vld [vmem:[#allocation4 + $0x70] sm:$0xff] }
 0xf05   : > { %v4158_v41 = vpop.f32.mrf.mxu0 }
 0xf06   : > { %v4181_v51 = vadd.f32 %v4158_v41, %v4048_v30  ;;  %v4405_v41 = vld [vmem:[#allocation4 + $0xe0] sm:$0xff] }
 0xf08   : > { %v4188_v23 = vadd.f32 %v4186_v38, %v4181_v51  ;;  %v4252_v51 = vld [vmem:[#allocation27 + $0x8] sm:$0xff] }
 0xf0a   : > { %v4192_v37 = vsel %vm1077_vm5, %v4188_v23, 0.0 }
 0xf0b   : > { %v4127_v26 = vpop.f32.mrf.mxu3 }
 0xf0c   : > { %v4128_v5 = vadd.f32 %v4127_v26, %v4107_v21  ;;  %v4390_v21 = vld [vmem:[#allocation4 + $0x68] sm:$0xff] }
 0xf0d   : > { %v4406_v26 = vld [vmem:[#allocation4 + $0xe8] sm:$0xff] }
 0xf0e   : > { %4827 = vmatpush.msk.msrb.mxu1 %vm1077_vm5, %v4128_v5  ;;  %v4389_v5 = vld [vmem:[#allocation4 + $0x60] sm:$0xff] }
 0xf0f   : > { %4828 = vmatmul.msk.f32.vlgmr.msrb.gmra.mxu1 %vm1437_vm10, %v4131_v27  ;;  %v4251_v27 = vld [vmem:[#allocation27] sm:$0xff] }
 0xf10   : > { %4368 = vmatpush.msra.mxu1 %v6631_v54 }
 0xf17   : > { %4836 = vmatmul.msk.f32.vlgmr.msra.gmra.mxu1 %vm1031_vm4, %v4323_v35  ;;  %v4408_v35 = vld [vmem:[#allocation4 + $0xf8] sm:$0xff] }
 0xf8c   : > { %v4178_v55 = vpop.f32.mrf.mxu1 }
 0xf8d   : > { %v4182_v57 = vadd.f32 %v4178_v55, %v4049_v44  ;;  %v4407_v44 = vld [vmem:[#allocation4 + $0xf0] sm:$0xff]  ;;  %v4404_v55 = vld [vmem:[#allocation4 + $0xd8] sm:$0xff] }
 0xf8f   : > { %v4189_v42 = vadd.f32 %v4186_v38, %v4182_v57  ;;  %v4388_v38 = vld [vmem:[#allocation4 + $0x58] sm:$0xff]  ;;  %v4403_v57 = vld [vmem:[#allocation4 + $0xd0] sm:$0xff] }
 0xf91   : > { %v4193_v59 = vsel %vm1077_vm5, %v4189_v42, 0.0 }
 0xf92   : > { %v4194_v46 = vadd.f32 %v4193_v59, %v4192_v37  ;;  %v4402_v37 = vld [vmem:[#allocation4 + $0xc8] sm:$0xff]  ;;  %v4385_v59 = vld [vmem:[#allocation4 + $0x40] sm:$0xff] }
 0xf94   : > { %4195 = vadd.xlane.f32.xlu1 %v4194_v46  ;;  %v4401_v46 = vld [vmem:[#allocation4 + $0xc0] sm:$0xff] }
 0xfad   : > { %4244 = vperm.xlu1 %5059, %v4191_v47   ;;  %v4384_v47 = vld [vmem:[#allocation4 + $0x38] sm:$0xff] }
0x1007   : > { %v4196_v50 = vpop.xlane.xlu1 %4195 }
0x1008   : > { %v4197_v28 = vsel %vm1077_vm5, %v4196_v50, 0.0  ;;  %v4400_v50 = vld [vmem:[#allocation4 + $0xb8] sm:$0xff] }
0x1009   : > { %v4198_v61 = vrot.slane %v4197_v28, 4 }
0x100b   : > { %v4199_v62 = vadd.f32 %v4198_v61, %v4197_v28  ;;  %v4383_v28 = vld [vmem:[#allocation4 + $0x30] sm:$0xff] }
0x100c   : > { %v4399_v61 = vld [vmem:[#allocation4 + $0xb0] sm:$0xff] }
0x100d   : > { %v4200_v0 = vrot.slane %v4199_v62, 2 }
0x100f   : > { %v4201_v2 = vadd.f32 %v4200_v0, %v4199_v62  ;;  %v4382_v62 = vld [vmem:[#allocation4 + $0x28] sm:$0xff] }
0x1010   : > { %v4398_v0 = vld [vmem:[#allocation4 + $0xa8] sm:$0xff] }
0x1011   : > { %v4202_v17 = vrot.slane %v4201_v2, 1 }
0x1013   : > { %v4203_v3 = vadd.f32 %v4202_v17, %v4201_v2  ;;  %v4381_v2 = vld [vmem:[#allocation4 + $0x20] sm:$0xff] }
0x1014   : > { %v4397_v17 = vld [vmem:[#allocation4 + $0xa0] sm:$0xff] }
0x1015   : > { %v4204_v6 = vmul.f32 %v4203_v3, %v6640_v13  ;;  %v4380_v3 = vld [vmem:[#allocation4 + $0x18] sm:$0xff] }
0x1017   : > { %v4205_v4 = vsub.f32 %v4188_v23, %v4204_v6  ;;  %v4206_v7 = vsub.f32 %v4189_v42, %v4204_v6  ;;  %v4387_v23 = vld [vmem:[#allocation4 + $0x50] sm:$0xff]  ;;  %v4386_v42 = vld [vmem:[#allocation4 + $0x48] sm:$0xff]  ;;  %v4396_v6 = vld [vmem:[#allocation4 + $0x98] sm:$0xff] }
0x1019   : > { %v4207_v8 = vmul.f32 %v4205_v4, %v4205_v4  ;;  %v4208_v1 = vmul.f32 %v4206_v7, %v4206_v7 }
0x101b   : > { %v4209_v9 = vsel %vm1077_vm5, %v4207_v8, 0.0  ;;  %v4210_v40 = vsel %vm1077_vm5, %v4208_v1, 0.0  ;;  %v4378_v8 = vld [vmem:[#allocation4 + $0x8] sm:$0xff] }
0x101c   : > { %v4211_v10 = vadd.f32 %v4210_v40, %v4209_v9  ;;  %v4394_v1 = vld [vmem:[#allocation4 + $0x88] sm:$0xff]  ;;  %v4377_v9 = vld [vmem:[#allocation4] sm:$0xff] }
0x101d   : > { %v4393_v40 = vld [vmem:[#allocation4 + $0x80] sm:$0xff] }
0x101e   : > { %4212 = vadd.xlane.f32.xlu0 %v4211_v10  ;;  %v4258_v10 = vpop.permute.xlu2 %4257 }
0x101f   : > { %v4245_v25 = vpop.permute.xlu1 %4244 }
0x1091   : > { %v4213_v22 = vpop.xlane.xlu0 %4212 }
0x1092   : > { %v4214_v56 = vsel %vm1077_vm5, %v4213_v22, 0.0  ;;  %v4263_v22 = vpop.permute.xlu2 %4262 }
0x1093   : > { %v4215_v11 = vrot.slane %v4214_v56, 4 }
0x1095   : > { %v4216_v14 = vadd.f32 %v4215_v11, %v4214_v56 }
0x1097   : > { %v4217_v15 = vrot.slane %v4216_v14, 2 }
0x1099   : > { %v4218_v18 = vadd.f32 %v4217_v15, %v4216_v14 }
0x109b   : > { %v4219_v24 = vrot.slane %v4218_v18, 1 }
0x109d   : > { %v4220_v52 = vadd.f32 %v4219_v24, %v4218_v18 }
0x109f   : > { %v4221_v30 = vmul.f32 %v4220_v52, %v6640_v13  ;;  %v4350_v52 = vpop.f32.mrf.mxu0 }
0x10a1   : > { %v4222_v60 = vadd.f32 1e-05, %v4221_v30  ;;  %v4370_v30 = vpop.f32.mrf.mxu1 }
0x10a3   : > { %5072 = vrsqrt.f32 %v4222_v60  ;;  %vm4229_vm15 = vweird.f32 %v4222_v60 }
0x10a9   : > { %v5073_v31 = vpop.eup %5072 }
0x10aa   : > { %v4224_v39 = vmul.f32 %v5073_v31, %v4222_v60  ;;  %vm4230_vm14 = vweird.f32 %v5073_v31  ;;  %v4328_v60 = vpop.permute.xlu2 %4327 }
0x10ab   : > { %vm4231_vm0 = vmor %vm4229_vm15, %vm4230_vm14 }
0x10ac   : > { %v4225_v48 = vmul.f32 %v5073_v31, %v4224_v39 }
0x10ae   : > { %v4226_v63 = vmul.f32 0.5, %v4225_v48  ;;  %v4351_v48 = vadd.f32 %v4350_v52, %v4328_v60 }
0x10b0   : > { %v4227_v34 = vsub.f32 1.5, %v4226_v63  ;;  %v4371_v63 = vadd.f32 %v4370_v30, %v4328_v60 }
0x10b2   : > { %v4228_v36 = vmul.f32 %v5073_v31, %v4227_v34 }
0x10b4   : > { %v4232_v43 = vsel %vm4231_vm0, %v5073_v31, %v4228_v36 }
0x10b5   : > { %v4233_v33 = vmul.f32 %v4232_v43, %v4205_v4  ;;  %v4234_v19 = vmul.f32 %v4232_v43, %v4206_v7  ;;  %v4379_v4 = vld [vmem:[#allocation4 + $0x10] sm:$0xff] }
0x10b6   : > { %v4395_v7 = vld [vmem:[#allocation4 + $0x90] sm:$0xff] }
0x10b7   : > { %v4240_v32 = vmul.f32 %v4238_v12, %v4233_v33  ;;  %v4241_v45 = vmul.f32 %v4238_v12, %v4234_v19 }
0x10b9   : > { %v4247_v58 = vadd.f32 %v4245_v25, %v4240_v32  ;;  %v4248_v13 = vadd.f32 %v4245_v25, %v4241_v45 }
0x10bb   : > { %v4249_v20 = vmax.f32 %v4247_v58, 0.0  ;;  %v4250_v16 = vmax.f32 %v4248_v13, 0.0 }
0x10bd   : > { %4829 = vmatpush.msk.msrb.mxu2 %vm1077_vm5, %v4249_v20  ;;  %4832 = vmatpush.msk.msrb.mxu3 %vm1077_vm5, %v4250_v16 }
0x10be   : > { %4830 = vmatmul.msk.f32.vlgmr.msrb.gmra.mxu2 %vm1437_vm10, %v4251_v27  ;;  %4833 = vmatmul.msk.f32.vlgmr.msrb.gmra.mxu3 %vm1437_vm10, %v4251_v27 }
0x10bf   : > { %4409 = vmatpush.msra.mxu2 %v4392_v29  ;;  %4432 = vmatpush.msra.mxu3 %v4408_v35 }
0x10c1   : > { %4410 = vmatpush.msra.mxu2 %v4391_v49  ;;  %4433 = vmatpush.msra.mxu3 %v4407_v44 }
0x10c3   : > { %4411 = vmatpush.msra.mxu2 %v4390_v21  ;;  %4434 = vmatpush.msra.mxu3 %v4406_v26 }
0x10c5   : > { %4412 = vmatpush.msra.mxu2 %v4389_v5  ;;  %4435 = vmatpush.msra.mxu3 %v4405_v41 }
0x10c6   : > { %4831 = vmatmul.msk.f32.gmra.mxu2 %vm1437_vm10, %v4252_v51  ;;  %4834 = vmatmul.msk.f32.gmra.mxu3 %vm1437_vm10, %v4252_v51 }
0x10c7   : > { %4413 = vmatpush.msra.mxu2 %v4388_v38  ;;  %4436 = vmatpush.msra.mxu3 %v4404_v55 }
0x10c9   : > { %4414 = vmatpush.msra.mxu2 %v4387_v23  ;;  %4437 = vmatpush.msra.mxu3 %v4403_v57 }
0x10cb   : > { %4415 = vmatpush.msra.mxu2 %v4386_v42  ;;  %4438 = vmatpush.msra.mxu3 %v4402_v37 }
0x10cd   : > { %4416 = vmatpush.msra.mxu2 %v4385_v59  ;;  %4439 = vmatpush.msra.mxu3 %v4401_v46 }
0x10cf   : > { %4417 = vmatpush.msra.mxu2 %v4384_v47  ;;  %4440 = vmatpush.msra.mxu3 %v4400_v50 }
0x10d1   : > { %4418 = vmatpush.msra.mxu2 %v4383_v28  ;;  %4441 = vmatpush.msra.mxu3 %v4399_v61 }
0x10d3   : > { %4419 = vmatpush.msra.mxu2 %v4382_v62  ;;  %4442 = vmatpush.msra.mxu3 %v4398_v0 }
0x10d5   : > { %4420 = vmatpush.msra.mxu2 %v4381_v2  ;;  %4443 = vmatpush.msra.mxu3 %v4397_v17 }
0x10d7   : > { %4421 = vmatpush.msra.mxu2 %v4380_v3  ;;  %4444 = vmatpush.msra.mxu3 %v4396_v6 }
0x10d9   : > { %4422 = vmatpush.msra.mxu2 %v4379_v4  ;;  %4445 = vmatpush.msra.mxu3 %v4395_v7 }
0x10db   : > { %4423 = vmatpush.msra.mxu2 %v4378_v8  ;;  %4446 = vmatpush.msra.mxu3 %v4394_v1 }
0x10dd   : > { %4424 = vmatpush.msra.mxu2 %v4377_v9  ;;  %4447 = vmatpush.msra.mxu3 %v4393_v40 }
0x1141   : > { %v4294_v56 = vpop.f32.mrf.mxu2  ;;  %v4317_v11 = vpop.f32.mrf.mxu3 }
0x1142   : > { %v4295_v14 = vadd.f32 %v4294_v56, %v4258_v10  ;;  %v4318_v15 = vadd.f32 %v4317_v11, %v4258_v10 }
0x1144   : > { %v4373_v18 = vadd.f32 %v4295_v14, %v6629_v53  ;;  %v4374_v24 = vadd.f32 %v4318_v15, %v6631_v54 }
0x1146   : > { %4425 = vmatmul.f32.vlgmr.msra.gmra.mxu2 %v4373_v18  ;;  %4448 = vmatmul.f32.vlgmr.msra.gmra.mxu3 %v4374_v24 }
0x1149   : > { %v4297_v31 = vpop.f32.mrf.mxu2  ;;  %v4320_v39 = vpop.f32.mrf.mxu3 }
0x114a   : > { %v4298_v34 = vadd.f32 %v4297_v31, %v4263_v22  ;;  %v4321_v36 = vadd.f32 %v4320_v39, %v4263_v22 }
0x114c   : > { %v4375_v43 = vadd.f32 %v4351_v48, %v4298_v34  ;;  %v4376_v33 = vadd.f32 %v4371_v63, %v4321_v36 }
0x114e   : > { %4428 = vmatmul.f32.gmra.mxu2 %v4375_v43  ;;  %4451 = vmatmul.f32.gmra.mxu3 %v4376_v33 }
0x11c9   : > { %v4426_v53 = vpop.f32.mrf.mxu2  ;;  %v4449_v54 = vpop.f32.mrf.mxu3 }
0x11ca   : > { %v4450_v19 = vadd.f32 %v4449_v54, %v4426_v53 }
0x11cc   : > { %4456 = vst.msk [vmem:[%s959_s27] sm:$0xff] %vm4455_vm1, %v4450_v19 }
0x11d1   : > { %v4429_v12 = vpop.f32.mrf.mxu2  ;;  %v4452_v32 = vpop.f32.mrf.mxu3 }
0x11d2   : > { %v4453_v45 = vadd.f32 %v4452_v32, %v4429_v12 }
0x11d4   : > { %4457 = vst.msk [vmem:[%s959_s27 + $0x8] sm:$0xff] %vm4455_vm1, %v4453_v45 }
0x11d5 PF: > { %s7035_s8 = sld [smem:[#allocation44_spill]] }
0x11db   : > { %s42_s2 = sadd.s32 1, %s7035_s8  }
0x11dc   : > { %p39_p7 = scmp.ge.s32.totalorder %s42_s2, 4  }
0x11de   :  { %41 = sbr.rel (!%p39_p7) target bundleno = 22 (0x16), region = 239 }
0x11e3   :  { %4479 = vsyncpa [#allocation3], 1 }
0x11e4   :  { %4481 = vsyncpa [#allocation3 + $0x1], 1 }
0x11e5   :  { %4482 = vsyncpa [#allocation5], 1 }
0x11e6   :  { %4483 = vsyncpa [#allocation8], 1 }
0x11e7   :  { %4484 = vsyncpa [#allocation11], 1 }
0x11e8   :  { %4485 = vsyncpa [#allocation14], 1 }
0x11e9   :  { %4486 = vsyncpa [#allocation17], 1 }
0x11ea   :  { %4487 = vsyncpa [#allocation20], 1 }
0x11eb   :  { %4488 = vsyncpa [#allocation23], 1 }
0x11ec   :  { %4489 = vsyncpa [#allocation26], 1 }
0x11ed   :  { %4490 = vsyncpa [#allocation29], 1 }
0x11ee   :  { %4491 = vsyncpa [#allocation32], 1 }

</bundles_post_ra>
